<compile_context>
chip_gen: v5e
topology: v5e:2x2
jax: 0.10.0
libtpu: 0.0.40
codegen_flags: <defaults>
</compile_context>

<pallas_src>
import functools

import numpy as np
import jax
import jax.numpy as jnp
from jax import lax
from jax.experimental import pallas as pl
from jax.experimental.pallas import tpu as pltpu


# --------------------------------------------------------------------------- #
# Pallas kernel
# --------------------------------------------------------------------------- #
def _dblock_kernel(x_ref, w3a_ref, b3a_ref, wf_ref, bf_ref, out_ref,
                   pad_scr, stk_scr, pool_scr, *, h, w, cin, cp, lead):
    hw = h * w
    ho, wo = h // 2, w // 2

    x = x_ref[0]                                            # (HW, Cin) bf16

    # Zero only the two border regions of the flat zero-padded staging buffer.
    # The interior [lead, lead+hw) is fully overwritten by every im2col pass,
    # so this tiny per-step write is all that is needed for row-border zeros.
    zero_border = jnp.zeros((lead, cin), pad_scr.dtype)
    pad_scr[pl.ds(0, lead), :] = zero_border
    pad_scr[pl.ds(lead + hw, lead), :] = zero_border

    # Column-validity masks (does source column j-1 / j+1 exist?).  Row borders
    # are handled by the zero pad rows above.
    col = lax.broadcasted_iota(jnp.int32, (hw, cin), 0) % w
    keep_l = col != 0                       # source column j-1 is in-bounds
    keep_r = col != (w - 1)                 # source column j+1 is in-bounds

    # Tap group 9 of the fused stack is the un-shifted input x (the 1x1-conv
    # operand).  It never changes, so store it once per grid step.
    stk_scr[:, pl.ds(9 * cin, cin)] = x

    def im2col_store(act_f32):
        # Write the 9 shifted/masked taps of `act` (cast to bf16) into tap
        # groups 0..8 of stk_scr.  Pure data movement, no MXU work.
        pad_scr[pl.ds(lead, hw), :] = act_f32
        for dy in range(3):
            for dx in range(3):
                delta = (dy - 1) * w + (dx - 1)
                t = pad_scr[pl.ds(lead + delta, hw), :]
                if dx == 0:
                    t = jnp.where(keep_l, t, 0.0)
                elif dx == 2:
                    t = jnp.where(keep_r, t, 0.0)
                stk_scr[:, pl.ds((dy * 3 + dx) * cin, cin)] = t.astype(jnp.bfloat16)

    # ---- conv a: ReLU(x) -> 3x3 conv -> bias.  One fused K = 10*Cin matmul
    #      (the x tap group multiplies zero rows appended to w3a). ----
    im2col_store(jnp.maximum(x, 0).astype(jnp.float32))
    a1 = jnp.dot(stk_scr[...], w3a_ref[...],
                 preferred_element_type=jnp.float32) + b3a_ref[...]

    # ---- conv b fused with the 1x1 path:
    #      p = im2col(ReLU(a1)) @ w3b + x @ w1 + (b1 + b3b) == path1 + path2,
    #      in one K = 10*Cin matmul (tap group 9 still holds x). ----
    im2col_store(jnp.maximum(a1, 0.0))
    p = jnp.dot(stk_scr[...], wf_ref[...],
                preferred_element_type=jnp.float32) + bf_ref[...]

    # ---- AvgPool2d(2,2): horizontal 2x pairs via stride-2 sublane loads
    #      (rows 2t, 2t+1 are pixels (i, 2jo), (i, 2jo+1)), vertical pairs via
    #      a tile-aligned reshape; everything on the VPU. ----
    pool_scr[...] = p                                       # (HW, Cp) f32
    hsum = (pool_scr[pl.ds(0, hw // 2, stride=2), :] +
            pool_scr[pl.ds(1, hw // 2, stride=2), :])       # rows t = i*Wo + jo
    r = hsum.reshape(ho, 2, wo, cp)                         # (i = 2io + b, jo)
    out_ref[0] = ((r[:, 0] + r[:, 1]) * 0.25).reshape(ho * wo, cp)


# --------------------------------------------------------------------------- #
# Wrapper (layout transposes + pallas_call plumbing)
# --------------------------------------------------------------------------- #
def dblock_forward(x_nchw, params):
    n, cin, h, w = x_nchw.shape
    assert h % 2 == 0 and w % 2 == 0, "AvgPool2d(2,2) requires even H and W"
    hw = h * w
    ho, wo = h // 2, w // 2
    cp = params["wf"].shape[1]          # lane-padded output channel count
    cout = int(params["cout"])
    lead = ((w + 1 + 7) // 8) * 8       # 8-sublane-aligned leading/trailing pad

    # NCHW -> (N, HW, Cin) bf16 (halves input DMA; ReLU commutes with the cast).
    x = jnp.transpose(x_nchw, (0, 2, 3, 1)).reshape(n, hw, cin).astype(jnp.bfloat16)

    kernel = functools.partial(_dblock_kernel, h=h, w=w, cin=cin, cp=cp, lead=lead)

    def const_spec(a):                  # grid-invariant full-array block
        return pl.BlockSpec(a.shape, lambda i, _nd=a.ndim: (0,) * _nd)

    out = pl.pallas_call(
        kernel,
        out_shape=jax.ShapeDtypeStruct((n, ho * wo, cp), jnp.float32),
        grid_spec=pltpu.PrefetchScalarGridSpec(
            num_scalar_prefetch=0,
            grid=(n,),
            in_specs=[
                pl.BlockSpec((1, hw, cin), lambda i: (i, 0, 0)),   # x, per batch
                const_spec(params["w3a"]), const_spec(params["b3a"]),
                const_spec(params["wf"]), const_spec(params["bf"]),
            ],
            out_specs=pl.BlockSpec((1, ho * wo, cp), lambda i: (i, 0, 0)),
            scratch_shapes=[
                pltpu.VMEM((hw + 2 * lead, cin), jnp.float32),     # pad_scr
                pltpu.VMEM((hw, 10 * cin), jnp.bfloat16),          # stk_scr
                pltpu.VMEM((hw, cp), jnp.float32),                 # pool_scr
            ],
        ),
        compiler_params=pltpu.CompilerParams(dimension_semantics=("parallel",)),
    )(x, params["w3a"], params["b3a"], params["wf"], params["bf"])

    out = out[:, :, :cout].reshape(n, ho, wo, cout)        # drop lane padding
    return jnp.transpose(out, (0, 3, 1, 2))                # back to NCHW


# --------------------------------------------------------------------------- #
# Deterministic parameter setup (plain JAX / numpy glue)
# --------------------------------------------------------------------------- #
def _spectral_normalize(wt, eps=1e-4, n_iter=30):
    # Power iteration on the (out, in*kh*kw) matrix, as torch spectral_norm
    # does (setup-time weight reparametrization, not a per-pixel op).
    out_ch = wt.shape[0]
    wm = wt.reshape(out_ch, -1)
    u = jnp.full((out_ch,), 1.0 / np.sqrt(out_ch), jnp.float32)
    v = None
    for _ in range(n_iter):
        v = wm.T @ u
        v = v / (jnp.linalg.norm(v) + eps)
        u = wm @ v
        u = u / (jnp.linalg.norm(u) + eps)
    sigma = u @ (wm @ v)
    return wt / sigma


def _im2col_weight(wt):
    # (Cout, Cin, 3, 3) torch OIHW -> (9*Cin, Cout); row = (dy*3+dx)*Cin + ci
    # matching the in-kernel tap stacking order.
    co, ci = wt.shape[0], wt.shape[1]
    return jnp.transpose(wt, (2, 3, 1, 0)).reshape(9 * ci, co)


def init_dblock_params(key, in_channels, out_channels, lane=128):
    k1, k2, k3, k4, k5, k6 = jax.random.split(key, 6)

    def conv_init(kw_, kb_, co, ci, ksz):
        fan_in = ci * ksz * ksz
        bound = 1.0 / np.sqrt(fan_in)
        wt = jax.random.uniform(kw_, (co, ci, ksz, ksz), jnp.float32, -bound, bound)
        b = jax.random.uniform(kb_, (co,), jnp.float32, -bound, bound)
        return wt, b

    w1_t, b1 = conv_init(k1, k2, out_channels, in_channels, 1)
    w3a_t, b3a = conv_init(k3, k4, in_channels, in_channels, 3)
    w3b_t, b3b = conv_init(k5, k6, out_channels, in_channels, 3)

    # spectral_norm(..., eps=1e-4) reparametrization (setup time)
    w1_t = _spectral_normalize(w1_t)
    w3a_t = _spectral_normalize(w3a_t)
    w3b_t = _spectral_normalize(w3b_t)

    cp = ((out_channels + lane - 1) // lane) * lane        # lane-dense Cout

    def pad_out(a):                                        # zero-pad last dim to cp
        return jnp.pad(a, ((0, 0), (0, cp - a.shape[-1])))

    # conv a weight, extended with zero rows so the x tap group (group 9) of the
    # shared fused stack is ignored.
    w3a_ext = jnp.concatenate(
        [_im2col_weight(w3a_t), jnp.zeros((in_channels, in_channels), jnp.float32)],
        axis=0)                                                     # (10*Cin, Cin)
    # fused conv-b / 1x1 weight: rows [0, 9*Cin) = im2col(w3b), rows
    # [9*Cin, 10*Cin) = w1 (Cin, Cout); biases b1 + b3b folded together.
    wf = jnp.concatenate([_im2col_weight(w3b_t), w1_t[:, :, 0, 0].T], axis=0)

    params = dict(
        w3a=w3a_ext.astype(jnp.bfloat16),                           # (10*Cin, Cin)
        b3a=b3a.reshape(1, -1),                                     # (1, Cin) f32
        wf=pad_out(wf).astype(jnp.bfloat16),                        # (10*Cin, Cp)
        bf=pad_out((b1 + b3b).reshape(1, -1)),                      # (1, Cp) f32
        cout=out_channels,
    )
    torch_format = dict(w1=w1_t, b1=b1, w3a=w3a_t, b3a=b3a, w3b=w3b_t, b3b=b3b)
    return params, torch_format


# --------------------------------------------------------------------------- #
# Plain-JAX reference (NCHW, real convs) for a sanity check
# --------------------------------------------------------------------------- #
def dblock_reference(x, tp):
    def conv(inp, wt, b, pad):
        y = lax.conv_general_dilated(
            inp, wt, (1, 1), [(pad, pad), (pad, pad)],
            dimension_numbers=("NCHW", "OIHW", "NCHW"))
        return y + b.reshape(1, -1, 1, 1)

    def avgpool(a):
        nn_, c, hh, ww = a.shape
        return a.reshape(nn_, c, hh // 2, 2, ww // 2, 2).mean(axis=(3, 5))

    p1 = avgpool(conv(x, tp["w1"], tp["b1"], 0))
    hh = jax.nn.relu(x)
    hh = jax.nn.relu(conv(hh, tp["w3a"], tp["b3a"], 1))
    p2 = avgpool(conv(hh, tp["w3b"], tp["b3b"], 1))
    return p1 + p2


if __name__ == "__main__":
    key = jax.random.PRNGKey(0)
    kx, kp = jax.random.split(key)

    N, CIN, COUT, H, W = 2, 4, 8, 16, 16
    x = jax.random.normal(kx, (N, CIN, H, W), jnp.float32)
    params, torch_fmt = init_dblock_params(kp, CIN, COUT)

    out = jax.block_until_ready(dblock_forward(x, params))
    assert out.shape == (N, COUT, H // 2, W // 2), out.shape

    ref = jax.block_until_ready(dblock_reference(x, torch_fmt))
    # Tolerance sized for bf16 MXU operands (two stacked 3x3 convs, K = 10*Cin):
    # ~2^-8 relative per product -> ~1e-2 abs worst case on O(1) activations.
    err = float(jnp.max(jnp.abs(out - ref)))
    assert jnp.allclose(out, ref, atol=3e-2, rtol=3e-2), err

    print("KERNEL_OK")
</pallas_src>

<mosaic_0001>
module attributes {stable_mosaic.version = 11 : i64} {
  func.func @_dblock_kernel(%arg0: i32, %arg1: memref<1x256x4xbf16, #tpu.memory_space<vmem>>, %arg2: memref<40x4xbf16, #tpu.memory_space<vmem>>, %arg3: memref<1x4xf32, #tpu.memory_space<vmem>>, %arg4: memref<40x128xbf16, #tpu.memory_space<vmem>>, %arg5: memref<1x128xf32, #tpu.memory_space<vmem>>, %arg6: memref<1x64x128xf32, #tpu.memory_space<vmem>>, %arg7: memref<304x4xf32, #tpu.memory_space<vmem>>, %arg8: memref<256x40xbf16, #tpu.memory_space<vmem>>, %arg9: memref<256x128xf32, #tpu.memory_space<vmem>>) attributes {dimension_semantics = [#tpu.dimension_semantics<parallel>], iteration_bounds = array<i64: 2>, scalar_prefetch = 0 : i64, scratch_operands = 3 : i64, tpu.core_type = #tpu.core_type<tc>, window_params = [{transform_indices = @transform_0, window_bounds = array<i64: 1, 256, 4>}, {pipeline_mode = #tpu.pipeline_mode<synchronous>, transform_indices = @transform_1, window_bounds = array<i64: 40, 4>}, {pipeline_mode = #tpu.pipeline_mode<synchronous>, transform_indices = @transform_2, window_bounds = array<i64: 1, 4>}, {pipeline_mode = #tpu.pipeline_mode<synchronous>, transform_indices = @transform_3, window_bounds = array<i64: 40, 128>}, {pipeline_mode = #tpu.pipeline_mode<synchronous>, transform_indices = @transform_4, window_bounds = array<i64: 1, 128>}, {transform_indices = @transform_5, window_bounds = array<i64: 1, 64, 128>}]} {
    %c0 = arith.constant 0 : index
    %c0_0 = arith.constant 0 : index
    %c0_1 = arith.constant 0 : index
    %0 = vector.load %arg1[%c0, %c0_0, %c0_1] : memref<1x256x4xbf16, #tpu.memory_space<vmem>>, vector<1x256x4xbf16>
    %1 = vector.shape_cast %0 : vector<1x256x4xbf16> to vector<256x4xbf16>
    %cst = arith.constant 0.000000e+00 : f32
    %2 = vector.broadcast %cst : f32 to vector<24x4xf32>
    %c0_2 = arith.constant 0 : index
    %c0_3 = arith.constant 0 : index
    %3 = vector.load %arg7[%c0_2, %c0_3] : memref<304x4xf32, #tpu.memory_space<vmem>>, vector<24x4xf32>
    tpu.vector_store %arg7[%c0_2, %c0_3], %2 {strides = array<i32>} : memref<304x4xf32, #tpu.memory_space<vmem>>, vector<24x4xf32>,
    %c280 = arith.constant 280 : index
    %c0_4 = arith.constant 0 : index
    %4 = vector.load %arg7[%c280, %c0_4] : memref<304x4xf32, #tpu.memory_space<vmem>>, vector<24x4xf32>
    tpu.vector_store %arg7[%c280, %c0_4], %2 {strides = array<i32>} : memref<304x4xf32, #tpu.memory_space<vmem>>, vector<24x4xf32>,
    %5 = tpu.iota {dimensions = array<i32: 0>} : vector<256x4xi32>
    %c16_i32 = arith.constant 16 : i32
    %c0_i32 = arith.constant 0 : i32
    %6 = arith.cmpi eq, %c16_i32, %c0_i32 : i32
    %c1_i32 = arith.constant 1 : i32
    %7 = arith.select %6, %c1_i32, %c16_i32 : i32
    %8 = vector.broadcast %7 : i32 to vector<256x4xi32>
    %9 = arith.remsi %5, %8 : vector<256x4xi32>
    %c0_i32_5 = arith.constant 0 : i32
    %10 = vector.broadcast %c0_i32_5 : i32 to vector<256x4xi32>
    %11 = arith.cmpi ne, %9, %10 : vector<256x4xi32>
    %c0_i32_6 = arith.constant 0 : i32
    %12 = vector.broadcast %c0_i32_6 : i32 to vector<256x4xi32>
    %13 = arith.cmpi slt, %9, %12 : vector<256x4xi32>
    %c0_i32_7 = arith.constant 0 : i32
    %14 = arith.cmpi slt, %7, %c0_i32_7 : i32
    %15 = vector.broadcast %14 : i1 to vector<256x4xi1>
    %16 = vector.broadcast %15 : vector<256x4xi1> to vector<256x4xi1>
    %17 = arith.xori %13, %16 : vector<256x4xi1>
    %18 = arith.andi %17, %11 : vector<256x4xi1>
    %19 = vector.broadcast %7 : i32 to vector<256x4xi32>
    %20 = arith.addi %9, %19 : vector<256x4xi32>
    %21 = arith.select %18, %20, %9 : vector<256x4xi1>, vector<256x4xi32>
    %c0_i32_8 = arith.constant 0 : i32
    %22 = vector.broadcast %c0_i32_8 : i32 to vector<256x4xi32>
    %23 = arith.cmpi ne, %21, %22 : vector<256x4xi32>
    %c15_i32 = arith.constant 15 : i32
    %24 = vector.broadcast %c15_i32 : i32 to vector<256x4xi32>
    %25 = arith.cmpi ne, %21, %24 : vector<256x4xi32>
    %c0_9 = arith.constant 0 : index
    %c36 = arith.constant 36 : index
    %26 = vector.load %arg8[%c0_9, %c36] : memref<256x40xbf16, #tpu.memory_space<vmem>>, vector<256x4xbf16>
    tpu.vector_store %arg8[%c0_9, %c36], %1 {strides = array<i32>} : memref<256x40xbf16, #tpu.memory_space<vmem>>, vector<256x4xbf16>,
    %cst_10 = arith.constant 0.000000e+00 : bf16
    %27 = vector.broadcast %cst_10 : bf16 to vector<256x4xbf16>
    %28 = arith.maximumf %1, %27 : vector<256x4xbf16>
    %29 = arith.extf %28 : vector<256x4xbf16> to vector<256x4xf32>
    %c24 = arith.constant 24 : index
    %c0_11 = arith.constant 0 : index
    %30 = vector.load %arg7[%c24, %c0_11] : memref<304x4xf32, #tpu.memory_space<vmem>>, vector<256x4xf32>
    tpu.vector_store %arg7[%c24, %c0_11], %29 {strides = array<i32>} : memref<304x4xf32, #tpu.memory_space<vmem>>, vector<256x4xf32>,
    %c7 = arith.constant 7 : index
    %c0_12 = arith.constant 0 : index
    %31 = vector.load %arg7[%c7, %c0_12] : memref<304x4xf32, #tpu.memory_space<vmem>>, vector<256x4xf32>
    %cst_13 = arith.constant 0.000000e+00 : f32
    %32 = vector.broadcast %cst_13 : f32 to vector<256x4xf32>
    %33 = arith.select %23, %31, %32 : vector<256x4xi1>, vector<256x4xf32>
    %34 = arith.truncf %33 : vector<256x4xf32> to vector<256x4xbf16>
    %c0_14 = arith.constant 0 : index
    %c0_15 = arith.constant 0 : index
    %35 = vector.load %arg8[%c0_14, %c0_15] : memref<256x40xbf16, #tpu.memory_space<vmem>>, vector<256x4xbf16>
    tpu.vector_store %arg8[%c0_14, %c0_15], %34 {strides = array<i32>} : memref<256x40xbf16, #tpu.memory_space<vmem>>, vector<256x4xbf16>,
    %c8 = arith.constant 8 : index
    %c0_16 = arith.constant 0 : index
    %36 = vector.load %arg7[%c8, %c0_16] : memref<304x4xf32, #tpu.memory_space<vmem>>, vector<256x4xf32>
    %37 = arith.truncf %36 : vector<256x4xf32> to vector<256x4xbf16>
    %c0_17 = arith.constant 0 : index
    %c4 = arith.constant 4 : index
    %38 = vector.load %arg8[%c0_17, %c4] : memref<256x40xbf16, #tpu.memory_space<vmem>>, vector<256x4xbf16>
    tpu.vector_store %arg8[%c0_17, %c4], %37 {strides = array<i32>} : memref<256x40xbf16, #tpu.memory_space<vmem>>, vector<256x4xbf16>,
    %c9 = arith.constant 9 : index
    %c0_18 = arith.constant 0 : index
    %39 = vector.load %arg7[%c9, %c0_18] : memref<304x4xf32, #tpu.memory_space<vmem>>, vector<256x4xf32>
    %cst_19 = arith.constant 0.000000e+00 : f32
    %40 = vector.broadcast %cst_19 : f32 to vector<256x4xf32>
    %41 = arith.select %25, %39, %40 : vector<256x4xi1>, vector<256x4xf32>
    %42 = arith.truncf %41 : vector<256x4xf32> to vector<256x4xbf16>
    %c0_20 = arith.constant 0 : index
    %c8_21 = arith.constant 8 : index
    %43 = vector.load %arg8[%c0_20, %c8_21] : memref<256x40xbf16, #tpu.memory_space<vmem>>, vector<256x4xbf16>
    tpu.vector_store %arg8[%c0_20, %c8_21], %42 {strides = array<i32>} : memref<256x40xbf16, #tpu.memory_space<vmem>>, vector<256x4xbf16>,
    %c23 = arith.constant 23 : index
    %c0_22 = arith.constant 0 : index
    %44 = vector.load %arg7[%c23, %c0_22] : memref<304x4xf32, #tpu.memory_space<vmem>>, vector<256x4xf32>
    %cst_23 = arith.constant 0.000000e+00 : f32
    %45 = vector.broadcast %cst_23 : f32 to vector<256x4xf32>
    %46 = arith.select %23, %44, %45 : vector<256x4xi1>, vector<256x4xf32>
    %47 = arith.truncf %46 : vector<256x4xf32> to vector<256x4xbf16>
    %c0_24 = arith.constant 0 : index
    %c12 = arith.constant 12 : index
    %48 = vector.load %arg8[%c0_24, %c12] : memref<256x40xbf16, #tpu.memory_space<vmem>>, vector<256x4xbf16>
    tpu.vector_store %arg8[%c0_24, %c12], %47 {strides = array<i32>} : memref<256x40xbf16, #tpu.memory_space<vmem>>, vector<256x4xbf16>,
    %c24_25 = arith.constant 24 : index
    %c0_26 = arith.constant 0 : index
    %49 = vector.load %arg7[%c24_25, %c0_26] : memref<304x4xf32, #tpu.memory_space<vmem>>, vector<256x4xf32>
    %50 = arith.truncf %49 : vector<256x4xf32> to vector<256x4xbf16>
    %c0_27 = arith.constant 0 : index
    %c16 = arith.constant 16 : index
    %51 = vector.load %arg8[%c0_27, %c16] : memref<256x40xbf16, #tpu.memory_space<vmem>>, vector<256x4xbf16>
    tpu.vector_store %arg8[%c0_27, %c16], %50 {strides = array<i32>} : memref<256x40xbf16, #tpu.memory_space<vmem>>, vector<256x4xbf16>,
    %c25 = arith.constant 25 : index
    %c0_28 = arith.constant 0 : index
    %52 = vector.load %arg7[%c25, %c0_28] : memref<304x4xf32, #tpu.memory_space<vmem>>, vector<256x4xf32>
    %cst_29 = arith.constant 0.000000e+00 : f32
    %53 = vector.broadcast %cst_29 : f32 to vector<256x4xf32>
    %54 = arith.select %25, %52, %53 : vector<256x4xi1>, vector<256x4xf32>
    %55 = arith.truncf %54 : vector<256x4xf32> to vector<256x4xbf16>
    %c0_30 = arith.constant 0 : index
    %c20 = arith.constant 20 : index
    %56 = vector.load %arg8[%c0_30, %c20] : memref<256x40xbf16, #tpu.memory_space<vmem>>, vector<256x4xbf16>
    tpu.vector_store %arg8[%c0_30, %c20], %55 {strides = array<i32>} : memref<256x40xbf16, #tpu.memory_space<vmem>>, vector<256x4xbf16>,
    %c39 = arith.constant 39 : index
    %c0_31 = arith.constant 0 : index
    %57 = vector.load %arg7[%c39, %c0_31] : memref<304x4xf32, #tpu.memory_space<vmem>>, vector<256x4xf32>
    %cst_32 = arith.constant 0.000000e+00 : f32
    %58 = vector.broadcast %cst_32 : f32 to vector<256x4xf32>
    %59 = arith.select %23, %57, %58 : vector<256x4xi1>, vector<256x4xf32>
    %60 = arith.truncf %59 : vector<256x4xf32> to vector<256x4xbf16>
    %c0_33 = arith.constant 0 : index
    %c24_34 = arith.constant 24 : index
    %61 = vector.load %arg8[%c0_33, %c24_34] : memref<256x40xbf16, #tpu.memory_space<vmem>>, vector<256x4xbf16>
    tpu.vector_store %arg8[%c0_33, %c24_34], %60 {strides = array<i32>} : memref<256x40xbf16, #tpu.memory_space<vmem>>, vector<256x4xbf16>,
    %c40 = arith.constant 40 : index
    %c0_35 = arith.constant 0 : index
    %62 = vector.load %arg7[%c40, %c0_35] : memref<304x4xf32, #tpu.memory_space<vmem>>, vector<256x4xf32>
    %63 = arith.truncf %62 : vector<256x4xf32> to vector<256x4xbf16>
    %c0_36 = arith.constant 0 : index
    %c28 = arith.constant 28 : index
    %64 = vector.load %arg8[%c0_36, %c28] : memref<256x40xbf16, #tpu.memory_space<vmem>>, vector<256x4xbf16>
    tpu.vector_store %arg8[%c0_36, %c28], %63 {strides = array<i32>} : memref<256x40xbf16, #tpu.memory_space<vmem>>, vector<256x4xbf16>,
    %c41 = arith.constant 41 : index
    %c0_37 = arith.constant 0 : index
    %65 = vector.load %arg7[%c41, %c0_37] : memref<304x4xf32, #tpu.memory_space<vmem>>, vector<256x4xf32>
    %cst_38 = arith.constant 0.000000e+00 : f32
    %66 = vector.broadcast %cst_38 : f32 to vector<256x4xf32>
    %67 = arith.select %25, %65, %66 : vector<256x4xi1>, vector<256x4xf32>
    %68 = arith.truncf %67 : vector<256x4xf32> to vector<256x4xbf16>
    %c0_39 = arith.constant 0 : index
    %c32 = arith.constant 32 : index
    %69 = vector.load %arg8[%c0_39, %c32] : memref<256x40xbf16, #tpu.memory_space<vmem>>, vector<256x4xbf16>
    tpu.vector_store %arg8[%c0_39, %c32], %68 {strides = array<i32>} : memref<256x40xbf16, #tpu.memory_space<vmem>>, vector<256x4xbf16>,
    %c0_40 = arith.constant 0 : index
    %c0_41 = arith.constant 0 : index
    %70 = vector.load %arg8[%c0_40, %c0_41] : memref<256x40xbf16, #tpu.memory_space<vmem>>, vector<256x40xbf16>
    %c0_42 = arith.constant 0 : index
    %c0_43 = arith.constant 0 : index
    %71 = vector.load %arg2[%c0_42, %c0_43] : memref<40x4xbf16, #tpu.memory_space<vmem>>, vector<40x4xbf16>
    %cst_44 = arith.constant dense<0.000000e+00> : vector<256x4xf32>
    %72 = tpu.matmul %70, %71, %cst_44 {dimension_numbers = #tpu.dot_dimension_numbers<[1], [0], [0], [1], [0, 0, 1, 1], [], []>} : vector<256x40xbf16>, vector<40x4xbf16>, vector<256x4xf32> -> vector<256x4xf32>
    %c0_45 = arith.constant 0 : index
    %c0_46 = arith.constant 0 : index
    %73 = vector.load %arg3[%c0_45, %c0_46] : memref<1x4xf32, #tpu.memory_space<vmem>>, vector<1x4xf32>
    %74 = vector.broadcast %73 : vector<1x4xf32> to vector<256x4xf32>
    %75 = arith.addf %72, %74 : vector<256x4xf32>
    %cst_47 = arith.constant 0.000000e+00 : f32
    %76 = vector.broadcast %cst_47 : f32 to vector<256x4xf32>
    %77 = arith.maximumf %75, %76 : vector<256x4xf32>
    %c24_48 = arith.constant 24 : index
    %c0_49 = arith.constant 0 : index
    %78 = vector.load %arg7[%c24_48, %c0_49] : memref<304x4xf32, #tpu.memory_space<vmem>>, vector<256x4xf32>
    tpu.vector_store %arg7[%c24_48, %c0_49], %77 {strides = array<i32>} : memref<304x4xf32, #tpu.memory_space<vmem>>, vector<256x4xf32>,
    %c7_50 = arith.constant 7 : index
    %c0_51 = arith.constant 0 : index
    %79 = vector.load %arg7[%c7_50, %c0_51] : memref<304x4xf32, #tpu.memory_space<vmem>>, vector<256x4xf32>
    %cst_52 = arith.constant 0.000000e+00 : f32
    %80 = vector.broadcast %cst_52 : f32 to vector<256x4xf32>
    %81 = arith.select %23, %79, %80 : vector<256x4xi1>, vector<256x4xf32>
    %82 = arith.truncf %81 : vector<256x4xf32> to vector<256x4xbf16>
    %c0_53 = arith.constant 0 : index
    %c0_54 = arith.constant 0 : index
    %83 = vector.load %arg8[%c0_53, %c0_54] : memref<256x40xbf16, #tpu.memory_space<vmem>>, vector<256x4xbf16>
    tpu.vector_store %arg8[%c0_53, %c0_54], %82 {strides = array<i32>} : memref<256x40xbf16, #tpu.memory_space<vmem>>, vector<256x4xbf16>,
    %c8_55 = arith.constant 8 : index
    %c0_56 = arith.constant 0 : index
    %84 = vector.load %arg7[%c8_55, %c0_56] : memref<304x4xf32, #tpu.memory_space<vmem>>, vector<256x4xf32>
    %85 = arith.truncf %84 : vector<256x4xf32> to vector<256x4xbf16>
    %c0_57 = arith.constant 0 : index
    %c4_58 = arith.constant 4 : index
    %86 = vector.load %arg8[%c0_57, %c4_58] : memref<256x40xbf16, #tpu.memory_space<vmem>>, vector<256x4xbf16>
    tpu.vector_store %arg8[%c0_57, %c4_58], %85 {strides = array<i32>} : memref<256x40xbf16, #tpu.memory_space<vmem>>, vector<256x4xbf16>,
    %c9_59 = arith.constant 9 : index
    %c0_60 = arith.constant 0 : index
    %87 = vector.load %arg7[%c9_59, %c0_60] : memref<304x4xf32, #tpu.memory_space<vmem>>, vector<256x4xf32>
    %cst_61 = arith.constant 0.000000e+00 : f32
    %88 = vector.broadcast %cst_61 : f32 to vector<256x4xf32>
    %89 = arith.select %25, %87, %88 : vector<256x4xi1>, vector<256x4xf32>
    %90 = arith.truncf %89 : vector<256x4xf32> to vector<256x4xbf16>
    %c0_62 = arith.constant 0 : index
    %c8_63 = arith.constant 8 : index
    %91 = vector.load %arg8[%c0_62, %c8_63] : memref<256x40xbf16, #tpu.memory_space<vmem>>, vector<256x4xbf16>
    tpu.vector_store %arg8[%c0_62, %c8_63], %90 {strides = array<i32>} : memref<256x40xbf16, #tpu.memory_space<vmem>>, vector<256x4xbf16>,
    %c23_64 = arith.constant 23 : index
    %c0_65 = arith.constant 0 : index
    %92 = vector.load %arg7[%c23_64, %c0_65] : memref<304x4xf32, #tpu.memory_space<vmem>>, vector<256x4xf32>
    %cst_66 = arith.constant 0.000000e+00 : f32
    %93 = vector.broadcast %cst_66 : f32 to vector<256x4xf32>
    %94 = arith.select %23, %92, %93 : vector<256x4xi1>, vector<256x4xf32>
    %95 = arith.truncf %94 : vector<256x4xf32> to vector<256x4xbf16>
    %c0_67 = arith.constant 0 : index
    %c12_68 = arith.constant 12 : index
    %96 = vector.load %arg8[%c0_67, %c12_68] : memref<256x40xbf16, #tpu.memory_space<vmem>>, vector<256x4xbf16>
    tpu.vector_store %arg8[%c0_67, %c12_68], %95 {strides = array<i32>} : memref<256x40xbf16, #tpu.memory_space<vmem>>, vector<256x4xbf16>,
    %c24_69 = arith.constant 24 : index
    %c0_70 = arith.constant 0 : index
    %97 = vector.load %arg7[%c24_69, %c0_70] : memref<304x4xf32, #tpu.memory_space<vmem>>, vector<256x4xf32>
    %98 = arith.truncf %97 : vector<256x4xf32> to vector<256x4xbf16>
    %c0_71 = arith.constant 0 : index
    %c16_72 = arith.constant 16 : index
    %99 = vector.load %arg8[%c0_71, %c16_72] : memref<256x40xbf16, #tpu.memory_space<vmem>>, vector<256x4xbf16>
    tpu.vector_store %arg8[%c0_71, %c16_72], %98 {strides = array<i32>} : memref<256x40xbf16, #tpu.memory_space<vmem>>, vector<256x4xbf16>,
    %c25_73 = arith.constant 25 : index
    %c0_74 = arith.constant 0 : index
    %100 = vector.load %arg7[%c25_73, %c0_74] : memref<304x4xf32, #tpu.memory_space<vmem>>, vector<256x4xf32>
    %cst_75 = arith.constant 0.000000e+00 : f32
    %101 = vector.broadcast %cst_75 : f32 to vector<256x4xf32>
    %102 = arith.select %25, %100, %101 : vector<256x4xi1>, vector<256x4xf32>
    %103 = arith.truncf %102 : vector<256x4xf32> to vector<256x4xbf16>
    %c0_76 = arith.constant 0 : index
    %c20_77 = arith.constant 20 : index
    %104 = vector.load %arg8[%c0_76, %c20_77] : memref<256x40xbf16, #tpu.memory_space<vmem>>, vector<256x4xbf16>
    tpu.vector_store %arg8[%c0_76, %c20_77], %103 {strides = array<i32>} : memref<256x40xbf16, #tpu.memory_space<vmem>>, vector<256x4xbf16>,
    %c39_78 = arith.constant 39 : index
    %c0_79 = arith.constant 0 : index
    %105 = vector.load %arg7[%c39_78, %c0_79] : memref<304x4xf32, #tpu.memory_space<vmem>>, vector<256x4xf32>
    %cst_80 = arith.constant 0.000000e+00 : f32
    %106 = vector.broadcast %cst_80 : f32 to vector<256x4xf32>
    %107 = arith.select %23, %105, %106 : vector<256x4xi1>, vector<256x4xf32>
    %108 = arith.truncf %107 : vector<256x4xf32> to vector<256x4xbf16>
    %c0_81 = arith.constant 0 : index
    %c24_82 = arith.constant 24 : index
    %109 = vector.load %arg8[%c0_81, %c24_82] : memref<256x40xbf16, #tpu.memory_space<vmem>>, vector<256x4xbf16>
    tpu.vector_store %arg8[%c0_81, %c24_82], %108 {strides = array<i32>} : memref<256x40xbf16, #tpu.memory_space<vmem>>, vector<256x4xbf16>,
    %c40_83 = arith.constant 40 : index
    %c0_84 = arith.constant 0 : index
    %110 = vector.load %arg7[%c40_83, %c0_84] : memref<304x4xf32, #tpu.memory_space<vmem>>, vector<256x4xf32>
    %111 = arith.truncf %110 : vector<256x4xf32> to vector<256x4xbf16>
    %c0_85 = arith.constant 0 : index
    %c28_86 = arith.constant 28 : index
    %112 = vector.load %arg8[%c0_85, %c28_86] : memref<256x40xbf16, #tpu.memory_space<vmem>>, vector<256x4xbf16>
    tpu.vector_store %arg8[%c0_85, %c28_86], %111 {strides = array<i32>} : memref<256x40xbf16, #tpu.memory_space<vmem>>, vector<256x4xbf16>,
    %c41_87 = arith.constant 41 : index
    %c0_88 = arith.constant 0 : index
    %113 = vector.load %arg7[%c41_87, %c0_88] : memref<304x4xf32, #tpu.memory_space<vmem>>, vector<256x4xf32>
    %cst_89 = arith.constant 0.000000e+00 : f32
    %114 = vector.broadcast %cst_89 : f32 to vector<256x4xf32>
    %115 = arith.select %25, %113, %114 : vector<256x4xi1>, vector<256x4xf32>
    %116 = arith.truncf %115 : vector<256x4xf32> to vector<256x4xbf16>
    %c0_90 = arith.constant 0 : index
    %c32_91 = arith.constant 32 : index
    %117 = vector.load %arg8[%c0_90, %c32_91] : memref<256x40xbf16, #tpu.memory_space<vmem>>, vector<256x4xbf16>
    tpu.vector_store %arg8[%c0_90, %c32_91], %116 {strides = array<i32>} : memref<256x40xbf16, #tpu.memory_space<vmem>>, vector<256x4xbf16>,
    %c0_92 = arith.constant 0 : index
    %c0_93 = arith.constant 0 : index
    %118 = vector.load %arg8[%c0_92, %c0_93] : memref<256x40xbf16, #tpu.memory_space<vmem>>, vector<256x40xbf16>
    %c0_94 = arith.constant 0 : index
    %c0_95 = arith.constant 0 : index
    %119 = vector.load %arg4[%c0_94, %c0_95] : memref<40x128xbf16, #tpu.memory_space<vmem>>, vector<40x128xbf16>
    %cst_96 = arith.constant dense<0.000000e+00> : vector<256x128xf32>
    %120 = tpu.matmul %118, %119, %cst_96 {dimension_numbers = #tpu.dot_dimension_numbers<[1], [0], [0], [1], [0, 0, 1, 1], [], []>} : vector<256x40xbf16>, vector<40x128xbf16>, vector<256x128xf32> -> vector<256x128xf32>
    %c0_97 = arith.constant 0 : index
    %c0_98 = arith.constant 0 : index
    %121 = vector.load %arg5[%c0_97, %c0_98] : memref<1x128xf32, #tpu.memory_space<vmem>>, vector<1x128xf32>
    %122 = vector.broadcast %121 : vector<1x128xf32> to vector<256x128xf32>
    %123 = arith.addf %120, %122 : vector<256x128xf32>
    %c0_99 = arith.constant 0 : index
    %c0_100 = arith.constant 0 : index
    %124 = vector.load %arg9[%c0_99, %c0_100] : memref<256x128xf32, #tpu.memory_space<vmem>>, vector<256x128xf32>
    tpu.vector_store %arg9[%c0_99, %c0_100], %123 {strides = array<i32>} : memref<256x128xf32, #tpu.memory_space<vmem>>, vector<256x128xf32>,
    %c0_101 = arith.constant 0 : index
    %c0_102 = arith.constant 0 : index
    %125 = tpu.strided_load %arg9[%c0_101, %c0_102] {strides = array<i32: 2, 1>} : memref<256x128xf32, #tpu.memory_space<vmem>>, vector<128x128xf32>
    %c1 = arith.constant 1 : index
    %c0_103 = arith.constant 0 : index
    %126 = tpu.strided_load %arg9[%c1, %c0_103] {strides = array<i32: 2, 1>} : memref<256x128xf32, #tpu.memory_space<vmem>>, vector<128x128xf32>
    %127 = arith.addf %125, %126 : vector<128x128xf32>
    %128 = vector.shape_cast %127 : vector<128x128xf32> to vector<8x2x8x128xf32>
    %129 = vector.extract_strided_slice %128 {offsets = [0, 0, 0, 0], sizes = [8, 1, 8, 128], strides = [1, 1, 1, 1]} : vector<8x2x8x128xf32> to vector<8x1x8x128xf32>
    %130 = vector.shape_cast %129 : vector<8x1x8x128xf32> to vector<8x8x128xf32>
    %131 = vector.extract_strided_slice %128 {offsets = [0, 1, 0, 0], sizes = [8, 1, 8, 128], strides = [1, 1, 1, 1]} : vector<8x2x8x128xf32> to vector<8x1x8x128xf32>
    %132 = vector.shape_cast %131 : vector<8x1x8x128xf32> to vector<8x8x128xf32>
    %133 = arith.addf %130, %132 : vector<8x8x128xf32>
    %cst_104 = arith.constant 2.500000e-01 : f32
    %134 = vector.broadcast %cst_104 : f32 to vector<8x8x128xf32>
    %135 = arith.mulf %133, %134 : vector<8x8x128xf32>
    %136 = vector.shape_cast %135 : vector<8x8x128xf32> to vector<64x128xf32>
    %c0_105 = arith.constant 0 : index
    %c0_106 = arith.constant 0 : index
    %c0_107 = arith.constant 0 : index
    %137 = vector.load %arg6[%c0_105, %c0_106, %c0_107] : memref<1x64x128xf32, #tpu.memory_space<vmem>>, vector<1x64x128xf32>
    %138 = vector.shape_cast %137 : vector<1x64x128xf32> to vector<64x128xf32>
    %139 = vector.shape_cast %136 : vector<64x128xf32> to vector<1x64x128xf32>
    tpu.vector_store %arg6[%c0_105, %c0_106, %c0_107], %139 {strides = array<i32>} : memref<1x64x128xf32, #tpu.memory_space<vmem>>, vector<1x64x128xf32>,
    return
  }
  func.func @transform_0(%arg0: i32) -> (i32, i32, i32) {
    %c0_i32 = arith.constant 0 : i32
    %c0_i32_0 = arith.constant 0 : i32
    %c0_i32_1 = arith.constant 0 : i32
    return %arg0, %c0_i32, %c0_i32_0 : i32, i32, i32
  }
  func.func @transform_1(%arg0: i32) -> (i32, i32) {
    %c0_i32 = arith.constant 0 : i32
    %c0_i32_0 = arith.constant 0 : i32
    %c0_i32_1 = arith.constant 0 : i32
    return %c0_i32, %c0_i32_0 : i32, i32
  }
  func.func @transform_2(%arg0: i32) -> (i32, i32) {
    %c0_i32 = arith.constant 0 : i32
    %c0_i32_0 = arith.constant 0 : i32
    %c0_i32_1 = arith.constant 0 : i32
    return %c0_i32, %c0_i32_0 : i32, i32
  }
  func.func @transform_3(%arg0: i32) -> (i32, i32) {
    %c0_i32 = arith.constant 0 : i32
    %c0_i32_0 = arith.constant 0 : i32
    %c0_i32_1 = arith.constant 0 : i32
    return %c0_i32, %c0_i32_0 : i32, i32
  }
  func.func @transform_4(%arg0: i32) -> (i32, i32) {
    %c0_i32 = arith.constant 0 : i32
    %c0_i32_0 = arith.constant 0 : i32
    %c0_i32_1 = arith.constant 0 : i32
    return %c0_i32, %c0_i32_0 : i32, i32
  }
  func.func @transform_5(%arg0: i32) -> (i32, i32, i32) {
    %c0_i32 = arith.constant 0 : i32
    %c0_i32_0 = arith.constant 0 : i32
    %c0_i32_1 = arith.constant 0 : i32
    return %arg0, %c0_i32, %c0_i32_0 : i32, i32, i32
  }
}

</mosaic_0001>

<bundles_post_ra>
// kernel: tpu_custom_call.1
= control target key start
LH: loop header
LB: loop body
LE: loop exit
PB: predicated region body
PF: predicated region fallthrough
CT: control target
= control target key end

     0   :  { %10 = vsyncpa [#allocation6], 0  ;;  %s9063_s0 = inlined_call_operand.vmem [shape: bf16[2,256,4], index: 0, kind: input, shape index: {}]   ;;  %s9064_s1 = inlined_call_operand.vmem [shape: bf16[40,4], index: 1, kind: input, shape index: {}]   ;;  %s9065_s2 = inlined_call_operand.vmem [shape: f32[1,4], index: 2, kind: input, shape index: {}]   ;;  %s9066_s3 = inlined_call_operand.vmem [shape: bf16[40,128], index: 3, kind: input, shape index: {}]   ;;  %s9067_s4 = inlined_call_operand.vmem [shape: f32[1,128], index: 4, kind: input, shape index: {}]   ;;  %s9068_s5 = inlined_call_operand.hbm [shape: f32[2,64,128], index: 5, kind: output, shape index: {}]  }
   0x1   :  { %12 = vsyncpa [#allocation6 + $0x1], 0  ;;  %s6454_s18 = smov 0   ;;  %s6456_s19 = smov 0  }
   0x2   :  { %s6458_s20 = smov 0   ;;  %s6460_s21 = smov 0  }
   0x3 LB: > { %s6475_s22 = sadd.s32 4294967295, %s6411_s21   ;;  %s6065_s23 = sadd.s32 4294967294, %s6411_s21   ;;  %s6411_s21 = sphi %s6460_s21, %s9841_s21   ;;  %s6407_s20 = sphi %s6458_s20, %s9840_s20   ;;  %s6403_s19 = sphi %s6456_s19, %s9839_s19   ;;  %s6399_s18 = sphi %s6454_s18, %s9838_s18  }
   0x4   : > { %s6479_s24 = sadd.s32 1, %s6411_s21   ;;  %s135_s25 = sadd.s32 1, %s6407_s20 }
   0x5   : > { %s132_s26 = ssub.s32 %s6411_s21, %s6479_s24  ;;  %p145_p0 = scmp.ne.s32.totalorder %s6407_s20, %s6403_s19 }
   0x6   : > { %p133_p1 = scmp.eq.s32.totalorder %s132_s26, 0  ;;  %p146_p2 = scmp.eq.s32.totalorder %s6475_s22, 1 }
   0x7   : > { %p151_p3 = scmp.ne.s32.totalorder %s6403_s19, %s6399_s18  ;;  %p152_p4 = scmp.eq.s32.totalorder %s6065_s23, 1 }
   0x8   : > { %s6490_s27 = scalar_select %p133_p1, %s6407_s20, %s135_s25  }
   0x9   : > { %p6492_p5 = por %p146_p2, %p145_p0  ;;  %p6496_p6 = por %p152_p4, %p151_p3 }
   0xa   : > { %p6068_p7 = scmp.ge.s32.totalorder %s6411_s21, 1  ;;  %p190_p8 = scmp.lt.s32.totalorder %s6411_s21, 3 }
   0xc   : > { %p191_p9 = pnand %p6068_p7, %p190_p8 }
   0xe   : > { %194 = sbr.rel (%p191_p9) target bundleno = 1997 (0x7cd), region = 40 }
  0x13   : > { %p218_p10 = scmp.lt.s32.totalorder %s6475_s22, 1  ;;  %s6413_s10 = smov 36   ;;  %vm9069_vm0 = vcmask 31744   ;;  %vm872_vm1 = vcmask 322848   ;;  %vm9070_vm4 = vcmask 27648   ;;  %vm9075_vm6 = vcmask 60448  }
  0x14   : > { %s6415_s11 = smov 4   ;;  %s6416_s12 = smov 8  }
  0x15   : > { %s219_s30 = scalar_select %p218_p10, %s6475_s22, 1 }
  0x16   : > { %s6417_s13 = smov 12   ;;  %s6418_s14 = smov 16  }
  0x17   : > { %s6253_s6 = sshll.u32 %s219_s30, 7  ;;  %s6419_s15 = smov 20  }
  0x18   : > { %s6507_s9 = scalar_lea.vmem %s9063_s0, %s6253_s6  ;;  %s6420_s16 = smov 24  }
  0x19   : > { %v226_v0 = vld [vmem:[%s6507_s9 + $0x8] sm:$0xf]  ;;  %v224_v1 = vld [vmem:[%s6507_s9] sm:$0xf]  ;;  %v227_v2 = vld [vmem:[%s6507_s9 + $0xc] sm:$0xf] }
  0x1a   : > { %780 = vrot.lane.b32.xlu1 %v226_v0, %s6413_s10  ;;  %v907_v3 = vunpack.c.l.bf16 %v226_v0  ;;  %776 = vrot.lane.b32.xlu0 %v224_v1, %s6413_s10  ;;  %v905_v4 = vunpack.c.l.bf16 %v224_v1  ;;  %v908_v5 = vunpack.c.l.bf16 %v227_v2  ;;  %v225_v6 = vld [vmem:[%s6507_s9 + $0x4] sm:$0xf]  ;;  %v6516_v7 = vld [vmem:[%s6507_s9 + $0x1c] sm:$0xf]  ;;  %s6421_s17 = smov 28   ;;  %s6422_s23 = smov 32  }
  0x1b   : > { %v906_v8 = vunpack.c.l.bf16 %v225_v6  ;;  %v912_v9 = vunpack.c.l.bf16 %v6516_v7  ;;  %v6520_v10 = vld [vmem:[%s6507_s9 + $0x18] sm:$0xf]  ;;  %v228_v11 = vld [vmem:[%s6507_s9 + $0x10] sm:$0xf]  ;;  %v6526_v16 = vld [vmem:[%s6507_s9 + $0x28] sm:$0xf] }
  0x1c   : > { %v939_v12 = vmax.f32 %v907_v3, 0.0  ;;  %v937_v13 = vmax.f32 %v905_v4, 0.0  ;;  %v940_v14 = vmax.f32 %v908_v5, 0.0  ;;  %v911_v15 = vunpack.c.l.bf16 %v6520_v10  ;;  %784 = vrot.lane.b32.xlu2 %v228_v11, %s6413_s10  ;;  %v6530_v37 = vld [vmem:[%s6507_s9 + $0x24] sm:$0xf]  ;;  %s6290_s7 = sshll.u32 %s6475_s22, 6 }
  0x1d   : > { %v938_v17 = vmax.f32 %v906_v8, 0.0  ;;  %v944_v18 = vmax.f32 %v912_v9, 0.0  ;;  %v909_v19 = vunpack.c.l.bf16 %v228_v11  ;;  %v915_v20 = vunpack.c.l.bf16 %v6526_v16  ;;  %v229_v38 = vld [vmem:[%s6507_s9 + $0x14] sm:$0xf]  ;;  %v6542_v44 = vld [vmem:[%s6507_s9 + $0x30] sm:$0xf] }
  0x1e   : > { %v971_v21 = vpack.c.bf16 %v939_v12, %v939_v12  ;;  %v969_v22 = vpack.c.bf16 %v937_v13, %v937_v13  ;;  %v972_v23 = vpack.c.bf16 %v940_v14, %v940_v14  ;;  %v943_v24 = vmax.f32 %v911_v15, 0.0  ;;  %v6534_v39 = vld [vmem:[%s6507_s9 + $0x34] sm:$0xf]  ;;  %v232_v45 = vld [vmem:[%s6507_s9 + $0x20] sm:$0xf] }
  0x1f   : > { %v970_v25 = vpack.c.bf16 %v938_v17, %v938_v17  ;;  %v976_v26 = vpack.c.bf16 %v944_v18, %v944_v18  ;;  %v941_v27 = vmax.f32 %v909_v19, 0.0  ;;  %v947_v28 = vmax.f32 %v915_v20, 0.0  ;;  %v6548_v50 = vld [vmem:[%s6507_s9 + $0x40] sm:$0xf]  ;;  %v6551_v51 = vld [vmem:[%s6507_s9 + $0x3c] sm:$0xf] }
  0x20   : > { %v1003_v29 = vunpack.c.l.bf16 %v971_v21  ;;  %v1001_v30 = vunpack.c.l.bf16 %v969_v22  ;;  %v1004_v31 = vunpack.c.l.bf16 %v972_v23  ;;  %v975_v32 = vpack.c.bf16 %v943_v24, %v943_v24  ;;  %v6557_v56 = vld [vmem:[%s6507_s9 + $0x2c] sm:$0xf]  ;;  %v6570_v15 = vld [vmem:[%s6507_s9 + $0x48] sm:$0xf]  ;;  %v238_v20 = vld [vmem:[%s6507_s9 + $0x38] sm:$0xf] }
  0x21   : > { %v1002_v33 = vunpack.c.l.bf16 %v970_v25  ;;  %v1008_v34 = vunpack.c.l.bf16 %v976_v26  ;;  %v973_v35 = vpack.c.bf16 %v941_v27, %v941_v27  ;;  %v979_v36 = vpack.c.bf16 %v947_v28, %v947_v28  ;;  %v6567_v14 = vld [vmem:[%s6507_s9 + $0x4c] sm:$0xf]  ;;  %v6581_v21 = vld [vmem:[%s6507_s9 + $0x58] sm:$0xf] }
  0x22   : > { %1035 = vst.msk [vmem:[#allocation2 + $0x28] sm:$0xff] %vm9069_vm0, %v1003_v29  ;;  %782 = vrot.lane.b32.xlu1 %v227_v2, %s6413_s10  ;;  %778 = vrot.lane.b32.xlu0 %v225_v6, %s6413_s10  ;;  %v1007_v40 = vunpack.c.l.bf16 %v975_v32  ;;  %v914_v41 = vunpack.c.l.bf16 %v6530_v37  ;;  %v910_v42 = vunpack.c.l.bf16 %v229_v38  ;;  %v918_v43 = vunpack.c.l.bf16 %v6534_v39 }
  0x23   : > { %1033 = vst.msk [vmem:[#allocation2 + $0x18] sm:$0xff] %vm9069_vm0, %v1001_v30  ;;  %v1005_v46 = vunpack.c.l.bf16 %v973_v35  ;;  %v1011_v47 = vunpack.c.l.bf16 %v979_v36  ;;  %v917_v48 = vunpack.c.l.bf16 %v6542_v44  ;;  %v913_v49 = vunpack.c.l.bf16 %v232_v45 }
  0x24   : > { %1036 = vst.msk [vmem:[#allocation2 + $0x30] sm:$0xff] %vm9069_vm0, %v1004_v31  ;;  %v946_v52 = vmax.f32 %v914_v41, 0.0  ;;  %v942_v53 = vmax.f32 %v910_v42, 0.0  ;;  %786 = vrot.lane.b32.xlu2 %v229_v38, %s6413_s10  ;;  %v950_v54 = vmax.f32 %v918_v43, 0.0  ;;  %v921_v55 = vunpack.c.l.bf16 %v6548_v50  ;;  %v6593_v38 = vld [vmem:[%s6507_s9 + $0x54] sm:$0xf] }
  0x25   : > { %1034 = vst.msk [vmem:[#allocation2 + $0x20] sm:$0xff] %vm9069_vm0, %v1002_v33  ;;  %v949_v57 = vmax.f32 %v917_v48, 0.0  ;;  %v945_v58 = vmax.f32 %v913_v49, 0.0  ;;  %v920_v59 = vunpack.c.l.bf16 %v6551_v51  ;;  %v916_v60 = vunpack.c.l.bf16 %v6557_v56  ;;  %v241_v41 = vld [vmem:[%s6507_s9 + $0x44] sm:$0xf] }
  0x26   : > { %1040 = vst.msk [vmem:[#allocation2 + $0x50] sm:$0xff] %vm9069_vm0, %v1008_v34  ;;  %v978_v61 = vpack.c.bf16 %v946_v52, %v946_v52  ;;  %v974_v62 = vpack.c.bf16 %v942_v53, %v942_v53  ;;  %v982_v63 = vpack.c.bf16 %v950_v54, %v950_v54  ;;  %v953_v0 = vmax.f32 %v921_v55, 0.0  ;;  %v6603_v42 = vld [vmem:[%s6507_s9 + $0x64] sm:$0xf]  ;;  %v6612_v55 = vld [vmem:[%s6507_s9 + $0x60] sm:$0xf] }
  0x27   : > { %1039 = vst.msk [vmem:[#allocation2 + $0x48] sm:$0xff] %vm9069_vm0, %v1007_v40  ;;  %v981_v1 = vpack.c.bf16 %v949_v57, %v949_v57  ;;  %v977_v2 = vpack.c.bf16 %v945_v58, %v945_v58  ;;  %v952_v3 = vmax.f32 %v920_v59, 0.0  ;;  %v948_v4 = vmax.f32 %v916_v60, 0.0  ;;  %v244_v57 = vld [vmem:[%s6507_s9 + $0x50] sm:$0xf] }
  0x28   : > { %1037 = vst.msk [vmem:[#allocation2 + $0x38] sm:$0xff] %vm9069_vm0, %v1005_v46  ;;  %v1010_v5 = vunpack.c.l.bf16 %v978_v61  ;;  %v1006_v6 = vunpack.c.l.bf16 %v974_v62  ;;  %v1014_v8 = vunpack.c.l.bf16 %v982_v63  ;;  %v985_v9 = vpack.c.bf16 %v953_v0, %v953_v0  ;;  %v6622_v58 = vld [vmem:[%s6507_s9 + $0x70] sm:$0xf] }
  0x29   : > { %1043 = vst.msk [vmem:[#allocation2 + $0x68] sm:$0xff] %vm9069_vm0, %v1011_v47  ;;  %v1013_v11 = vunpack.c.l.bf16 %v981_v1  ;;  %v984_v12 = vpack.c.bf16 %v952_v3, %v952_v3  ;;  %v980_v13 = vpack.c.bf16 %v948_v4, %v948_v4  ;;  %v1009_v17 = vunpack.c.l.bf16 %v977_v2  ;;  %v251_v4 = vld [vmem:[%s6507_s9 + $0x6c] sm:$0xf] }
  0x2a   : > { %790 = vrot.lane.b32.xlu1 %v6516_v7, %s6413_s10  ;;  %788 = vrot.lane.b32.xlu0 %v6520_v10, %s6413_s10  ;;  %1042 = vst.msk [vmem:[#allocation2 + $0x60] sm:$0xff] %vm9069_vm0, %v1010_v5  ;;  %v924_v18 = vunpack.c.l.bf16 %v6567_v14  ;;  %v923_v19 = vunpack.c.l.bf16 %v6570_v15  ;;  %v1017_v22 = vunpack.c.l.bf16 %v985_v9  ;;  %v919_v23 = vunpack.c.l.bf16 %v238_v20 }
  0x2b   : > { %1038 = vst.msk [vmem:[#allocation2 + $0x40] sm:$0xff] %vm9069_vm0, %v1006_v6  ;;  %v927_v24 = vunpack.c.l.bf16 %v6581_v21  ;;  %v1016_v7 = vunpack.c.l.bf16 %v984_v12  ;;  %v1012_v26 = vunpack.c.l.bf16 %v980_v13  ;;  %v926_v40 = vunpack.c.l.bf16 %v6593_v38  ;;  %v247_v6 = vld [vmem:[%s6507_s9 + $0x5c] sm:$0xf] }
  0x2c   : > { %1046 = vst.msk [vmem:[#allocation2 + $0x80] sm:$0xff] %vm9069_vm0, %v1014_v8  ;;  %792 = vrot.lane.b32.xlu2 %v232_v45, %s6413_s10  ;;  %v956_v10 = vmax.f32 %v924_v18, 0.0  ;;  %v955_v25 = vmax.f32 %v923_v19, 0.0  ;;  %v951_v27 = vmax.f32 %v919_v23, 0.0  ;;  %v922_v43 = vunpack.c.l.bf16 %v241_v41  ;;  %v255_v8 = vld [vmem:[%s6507_s9 + $0x7c] sm:$0xf] }
  0x2d   : > { %1045 = vst.msk [vmem:[#allocation2 + $0x78] sm:$0xff] %vm9069_vm0, %v1013_v11  ;;  %v959_v28 = vmax.f32 %v927_v24, 0.0  ;;  %v930_v45 = vunpack.c.l.bf16 %v6603_v42  ;;  %v925_v59 = vunpack.c.l.bf16 %v244_v57  ;;  %v933_v60 = vunpack.c.l.bf16 %v6622_v58  ;;  %v254_v24 = vld [vmem:[%s6507_s9 + $0x78] sm:$0xf] }
  0x2e   : > { %1041 = vst.msk [vmem:[#allocation2 + $0x58] sm:$0xff] %vm9069_vm0, %v1009_v17  ;;  %v988_v29 = vpack.c.bf16 %v956_v10, %v956_v10  ;;  %v987_v30 = vpack.c.bf16 %v955_v25, %v955_v25  ;;  %v983_v31 = vpack.c.bf16 %v951_v27, %v951_v27  ;;  %v932_v5 = vunpack.c.l.bf16 %v251_v4  ;;  %v250_v10 = vld [vmem:[%s6507_s9 + $0x68] sm:$0xf] }
  0x2f   : > { %1049 = vst.msk [vmem:[#allocation2 + $0x98] sm:$0xff] %vm9069_vm0, %v1017_v22  ;;  %v991_v32 = vpack.c.bf16 %v959_v28, %v959_v28  ;;  %v962_v46 = vmax.f32 %v930_v45, 0.0  ;;  %v965_v61 = vmax.f32 %v933_v60, 0.0  ;;  %v928_v9 = vunpack.c.l.bf16 %v247_v6  ;;  %v1198_v45 = vld [vmem:[#allocation2 + $0x28] sm:$0xff] }
  0x30   : > { %1048 = vst.msk [vmem:[#allocation2 + $0x90] sm:$0xff] %vm9069_vm0, %v1016_v7  ;;  %v1020_v33 = vunpack.c.l.bf16 %v988_v29  ;;  %v1019_v34 = vunpack.c.l.bf16 %v987_v30  ;;  %v1015_v35 = vunpack.c.l.bf16 %v983_v31  ;;  %v936_v11 = vunpack.c.l.bf16 %v255_v8  ;;  %v253_v30 = vld [vmem:[%s6507_s9 + $0x74] sm:$0xf] }
  0x31   : > { %1044 = vst.msk [vmem:[#allocation2 + $0x70] sm:$0xff] %vm9069_vm0, %v1012_v26  ;;  %v1023_v36 = vunpack.c.l.bf16 %v991_v32  ;;  %v994_v49 = vpack.c.bf16 %v962_v46, %v962_v46  ;;  %v997_v0 = vpack.c.bf16 %v965_v61, %v965_v61  ;;  %v964_v12 = vmax.f32 %v932_v5, 0.0  ;;  %v1205_v60 = vld [vmem:[#allocation2 + $0x60] sm:$0xff] }
  0x32   : > { %796 = vrot.lane.b32.xlu1 %v6526_v16, %s6413_s10  ;;  %794 = vrot.lane.b32.xlu0 %v6530_v37, %s6413_s10  ;;  %1052 = vst.msk [vmem:[#allocation2 + $0xb0] sm:$0xff] %vm9069_vm0, %v1020_v33  ;;  %v958_v16 = vmax.f32 %v926_v40, 0.0  ;;  %v954_v37 = vmax.f32 %v922_v43, 0.0  ;;  %v960_v13 = vmax.f32 %v928_v9, 0.0  ;;  %v935_v7 = vunpack.c.l.bf16 %v254_v24  ;;  %v1197_v40 = vld [vmem:[#allocation2 + $0x20] sm:$0xff] }
  0x33   : > { %1051 = vst.msk [vmem:[#allocation2 + $0xa8] sm:$0xff] %vm9069_vm0, %v1019_v34  ;;  %v1026_v54 = vunpack.c.l.bf16 %v994_v49  ;;  %v1029_v3 = vunpack.c.l.bf16 %v997_v0  ;;  %v996_v17 = vpack.c.bf16 %v964_v12, %v964_v12  ;;  %v931_v25 = vunpack.c.l.bf16 %v250_v10 }
  0x34   : > { %798 = vrot.lane.b32.xlu2 %v6557_v56, %s6413_s10  ;;  %1047 = vst.msk [vmem:[#allocation2 + $0x88] sm:$0xff] %vm9069_vm0, %v1015_v35  ;;  %v990_v47 = vpack.c.bf16 %v958_v16, %v958_v16  ;;  %v986_v48 = vpack.c.bf16 %v954_v37, %v954_v37  ;;  %v929_v56 = vunpack.c.l.bf16 %v6612_v55  ;;  %v967_v26 = vmax.f32 %v935_v7, 0.0  ;;  %v1199_v16 = vld [vmem:[#allocation2 + $0x30] sm:$0xff]  ;;  %v1200_v37 = vld [vmem:[#allocation2 + $0x38] sm:$0xff] }
  0x35   : > { %1055 = vst.msk [vmem:[#allocation2 + $0xc8] sm:$0xff] %vm9069_vm0, %v1023_v36  ;;  %v1028_v19 = vunpack.c.l.bf16 %v996_v17  ;;  %v963_v27 = vmax.f32 %v931_v25, 0.0  ;;  %v934_v31 = vunpack.c.l.bf16 %v253_v30  ;;  %v1229_v43 = vpack.c.bf16 %v1197_v40, %v1197_v40 }
  0x36   : > { %v1022_v52 = vunpack.c.l.bf16 %v990_v47  ;;  %v1018_v53 = vunpack.c.l.bf16 %v986_v48  ;;  %1058 = vst.msk [vmem:[#allocation2 + $0xe0] sm:$0xff] %vm9069_vm0, %v1026_v54  ;;  %v1230_v46 = vpack.c.bf16 %v1198_v45, %v1198_v45  ;;  %v1231_v47 = vpack.c.bf16 %v1199_v16, %v1199_v16  ;;  %v1203_v54 = vld [vmem:[#allocation2 + $0x50] sm:$0xff]  ;;  %v1212_v17 = vld [vmem:[#allocation2 + $0x98] sm:$0xff] }
  0x37   : > { %1061 = vst.msk [vmem:[#allocation2 + $0xf8] sm:$0xff] %vm9069_vm0, %v1029_v3  ;;  %v966_v32 = vmax.f32 %v934_v31, 0.0  ;;  %v1232_v49 = vpack.c.bf16 %v1200_v37, %v1200_v37  ;;  %v1237_v61 = vpack.c.bf16 %v1205_v60, %v1205_v60  ;;  %v1211_v12 = vld [vmem:[#allocation2 + $0x90] sm:$0xff] }
  0x38   : > { %1054 = vst.msk [vmem:[#allocation2 + $0xc0] sm:$0xff] %vm9069_vm0, %v1022_v52  ;;  %v1201_v52 = vld [vmem:[#allocation2 + $0x40] sm:$0xff]  ;;  %v1207_v0 = vld [vmem:[#allocation2 + $0x70] sm:$0xff] }
  0x39   : > { %1050 = vst.msk [vmem:[#allocation2 + $0xa0] sm:$0xff] %vm9069_vm0, %v1018_v53  ;;  %v998_v33 = vpack.c.bf16 %v966_v32, %v966_v32  ;;  %v1202_v53 = vld [vmem:[#allocation2 + $0x48] sm:$0xff]  ;;  %v1239_v5 = vpack.c.bf16 %v1207_v0, %v1207_v0 }
  0x3a   : > { %802 = vrot.lane.b32.xlu1 %v6534_v39, %s6413_s10  ;;  %800 = vrot.lane.b32.xlu0 %v6542_v44, %s6413_s10  ;;  %v961_v39 = vmax.f32 %v929_v56, 0.0  ;;  %v957_v44 = vmax.f32 %v925_v59, 0.0  ;;  %1060 = vst.msk [vmem:[#allocation2 + $0xf0] sm:$0xff] %vm9069_vm0, %v1028_v19  ;;  %v1234_v56 = vpack.c.bf16 %v1202_v53, %v1202_v53  ;;  %v1204_v59 = vld [vmem:[#allocation2 + $0x58] sm:$0xff] }
  0x3b   : > { %v1030_v34 = vunpack.c.l.bf16 %v998_v33 }
  0x3c   : > { %804 = vrot.lane.b32.xlu2 %v238_v20, %s6413_s10  ;;  %v993_v62 = vpack.c.bf16 %v961_v39, %v961_v39  ;;  %v989_v63 = vpack.c.bf16 %v957_v44, %v957_v44  ;;  %v6414_v20 = vmov 0.0   ;;  %v1206_v39 = vld [vmem:[#allocation2 + $0x68] sm:$0xff]  ;;  %v1236_v44 = vpack.c.bf16 %v1204_v59, %v1204_v59 }
  0x3d   : > { %259 = vst.msk [vmem:[#allocation2 + $0x10] sm:$0xff] %vm9069_vm0, %v6414_v20  ;;  %v1218_v31 = vld [vmem:[#allocation2 + $0xc8] sm:$0xff] }
  0x3e   : > { %v1025_v1 = vunpack.c.l.bf16 %v993_v62  ;;  %v1021_v2 = vunpack.c.l.bf16 %v989_v63  ;;  %257 = vst.msk [vmem:[#allocation2] sm:$0xff] %vm9069_vm0, %v6414_v20  ;;  %v1238_v63 = vpack.c.bf16 %v1206_v39, %v1206_v39  ;;  %v9201_v39 = vmov 0 }
  0x3f   : > { %258 = vst.msk [vmem:[#allocation2 + $0x8] sm:$0xff] %vm9069_vm0, %v6414_v20 }
  0x40   : > { %1057 = vst.msk [vmem:[#allocation2 + $0xd8] sm:$0xff] %vm9069_vm0, %v1025_v1  ;;  %v1208_v1 = vld [vmem:[#allocation2 + $0x78] sm:$0xff] }
  0x41   : > { %1053 = vst.msk [vmem:[#allocation2 + $0xb8] sm:$0xff] %vm9069_vm0, %v1021_v2 }
  0x42   : > { %808 = vrot.lane.b32.xlu1 %v6548_v50, %s6413_s10  ;;  %806 = vrot.lane.b32.xlu0 %v6551_v51, %s6413_s10  ;;  %v968_v50 = vmax.f32 %v936_v11, 0.0  ;;  %v992_v51 = vpack.c.bf16 %v960_v13, %v960_v13  ;;  %260 = vst.msk [vmem:[#allocation2 + $0x118] sm:$0xff] %vm9069_vm0, %v6414_v20  ;;  %v1210_v11 = vld [vmem:[#allocation2 + $0x88] sm:$0xff] }
  0x43   : > { %261 = vst.msk [vmem:[#allocation2 + $0x120] sm:$0xff] %vm9069_vm0, %v6414_v20 }
  0x44   : > { %810 = vrot.lane.b32.xlu2 %v241_v41, %s6413_s10  ;;  %v1000_v18 = vpack.c.bf16 %v968_v50, %v968_v50  ;;  %v1024_v22 = vunpack.c.l.bf16 %v992_v51  ;;  %262 = vst.msk [vmem:[#allocation2 + $0x128] sm:$0xff] %vm9069_vm0, %v6414_v20  ;;  %v1195_v36 = vld [vmem:[#allocation2 + $0x10] sm:$0xff]  ;;  %v1242_v51 = vpack.c.bf16 %v1210_v11, %v1210_v11  ;;  %v1244_v20 = vpack.c.bf16 %v1212_v17, %v1212_v17  ;;  %v1422_v17 = vld [vmem:[#allocation2 + $0x21] sm:$0xff] }
  0x45   : > { %1062 = vst.msk [vmem:[#allocation2 + $0x100] sm:$0xff] %vm9069_vm0, %v1030_v34  ;;  %v1227_v41 = vpack.c.bf16 %v1195_v36, %v1195_v36 }
  0x46   : > { %v1032_v23 = vunpack.c.l.bf16 %v1000_v18  ;;  %1056 = vst.msk [vmem:[#allocation2 + $0xd0] sm:$0xff] %vm9069_vm0, %v1024_v22  ;;  %v1243_v18 = vpack.c.bf16 %v1211_v12, %v1211_v12  ;;  %v1213_v22 = vld [vmem:[#allocation2 + $0xa0] sm:$0xff]  ;;  %v1419_v0 = vld [vmem:[#allocation2 + $0x9] sm:$0xff] }
  0x47   : > { %v1245_v25 = vpack.c.bf16 %v1213_v22, %v1213_v22  ;;  %v1220_v36 = vld [vmem:[#allocation2 + $0xd8] sm:$0xff] }
  0x48   : > { %1064 = vst.msk [vmem:[#allocation2 + $0x110] sm:$0xff] %vm9069_vm0, %v1032_v23  ;;  %v1214_v23 = vld [vmem:[#allocation2 + $0xa8] sm:$0xff]  ;;  %v1252_v45 = vpack.c.bf16 %v1220_v36, %v1220_v36  ;;  %v1421_v22 = vld [vmem:[#allocation2 + $0x19] sm:$0xff]  ;;  %v1424_v36 = vld [vmem:[#allocation2 + $0x31] sm:$0xff] }
  0x4a   : > { %814 = vrot.lane.b32.xlu1 %v6567_v14, %s6413_s10  ;;  %812 = vrot.lane.b32.xlu0 %v6570_v15, %s6413_s10  ;;  %v999_v14 = vpack.c.bf16 %v967_v26, %v967_v26  ;;  %v995_v15 = vpack.c.bf16 %v963_v27, %v963_v27  ;;  %v1246_v26 = vpack.c.bf16 %v1214_v23, %v1214_v23 }
  0x4c   : > { %816 = vrot.lane.b32.xlu2 %v244_v57, %s6413_s10  ;;  %v1031_v28 = vunpack.c.l.bf16 %v999_v14  ;;  %v1027_v29 = vunpack.c.l.bf16 %v995_v15  ;;  %v1216_v15 = vld [vmem:[#allocation2 + $0xb8] sm:$0xff] }
  0x4d   : > { %v1248_v32 = vpack.c.bf16 %v1216_v15, %v1216_v15 }
  0x4e   : > { %1063 = vst.msk [vmem:[#allocation2 + $0x108] sm:$0xff] %vm9069_vm0, %v1031_v28  ;;  %v1217_v28 = vld [vmem:[#allocation2 + $0xc0] sm:$0xff] }
  0x4f   : > { %1059 = vst.msk [vmem:[#allocation2 + $0xe8] sm:$0xff] %vm9069_vm0, %v1027_v29  ;;  %v1249_v33 = vpack.c.bf16 %v1217_v28, %v1217_v28  ;;  %v6763_v28 = vld [vmem:[#allocation2 + $0x17] sm:$0xff] }
  0x52   : > { %820 = vrot.lane.b32.xlu1 %v6581_v21, %s6413_s10  ;;  %818 = vrot.lane.b32.xlu0 %v6593_v38, %s6413_s10  ;;  %v1194_v21 = vld [vmem:[#allocation2 + $0x8] sm:$0xff]  ;;  %v1196_v38 = vld [vmem:[#allocation2 + $0x18] sm:$0xff] }
  0x53   : > { %v1226_v35 = vpack.c.bf16 %v1194_v21, %v1194_v21  ;;  %v1250_v21 = vpack.c.bf16 %v1218_v31, %v1218_v31 }
  0x54   : > { %822 = vrot.lane.b32.xlu2 %v247_v6, %s6413_s10  ;;  %v1240_v6 = vpack.c.bf16 %v1208_v1, %v1208_v1 }
  0x5a   : > { %826 = vrot.lane.b32.xlu1 %v6603_v42, %s6413_s10  ;;  %824 = vrot.lane.b32.xlu0 %v6612_v55, %s6413_s10  ;;  %v1228_v42 = vpack.c.bf16 %v1196_v38, %v1196_v38  ;;  %v1233_v55 = vpack.c.bf16 %v1201_v52, %v1201_v52 }
  0x5c   : > { %828 = vrot.lane.b32.xlu2 %v250_v10, %s6413_s10  ;;  %v1215_v10 = vld [vmem:[#allocation2 + $0xb0] sm:$0xff] }
  0x5d   : > { %v1247_v14 = vpack.c.bf16 %v1215_v10, %v1215_v10 }
  0x62   : > { %832 = vrot.lane.b32.xlu1 %v6622_v58, %s6413_s10  ;;  %830 = vrot.lane.b32.xlu0 %v251_v4, %s6413_s10  ;;  %v1235_v58 = vpack.c.bf16 %v1203_v54, %v1203_v54  ;;  %v1209_v4 = vld [vmem:[#allocation2 + $0x80] sm:$0xff]  ;;  %v1224_v54 = vld [vmem:[#allocation2 + $0xf8] sm:$0xff] }
  0x63   : > { %v1241_v9 = vpack.c.bf16 %v1209_v4, %v1209_v4  ;;  %v1256_v60 = vpack.c.bf16 %v1224_v54, %v1224_v54  ;;  %v9203_v4 = vmov 0 }
  0x64   : > { %834 = vrot.lane.b32.xlu2 %v253_v30, %s6413_s10 }
  0x6a   : > { %838 = vrot.lane.b32.xlu1 %v255_v8, %s6413_s10  ;;  %836 = vrot.lane.b32.xlu0 %v254_v24, %s6413_s10  ;;  %s5999_s10 = scalar_lea.hbm %s9068_s5, %s6290_s7 }
  0x6c   : > { %1290 = vrot.lane.b32.xlu2 %v1226_v35, %s6415_s11  ;;  %v1219_v35 = vld [vmem:[#allocation2 + $0xd0] sm:$0xff] }
  0x72   : > { %1292 = vrot.lane.b32.xlu0 %v1227_v41, %s6415_s11  ;;  %1294 = vrot.lane.b32.xlu1 %v1228_v42, %s6415_s11  ;;  %v1221_v41 = vld [vmem:[#allocation2 + $0xe0] sm:$0xff]  ;;  %v263_v42 = vlaneseq }
  0x73   : > { %v1253_v37 = vpack.c.bf16 %v1221_v41, %v1221_v41 }
  0x74   : > { %1296 = vrot.lane.b32.xlu2 %v1229_v43, %s6415_s11  ;;  %v1251_v43 = vpack.c.bf16 %v1219_v35, %v1219_v35 }
  0x76   : > { %v785_v48 = vpop.permute.xlu2 %784 }
  0x77   : > { %877 = vst.msk [vmem:[#allocation3 + $0x10] sm:$0xf] %vm872_vm1, %v785_v48  ;;  %v1223_v48 = vld [vmem:[#allocation2 + $0xf0] sm:$0xff] }
  0x7a   : > { %1298 = vrot.lane.b32.xlu0 %v1230_v46, %s6415_s11  ;;  %1300 = vrot.lane.b32.xlu1 %v1231_v47, %s6415_s11  ;;  %v6718_v46 = vshrl.u32 %v263_v42, 7  ;;  %v1222_v47 = vld [vmem:[#allocation2 + $0xe8] sm:$0xff] }
  0x7c   : > { %1302 = vrot.lane.b32.xlu2 %v1232_v49, %s6415_s11  ;;  %v265_v49 = vadd.s32 8, %v6718_v46  ;;  %v267_v59 = vadd.s32 24, %v6718_v46 }
  0x7e   : > { %v787_v57 = vpop.permute.xlu2 %786 }
  0x7f   : > { %878 = vst.msk [vmem:[#allocation3 + $0x14] sm:$0xf] %vm872_vm1, %v787_v57 }
  0x82   : > { %1304 = vrot.lane.b32.xlu0 %v1233_v55, %s6415_s11  ;;  %1306 = vrot.lane.b32.xlu1 %v1234_v56, %s6415_s11  ;;  %v1254_v55 = vpack.c.bf16 %v1222_v47, %v1222_v47  ;;  %v1255_v56 = vpack.c.bf16 %v1223_v48, %v1223_v48 }
  0x84   : > { %1308 = vrot.lane.b32.xlu2 %v1235_v58, %s6415_s11  ;;  %v307_v58 = vand.u32 15, %v265_v49  ;;  %v1425_v49 = vld [vmem:[#allocation2 + $0x39] sm:$0xff] }
  0x86   : > { %v793_v62 = vpop.permute.xlu2 %792  ;;  %vm6730_vm2 = vcmp.ne.s32.totalorder %v307_v58, 15 }
  0x87   : > { %881 = vst.msk [vmem:[#allocation3 + $0x20] sm:$0xf] %vm872_vm1, %v793_v62  ;;  %v9202_v39 = vsel %vm6730_vm2, 4294967295, %v9201_v39  ;;  %v1065_v62 = vld [vmem:[#allocation2 + $0x7] sm:$0xff] }
  0x8a   : > { %1310 = vrot.lane.b32.xlu0 %v1236_v44, %s6415_s11  ;;  %1312 = vrot.lane.b32.xlu1 %v1237_v61, %s6415_s11  ;;  %v1420_v44 = vld [vmem:[#allocation2 + $0x11] sm:$0xff]  ;;  %v300_v61 = vand.u32 15, %v6718_v46 }
  0x8c   : > { %v781_v2 = vpop.permute.xlu1 %780  ;;  %v777_v3 = vpop.permute.xlu0 %776  ;;  %1314 = vrot.lane.b32.xlu2 %v1238_v63, %s6415_s11  ;;  %v1225_v63 = vld [vmem:[#allocation2 + $0x100] sm:$0xff]  ;;  %vm6736_vm3 = vcmp.ne.s32.totalorder %v300_v61, 0  ;;  %v1489_v61 = vpack.c.bf16 %v1425_v49, %v1425_v49 }
  0x8d   : > { %875 = vst.msk [vmem:[#allocation3 + $0x8] sm:$0xf] %vm872_vm1, %v781_v2  ;;  %v9204_v4 = vsel %vm6736_vm3, 4294967295, %v9203_v4 }
  0x8e   : > { %873 = vst.msk [vmem:[#allocation3] sm:$0xf] %vm872_vm1, %v777_v3  ;;  %v799_v8 = vpop.permute.xlu2 %798  ;;  %v321_v3 = vand.u32 15, %v267_v59 }
  0x8f   : > { %884 = vst.msk [vmem:[#allocation3 + $0x2c] sm:$0xf] %vm872_vm1, %v799_v8  ;;  %v1257_v8 = vpack.c.bf16 %v1225_v63, %v1225_v63  ;;  %v9215_v63 = vmov 0 }
  0x90   : > { %vm6748_vm5 = vcmp.ne.s32.totalorder %v321_v3, 15  ;;  %v9217_v3 = vmov 0 }
  0x91   : > { %v1454_v23 = vsel %vm6748_vm5, %v1422_v17, 0.0 }
  0x92   : > { %1316 = vrot.lane.b32.xlu0 %v1239_v5, %s6415_s11  ;;  %1318 = vrot.lane.b32.xlu1 %v1240_v6, %s6415_s11  ;;  %v1452_v5 = vsel %vm6730_vm2, %v1420_v44, 0.0  ;;  %v1097_v6 = vsel %vm6736_vm3, %v1065_v62, 0.0  ;;  %v1486_v31 = vpack.c.bf16 %v1454_v23, %v1454_v23 }
  0x93   : > { %v1129_v12 = vpack.c.bf16 %v1097_v6, %v1097_v6 }
  0x94   : > { %v783_v13 = vpop.permute.xlu1 %782  ;;  %v779_v50 = vpop.permute.xlu0 %778  ;;  %1320 = vrot.lane.b32.xlu2 %v1241_v9, %s6415_s11  ;;  %v1483_v9 = vpack.c.bf16 %v1419_v0, %v1419_v0 }
  0x95   : > { %876 = vst.msk [vmem:[#allocation3 + $0xc] sm:$0xf] %vm872_vm1, %v783_v13  ;;  %v269_v13 = vadd.s32 40, %v6718_v46 }
  0x96   : > { %874 = vst.msk [vmem:[#allocation3 + $0x4] sm:$0xf] %vm872_vm1, %v779_v50  ;;  %v805_v19 = vpop.permute.xlu2 %804  ;;  %v9205_v50 = vmov 0 }
  0x97   : > { %887 = vst.msk [vmem:[#allocation3 + $0x38] sm:$0xf] %vm872_vm1, %v805_v19  ;;  %v9206_v50 = vsel %vm6748_vm5, 4294967295, %v9205_v50  ;;  %v1066_v19 = vld [vmem:[#allocation2 + $0xf] sm:$0xff] }
  0x98   : > { %1162 = vst.msk [vmem:[#allocation3] sm:$0xf] %vm9070_vm4, %v1129_v12  ;;  %v1130_v15 = vpack.c.bf16 %v1066_v19, %v1066_v19  ;;  %v272_v12 = vadd.s32 64, %v6718_v46 }
  0x9a   : > { %1322 = vrot.lane.b32.xlu0 %v1242_v51, %s6415_s11  ;;  %1324 = vrot.lane.b32.xlu1 %v1243_v18, %s6415_s11  ;;  %v1484_v51 = vpack.c.bf16 %v1452_v5, %v1452_v5  ;;  %v1068_v18 = vld [vmem:[#allocation2 + $0x1f] sm:$0xff]  ;;  %1163 = vst.msk [vmem:[#allocation3 + $0x4] sm:$0xf] %vm9070_vm4, %v1130_v15  ;;  %v1428_v5 = vld [vmem:[#allocation2 + $0x51] sm:$0xff]  ;;  %v356_v23 = vand.u32 15, %v272_v12 }
  0x9b   : > { %v1434_v12 = vld [vmem:[#allocation2 + $0x81] sm:$0xff] }
  0x9c   : > { %v791_v24 = vpop.permute.xlu1 %790  ;;  %v789_v7 = vpop.permute.xlu0 %788  ;;  %1326 = vrot.lane.b32.xlu2 %v1244_v20, %s6415_s11  ;;  %v266_v20 = vadd.s32 16, %v6718_v46  ;;  %vm6844_vm13 = vcmp.ne.s32.totalorder %v356_v23, 0 }
  0x9d   : > { %880 = vst.msk [vmem:[#allocation3 + $0x1c] sm:$0xf] %vm872_vm1, %v791_v24  ;;  %v335_v24 = vand.u32 15, %v269_v13  ;;  %v1427_v13 = vld [vmem:[#allocation2 + $0x49] sm:$0xff] }
  0x9e   : > { %879 = vst.msk [vmem:[#allocation3 + $0x18] sm:$0xf] %vm872_vm1, %v789_v7  ;;  %v811_v27 = vpop.permute.xlu2 %810  ;;  %v271_v7 = vadd.s32 56, %v6718_v46 }
  0x9f   : > { %890 = vst.msk [vmem:[#allocation3 + $0x44] sm:$0xf] %vm872_vm1, %v811_v27  ;;  %v314_v27 = vand.u32 15, %v266_v20  ;;  %vm6771_vm8 = vcmp.ne.s32.totalorder %v335_v24, 15  ;;  %v1429_v24 = vld [vmem:[#allocation2 + $0x59] sm:$0xff] }
  0xa0   : > { %v1456_v48 = vsel %vm6771_vm8, %v1424_v36, 0.0  ;;  %v1493_v36 = vpack.c.bf16 %v1429_v24, %v1429_v24 }
  0xa1   : > { %vm6767_vm7 = vcmp.ne.s32.totalorder %v314_v27, 0  ;;  %v1488_v44 = vpack.c.bf16 %v1456_v48, %v1456_v48  ;;  %v1491_v27 = vpack.c.bf16 %v1427_v13, %v1427_v13  ;;  %v9228_v48 = vmov 0 }
  0xa2   : > { %1328 = vrot.lane.b32.xlu0 %v1245_v25, %s6415_s11  ;;  %1330 = vrot.lane.b32.xlu1 %v1246_v26, %s6415_s11  ;;  %v6760_v26 = vpack.c.bf16 %v1068_v18, %v1068_v18  ;;  %v1099_v35 = vsel %vm6767_vm7, %v6763_v28, 0.0  ;;  %v277_v18 = vadd.s32 104, %v6718_v46 }
  0xa3   : > { %v1131_v41 = vpack.c.bf16 %v1099_v35, %v1099_v35  ;;  %v279_v35 = vadd.s32 120, %v6718_v46 }
  0xa4   : > { %v797_v29 = vpop.permute.xlu1 %796  ;;  %v795_v30 = vpop.permute.xlu0 %794  ;;  %1332 = vrot.lane.b32.xlu2 %v1247_v14, %s6415_s11  ;;  %v1423_v14 = vld [vmem:[#allocation2 + $0x29] sm:$0xff]  ;;  %1165 = vst.msk [vmem:[#allocation3 + $0xc] sm:$0xf] %vm9070_vm4, %v6760_v26 }
  0xa5   : > { %883 = vst.msk [vmem:[#allocation3 + $0x28] sm:$0xf] %vm872_vm1, %v797_v29  ;;  %v268_v29 = vadd.s32 32, %v6718_v46 }
  0xa6   : > { %882 = vst.msk [vmem:[#allocation3 + $0x24] sm:$0xf] %vm872_vm1, %v795_v30  ;;  %v817_v34 = vpop.permute.xlu2 %816  ;;  %v1485_v30 = vpack.c.bf16 %v1421_v22, %v1421_v22 }
  0xa7   : > { %893 = vst.msk [vmem:[#allocation3 + $0x50] sm:$0xf] %vm872_vm1, %v817_v34  ;;  %v349_v34 = vand.u32 15, %v271_v7  ;;  %v328_v42 = vand.u32 15, %v268_v29  ;;  %v9220_v29 = vmov 0 }
  0xa8   : > { %1164 = vst.msk [vmem:[#allocation3 + $0x8] sm:$0xf] %vm9070_vm4, %v1131_v41  ;;  %v9221_v29 = vsel %vm6844_vm13, 4294967295, %v9220_v29  ;;  %v6861_v41 = vld [vmem:[#allocation2 + $0x57] sm:$0xff] }
  0xa9   : > { %vm6788_vm9 = vcmp.ne.s32.totalorder %v349_v34, 15  ;;  %vm6793_vm10 = vcmp.ne.s32.totalorder %v328_v42, 0  ;;  %v1430_v34 = vld [vmem:[#allocation2 + $0x61] sm:$0xff]  ;;  %v9225_v42 = vmov 0 }
  0xaa   : > { %1334 = vrot.lane.b32.xlu0 %v1248_v32, %s6415_s11  ;;  %1336 = vrot.lane.b32.xlu1 %v1249_v33, %s6415_s11 }
  0xac   : > { %v803_v38 = vpop.permute.xlu1 %802  ;;  %v801_v40 = vpop.permute.xlu0 %800  ;;  %1338 = vrot.lane.b32.xlu2 %v1250_v21, %s6415_s11  ;;  %v9209_v21 = vmov 0 }
  0xad   : > { %886 = vst.msk [vmem:[#allocation3 + $0x34] sm:$0xf] %vm872_vm1, %v803_v38  ;;  %v9210_v21 = vsel %vm6771_vm8, 4294967295, %v9209_v21  ;;  %v273_v38 = vadd.s32 72, %v6718_v46 }
  0xae   : > { %885 = vst.msk [vmem:[#allocation3 + $0x30] sm:$0xf] %vm872_vm1, %v801_v40  ;;  %v823_v16 = vpop.permute.xlu2 %822  ;;  %v1487_v40 = vpack.c.bf16 %v1423_v14, %v1423_v14 }
  0xaf   : > { %896 = vst.msk [vmem:[#allocation3 + $0x5c] sm:$0xf] %vm872_vm1, %v823_v16  ;;  %v1426_v16 = vld [vmem:[#allocation2 + $0x41] sm:$0xff] }
  0xb0   : > { %v1458_v59 = vsel %vm6788_vm9, %v1426_v16, 0.0  ;;  %v1432_v16 = vld [vmem:[#allocation2 + $0x71] sm:$0xff] }
  0xb1   : > { %v1490_v6 = vpack.c.bf16 %v1458_v59, %v1458_v59  ;;  %v6881_v59 = vld [vmem:[#allocation2 + $0x67] sm:$0xff] }
  0xb2   : > { %1340 = vrot.lane.b32.xlu0 %v1251_v43, %s6415_s11  ;;  %1342 = vrot.lane.b32.xlu1 %v1252_v45, %s6415_s11  ;;  %v6783_v43 = vld [vmem:[#allocation2 + $0x27] sm:$0xff]  ;;  %v9211_v45 = vmov 0 }
  0xb3   : > { %v9212_v45 = vsel %vm6788_vm9, 4294967295, %v9211_v45 }
  0xb4   : > { %v809_v52 = vpop.permute.xlu1 %808  ;;  %v807_v53 = vpop.permute.xlu0 %806  ;;  %1344 = vrot.lane.b32.xlu2 %v1253_v37, %s6415_s11  ;;  %v270_v37 = vadd.s32 48, %v6718_v46 }
  0xb5   : > { %889 = vst.msk [vmem:[#allocation3 + $0x40] sm:$0xf] %vm872_vm1, %v809_v52  ;;  %v1101_v52 = vsel %vm6793_vm10, %v6783_v43, 0.0 }
  0xb6   : > { %888 = vst.msk [vmem:[#allocation3 + $0x3c] sm:$0xf] %vm872_vm1, %v807_v53  ;;  %v829_v57 = vpop.permute.xlu2 %828  ;;  %v1133_v58 = vpack.c.bf16 %v1101_v52, %v1101_v52  ;;  %v1431_v52 = vld [vmem:[#allocation2 + $0x69] sm:$0xff] }
  0xb7   : > { %899 = vst.msk [vmem:[#allocation3 + $0x68] sm:$0xf] %vm872_vm1, %v829_v57  ;;  %v6803_v57 = vld [vmem:[#allocation2 + $0x37] sm:$0xff] }
  0xb8   : > { %1166 = vst.msk [vmem:[#allocation3 + $0x10] sm:$0xf] %vm9070_vm4, %v1133_v58 }
  0xba   : > { %1346 = vrot.lane.b32.xlu0 %v1254_v55, %s6415_s11  ;;  %1348 = vrot.lane.b32.xlu1 %v1255_v56, %s6415_s11  ;;  %v363_v55 = vand.u32 15, %v273_v38  ;;  %v342_v56 = vand.u32 15, %v270_v37  ;;  %v276_v37 = vadd.s32 96, %v6718_v46 }
  0xbc   : > { %v815_v1 = vpop.permute.xlu1 %814  ;;  %v813_v2 = vpop.permute.xlu0 %812  ;;  %1350 = vrot.lane.b32.xlu2 %v1256_v60, %s6415_s11  ;;  %v1070_v60 = vld [vmem:[#allocation2 + $0x2f] sm:$0xff]  ;;  %vm6809_vm11 = vcmp.ne.s32.totalorder %v342_v56, 0  ;;  %vm6820_vm12 = vcmp.ne.s32.totalorder %v363_v55, 15  ;;  %v405_v56 = vand.u32 15, %v279_v35  ;;  %v384_v58 = vand.u32 15, %v276_v37  ;;  %v6918_v35 = vld [vmem:[#allocation2 + $0x77] sm:$0xff] }
  0xbd   : > { %892 = vst.msk [vmem:[#allocation3 + $0x4c] sm:$0xf] %vm872_vm1, %v815_v1  ;;  %v9216_v63 = vsel %vm6809_vm11, 4294967295, %v9215_v63  ;;  %v6813_v0 = vpack.c.bf16 %v1070_v60, %v1070_v60  ;;  %v275_v1 = vadd.s32 88, %v6718_v46  ;;  %v9218_v3 = vsel %vm6820_vm12, 4294967295, %v9217_v3 }
  0xbe   : > { %891 = vst.msk [vmem:[#allocation3 + $0x48] sm:$0xf] %vm872_vm1, %v813_v2  ;;  %v835_v11 = vpop.permute.xlu2 %834  ;;  %v1103_v2 = vsel %vm6809_vm11, %v6803_v57, 0.0  ;;  %v1460_v17 = vsel %vm6820_vm12, %v1428_v5, 0.0  ;;  %v9231_v5 = vmov 0  ;;  %v9242_v37 = vmov 0 }
  0xbf   : > { %902 = vst.msk [vmem:[#allocation3 + $0x74] sm:$0xf] %vm872_vm1, %v835_v11  ;;  %v1072_v11 = vld [vmem:[#allocation2 + $0x3f] sm:$0xff]  ;;  %v1492_v14 = vpack.c.bf16 %v1460_v17, %v1460_v17 }
  0xc0   : > { %9219 = vst [vmem:[#allocation8_spill] sm:$0xff] %v9218_v3  ;;  %v6838_v7 = vpack.c.bf16 %v1072_v11, %v1072_v11  ;;  %v9234_v11 = vmov 0  ;;  %v9317_v3 = vmov 0 }
  0xc1   : > { %1167 = vst.msk [vmem:[#allocation3 + $0x14] sm:$0xf] %vm9070_vm4, %v6813_v0 }
  0xc2   : > { %1352 = vrot.lane.b32.xlu0 %v1257_v8, %s6415_s11  ;;  %1547 = vrot.lane.b32.xlu1 %v1483_v9, %s6416_s12  ;;  %v1135_v8 = vpack.c.bf16 %v1103_v2, %v1103_v2  ;;  %v1074_v9 = vld [vmem:[#allocation2 + $0x4f] sm:$0xff]  ;;  %1169 = vst.msk [vmem:[#allocation3 + $0x1c] sm:$0xf] %vm9070_vm4, %v6838_v7 }
  0xc3   : > { %v6835_v22 = vpack.c.bf16 %v1074_v9, %v1074_v9 }
  0xc4   : > { %v821_v10 = vpop.permute.xlu1 %820  ;;  %v819_v25 = vpop.permute.xlu0 %818  ;;  %1549 = vrot.lane.b32.xlu2 %v1484_v51, %s6416_s12  ;;  %1168 = vst.msk [vmem:[#allocation3 + $0x18] sm:$0xf] %vm9070_vm4, %v1135_v8  ;;  %v377_v51 = vand.u32 15, %v275_v1  ;;  %v1495_v1 = vpack.c.bf16 %v1431_v52, %v1431_v52  ;;  %v281_v8 = vadd.s32 136, %v6718_v46  ;;  %v9245_v52 = vmov 0 }
  0xc5   : > { %895 = vst.msk [vmem:[#allocation3 + $0x58] sm:$0xf] %vm872_vm1, %v821_v10  ;;  %v6840_v10 = vld [vmem:[#allocation2 + $0x47] sm:$0xff] }
  0xc6   : > { %894 = vst.msk [vmem:[#allocation3 + $0x54] sm:$0xf] %vm872_vm1, %v819_v25  ;;  %v1291_v32 = vpop.permute.xlu2 %1290  ;;  %v274_v25 = vadd.s32 80, %v6718_v46  ;;  %vm6848_vm14 = vcmp.ne.s32.totalorder %v377_v51, 15  ;;  %v1080_v51 = vld [vmem:[#allocation2 + $0x7f] sm:$0xff]  ;;  %v419_v24 = vand.u32 15, %v281_v8 }
  0xc7   : > { %1387 = vst.msk [vmem:[#allocation3] sm:$0xf] %vm9075_vm6, %v1291_v32  ;;  %v1105_v32 = vsel %vm6844_vm13, %v6840_v10, 0.0  ;;  %v1462_v49 = vsel %vm6848_vm14, %v1430_v34, 0.0 }
  0xc8   : > { %1171 = vst.msk [vmem:[#allocation3 + $0x24] sm:$0xf] %vm9070_vm4, %v6835_v22  ;;  %v1137_v38 = vpack.c.bf16 %v1105_v32, %v1105_v32  ;;  %v1435_v32 = vld [vmem:[#allocation2 + $0x89] sm:$0xff] }
  0xca   : > { %1551 = vrot.lane.b32.xlu0 %v1485_v30, %s6416_s12  ;;  %1553 = vrot.lane.b32.xlu1 %v1486_v31, %s6416_s12  ;;  %v391_v30 = vand.u32 15, %v277_v18  ;;  %v9222_v31 = vmov 0  ;;  %1170 = vst.msk [vmem:[#allocation3 + $0x20] sm:$0xf] %vm9070_vm4, %v1137_v38  ;;  %vm6887_vm4 = vcmp.ne.s32.totalorder %v384_v58, 0  ;;  %v1078_v18 = vld [vmem:[#allocation2 + $0x6f] sm:$0xff] }
  0xcb   : > { %v9223_v31 = vsel %vm6848_vm14, 4294967295, %v9222_v31  ;;  %v9232_v5 = vsel %vm6887_vm4, 4294967295, %v9231_v5  ;;  %v1109_v9 = vsel %vm6887_vm4, %v6881_v59, 0.0  ;;  %v6916_v34 = vpack.c.bf16 %v1078_v18, %v1078_v18 }
  0xcc   : > { %v827_v53 = vpop.permute.xlu1 %826  ;;  %v825_v54 = vpop.permute.xlu0 %824  ;;  %1555 = vrot.lane.b32.xlu2 %v1487_v40, %s6416_s12  ;;  %9224 = vst [vmem:[#allocation9_spill] sm:$0xff] %v9223_v31  ;;  %v370_v40 = vand.u32 15, %v274_v25  ;;  %vm6866_vm15 = vcmp.ne.s32.totalorder %v391_v30, 15  ;;  %v1141_v17 = vpack.c.bf16 %v1109_v9, %v1109_v9  ;;  %v283_v25 = vadd.s32 152, %v6718_v46  ;;  %v1437_v9 = vld [vmem:[#allocation2 + $0x99] sm:$0xff] }
  0xcd   : > { %898 = vst.msk [vmem:[#allocation3 + $0x64] sm:$0xf] %vm872_vm1, %v827_v53  ;;  %v9226_v42 = vsel %vm6866_vm15, 4294967295, %v9225_v42 }
  0xce   : > { %897 = vst.msk [vmem:[#allocation3 + $0x60] sm:$0xf] %vm872_vm1, %v825_v54  ;;  %v1297_v62 = vpop.permute.xlu2 %1296  ;;  %vm6871_vm0 = vcmp.ne.s32.totalorder %v370_v40, 0 }
  0xcf   : > { %1390 = vst.msk [vmem:[#allocation3 + $0xc] sm:$0xf] %vm9075_vm6, %v1297_v62  ;;  %v9229_v48 = vsel %vm6871_vm0, 4294967295, %v9228_v48  ;;  %v1107_v53 = vsel %vm6871_vm0, %v6861_v41, 0.0  ;;  %v1494_v62 = vpack.c.bf16 %v1462_v49, %v1462_v49  ;;  %v433_v49 = vand.u32 15, %v283_v25 }
  0xd0   : > { %9227 = vst [vmem:[#allocation10_spill] sm:$0xff] %v9226_v42  ;;  %v1139_v60 = vpack.c.bf16 %v1107_v53, %v1107_v53  ;;  %v1094_v42 = vld [vmem:[#allocation2 + $0xef] sm:$0xff] }
  0xd1   : > { %9230 = vst [vmem:[#allocation11_spill] sm:$0xff] %v9229_v48  ;;  %vm6944_vm9 = vcmp.ne.s32.totalorder %v433_v49, 15 }
  0xd2   : > { %1557 = vrot.lane.b32.xlu0 %v1488_v44, %s6416_s12  ;;  %1559 = vrot.lane.b32.xlu1 %v1489_v61, %s6416_s12  ;;  %v1464_v44 = vsel %vm6866_vm15, %v1432_v16, 0.0  ;;  %v1076_v61 = vld [vmem:[#allocation2 + $0x5f] sm:$0xff]  ;;  %9233 = vst [vmem:[#allocation12_spill] sm:$0xff] %v9232_v5  ;;  %vm6898_vm15 = vcmp.ne.s32.totalorder %v405_v56, 15  ;;  %v1499_v56 = vpack.c.bf16 %v1435_v32, %v1435_v32 }
  0xd3   : > { %v9235_v11 = vsel %vm6898_vm15, 4294967295, %v9234_v11  ;;  %v1496_v13 = vpack.c.bf16 %v1464_v44, %v1464_v44  ;;  %v1466_v23 = vsel %vm6898_vm15, %v1434_v12, 0.0  ;;  %vm6926_vm15 = vcmp.ne.s32.totalorder %v419_v24, 15  ;;  %v6939_v44 = vld [vmem:[#allocation2 + $0x87] sm:$0xff]  ;;  %v1082_v24 = vld [vmem:[#allocation2 + $0x8f] sm:$0xff] }
  0xd4   : > { %v833_v19 = vpop.permute.xlu1 %832  ;;  %v831_v20 = vpop.permute.xlu0 %830  ;;  %1561 = vrot.lane.b32.xlu2 %v1490_v6, %s6416_s12  ;;  %v6891_v6 = vpack.c.bf16 %v1076_v61, %v1076_v61  ;;  %9236 = vst [vmem:[#allocation13_spill] sm:$0xff] %v9235_v11  ;;  %v1498_v40 = vpack.c.bf16 %v1466_v23, %v1466_v23  ;;  %v9246_v52 = vsel %vm6926_vm15, 4294967295, %v9245_v52  ;;  %v9252_v61 = vmov 0 }
  0xd5   : > { %901 = vst.msk [vmem:[#allocation3 + $0x70] sm:$0xf] %vm872_vm1, %v833_v19  ;;  %v278_v19 = vadd.s32 112, %v6718_v46  ;;  %v9253_v61 = vsel %vm6944_vm9, 4294967295, %v9252_v61  ;;  %v6969_v32 = vpack.c.bf16 %v1082_v24, %v1082_v24 }
  0xd6   : > { %900 = vst.msk [vmem:[#allocation3 + $0x6c] sm:$0xf] %vm872_vm1, %v831_v20  ;;  %v1303_v15 = vpop.permute.xlu2 %1302  ;;  %v1433_v20 = vld [vmem:[#allocation2 + $0x79] sm:$0xff] }
  0xd7   : > { %1393 = vst.msk [vmem:[#allocation3 + $0x18] sm:$0xf] %vm9075_vm6, %v1303_v15  ;;  %v6913_v15 = vpack.c.bf16 %v1080_v51, %v1080_v51  ;;  %v398_v30 = vand.u32 15, %v278_v19  ;;  %v1497_v38 = vpack.c.bf16 %v1433_v20, %v1433_v20  ;;  %v6959_v19 = vld [vmem:[#allocation2 + $0x97] sm:$0xff] }
  0xd8   : > { %9247 = vst [vmem:[#allocation15_spill] sm:$0xff] %v9246_v52 }
  0xd9   : > { %9254 = vst [vmem:[#allocation16_spill] sm:$0xff] %v9253_v61  ;;  %v7074_v61 = vld [vmem:[#allocation2 + $0xd7] sm:$0xff] }
  0xda   : > { %1563 = vrot.lane.b32.xlu0 %v1491_v27, %s6416_s12  ;;  %1565 = vrot.lane.b32.xlu1 %v1492_v14, %s6416_s12 }
  0xdc   : > { %v839_v54 = vpop.permute.xlu1 %838  ;;  %v837_v55 = vpop.permute.xlu0 %836  ;;  %1567 = vrot.lane.b32.xlu2 %v1493_v36, %s6416_s12  ;;  %v280_v36 = vadd.s32 128, %v6718_v46 }
  0xdd   : > { %904 = vst.msk [vmem:[#allocation3 + $0x7c] sm:$0xf] %vm872_vm1, %v839_v54  ;;  %v1436_v54 = vld [vmem:[#allocation2 + $0x91] sm:$0xff] }
  0xde   : > { %903 = vst.msk [vmem:[#allocation3 + $0x78] sm:$0xf] %vm872_vm1, %v837_v55  ;;  %v1309_v2 = vpop.permute.xlu2 %1308  ;;  %vm9237_vm1 = vcmask 27648   ;;  %v285_v55 = vadd.s32 168, %v6718_v46  ;;  %v1468_v8 = vsel %vm6926_vm15, %v1436_v54, 0.0  ;;  %v1086_v54 = vld [vmem:[#allocation2 + $0xaf] sm:$0xff] }
  0xdf   : > { %1396 = vst.msk [vmem:[#allocation3 + $0x24] sm:$0xf] %vm9075_vm6, %v1309_v2  ;;  %vm9238_vm14 = vmmov %vm9237_vm1  ;;  %v9255_v2 = vmov 0  ;;  %v1500_v25 = vpack.c.bf16 %v1468_v8, %v1468_v8 }
  0xe0   : > { %1172 = vst.msk [vmem:[#allocation3 + $0x28] sm:$0xf] %vm9237_vm1, %v1139_v60  ;;  %vm9239_vm6 = vmmov %vm9237_vm1  ;;  %vm6922_vm1 = vcmp.ne.s32.totalorder %v398_v30, 0  ;;  %v412_v60 = vand.u32 15, %v280_v36  ;;  %v447_v51 = vand.u32 15, %v285_v55  ;;  %v9259_v30 = vmov 0 }
  0xe1   : > { %1173 = vst.msk [vmem:[#allocation3 + $0x2c] sm:$0xf] %vm9238_vm14, %v6891_v6  ;;  %vm9240_vm14 = vcmask 60448   ;;  %v9243_v37 = vsel %vm6922_vm1, 4294967295, %v9242_v37  ;;  %v1111_v53 = vsel %vm6922_vm1, %v6918_v35, 0.0  ;;  %v1084_v55 = vld [vmem:[#allocation2 + $0x9f] sm:$0xff] }
  0xe2   : > { %1569 = vrot.lane.b32.xlu0 %v1494_v62, %s6416_s12  ;;  %1571 = vrot.lane.b32.xlu1 %v1495_v1, %s6416_s12  ;;  %1174 = vst.msk [vmem:[#allocation3 + $0x30] sm:$0xf] %vm9239_vm6, %v1141_v17  ;;  %vm9241_vm6 = vmmov %vm9240_vm14  ;;  %v1143_v58 = vpack.c.bf16 %v1111_v53, %v1111_v53  ;;  %v1438_v62 = vld [vmem:[#allocation2 + $0xa1] sm:$0xff]  ;;  %v282_v1 = vadd.s32 144, %v6718_v46 }
  0xe3   : > { %9244 = vst [vmem:[#allocation14_spill] sm:$0xff] %v9243_v37  ;;  %v1470_v23 = vsel %vm6944_vm9, %v1438_v62, 0.0  ;;  %v289_v62 = vadd.s32 200, %v6718_v46 }
  0xe4   : > { %v1293_v27 = vpop.permute.xlu0 %1292  ;;  %v1295_v14 = vpop.permute.xlu1 %1294  ;;  %1573 = vrot.lane.b32.xlu2 %v1496_v13, %s6416_s12  ;;  %v426_v18 = vand.u32 15, %v282_v1  ;;  %v1502_v49 = vpack.c.bf16 %v1470_v23, %v1470_v23 }
  0xe5   : > { %1388 = vst.msk [vmem:[#allocation3 + $0x4] sm:$0xf] %vm9240_vm14, %v1293_v27  ;;  %vm9248_vm14 = vmmov %vm9241_vm6  ;;  %v1501_v27 = vpack.c.bf16 %v1437_v9, %v1437_v9 }
  0xe6   : > { %1389 = vst.msk [vmem:[#allocation3 + $0x8] sm:$0xf] %vm9241_vm6, %v1295_v14  ;;  %v1315_v16 = vpop.permute.xlu2 %1314  ;;  %vm9249_vm6 = vcmask 27648   ;;  %vm6965_vm15 = vcmp.ne.s32.totalorder %v426_v18, 0  ;;  %v6996_v18 = vld [vmem:[#allocation2 + $0xa7] sm:$0xff] }
  0xe7   : > { %1399 = vst.msk [vmem:[#allocation3 + $0x30] sm:$0xf] %vm9248_vm14, %v1315_v16  ;;  %vm9250_vm12 = vmmov %vm9249_vm6  ;;  %v9260_v30 = vsel %vm6965_vm15, 4294967295, %v9259_v30  ;;  %v1115_v36 = vsel %vm6965_vm15, %v6959_v19, 0.0  ;;  %v287_v16 = vadd.s32 184, %v6718_v46 }
  0xe8   : > { %1177 = vst.msk [vmem:[#allocation3 + $0x3c] sm:$0xf] %vm9249_vm6, %v6913_v15  ;;  %vm9251_vm14 = vmmov %vm9249_vm6  ;;  %vm6949_vm6 = vcmp.ne.s32.totalorder %v412_v60, 0  ;;  %v1147_v53 = vpack.c.bf16 %v1115_v36, %v1115_v36 }
  0xe9   : > { %1175 = vst.msk [vmem:[#allocation3 + $0x34] sm:$0xf] %vm9250_vm12, %v6916_v34  ;;  %v9256_v2 = vsel %vm6949_vm6, 4294967295, %v9255_v2  ;;  %v1113_v12 = vsel %vm6949_vm6, %v6939_v44, 0.0  ;;  %vm9257_vm12 = vcmask 60448   ;;  %v461_v9 = vand.u32 15, %v287_v16 }
  0xea   : > { %1575 = vrot.lane.b32.xlu0 %v1497_v38, %s6416_s12  ;;  %1577 = vrot.lane.b32.xlu1 %v1498_v40, %s6416_s12  ;;  %1176 = vst.msk [vmem:[#allocation3 + $0x38] sm:$0xf] %vm9251_vm14, %v1143_v58  ;;  %v1145_v20 = vpack.c.bf16 %v1113_v12, %v1113_v12  ;;  %vm9258_vm14 = vmmov %vm9257_vm12  ;;  %v9262_v38 = vmov 0  ;;  %v1440_v40 = vld [vmem:[#allocation2 + $0xb1] sm:$0xff]  ;;  %v1439_v58 = vld [vmem:[#allocation2 + $0xa9] sm:$0xff]  ;;  %v6991_v12 = vpack.c.bf16 %v1086_v54, %v1086_v54  ;;  %v9273_v16 = vmov 0 }
  0xeb   : > { %vm9261_vm8 = vmmov %vm9257_vm12  ;;  %v1503_v23 = vpack.c.bf16 %v1439_v58, %v1439_v58  ;;  %v7021_v58 = vld [vmem:[#allocation2 + $0xb7] sm:$0xff] }
  0xec   : > { %v1299_v13 = vpop.permute.xlu0 %1298  ;;  %v1301_v17 = vpop.permute.xlu1 %1300  ;;  %1579 = vrot.lane.b32.xlu2 %v1499_v56, %s6416_s12  ;;  %v284_v56 = vadd.s32 160, %v6718_v46 }
  0xed   : > { %1391 = vst.msk [vmem:[#allocation3 + $0x10] sm:$0xf] %vm9257_vm12, %v1299_v13  ;;  %vm6975_vm12 = vcmp.ne.s32.totalorder %v447_v51, 15  ;;  %v6994_v51 = vpack.c.bf16 %v1084_v55, %v1084_v55 }
  0xee   : > { %1392 = vst.msk [vmem:[#allocation3 + $0x14] sm:$0xf] %vm9258_vm14, %v1301_v17  ;;  %v1321_v14 = vpop.permute.xlu2 %1320  ;;  %v9263_v38 = vsel %vm6975_vm12, 4294967295, %v9262_v38  ;;  %vm9265_vm14 = vcmask 27648   ;;  %v1472_v60 = vsel %vm6975_vm12, %v1440_v40, 0.0  ;;  %v440_v13 = vand.u32 15, %v284_v56 }
  0xef   : > { %1402 = vst.msk [vmem:[#allocation3 + $0x3c] sm:$0xf] %vm9261_vm8, %v1321_v14  ;;  %vm9266_vm9 = vmmov %vm9265_vm14  ;;  %v1441_v17 = vld [vmem:[#allocation2 + $0xb9] sm:$0xff]  ;;  %v1504_v24 = vpack.c.bf16 %v1472_v60, %v1472_v60  ;;  %v475_v14 = vand.u32 15, %v289_v62  ;;  %v9278_v56 = vmov 0  ;;  %v9282_v60 = vmov 0 }
  0xf0   : > { %9264 = vst [vmem:[#allocation17_spill] sm:$0xff] %v9263_v38  ;;  %vm9267_vm8 = vmmov %vm9266_vm9  ;;  %v1505_v54 = vpack.c.bf16 %v1441_v17, %v1441_v17  ;;  %v1444_v62 = vld [vmem:[#allocation2 + $0xd1] sm:$0xff]  ;;  %v9287_v38 = vmov 0 }
  0xf1   : > { %1178 = vst.msk [vmem:[#allocation3 + $0x40] sm:$0xf] %vm9265_vm14, %v1145_v20  ;;  %v286_v20 = vadd.s32 176, %v6718_v46 }
  0xf2   : > { %1179 = vst.msk [vmem:[#allocation3 + $0x44] sm:$0xf] %vm9266_vm9, %v6969_v32  ;;  %1581 = vrot.lane.b32.xlu0 %v1500_v25, %s6416_s12  ;;  %1583 = vrot.lane.b32.xlu1 %v1501_v27, %s6416_s12  ;;  %vm9268_vm9 = vcmask 60448   ;;  %v9270_v27 = vmov 0 }
  0xf3   : > { %1180 = vst.msk [vmem:[#allocation3 + $0x48] sm:$0xf] %vm9267_vm8, %v1147_v53  ;;  %vm9269_vm14 = vmmov %vm9268_vm9  ;;  %vm7000_vm8 = vcmp.ne.s32.totalorder %v440_v13, 0  ;;  %v454_v40 = vand.u32 15, %v286_v20  ;;  %v291_v53 = vadd.s32 216, %v6718_v46  ;;  %v1443_v13 = vld [vmem:[#allocation2 + $0xc9] sm:$0xff] }
  0xf4   : > { %v1305_v1 = vpop.permute.xlu0 %1304  ;;  %v1307_v8 = vpop.permute.xlu1 %1306  ;;  %1585 = vrot.lane.b32.xlu2 %v1502_v49, %s6416_s12  ;;  %v9271_v27 = vsel %vm7000_vm8, 4294967295, %v9270_v27  ;;  %vm9272_vm12 = vmmov %vm9268_vm9  ;;  %v1117_v36 = vsel %vm7000_vm8, %v6996_v18, 0.0  ;;  %v1442_v49 = vld [vmem:[#allocation2 + $0xc1] sm:$0xff]  ;;  %vm7026_vm8 = vcmp.ne.s32.totalorder %v475_v14, 15 }
  0xf5   : > { %1394 = vst.msk [vmem:[#allocation3 + $0x1c] sm:$0xf] %vm9268_vm9, %v1305_v1  ;;  %vm7008_vm9 = vcmp.ne.s32.totalorder %v461_v9, 15  ;;  %v1149_v55 = vpack.c.bf16 %v1117_v36, %v1117_v36  ;;  %v9283_v60 = vsel %vm7026_vm8, 4294967295, %v9282_v60  ;;  %v288_v1 = vadd.s32 192, %v6718_v46 }
  0xf6   : > { %1395 = vst.msk [vmem:[#allocation3 + $0x20] sm:$0xf] %vm9269_vm14, %v1307_v8  ;;  %v1327_v25 = vpop.permute.xlu2 %1326  ;;  %v9274_v16 = vsel %vm7008_vm9, 4294967295, %v9273_v16  ;;  %vm9276_vm14 = vcmask 27648   ;;  %v1474_v9 = vsel %vm7008_vm9, %v1442_v49, 0.0  ;;  %v1476_v36 = vsel %vm7026_vm8, %v1444_v62, 0.0 }
  0xf7   : > { %1405 = vst.msk [vmem:[#allocation3 + $0x48] sm:$0xf] %vm9272_vm12, %v1327_v25  ;;  %vm9277_vm5 = vmmov %vm9276_vm14  ;;  %vm7017_vm12 = vcmp.ne.s32.totalorder %v454_v40, 0  ;;  %v7037_v25 = vld [vmem:[#allocation2 + $0xc7] sm:$0xff]  ;;  %v1088_v40 = vld [vmem:[#allocation2 + $0xbf] sm:$0xff]  ;;  %v1507_v49 = vpack.c.bf16 %v1443_v13, %v1443_v13  ;;  %v9291_v62 = vmov 0 }
  0xf8   : > { %9275 = vst [vmem:[#allocation18_spill] sm:$0xff] %v9274_v16  ;;  %v9279_v56 = vsel %vm7017_vm12, 4294967295, %v9278_v56  ;;  %vm9281_vm2 = vmmov %vm9277_vm5  ;;  %v1119_v8 = vsel %vm7017_vm12, %v7021_v58, 0.0 }
  0xf9   : > { %1183 = vst.msk [vmem:[#allocation3 + $0x54] sm:$0xf] %vm9276_vm14, %v6991_v12  ;;  %v1151_v14 = vpack.c.bf16 %v1119_v8, %v1119_v8  ;;  %v293_v8 = vadd.s32 232, %v6718_v46 }
  0xfa   : > { %1181 = vst.msk [vmem:[#allocation3 + $0x4c] sm:$0xf] %vm9277_vm5, %v6994_v51  ;;  %1587 = vrot.lane.b32.xlu0 %v1503_v23, %s6416_s12  ;;  %1589 = vrot.lane.b32.xlu1 %v1504_v24, %s6416_s12  ;;  %v489_v23 = vand.u32 15, %v291_v53  ;;  %v468_v24 = vand.u32 15, %v288_v1  ;;  %v7047_v53 = vpack.c.bf16 %v1088_v40, %v1088_v40  ;;  %v1446_v1 = vld [vmem:[#allocation2 + $0xe1] sm:$0xff] }
  0xfb   : > { %9280 = vst [vmem:[#allocation19_spill] sm:$0xff] %v9279_v56 }
  0xfc   : > { %1182 = vst.msk [vmem:[#allocation3 + $0x50] sm:$0xf] %vm9281_vm2, %v1149_v55  ;;  %v1311_v17 = vpop.permute.xlu0 %1310  ;;  %v1313_v20 = vpop.permute.xlu1 %1312  ;;  %1591 = vrot.lane.b32.xlu2 %v1505_v54, %s6416_s12  ;;  %vm9285_vm2 = vcmask 60448   ;;  %v1506_v55 = vpack.c.bf16 %v1474_v9, %v1474_v9  ;;  %vm7043_vm14 = vcmp.ne.s32.totalorder %v468_v24, 0  ;;  %v1508_v9 = vpack.c.bf16 %v1476_v36, %v1476_v36 }
  0xfd   : > { %9284 = vst [vmem:[#allocation20_spill] sm:$0xff] %v9283_v60  ;;  %vm9286_vm5 = vmmov %vm9285_vm2  ;;  %v9288_v38 = vsel %vm7043_vm14, 4294967295, %v9287_v38  ;;  %v1121_v54 = vsel %vm7043_vm14, %v7037_v25, 0.0  ;;  %v295_v36 = vadd.s32 248, %v6718_v46 }
  0xfe   : > { %1397 = vst.msk [vmem:[#allocation3 + $0x28] sm:$0xf] %vm9285_vm2, %v1311_v17  ;;  %v1333_v16 = vpop.permute.xlu2 %1332  ;;  %vm9290_vm9 = vmmov %vm9285_vm2  ;;  %vm7053_vm2 = vcmp.ne.s32.totalorder %v489_v23, 15  ;;  %v1153_v13 = vpack.c.bf16 %v1121_v54, %v1121_v54  ;;  %v1090_v17 = vld [vmem:[#allocation2 + $0xcf] sm:$0xff]  ;;  %v1445_v23 = vld [vmem:[#allocation2 + $0xd9] sm:$0xff]  ;;  %v503_v54 = vand.u32 15, %v293_v8 }
  0xff   : > { %1398 = vst.msk [vmem:[#allocation3 + $0x2c] sm:$0xf] %vm9286_vm5, %v1313_v20  ;;  %v9292_v62 = vsel %vm7053_vm2, 4294967295, %v9291_v62  ;;  %vm9294_vm5 = vcmask 27648   ;;  %v290_v20 = vadd.s32 208, %v6718_v46  ;;  %v1478_v24 = vsel %vm7053_vm2, %v1446_v1, 0.0 }
 0x100   : > { %9289 = vst [vmem:[#allocation21_spill] sm:$0xff] %v9288_v38  ;;  %vm9295_vm8 = vmmov %vm9294_vm5  ;;  %v7072_v60 = vpack.c.bf16 %v1090_v17, %v1090_v17  ;;  %v1509_v1 = vpack.c.bf16 %v1445_v23, %v1445_v23  ;;  %v1510_v52 = vpack.c.bf16 %v1478_v24, %v1478_v24  ;;  %v9299_v8 = vmov 0 }
 0x101   : > { %1408 = vst.msk [vmem:[#allocation3 + $0x54] sm:$0xf] %vm9290_vm9, %v1333_v16  ;;  %vm9296_vm9 = vmmov %vm9294_vm5  ;;  %v1092_v16 = vld [vmem:[#allocation2 + $0xdf] sm:$0xff] }
 0x102   : > { %9293 = vst [vmem:[#allocation22_spill] sm:$0xff] %v9292_v62  ;;  %1593 = vrot.lane.b32.xlu0 %v1506_v55, %s6416_s12  ;;  %1595 = vrot.lane.b32.xlu1 %v1507_v49, %s6416_s12  ;;  %v7069_v55 = vpack.c.bf16 %v1092_v16, %v1092_v16  ;;  %v482_v49 = vand.u32 15, %v290_v20  ;;  %v292_v62 = vadd.s32 224, %v6718_v46  ;;  %v9303_v20 = vmov 0 }
 0x103   : > { %1184 = vst.msk [vmem:[#allocation3 + $0x58] sm:$0xf] %vm9294_vm5, %v1151_v14 }
 0x104   : > { %1185 = vst.msk [vmem:[#allocation3 + $0x5c] sm:$0xf] %vm9295_vm8, %v7047_v53  ;;  %v1317_v14 = vpop.permute.xlu0 %1316  ;;  %v1319_v40 = vpop.permute.xlu1 %1318  ;;  %1597 = vrot.lane.b32.xlu2 %v1508_v9, %s6416_s12  ;;  %vm9297_vm8 = vcmask 60448   ;;  %v517_v9 = vand.u32 15, %v295_v36  ;;  %v496_v17 = vand.u32 15, %v292_v62  ;;  %v7100_v36 = vld [vmem:[#allocation2 + $0xe7] sm:$0xff] }
 0x105   : > { %1186 = vst.msk [vmem:[#allocation3 + $0x60] sm:$0xf] %vm9296_vm9, %v1153_v13  ;;  %v1447_v13 = vld [vmem:[#allocation2 + $0xe9] sm:$0xff]  ;;  %vm9298_vm5 = vmmov %vm9297_vm8  ;;  %vm7078_vm9 = vcmp.ne.s32.totalorder %v482_v49, 0  ;;  %v9312_v62 = vmov 0 }
 0x106   : > { %1400 = vst.msk [vmem:[#allocation3 + $0x34] sm:$0xf] %vm9297_vm8, %v1317_v14  ;;  %v1339_v11 = vpop.permute.xlu2 %1338  ;;  %v9300_v8 = vsel %vm7078_vm9, 4294967295, %v9299_v8  ;;  %vm9302_vm2 = vmmov %vm9298_vm5  ;;  %v1123_v16 = vsel %vm7078_vm9, %v7074_v61, 0.0  ;;  %vm7086_vm8 = vcmp.ne.s32.totalorder %v503_v54, 15  ;;  %v1448_v14 = vld [vmem:[#allocation2 + $0xf1] sm:$0xff]  ;;  %v7090_v23 = vpack.c.bf16 %v1447_v13, %v1447_v13 }
 0x107   : > { %1401 = vst.msk [vmem:[#allocation3 + $0x38] sm:$0xf] %vm9298_vm5, %v1319_v40  ;;  %v9304_v20 = vsel %vm7086_vm8, 4294967295, %v9303_v20  ;;  %vm9306_vm5 = vcmask 27648   ;;  %v1155_v24 = vpack.c.bf16 %v1123_v16, %v1123_v16  ;;  %vm7105_vm12 = vcmp.ne.s32.totalorder %v517_v9, 15  ;;  %v7109_v40 = vld [vmem:[#allocation2 + $0x101] sm:$0xff] }
 0x108   : > { %9301 = vst [vmem:[#allocation23_spill] sm:$0xff] %v9300_v8  ;;  %vm9307_vm14 = vmmov %vm9306_vm5  ;;  %v9313_v62 = vsel %vm7105_vm12, 4294967295, %v9312_v62  ;;  %v294_v54 = vadd.s32 240, %v6718_v46  ;;  %v1480_v13 = vsel %vm7086_vm8, %v1448_v14, 0.0  ;;  %v1482_v46 = vsel %vm7105_vm12, %v7109_v40, 0.0 }
 0x109   : > { %1411 = vst.msk [vmem:[#allocation3 + $0x60] sm:$0xf] %vm9302_vm2, %v1339_v11  ;;  %vm7096_vm2 = vcmp.ne.s32.totalorder %v496_v17, 0  ;;  %v9308_v11 = vmov 0  ;;  %vm9311_vm9 = vmmov %vm9306_vm5  ;;  %v7119_v17 = vld [vmem:[#allocation2 + $0xf7] sm:$0xff]  ;;  %v1512_v14 = vpack.c.bf16 %v1480_v13, %v1480_v13 }
 0x10a   : > { %9305 = vst [vmem:[#allocation24_spill] sm:$0xff] %v9304_v20  ;;  %v9309_v11 = vsel %vm7096_vm2, 4294967295, %v9308_v11  ;;  %1599 = vrot.lane.b32.xlu0 %v1509_v1, %s6416_s12  ;;  %1601 = vrot.lane.b32.xlu1 %v1510_v52, %s6416_s12  ;;  %v1125_v49 = vsel %vm7096_vm2, %v7100_v36, 0.0  ;;  %v1449_v1 = vld [vmem:[#allocation2 + $0xf9] sm:$0xff]  ;;  %v510_v9 = vand.u32 15, %v294_v54  ;;  %v7130_v54 = vpack.c.bf16 %v1094_v42, %v1094_v42 }
 0x10b   : > { %1189 = vst.msk [vmem:[#allocation3 + $0x6c] sm:$0xf] %vm9306_vm5, %v7069_v55  ;;  %v1513_v20 = vpack.c.bf16 %v1449_v1, %v1449_v1  ;;  %v1096_v42 = vld [vmem:[#allocation2 + $0xff] sm:$0xff] }
 0x10c   : > { %1187 = vst.msk [vmem:[#allocation3 + $0x64] sm:$0xf] %vm9307_vm14, %v7072_v60  ;;  %v1323_v16 = vpop.permute.xlu0 %1322  ;;  %v1325_v52 = vpop.permute.xlu1 %1324  ;;  %1603 = vrot.lane.b32.xlu2 %v7090_v23, %s6416_s12  ;;  %vm9315_vm14 = vcmask 60448   ;;  %vm7126_vm5 = vcmp.ne.s32.totalorder %v510_v9, 0  ;;  %v1710_v9 = vsel %vm6767_vm7, %v6783_v43, 0.0 }
 0x10d   : > { %9310 = vst [vmem:[#allocation25_spill] sm:$0xff] %v9309_v11  ;;  %v9318_v3 = vsel %vm7126_vm5, 4294967295, %v9317_v3 }
 0x10e   : > { %1188 = vst.msk [vmem:[#allocation3 + $0x68] sm:$0xf] %vm9311_vm9, %v1155_v24  ;;  %v1157_v24 = vpack.c.bf16 %v1125_v49, %v1125_v49  ;;  %vm9316_vm9 = vmmov %vm9315_vm14  ;;  %v1345_v31 = vpop.permute.xlu2 %1344  ;;  %v1127_v49 = vsel %vm7126_vm5, %v7119_v17, 0.0 }
 0x10f   : > { %9314 = vst [vmem:[#allocation26_spill] sm:$0xff] %v9313_v62  ;;  %vm9320_vm8 = vmmov %vm9316_vm9  ;;  %v1159_v62 = vpack.c.bf16 %v1127_v49, %v1127_v49 }
 0x110   : > { %1403 = vst.msk [vmem:[#allocation3 + $0x40] sm:$0xf] %vm9315_vm14, %v1323_v16  ;;  %v1514_v16 = vpack.c.bf16 %v1482_v46, %v1482_v46  ;;  %vm9321_vm14 = vcmask 27648  }
 0x111   : > { %1404 = vst.msk [vmem:[#allocation3 + $0x44] sm:$0xf] %vm9316_vm9, %v1325_v52  ;;  %vm9322_vm9 = vmmov %vm9321_vm14  ;;  %v7146_v52 = vpack.c.bf16 %v1096_v42, %v1096_v42  ;;  %v1716_v42 = vsel %vm6844_vm13, %v6861_v41, 0.0 }
 0x112   : > { %9319 = vst [vmem:[#allocation27_spill] sm:$0xff] %v9318_v3  ;;  %1605 = vrot.lane.b32.xlu0 %v1512_v14, %s6416_s12  ;;  %1607 = vrot.lane.b32.xlu1 %v1513_v20, %s6416_s12  ;;  %vm9323_vm12 = vmmov %vm9322_vm9 }
 0x113   : > { %1414 = vst.msk [vmem:[#allocation3 + $0x6c] sm:$0xf] %vm9320_vm8, %v1345_v31  ;;  %v1708_v31 = vsel %vm6736_vm3, %v6763_v28, 0.0  ;;  %v1712_v28 = vsel %vm6793_vm10, %v6803_v57, 0.0 }
 0x114   : > { %1190 = vst.msk [vmem:[#allocation3 + $0x70] sm:$0xf] %vm9321_vm14, %v1157_v24  ;;  %v1329_v13 = vpop.permute.xlu0 %1328  ;;  %v1331_v1 = vpop.permute.xlu1 %1330  ;;  %1609 = vrot.lane.b32.xlu2 %v1514_v16, %s6416_s12  ;;  %vm9324_vm14 = vmmov %vm9320_vm8  ;;  %v1740_v20 = vpack.c.bf16 %v1708_v31, %v1708_v31  ;;  %v1742_v24 = vpack.c.bf16 %v1710_v9, %v1710_v9  ;;  %v1744_v14 = vpack.c.bf16 %v1712_v28, %v1712_v28 }
 0x115   : > { %1191 = vst.msk [vmem:[#allocation3 + $0x74] sm:$0xf] %vm9322_vm9, %v7130_v54 }
 0x116   : > { %1192 = vst.msk [vmem:[#allocation3 + $0x78] sm:$0xf] %vm9323_vm12, %v1159_v62  ;;  %v1351_v62 = vpop.permute.xlu2 %1350  ;;  %vm9325_vm12 = vmmov %vm9320_vm8 }
 0x117   : > { %1406 = vst.msk [vmem:[#allocation3 + $0x4c] sm:$0xf] %vm9320_vm8, %v1329_v13  ;;  %vm9138_vm8 = vcmask 93248   ;;  %v1748_v13 = vpack.c.bf16 %v1716_v42, %v1716_v42 }
 0x118   : > { %1407 = vst.msk [vmem:[#allocation3 + $0x50] sm:$0xf] %vm9324_vm14, %v1331_v1  ;;  %vm9326_vm14 = vmmov %vm9325_vm12 }
 0x119   : > { %1417 = vst.msk [vmem:[#allocation3 + $0x78] sm:$0xf] %vm9325_vm12, %v1351_v62  ;;  %v1722_v62 = vsel %vm6922_vm1, %v6939_v44, 0.0 }
 0x11a   : > { %1193 = vst.msk [vmem:[#allocation3 + $0x7c] sm:$0xf] %vm9322_vm9, %v7146_v52  ;;  %1804 = vrot.lane.b32.xlu0 %v1740_v20, %s6417_s13  ;;  %1806 = vrot.lane.b32.xlu1 %v6760_v26, %s6417_s13  ;;  %v1714_v26 = vsel %vm6809_vm11, %v6840_v10, 0.0  ;;  %vm9327_vm9 = vmmov %vm9325_vm12  ;;  %v1754_v28 = vpack.c.bf16 %v1722_v62, %v1722_v62 }
 0x11c   : > { %v1335_v43 = vpop.permute.xlu0 %1334  ;;  %v1337_v46 = vpop.permute.xlu1 %1336  ;;  %1808 = vrot.lane.b32.xlu2 %v1742_v24, %s6417_s13 }
 0x11d   : > { %1409 = vst.msk [vmem:[#allocation3 + $0x58] sm:$0xf] %vm9326_vm14, %v1335_v43  ;;  %vm9328_vm14 = vmmov %vm9327_vm9 }
 0x11e   : > { %1410 = vst.msk [vmem:[#allocation3 + $0x5c] sm:$0xf] %vm9325_vm12, %v1337_v46  ;;  %v1550_v49 = vpop.permute.xlu2 %1549  ;;  %vm9329_vm12 = vmmov %vm9327_vm9 }
 0x11f   : > { %1645 = vst.msk [vmem:[#allocation3 + $0x4] sm:$0xf] %vm9138_vm8, %v1550_v49 }
 0x122   : > { %1810 = vrot.lane.b32.xlu0 %v6813_v0, %s6417_s13  ;;  %1812 = vrot.lane.b32.xlu1 %v1744_v14, %s6417_s13  ;;  %v1746_v0 = vpack.c.bf16 %v1714_v26, %v1714_v26 }
 0x124   : > { %v1341_v57 = vpop.permute.xlu0 %1340  ;;  %v1343_v16 = vpop.permute.xlu1 %1342  ;;  %1814 = vrot.lane.b32.xlu2 %v6838_v7, %s6417_s13  ;;  %v1718_v7 = vsel %vm6871_vm0, %v6881_v59, 0.0 }
 0x125   : > { %1412 = vst.msk [vmem:[#allocation3 + $0x64] sm:$0xf] %vm9327_vm9, %v1341_v57  ;;  %v1750_v41 = vpack.c.bf16 %v1718_v7, %v1718_v7 }
 0x126   : > { %1413 = vst.msk [vmem:[#allocation3 + $0x68] sm:$0xf] %vm9328_vm14, %v1343_v16  ;;  %v1556_v31 = vpop.permute.xlu2 %1555  ;;  %vm9330_vm14 = vmmov %vm9327_vm9 }
 0x127   : > { %1648 = vst.msk [vmem:[#allocation3 + $0x10] sm:$0xf] %vm9138_vm8, %v1556_v31 }
 0x12a   : > { %1816 = vrot.lane.b32.xlu0 %v1746_v0, %s6417_s13  ;;  %1818 = vrot.lane.b32.xlu1 %v6835_v22, %s6417_s13  ;;  %v1720_v22 = vsel %vm6887_vm4, %v6918_v35, 0.0 }
 0x12c   : > { %v1347_v10 = vpop.permute.xlu0 %1346  ;;  %v1349_v1 = vpop.permute.xlu1 %1348  ;;  %1820 = vrot.lane.b32.xlu2 %v1748_v13, %s6417_s13 }
 0x12d   : > { %1415 = vst.msk [vmem:[#allocation3 + $0x70] sm:$0xf] %vm9329_vm12, %v1347_v10  ;;  %vm9331_vm12 = vnez %v9271_v27 }
 0x12e   : > { %1416 = vst.msk [vmem:[#allocation3 + $0x74] sm:$0xf] %vm9327_vm9, %v1349_v1  ;;  %v1562_v9 = vpop.permute.xlu2 %1561  ;;  %v1728_v49 = vsel %vm9331_vm12, %v7021_v58, 0.0  ;;  %vm9332_vm9 = vnez %v9279_v56 }
 0x12f   : > { %1651 = vst.msk [vmem:[#allocation3 + $0x1c] sm:$0xf] %vm9138_vm8, %v1562_v9  ;;  %v1760_v57 = vpack.c.bf16 %v1728_v49, %v1728_v49 }
 0x132   : > { %1822 = vrot.lane.b32.xlu0 %v6891_v6, %s6417_s13  ;;  %1824 = vrot.lane.b32.xlu1 %v1750_v41, %s6417_s13  ;;  %v1752_v6 = vpack.c.bf16 %v1720_v22, %v1720_v22  ;;  %v7262_v41 = vld [vmem:[#allocation2 + $0x107] sm:$0xff] }
 0x134   : > { %v1353_v59 = vpop.permute.xlu0 %1352  ;;  %v1548_v20 = vpop.permute.xlu1 %1547  ;;  %1826 = vrot.lane.b32.xlu2 %v6916_v34, %s6417_s13  ;;  %v1724_v34 = vsel %vm6949_vm6, %v6959_v19, 0.0 }
 0x135   : > { %1418 = vst.msk [vmem:[#allocation3 + $0x7c] sm:$0xf] %vm9330_vm14, %v1353_v59  ;;  %v1756_v44 = vpack.c.bf16 %v1724_v34, %v1724_v34  ;;  %vm9333_vm14 = vnez %v9288_v38  ;;  %v1933_v59 = vld [vmem:[#allocation2 + $0x18] sm:$0xff] }
 0x136   : > { %1644 = vst.msk [vmem:[#allocation3] sm:$0xf] %vm9138_vm8, %v1548_v20  ;;  %v1568_v24 = vpop.permute.xlu2 %1567 }
 0x137   : > { %1654 = vst.msk [vmem:[#allocation3 + $0x28] sm:$0xf] %vm9138_vm8, %v1568_v24  ;;  %v1934_v24 = vld [vmem:[#allocation2 + $0x20] sm:$0xff] }
 0x13a   : > { %1828 = vrot.lane.b32.xlu0 %v1752_v6, %s6417_s13  ;;  %1830 = vrot.lane.b32.xlu1 %v6913_v15, %s6417_s13  ;;  %v1726_v15 = vsel %vm6965_vm15, %v6996_v18, 0.0  ;;  %v1965_v6 = vpack.c.bf16 %v1933_v59, %v1933_v59  ;;  %v1946_v59 = vld [vmem:[#allocation2 + $0x80] sm:$0xff] }
 0x13c   : > { %v1552_v35 = vpop.permute.xlu0 %1551  ;;  %v1554_v43 = vpop.permute.xlu1 %1553  ;;  %1832 = vrot.lane.b32.xlu2 %v1754_v28, %s6417_s13  ;;  %v1935_v28 = vld [vmem:[#allocation2 + $0x28] sm:$0xff] }
 0x13d   : > { %1646 = vst.msk [vmem:[#allocation3 + $0x8] sm:$0xf] %vm9138_vm8, %v1552_v35 }
 0x13e   : > { %1647 = vst.msk [vmem:[#allocation3 + $0xc] sm:$0xf] %vm9138_vm8, %v1554_v43  ;;  %v1574_v46 = vpop.permute.xlu2 %1573  ;;  %v1966_v43 = vpack.c.bf16 %v1934_v24, %v1934_v24  ;;  %v7325_v24 = vpack.c.bf16 %v1946_v59, %v1946_v59 }
 0x13f   : > { %1657 = vst.msk [vmem:[#allocation3 + $0x34] sm:$0xf] %vm9138_vm8, %v1574_v46 }
 0x142   : > { %1834 = vrot.lane.b32.xlu0 %v6969_v32, %s6417_s13  ;;  %1836 = vrot.lane.b32.xlu1 %v1756_v44, %s6417_s13  ;;  %v1758_v32 = vpack.c.bf16 %v1726_v15, %v1726_v15  ;;  %v1967_v44 = vpack.c.bf16 %v1935_v28, %v1935_v28 }
 0x144   : > { %v1558_v19 = vpop.permute.xlu0 %1557  ;;  %v1560_v14 = vpop.permute.xlu1 %1559  ;;  %1838 = vrot.lane.b32.xlu2 %v6994_v51, %s6417_s13  ;;  %v1730_v51 = vsel %vm9332_vm9, %v7037_v25, 0.0  ;;  %vm9334_vm9 = vnez %v9300_v8 }
 0x145   : > { %1649 = vst.msk [vmem:[#allocation3 + $0x14] sm:$0xf] %vm9138_vm8, %v1558_v19  ;;  %v1762_v58 = vpack.c.bf16 %v1730_v51, %v1730_v51  ;;  %v1734_v31 = vsel %vm9334_vm9, %v7100_v36, 0.0  ;;  %v1937_v19 = vld [vmem:[#allocation2 + $0x38] sm:$0xff] }
 0x146   : > { %1650 = vst.msk [vmem:[#allocation3 + $0x18] sm:$0xf] %vm9138_vm8, %v1560_v14  ;;  %v1580_v26 = vpop.permute.xlu2 %1579  ;;  %v1766_v7 = vpack.c.bf16 %v1734_v31, %v1734_v31  ;;  %v1938_v14 = vld [vmem:[#allocation2 + $0x40] sm:$0xff] }
 0x147   : > { %1660 = vst.msk [vmem:[#allocation3 + $0x40] sm:$0xf] %vm9138_vm8, %v1580_v26  ;;  %v1939_v26 = vld [vmem:[#allocation2 + $0x48] sm:$0xff]  ;;  %v1970_v51 = vpack.c.bf16 %v1938_v14, %v1938_v14 }
 0x14a   : > { %1840 = vrot.lane.b32.xlu0 %v1758_v32, %s6417_s13  ;;  %1842 = vrot.lane.b32.xlu1 %v6991_v12, %s6417_s13  ;;  %v1732_v12 = vsel %vm9333_vm14, %v7074_v61, 0.0  ;;  %v1736_v61 = vsel %vm7096_vm2, %v7119_v17, 0.0  ;;  %v1707_v17 = vld [vmem:[#allocation2 + $0x10f] sm:$0xff]  ;;  %vm9336_vm2 = vnez %v9206_v50  ;;  %vm9341_vm14 = vcmask 158848  }
 0x14b   : > { %v1768_v36 = vpack.c.bf16 %v1736_v61, %v1736_v61  ;;  %v1771_v62 = vpack.c.bf16 %v1707_v17, %v1707_v17  ;;  %v1943_v61 = vld [vmem:[#allocation2 + $0x68] sm:$0xff] }
 0x14c   : > { %v1564_v18 = vpop.permute.xlu0 %1563  ;;  %v1566_v16 = vpop.permute.xlu1 %1565  ;;  %1844 = vrot.lane.b32.xlu2 %v1760_v57, %s6417_s13  ;;  %v7289_v57 = vpack.c.bf16 %v1937_v19, %v1937_v19  ;;  %v1951_v19 = vld [vmem:[#allocation2 + $0xa8] sm:$0xff] }
 0x14d   : > { %1652 = vst.msk [vmem:[#allocation3 + $0x20] sm:$0xf] %vm9138_vm8, %v1564_v18 }
 0x14e   : > { %1653 = vst.msk [vmem:[#allocation3 + $0x24] sm:$0xf] %vm9138_vm8, %v1566_v16  ;;  %v1586_v42 = vpop.permute.xlu2 %1585  ;;  %v7292_v16 = vpack.c.bf16 %v1939_v26, %v1939_v26  ;;  %v7340_v26 = vpack.c.bf16 %v1951_v19, %v1951_v19  ;;  %v1961_v19 = vld [vmem:[#allocation2 + $0xf8] sm:$0xff] }
 0x14f   : > { %1663 = vst.msk [vmem:[#allocation3 + $0x4c] sm:$0xf] %vm9138_vm8, %v1586_v42  ;;  %v1941_v42 = vld [vmem:[#allocation2 + $0x58] sm:$0xff] }
 0x152   : > { %1846 = vrot.lane.b32.xlu0 %v7047_v53, %s6417_s13  ;;  %1848 = vrot.lane.b32.xlu1 %v1762_v58, %s6417_s13  ;;  %v1764_v53 = vpack.c.bf16 %v1732_v12, %v1732_v12  ;;  %v1940_v58 = vld [vmem:[#allocation2 + $0x50] sm:$0xff] }
 0x153   : > { %v7301_v31 = vpack.c.bf16 %v1940_v58, %v1940_v58 }
 0x154   : > { %v1570_v25 = vpop.permute.xlu0 %1569  ;;  %v1572_v0 = vpop.permute.xlu1 %1571  ;;  %1850 = vrot.lane.b32.xlu2 %v7072_v60, %s6417_s13 }
 0x155   : > { %1655 = vst.msk [vmem:[#allocation3 + $0x2c] sm:$0xf] %vm9138_vm8, %v1570_v25 }
 0x156   : > { %1656 = vst.msk [vmem:[#allocation3 + $0x30] sm:$0xf] %vm9138_vm8, %v1572_v0  ;;  %v1592_v13 = vpop.permute.xlu2 %1591  ;;  %v1942_v0 = vld [vmem:[#allocation2 + $0x60] sm:$0xff] }
 0x157   : > { %1666 = vst.msk [vmem:[#allocation3 + $0x58] sm:$0xf] %vm9138_vm8, %v1592_v13 }
 0x15a   : > { %1852 = vrot.lane.b32.xlu0 %v1764_v53, %s6417_s13  ;;  %1854 = vrot.lane.b32.xlu1 %v7069_v55, %s6417_s13  ;;  %v1738_v55 = vsel %vm7126_vm5, %v7262_v41, 0.0  ;;  %vm9141_vm5 = vcmask 126048   ;;  %v1973_v53 = vpack.c.bf16 %v1941_v42, %v1941_v42 }
 0x15b   : > { %v1770_v20 = vpack.c.bf16 %v1738_v55, %v1738_v55  ;;  %v7313_v55 = vpack.c.bf16 %v1943_v61, %v1943_v61  ;;  %v1955_v61 = vld [vmem:[#allocation2 + $0xc8] sm:$0xff] }
 0x15c   : > { %v1576_v60 = vpop.permute.xlu0 %1575  ;;  %v1578_v10 = vpop.permute.xlu1 %1577  ;;  %1856 = vrot.lane.b32.xlu2 %v1766_v7, %s6417_s13  ;;  %v7304_v7 = vpack.c.bf16 %v1942_v0, %v1942_v0 }
 0x15d   : > { %1658 = vst.msk [vmem:[#allocation3 + $0x38] sm:$0xf] %vm9138_vm8, %v1576_v60  ;;  %v1944_v60 = vld [vmem:[#allocation2 + $0x70] sm:$0xff] }
 0x15e   : > { %1659 = vst.msk [vmem:[#allocation3 + $0x3c] sm:$0xf] %vm9138_vm8, %v1578_v10  ;;  %v1598_v1 = vpop.permute.xlu2 %1597  ;;  %v1976_v17 = vpack.c.bf16 %v1944_v60, %v1944_v60  ;;  %v1956_v60 = vld [vmem:[#allocation2 + $0xd0] sm:$0xff] }
 0x15f   : > { %1669 = vst.msk [vmem:[#allocation3 + $0x64] sm:$0xf] %vm9138_vm8, %v1598_v1  ;;  %v1945_v1 = vld [vmem:[#allocation2 + $0x78] sm:$0xff] }
 0x162   : > { %1858 = vrot.lane.b32.xlu0 %v7130_v54, %s6417_s13  ;;  %1860 = vrot.lane.b32.xlu1 %v1768_v36, %s6417_s13 }
 0x164   : > { %v1582_v9 = vpop.permute.xlu0 %1581  ;;  %v1584_v22 = vpop.permute.xlu1 %1583  ;;  %1862 = vrot.lane.b32.xlu2 %v7146_v52, %s6417_s13  ;;  %v1936_v52 = vld [vmem:[#allocation2 + $0x30] sm:$0xff] }
 0x165   : > { %1661 = vst.msk [vmem:[#allocation3 + $0x44] sm:$0xf] %vm9138_vm8, %v1582_v9  ;;  %v7281_v15 = vpack.c.bf16 %v1936_v52, %v1936_v52  ;;  %v1949_v52 = vld [vmem:[#allocation2 + $0x98] sm:$0xff] }
 0x166   : > { %1662 = vst.msk [vmem:[#allocation3 + $0x48] sm:$0xf] %vm9138_vm8, %v1584_v22  ;;  %v1604_v54 = vpop.permute.xlu2 %1603  ;;  %v7316_v22 = vpack.c.bf16 %v1945_v1, %v1945_v1  ;;  %v7337_v14 = vpack.c.bf16 %v1949_v52, %v1949_v52  ;;  %v1957_v1 = vld [vmem:[#allocation2 + $0xd8] sm:$0xff] }
 0x167   : > { %1672 = vst.msk [vmem:[#allocation3 + $0x70] sm:$0xf] %vm9138_vm8, %v1604_v54 }
 0x16a   : > { %1864 = vrot.lane.b32.xlu0 %v1770_v20, %s6417_s13  ;;  %1866 = vrot.lane.b32.xlu1 %v1771_v62, %s6417_s13  ;;  %v1947_v20 = vld [vmem:[#allocation2 + $0x88] sm:$0xff] }
 0x16b   : > { %v1979_v28 = vpack.c.bf16 %v1947_v20, %v1947_v20  ;;  %v7364_v20 = vpack.c.bf16 %v1957_v1, %v1957_v1 }
 0x16c   : > { %v1588_v34 = vpop.permute.xlu0 %1587  ;;  %v1590_v35 = vpop.permute.xlu1 %1589  ;;  %2029 = vrot.lane.b32.xlu2 %v1965_v6, %s6418_s14  ;;  %v1948_v6 = vld [vmem:[#allocation2 + $0x90] sm:$0xff] }
 0x16d   : > { %1664 = vst.msk [vmem:[#allocation3 + $0x50] sm:$0xf] %vm9138_vm8, %v1588_v34 }
 0x16e   : > { %1665 = vst.msk [vmem:[#allocation3 + $0x54] sm:$0xf] %vm9138_vm8, %v1590_v35  ;;  %v1610_v46 = vpop.permute.xlu2 %1609  ;;  %v7328_v35 = vpack.c.bf16 %v1948_v6, %v1948_v6 }
 0x16f   : > { %1675 = vst.msk [vmem:[#allocation3 + $0x7c] sm:$0xf] %vm9138_vm8, %v1610_v46 }
 0x172   : > { %2031 = vrot.lane.b32.xlu0 %v1966_v43, %s6418_s14  ;;  %2033 = vrot.lane.b32.xlu1 %v1967_v44, %s6418_s14  ;;  %v1950_v43 = vld [vmem:[#allocation2 + $0xa0] sm:$0xff] }
 0x174   : > { %v1594_v49 = vpop.permute.xlu0 %1593  ;;  %v1596_v32 = vpop.permute.xlu1 %1595  ;;  %2035 = vrot.lane.b32.xlu2 %v7281_v15, %s6418_s14 }
 0x175   : > { %1667 = vst.msk [vmem:[#allocation3 + $0x5c] sm:$0xf] %vm9138_vm8, %v1594_v49  ;;  %v1982_v49 = vpack.c.bf16 %v1950_v43, %v1950_v43 }
 0x176   : > { %1668 = vst.msk [vmem:[#allocation3 + $0x60] sm:$0xf] %vm9138_vm8, %v1596_v32  ;;  %v1809_v18 = vpop.permute.xlu2 %1808 }
 0x177   : > { %1903 = vst.msk [vmem:[#allocation3 + $0x8] sm:$0xf] %vm9141_vm5, %v1809_v18  ;;  %v1953_v18 = vld [vmem:[#allocation2 + $0xb8] sm:$0xff] }
 0x178   : > { %v1985_v0 = vpack.c.bf16 %v1953_v18, %v1953_v18  ;;  %v1963_v18 = vld [vmem:[#allocation2 + $0x108] sm:$0xff] }
 0x17a   : > { %2037 = vrot.lane.b32.xlu0 %v7289_v57, %s6418_s14  ;;  %2039 = vrot.lane.b32.xlu1 %v1970_v51, %s6418_s14  ;;  %v1952_v51 = vld [vmem:[#allocation2 + $0xb0] sm:$0xff] }
 0x17c   : > { %v1600_v12 = vpop.permute.xlu0 %1599  ;;  %v1602_v25 = vpop.permute.xlu1 %1601  ;;  %2041 = vrot.lane.b32.xlu2 %v7292_v16, %s6418_s14 }
 0x17d   : > { %1670 = vst.msk [vmem:[#allocation3 + $0x68] sm:$0xf] %vm9138_vm8, %v1600_v12  ;;  %v1954_v12 = vld [vmem:[#allocation2 + $0xc0] sm:$0xff] }
 0x17e   : > { %1671 = vst.msk [vmem:[#allocation3 + $0x6c] sm:$0xf] %vm9138_vm8, %v1602_v25  ;;  %v1815_v13 = vpop.permute.xlu2 %1814  ;;  %v7349_v25 = vpack.c.bf16 %v1952_v51, %v1952_v51 }
 0x17f   : > { %1906 = vst.msk [vmem:[#allocation3 + $0x14] sm:$0xf] %vm9141_vm5, %v1815_v13  ;;  %v7352_v13 = vpack.c.bf16 %v1954_v12, %v1954_v12 }
 0x182   : > { %2043 = vrot.lane.b32.xlu0 %v7301_v31, %s6418_s14  ;;  %2045 = vrot.lane.b32.xlu1 %v1973_v53, %s6418_s14 }
 0x184   : > { %v1606_v10 = vpop.permute.xlu0 %1605  ;;  %v1608_v36 = vpop.permute.xlu1 %1607  ;;  %2047 = vrot.lane.b32.xlu2 %v7304_v7, %s6418_s14 }
 0x185   : > { %1673 = vst.msk [vmem:[#allocation3 + $0x74] sm:$0xf] %vm9138_vm8, %v1606_v10 }
 0x186   : > { %1674 = vst.msk [vmem:[#allocation3 + $0x78] sm:$0xf] %vm9138_vm8, %v1608_v36  ;;  %v1821_v9 = vpop.permute.xlu2 %1820  ;;  %vm9335_vm8 = vnez %v9202_v39 }
 0x187   : > { %1909 = vst.msk [vmem:[#allocation3 + $0x20] sm:$0xf] %vm9141_vm5, %v1821_v9  ;;  %v1988_v9 = vpack.c.bf16 %v1956_v60, %v1956_v60  ;;  %v2158_v60 = vld [vmem:[#allocation2 + $0x19] sm:$0xff] }
 0x18a   : > { %2049 = vrot.lane.b32.xlu0 %v7313_v55, %s6418_s14  ;;  %2051 = vrot.lane.b32.xlu1 %v1976_v17, %s6418_s14  ;;  %v7361_v17 = vpack.c.bf16 %v1955_v61, %v1955_v61  ;;  %v1964_v61 = vld [vmem:[#allocation2 + $0x110] sm:$0xff] }
 0x18c   : > { %v1805_v62 = vpop.permute.xlu0 %1804  ;;  %v1807_v54 = vpop.permute.xlu1 %1806  ;;  %2053 = vrot.lane.b32.xlu2 %v7316_v22, %s6418_s14 }
 0x18d   : > { %1901 = vst.msk [vmem:[#allocation3] sm:$0xf] %vm9141_vm5, %v1805_v62  ;;  %v1958_v62 = vld [vmem:[#allocation2 + $0xe0] sm:$0xff] }
 0x18e   : > { %1902 = vst.msk [vmem:[#allocation3 + $0x4] sm:$0xf] %vm9141_vm5, %v1807_v54  ;;  %v1827_v34 = vpop.permute.xlu2 %1826  ;;  %v1959_v54 = vld [vmem:[#allocation2 + $0xe8] sm:$0xff]  ;;  %v7373_v52 = vpack.c.bf16 %v1958_v62, %v1958_v62 }
 0x18f   : > { %1912 = vst.msk [vmem:[#allocation3 + $0x2c] sm:$0xf] %vm9141_vm5, %v1827_v34  ;;  %v1960_v34 = vld [vmem:[#allocation2 + $0xf0] sm:$0xff]  ;;  %v1991_v43 = vpack.c.bf16 %v1959_v54, %v1959_v54 }
 0x190   : > { %v2161_v54 = vld [vmem:[#allocation2 + $0x31] sm:$0xff] }
 0x192   : > { %2055 = vrot.lane.b32.xlu0 %v7325_v24, %s6418_s14  ;;  %2057 = vrot.lane.b32.xlu1 %v1979_v28, %s6418_s14 }
 0x194   : > { %v1811_v44 = vpop.permute.xlu0 %1810  ;;  %v1813_v46 = vpop.permute.xlu1 %1812  ;;  %2059 = vrot.lane.b32.xlu2 %v7328_v35, %s6418_s14 }
 0x195   : > { %1904 = vst.msk [vmem:[#allocation3 + $0xc] sm:$0xf] %vm9141_vm5, %v1811_v44 }
 0x196   : > { %1905 = vst.msk [vmem:[#allocation3 + $0x10] sm:$0xf] %vm9141_vm5, %v1813_v46  ;;  %v1833_v32 = vpop.permute.xlu2 %1832  ;;  %v7376_v46 = vpack.c.bf16 %v1960_v34, %v1960_v34  ;;  %v2193_v34 = vsel %vm9336_vm2, %v2161_v54, 0.0  ;;  %vm9339_vm2 = vnez %v9212_v45  ;;  %v2167_v54 = vld [vmem:[#allocation2 + $0x61] sm:$0xff] }
 0x197   : > { %1915 = vst.msk [vmem:[#allocation3 + $0x38] sm:$0xf] %vm9141_vm5, %v1833_v32 }
 0x19a   : > { %2061 = vrot.lane.b32.xlu0 %v7337_v14, %s6418_s14  ;;  %2063 = vrot.lane.b32.xlu1 %v1982_v49, %s6418_s14  ;;  %v1962_v49 = vld [vmem:[#allocation2 + $0x100] sm:$0xff] }
 0x19c   : > { %v1817_v58 = vpop.permute.xlu0 %1816  ;;  %v1819_v42 = vpop.permute.xlu1 %1818  ;;  %2065 = vrot.lane.b32.xlu2 %v7340_v26, %s6418_s14 }
 0x19d   : > { %1907 = vst.msk [vmem:[#allocation3 + $0x18] sm:$0xf] %vm9141_vm5, %v1817_v58  ;;  %v7385_v58 = vpack.c.bf16 %v1961_v19, %v1961_v19  ;;  %v2162_v19 = vld [vmem:[#allocation2 + $0x39] sm:$0xff] }
 0x19e   : > { %1908 = vst.msk [vmem:[#allocation3 + $0x1c] sm:$0xf] %vm9141_vm5, %v1819_v42  ;;  %v1839_v53 = vpop.permute.xlu2 %1838  ;;  %v1994_v42 = vpack.c.bf16 %v1962_v49, %v1962_v49 }
 0x19f   : > { %1918 = vst.msk [vmem:[#allocation3 + $0x44] sm:$0xf] %vm9141_vm5, %v1839_v53  ;;  %v2159_v53 = vld [vmem:[#allocation2 + $0x21] sm:$0xff] }
 0x1a0   : > { %v2191_v1 = vsel %vm9335_vm8, %v2159_v53, 0.0  ;;  %vm9142_vm8 = vcmask 158848  }
 0x1a2   : > { %2067 = vrot.lane.b32.xlu0 %v7349_v25, %s6418_s14  ;;  %2069 = vrot.lane.b32.xlu1 %v1985_v0, %s6418_s14  ;;  %v7388_v0 = vpack.c.bf16 %v1963_v18, %v1963_v18  ;;  %v7413_v18 = vld [vmem:[#allocation2 + $0x41] sm:$0xff] }
 0x1a4   : > { %v1823_v10 = vpop.permute.xlu0 %1822  ;;  %v1825_v36 = vpop.permute.xlu1 %1824  ;;  %2071 = vrot.lane.b32.xlu2 %v7352_v13, %s6418_s14 }
 0x1a5   : > { %1910 = vst.msk [vmem:[#allocation3 + $0x24] sm:$0xf] %vm9141_vm5, %v1823_v10 }
 0x1a6   : > { %1911 = vst.msk [vmem:[#allocation3 + $0x28] sm:$0xf] %vm9141_vm5, %v1825_v36  ;;  %v1845_v59 = vpop.permute.xlu2 %1844 }
 0x1a7   : > { %1921 = vst.msk [vmem:[#allocation3 + $0x50] sm:$0xf] %vm9141_vm5, %v1845_v59  ;;  %v2222_v59 = vpack.c.bf16 %v2158_v60, %v2158_v60 }
 0x1aa   : > { %2073 = vrot.lane.b32.xlu0 %v7361_v17, %s6418_s14  ;;  %2075 = vrot.lane.b32.xlu1 %v1988_v9, %s6418_s14  ;;  %v7399_v9 = vpack.c.bf16 %v1964_v61, %v1964_v61  ;;  %v2164_v61 = vld [vmem:[#allocation2 + $0x49] sm:$0xff] }
 0x1ac   : > { %v1829_v6 = vpop.permute.xlu0 %1828  ;;  %v1831_v28 = vpop.permute.xlu1 %1830  ;;  %2077 = vrot.lane.b32.xlu2 %v7364_v20, %s6418_s14 }
 0x1ad   : > { %1913 = vst.msk [vmem:[#allocation3 + $0x30] sm:$0xf] %vm9141_vm5, %v1829_v6  ;;  %v2223_v6 = vpack.c.bf16 %v2191_v1, %v2191_v1 }
 0x1ae   : > { %1914 = vst.msk [vmem:[#allocation3 + $0x34] sm:$0xf] %vm9141_vm5, %v1831_v28  ;;  %v1851_v44 = vpop.permute.xlu2 %1850  ;;  %v2160_v28 = vld [vmem:[#allocation2 + $0x29] sm:$0xff] }
 0x1af   : > { %1924 = vst.msk [vmem:[#allocation3 + $0x5c] sm:$0xf] %vm9141_vm5, %v1851_v44  ;;  %v7410_v49 = vpack.c.bf16 %v2160_v28, %v2160_v28  ;;  %v2166_v28 = vld [vmem:[#allocation2 + $0x59] sm:$0xff] }
 0x1b2   : > { %2079 = vrot.lane.b32.xlu0 %v7373_v52, %s6418_s14  ;;  %2081 = vrot.lane.b32.xlu1 %v1991_v43, %s6418_s14 }
 0x1b4   : > { %v1835_v32 = vpop.permute.xlu0 %1834  ;;  %v1837_v51 = vpop.permute.xlu1 %1836  ;;  %2083 = vrot.lane.b32.xlu2 %v7376_v46, %s6418_s14 }
 0x1b5   : > { %1916 = vst.msk [vmem:[#allocation3 + $0x3c] sm:$0xf] %vm9141_vm5, %v1835_v32  ;;  %v2225_v32 = vpack.c.bf16 %v2193_v34, %v2193_v34  ;;  %v9342_v34 = vld [vmem:[#allocation8_spill] sm:$0xff] }
 0x1b6   : > { %1917 = vst.msk [vmem:[#allocation3 + $0x40] sm:$0xf] %vm9141_vm5, %v1837_v51  ;;  %v1857_v12 = vpop.permute.xlu2 %1856 }
 0x1b7   : > { %1927 = vst.msk [vmem:[#allocation3 + $0x68] sm:$0xf] %vm9141_vm5, %v1857_v12  ;;  %v7420_v12 = vld [vmem:[#allocation2 + $0x51] sm:$0xff] }
 0x1ba   : > { %2085 = vrot.lane.b32.xlu0 %v7385_v58, %s6418_s14  ;;  %2087 = vrot.lane.b32.xlu1 %v1994_v42, %s6418_s14  ;;  %v7415_v42 = vpack.c.bf16 %v2162_v19, %v2162_v19 }
 0x1bc   : > { %v1841_v10 = vpop.permute.xlu0 %1840  ;;  %v1843_v36 = vpop.permute.xlu1 %1842  ;;  %2089 = vrot.lane.b32.xlu2 %v7388_v0, %s6418_s14 }
 0x1bd   : > { %1919 = vst.msk [vmem:[#allocation3 + $0x48] sm:$0xf] %vm9141_vm5, %v1841_v10 }
 0x1be   : > { %1920 = vst.msk [vmem:[#allocation3 + $0x4c] sm:$0xf] %vm9141_vm5, %v1843_v36  ;;  %v1863_v62 = vpop.permute.xlu2 %1862  ;;  %v2197_v36 = vsel %vm9339_vm2, %v7420_v12, 0.0 }
 0x1bf   : > { %1930 = vst.msk [vmem:[#allocation3 + $0x74] sm:$0xf] %vm9141_vm5, %v1863_v62 }
 0x1c2   : > { %2091 = vrot.lane.b32.xlu0 %v7399_v9, %s6418_s14  ;;  %2286 = vrot.lane.b32.xlu1 %v2222_v59, %s6419_s15  ;;  %v2228_v59 = vpack.c.bf16 %v2164_v61, %v2164_v61 }
 0x1c4   : > { %v1847_v43 = vpop.permute.xlu0 %1846  ;;  %v1849_v44 = vpop.permute.xlu1 %1848  ;;  %2288 = vrot.lane.b32.xlu2 %v2223_v6, %s6419_s15  ;;  %v2229_v6 = vpack.c.bf16 %v2197_v36, %v2197_v36  ;;  %v7450_v36 = vld [vmem:[#allocation2 + $0x81] sm:$0xff] }
 0x1c5   : > { %1922 = vst.msk [vmem:[#allocation3 + $0x54] sm:$0xf] %vm9141_vm5, %v1847_v43 }
 0x1c6   : > { %1923 = vst.msk [vmem:[#allocation3 + $0x58] sm:$0xf] %vm9141_vm5, %v1849_v44  ;;  %v2030_v51 = vpop.permute.xlu2 %2029  ;;  %vm9337_vm5 = vnez %v9210_v21 }
 0x1c7   : > { %2126 = vst.msk [vmem:[#allocation3] sm:$0xf] %vm9142_vm8, %v2030_v51  ;;  %v2195_v53 = vsel %vm9337_vm5, %v7413_v18, 0.0  ;;  %vm9338_vm8 = vcmask 126048   ;;  %v7440_v51 = vpack.c.bf16 %v2166_v28, %v2166_v28  ;;  %v9349_v28 = vld [vmem:[#allocation10_spill] sm:$0xff]  ;;  %vm9352_vm5 = vcmask 158848  }
 0x1c8   : > { %vm9340_vm9 = vmmov %vm9338_vm8  ;;  %v2227_v1 = vpack.c.bf16 %v2195_v53, %v2195_v53  ;;  %9346 = vst [vmem:[#allocation29_spill] sm:$0xff] %v7450_v36 }
 0x1c9   : > { %vm9344_vm2 = vmmov %vm9340_vm9 }
 0x1ca   : > { %2290 = vrot.lane.b32.xlu0 %v7410_v49, %s6419_s15  ;;  %2292 = vrot.lane.b32.xlu1 %v2225_v32, %s6419_s15  ;;  %v2168_v32 = vld [vmem:[#allocation2 + $0x69] sm:$0xff] }
 0x1cc   : > { %v1853_v60 = vpop.permute.xlu0 %1852  ;;  %v1855_v10 = vpop.permute.xlu1 %1854  ;;  %2294 = vrot.lane.b32.xlu2 %v7415_v42, %s6419_s15 }
 0x1cd   : > { %1925 = vst.msk [vmem:[#allocation3 + $0x60] sm:$0xf] %vm9338_vm8, %v1853_v60  ;;  %vm9343_vm8 = vnez %v9342_v34  ;;  %v7443_v60 = vld [vmem:[#allocation2 + $0x71] sm:$0xff] }
 0x1ce   : > { %1926 = vst.msk [vmem:[#allocation3 + $0x64] sm:$0xf] %vm9340_vm9, %v1855_v10  ;;  %v2036_v62 = vpop.permute.xlu2 %2035  ;;  %v2199_v43 = vsel %vm9343_vm8, %v2167_v54, 0.0  ;;  %v7445_v10 = vpack.c.bf16 %v2168_v32, %v2168_v32  ;;  %vm9351_vm8 = vmmov %vm9340_vm9 }
 0x1cf   : > { %2129 = vst.msk [vmem:[#allocation3 + $0xc] sm:$0xf] %vm9341_vm14, %v2036_v62  ;;  %v2231_v53 = vpack.c.bf16 %v2199_v43, %v2199_v43  ;;  %v2170_v62 = vld [vmem:[#allocation2 + $0x79] sm:$0xff] }
 0x1d0   : > { %9345 = vst [vmem:[#allocation28_spill] sm:$0xff] %v7445_v10 }
 0x1d2   : > { %2296 = vrot.lane.b32.xlu0 %v2227_v1, %s6419_s15  ;;  %2298 = vrot.lane.b32.xlu1 %v2228_v59, %s6419_s15  ;;  %v9347_v1 = vld [vmem:[#allocation9_spill] sm:$0xff] }
 0x1d4   : > { %v1859_v44 = vpop.permute.xlu0 %1858  ;;  %v1861_v19 = vpop.permute.xlu1 %1860  ;;  %2300 = vrot.lane.b32.xlu2 %v2229_v6, %s6419_s15 }
 0x1d5   : > { %1928 = vst.msk [vmem:[#allocation3 + $0x6c] sm:$0xf] %vm9340_vm9, %v1859_v44 }
 0x1d6   : > { %1929 = vst.msk [vmem:[#allocation3 + $0x70] sm:$0xf] %vm9344_vm2, %v1861_v19  ;;  %v2042_v61 = vpop.permute.xlu2 %2041  ;;  %vm9348_vm2 = vnez %v9347_v1  ;;  %v2234_v19 = vpack.c.bf16 %v2170_v62, %v2170_v62  ;;  %v2172_v1 = vld [vmem:[#allocation2 + $0x89] sm:$0xff] }
 0x1d7   : > { %2132 = vst.msk [vmem:[#allocation3 + $0x18] sm:$0xf] %vm9341_vm14, %v2042_v61  ;;  %v2201_v59 = vsel %vm9348_vm2, %v7443_v60, 0.0  ;;  %vm9350_vm14 = vnez %v9349_v28  ;;  %v7470_v62 = vpack.c.bf16 %v2172_v1, %v2172_v1 }
 0x1d8   : > { %v2203_v43 = vsel %vm9350_vm14, %v7450_v36, 0.0  ;;  %v2233_v44 = vpack.c.bf16 %v2201_v59, %v2201_v59  ;;  %v2174_v59 = vld [vmem:[#allocation2 + $0x99] sm:$0xff]  ;;  %vm9356_vm14 = vmmov %vm9352_vm5 }
 0x1d9   : > { %v2235_v61 = vpack.c.bf16 %v2203_v43, %v2203_v43  ;;  %9357 = vst [vmem:[#allocation30_spill] sm:$0xff] %v7470_v62 }
 0x1da   : > { %2302 = vrot.lane.b32.xlu0 %v7440_v51, %s6419_s15  ;;  %2304 = vrot.lane.b32.xlu1 %v2231_v53, %s6419_s15  ;;  %v2173_v53 = vld [vmem:[#allocation2 + $0x91] sm:$0xff] }
 0x1dc   : > { %v1865_v54 = vpop.permute.xlu0 %1864  ;;  %v1867_v6 = vpop.permute.xlu1 %1866  ;;  %2306 = vrot.lane.b32.xlu2 %v7445_v10, %s6419_s15  ;;  %v9353_v10 = vld [vmem:[#allocation13_spill] sm:$0xff] }
 0x1dd   : > { %1931 = vst.msk [vmem:[#allocation3 + $0x78] sm:$0xf] %vm9340_vm9, %v1865_v54  ;;  %vm9354_vm9 = vnez %v9353_v10 }
 0x1de   : > { %1932 = vst.msk [vmem:[#allocation3 + $0x7c] sm:$0xf] %vm9351_vm8, %v1867_v6  ;;  %v2048_v32 = vpop.permute.xlu2 %2047  ;;  %v2205_v54 = vsel %vm9354_vm9, %v2173_v53, 0.0  ;;  %vm9355_vm8 = vmmov %vm9352_vm5 }
 0x1df   : > { %2135 = vst.msk [vmem:[#allocation3 + $0x24] sm:$0xf] %vm9352_vm5, %v2048_v32  ;;  %v2237_v6 = vpack.c.bf16 %v2205_v54, %v2205_v54  ;;  %v7480_v32 = vld [vmem:[#allocation2 + $0xb1] sm:$0xff] }
 0x1e0   : > { %9360 = vst [vmem:[#allocation33_spill] sm:$0xff] %v7480_v32  ;;  %v9364_v54 = vld [vmem:[#allocation16_spill] sm:$0xff] }
 0x1e2   : > { %2308 = vrot.lane.b32.xlu0 %v2233_v44, %s6419_s15  ;;  %2310 = vrot.lane.b32.xlu1 %v2234_v19, %s6419_s15  ;;  %v7473_v44 = vld [vmem:[#allocation2 + $0xa1] sm:$0xff]  ;;  %v7475_v19 = vpack.c.bf16 %v2174_v59, %v2174_v59 }
 0x1e3   : > { %9358 = vst [vmem:[#allocation31_spill] sm:$0xff] %v7473_v44 }
 0x1e4   : > { %v2032_v34 = vpop.permute.xlu0 %2031  ;;  %v2034_v28 = vpop.permute.xlu1 %2033  ;;  %2312 = vrot.lane.b32.xlu2 %v2235_v61, %s6419_s15  ;;  %9359 = vst [vmem:[#allocation32_spill] sm:$0xff] %v7475_v19 }
 0x1e5   : > { %2127 = vst.msk [vmem:[#allocation3 + $0x4] sm:$0xf] %vm9355_vm8, %v2032_v34  ;;  %v9361_v34 = vld [vmem:[#allocation15_spill] sm:$0xff]  ;;  %vm9363_vm8 = vmmov %vm9352_vm5 }
 0x1e6   : > { %2128 = vst.msk [vmem:[#allocation3 + $0x8] sm:$0xf] %vm9356_vm14, %v2034_v28  ;;  %v2054_v43 = vpop.permute.xlu2 %2053  ;;  %vm9362_vm14 = vnez %v9361_v34  ;;  %v2176_v28 = vld [vmem:[#allocation2 + $0xa9] sm:$0xff]  ;;  %vm9366_vm9 = vmmov %vm9363_vm8  ;;  %v2179_v34 = vld [vmem:[#allocation2 + $0xc1] sm:$0xff] }
 0x1e7   : > { %2138 = vst.msk [vmem:[#allocation3 + $0x30] sm:$0xf] %vm9352_vm5, %v2054_v43  ;;  %v2207_v1 = vsel %vm9362_vm14, %v7473_v44, 0.0  ;;  %vm9365_vm5 = vnez %v9364_v54  ;;  %v2240_v43 = vpack.c.bf16 %v2176_v28, %v2176_v28  ;;  %vm9367_vm2 = vmmov %vm9363_vm8 }
 0x1e8   : > { %v2209_v59 = vsel %vm9365_vm5, %v7480_v32, 0.0  ;;  %vm9371_vm5 = vmmov %vm9367_vm2 }
 0x1e9   : > { %v2241_v44 = vpack.c.bf16 %v2209_v59, %v2209_v59  ;;  %v2181_v59 = vld [vmem:[#allocation2 + $0xd1] sm:$0xff]  ;;  %vm9378_vm14 = vmmov %vm9367_vm2 }
 0x1ea   : > { %2314 = vrot.lane.b32.xlu0 %v7470_v62, %s6419_s15  ;;  %2316 = vrot.lane.b32.xlu1 %v2237_v6, %s6419_s15  ;;  %v2239_v6 = vpack.c.bf16 %v2207_v1, %v2207_v1  ;;  %v9368_v62 = vld [vmem:[#allocation17_spill] sm:$0xff]  ;;  %v2180_v1 = vld [vmem:[#allocation2 + $0xc9] sm:$0xff] }
 0x1ec   : > { %v2038_v53 = vpop.permute.xlu0 %2037  ;;  %v2040_v61 = vpop.permute.xlu1 %2039  ;;  %2318 = vrot.lane.b32.xlu2 %v7475_v19, %s6419_s15  ;;  %v2178_v19 = vld [vmem:[#allocation2 + $0xb9] sm:$0xff] }
 0x1ed   : > { %2130 = vst.msk [vmem:[#allocation3 + $0x10] sm:$0xf] %vm9363_vm8, %v2038_v53  ;;  %vm9369_vm8 = vnez %v9368_v62 }
 0x1ee   : > { %2131 = vst.msk [vmem:[#allocation3 + $0x14] sm:$0xf] %vm9366_vm9, %v2040_v61  ;;  %v2060_v10 = vpop.permute.xlu2 %2059  ;;  %v2211_v53 = vsel %vm9369_vm8, %v2179_v34, 0.0  ;;  %vm9370_vm9 = vmmov %vm9367_vm2  ;;  %v7505_v34 = vld [vmem:[#allocation2 + $0xe1] sm:$0xff] }
 0x1ef   : > { %2141 = vst.msk [vmem:[#allocation3 + $0x3c] sm:$0xf] %vm9367_vm2, %v2060_v10  ;;  %v2242_v10 = vpack.c.bf16 %v2178_v19, %v2178_v19  ;;  %v2243_v28 = vpack.c.bf16 %v2211_v53, %v2211_v53  ;;  %v9376_v19 = vld [vmem:[#allocation20_spill] sm:$0xff] }
 0x1f2   : > { %2320 = vrot.lane.b32.xlu0 %v2239_v6, %s6419_s15  ;;  %2322 = vrot.lane.b32.xlu1 %v2240_v43, %s6419_s15  ;;  %v7501_v6 = vpack.c.bf16 %v2180_v1, %v2180_v1  ;;  %v2182_v43 = vld [vmem:[#allocation2 + $0xd9] sm:$0xff] }
 0x1f4   : > { %v2044_v36 = vpop.permute.xlu0 %2043  ;;  %v2046_v54 = vpop.permute.xlu1 %2045  ;;  %2324 = vrot.lane.b32.xlu2 %v2241_v44, %s6419_s15  ;;  %9372 = vst [vmem:[#allocation34_spill] sm:$0xff] %v7501_v6  ;;  %v9373_v44 = vld [vmem:[#allocation18_spill] sm:$0xff] }
 0x1f5   : > { %2133 = vst.msk [vmem:[#allocation3 + $0x1c] sm:$0xf] %vm9370_vm9, %v2044_v36  ;;  %vm9374_vm8 = vnez %v9373_v44  ;;  %vm9377_vm9 = vnez %v9376_v19  ;;  %v9379_v44 = vld [vmem:[#allocation22_spill] sm:$0xff] }
 0x1f6   : > { %2134 = vst.msk [vmem:[#allocation3 + $0x20] sm:$0xf] %vm9371_vm5, %v2046_v54  ;;  %v2066_v61 = vpop.permute.xlu2 %2065  ;;  %v2213_v36 = vsel %vm9374_vm8, %v2181_v59, 0.0  ;;  %vm9375_vm5 = vmmov %vm9367_vm2  ;;  %v2215_v53 = vsel %vm9377_vm9, %v7505_v34, 0.0  ;;  %vm9380_vm8 = vnez %v9379_v44 }
 0x1f7   : > { %2144 = vst.msk [vmem:[#allocation3 + $0x48] sm:$0xf] %vm9367_vm2, %v2066_v61  ;;  %v2245_v1 = vpack.c.bf16 %v2213_v36, %v2213_v36  ;;  %v2185_v61 = vld [vmem:[#allocation2 + $0xf1] sm:$0xff]  ;;  %v2247_v59 = vpack.c.bf16 %v2215_v53, %v2215_v53  ;;  %v2186_v36 = vld [vmem:[#allocation2 + $0xf9] sm:$0xff] }
 0x1f8   : > { %v2250_v53 = vpack.c.bf16 %v2186_v36, %v2186_v36 }
 0x1fa   : > { %2326 = vrot.lane.b32.xlu0 %v2242_v10, %s6419_s15  ;;  %2328 = vrot.lane.b32.xlu1 %v2243_v28, %s6419_s15  ;;  %v2246_v10 = vpack.c.bf16 %v2182_v43, %v2182_v43 }
 0x1fc   : > { %v2050_v62 = vpop.permute.xlu0 %2049  ;;  %v2052_v54 = vpop.permute.xlu1 %2051  ;;  %2330 = vrot.lane.b32.xlu2 %v7501_v6, %s6419_s15 }
 0x1fd   : > { %2136 = vst.msk [vmem:[#allocation3 + $0x28] sm:$0xf] %vm9375_vm5, %v2050_v62  ;;  %v2217_v62 = vsel %vm9380_vm8, %v2185_v61, 0.0  ;;  %vm9381_vm5 = vmmov %vm9367_vm2  ;;  %v2188_v61 = vld [vmem:[#allocation2 + $0x109] sm:$0xff] }
 0x1fe   : > { %2137 = vst.msk [vmem:[#allocation3 + $0x2c] sm:$0xf] %vm9367_vm2, %v2052_v54  ;;  %v2072_v28 = vpop.permute.xlu2 %2071  ;;  %v2249_v43 = vpack.c.bf16 %v2217_v62, %v2217_v62  ;;  %v2252_v36 = vpack.c.bf16 %v2188_v61, %v2188_v61 }
 0x1ff   : > { %2147 = vst.msk [vmem:[#allocation3 + $0x54] sm:$0xf] %vm9378_vm14, %v2072_v28  ;;  %vm9382_vm14 = vmmov %vm9367_vm2 }
 0x202   : > { %2332 = vrot.lane.b32.xlu0 %v2245_v1, %s6419_s15  ;;  %2334 = vrot.lane.b32.xlu1 %v2246_v10, %s6419_s15  ;;  %v2189_v1 = vld [vmem:[#allocation2 + $0x111] sm:$0xff] }
 0x203   : > { %v9383_v10 = vld [vmem:[#allocation24_spill] sm:$0xff] }
 0x204   : > { %v2056_v6 = vpop.permute.xlu0 %2055  ;;  %v2058_v32 = vpop.permute.xlu1 %2057  ;;  %2336 = vrot.lane.b32.xlu2 %v2247_v59, %s6419_s15  ;;  %vm9384_vm9 = vnez %v9383_v10 }
 0x205   : > { %2139 = vst.msk [vmem:[#allocation3 + $0x34] sm:$0xf] %vm9381_vm5, %v2056_v6  ;;  %v2219_v28 = vsel %vm9384_vm9, %v7109_v40, 0.0  ;;  %vm9385_vm5 = vmmov %vm9367_vm2  ;;  %v2417_v40 = vld [vmem:[#allocation2 + $0x37] sm:$0xff] }
 0x206   : > { %2140 = vst.msk [vmem:[#allocation3 + $0x38] sm:$0xf] %vm9367_vm2, %v2058_v32  ;;  %v2078_v54 = vpop.permute.xlu2 %2077  ;;  %v9386_v32 = vld [vmem:[#allocation26_spill] sm:$0xff]  ;;  %vm9389_vm8 = vmmov %vm9385_vm5 }
 0x207   : > { %2150 = vst.msk [vmem:[#allocation3 + $0x60] sm:$0xf] %vm9382_vm14, %v2078_v54  ;;  %vm9387_vm2 = vnez %v9386_v32  ;;  %vm9388_vm14 = vmmov %vm9385_vm5  ;;  %v2415_v54 = vld [vmem:[#allocation2 + $0x27] sm:$0xff] }
 0x208   : > { %v2221_v62 = vsel %vm9387_vm2, %v2189_v1, 0.0 }
 0x209   : > { %v2253_v10 = vpack.c.bf16 %v2221_v62, %v2221_v62 }
 0x20a   : > { %2338 = vrot.lane.b32.xlu0 %v7090_v23, %s6419_s15  ;;  %2340 = vrot.lane.b32.xlu1 %v2249_v43, %s6419_s15  ;;  %v2251_v23 = vpack.c.bf16 %v2219_v28, %v2219_v28  ;;  %v2449_v28 = vsel %vm6767_vm7, %v2417_v40, 0.0  ;;  %v2420_v40 = vld [vmem:[#allocation2 + $0x4f] sm:$0xff] }
 0x20c   : > { %v2062_v6 = vpop.permute.xlu0 %2061  ;;  %v2064_v59 = vpop.permute.xlu1 %2063  ;;  %2342 = vrot.lane.b32.xlu2 %v2250_v53, %s6419_s15  ;;  %v2447_v53 = vsel %vm6736_vm3, %v2415_v54, 0.0 }
 0x20d   : > { %2142 = vst.msk [vmem:[#allocation3 + $0x40] sm:$0xf] %vm9385_vm5, %v2062_v6  ;;  %v2416_v6 = vld [vmem:[#allocation2 + $0x2f] sm:$0xff]  ;;  %v2479_v61 = vpack.c.bf16 %v2447_v53, %v2447_v53 }
 0x20e   : > { %2143 = vst.msk [vmem:[#allocation3 + $0x44] sm:$0xf] %vm9388_vm14, %v2064_v59  ;;  %v2084_v43 = vpop.permute.xlu2 %2083  ;;  %v2480_v59 = vpack.c.bf16 %v2416_v6, %v2416_v6  ;;  %vm9391_vm14 = vmmov %vm9385_vm5 }
 0x20f   : > { %2153 = vst.msk [vmem:[#allocation3 + $0x6c] sm:$0xf] %vm9389_vm8, %v2084_v43  ;;  %vm9390_vm8 = vmmov %vm9385_vm5 }
 0x212   : > { %2344 = vrot.lane.b32.xlu0 %v2251_v23, %s6419_s15  ;;  %2346 = vrot.lane.b32.xlu1 %v2252_v36, %s6419_s15  ;;  %v2419_v23 = vld [vmem:[#allocation2 + $0x47] sm:$0xff]  ;;  %v2481_v36 = vpack.c.bf16 %v2449_v28, %v2449_v28  ;;  %v2421_v28 = vld [vmem:[#allocation2 + $0x57] sm:$0xff] }
 0x214   : > { %v2068_v32 = vpop.permute.xlu0 %2067  ;;  %v2070_v1 = vpop.permute.xlu1 %2069  ;;  %2348 = vrot.lane.b32.xlu2 %v2253_v10, %s6419_s15  ;;  %v2418_v10 = vld [vmem:[#allocation2 + $0x3f] sm:$0xff] }
 0x215   : > { %2145 = vst.msk [vmem:[#allocation3 + $0x4c] sm:$0xf] %vm9385_vm5, %v2068_v32  ;;  %v2451_v32 = vsel %vm6793_vm10, %v2419_v23, 0.0  ;;  %vm9154_vm5 = vcmask 191648   ;;  %v2482_v53 = vpack.c.bf16 %v2418_v10, %v2418_v10  ;;  %v2422_v23 = vld [vmem:[#allocation2 + $0x5f] sm:$0xff] }
 0x216   : > { %2146 = vst.msk [vmem:[#allocation3 + $0x50] sm:$0xf] %vm9390_vm8, %v2070_v1  ;;  %v2090_v62 = vpop.permute.xlu2 %2089  ;;  %v2483_v6 = vpack.c.bf16 %v2451_v32, %v2451_v32 }
 0x217   : > { %2156 = vst.msk [vmem:[#allocation3 + $0x78] sm:$0xf] %vm9391_vm14, %v2090_v62  ;;  %vm9392_vm14 = vmmov %vm9390_vm8  ;;  %v2453_v62 = vsel %vm6809_vm11, %v2421_v28, 0.0 }
 0x218   : > { %v2485_v32 = vpack.c.bf16 %v2453_v62, %v2453_v62 }
 0x21a   : > { %2543 = vrot.lane.b32.xlu0 %v2479_v61, %s6420_s16  ;;  %2545 = vrot.lane.b32.xlu1 %v2480_v59, %s6420_s16  ;;  %v2484_v61 = vpack.c.bf16 %v2420_v40, %v2420_v40  ;;  %v2423_v59 = vld [vmem:[#allocation2 + $0x67] sm:$0xff] }
 0x21b   : > { %v2455_v10 = vsel %vm6844_vm13, %v2423_v59, 0.0  ;;  %v2426_v59 = vld [vmem:[#allocation2 + $0x7f] sm:$0xff] }
 0x21c   : > { %v2074_v43 = vpop.permute.xlu0 %2073  ;;  %v2076_v54 = vpop.permute.xlu1 %2075  ;;  %2547 = vrot.lane.b32.xlu2 %v2481_v36, %s6420_s16 }
 0x21d   : > { %2148 = vst.msk [vmem:[#allocation3 + $0x58] sm:$0xf] %vm9390_vm8, %v2074_v43 }
 0x21e   : > { %2149 = vst.msk [vmem:[#allocation3 + $0x5c] sm:$0xf] %vm9392_vm14, %v2076_v54  ;;  %v2289_v1 = vpop.permute.xlu2 %2288  ;;  %vm9393_vm14 = vmmov %vm9390_vm8  ;;  %v2486_v54 = vpack.c.bf16 %v2422_v23, %v2422_v23 }
 0x21f   : > { %2384 = vst.msk [vmem:[#allocation3 + $0x4] sm:$0xf] %vm9154_vm5, %v2289_v1  ;;  %v2424_v1 = vld [vmem:[#allocation2 + $0x6f] sm:$0xff] }
 0x220   : > { %v2488_v62 = vpack.c.bf16 %v2424_v1, %v2424_v1 }
 0x222   : > { %2549 = vrot.lane.b32.xlu0 %v2482_v53, %s6420_s16  ;;  %2551 = vrot.lane.b32.xlu1 %v2483_v6, %s6420_s16  ;;  %v2425_v53 = vld [vmem:[#allocation2 + $0x77] sm:$0xff]  ;;  %v2487_v6 = vpack.c.bf16 %v2455_v10, %v2455_v10  ;;  %v2427_v10 = vld [vmem:[#allocation2 + $0x87] sm:$0xff] }
 0x223   : > { %v2457_v28 = vsel %vm6871_vm0, %v2425_v53, 0.0  ;;  %v2428_v53 = vld [vmem:[#allocation2 + $0x8f] sm:$0xff] }
 0x224   : > { %v2080_v36 = vpop.permute.xlu0 %2079  ;;  %v2082_v43 = vpop.permute.xlu1 %2081  ;;  %2553 = vrot.lane.b32.xlu2 %v2484_v61, %s6420_s16  ;;  %v2489_v23 = vpack.c.bf16 %v2457_v28, %v2457_v28 }
 0x225   : > { %2151 = vst.msk [vmem:[#allocation3 + $0x64] sm:$0xf] %vm9390_vm8, %v2080_v36 }
 0x226   : > { %2152 = vst.msk [vmem:[#allocation3 + $0x68] sm:$0xf] %vm9393_vm14, %v2082_v43  ;;  %v2295_v40 = vpop.permute.xlu2 %2294  ;;  %vm9394_vm14 = vmmov %vm9390_vm8 }
 0x227   : > { %2387 = vst.msk [vmem:[#allocation3 + $0x10] sm:$0xf] %vm9154_vm5, %v2295_v40  ;;  %v2459_v40 = vsel %vm6887_vm4, %v2427_v10, 0.0 }
 0x228   : > { %v2491_v28 = vpack.c.bf16 %v2459_v40, %v2459_v40 }
 0x22a   : > { %2555 = vrot.lane.b32.xlu0 %v2485_v32, %s6420_s16  ;;  %2557 = vrot.lane.b32.xlu1 %v2486_v54, %s6420_s16  ;;  %v2490_v32 = vpack.c.bf16 %v2426_v59, %v2426_v59  ;;  %v2429_v54 = vld [vmem:[#allocation2 + $0x97] sm:$0xff] }
 0x22b   : > { %v2461_v1 = vsel %vm6922_vm1, %v2429_v54, 0.0  ;;  %v2432_v54 = vld [vmem:[#allocation2 + $0xaf] sm:$0xff] }
 0x22c   : > { %v2086_v61 = vpop.permute.xlu0 %2085  ;;  %v2088_v36 = vpop.permute.xlu1 %2087  ;;  %2559 = vrot.lane.b32.xlu2 %v2487_v6, %s6420_s16 }
 0x22d   : > { %2154 = vst.msk [vmem:[#allocation3 + $0x70] sm:$0xf] %vm9390_vm8, %v2086_v61 }
 0x22e   : > { %2155 = vst.msk [vmem:[#allocation3 + $0x74] sm:$0xf] %vm9394_vm14, %v2088_v36  ;;  %v2301_v43 = vpop.permute.xlu2 %2300  ;;  %v2492_v36 = vpack.c.bf16 %v2428_v53, %v2428_v53  ;;  %vm9395_vm14 = vnez %v9279_v56 }
 0x22f   : > { %2390 = vst.msk [vmem:[#allocation3 + $0x1c] sm:$0xf] %vm9154_vm5, %v2301_v43  ;;  %v2430_v43 = vld [vmem:[#allocation2 + $0x9f] sm:$0xff] }
 0x230   : > { %v2494_v40 = vpack.c.bf16 %v2430_v43, %v2430_v43 }
 0x232   : > { %2561 = vrot.lane.b32.xlu0 %v2488_v62, %s6420_s16  ;;  %2563 = vrot.lane.b32.xlu1 %v2489_v23, %s6420_s16  ;;  %v2431_v62 = vld [vmem:[#allocation2 + $0xa7] sm:$0xff]  ;;  %v2493_v23 = vpack.c.bf16 %v2461_v1, %v2461_v1  ;;  %v2433_v1 = vld [vmem:[#allocation2 + $0xb7] sm:$0xff] }
 0x233   : > { %v2463_v10 = vsel %vm6949_vm6, %v2431_v62, 0.0  ;;  %v2434_v62 = vld [vmem:[#allocation2 + $0xbf] sm:$0xff]  ;;  %vm9398_vm6 = vnez %v9309_v11 }
 0x234   : > { %v2092_v6 = vpop.permute.xlu0 %2091  ;;  %v2287_v61 = vpop.permute.xlu1 %2286  ;;  %2565 = vrot.lane.b32.xlu2 %v2490_v32, %s6420_s16  ;;  %v2495_v53 = vpack.c.bf16 %v2463_v10, %v2463_v10 }
 0x235   : > { %2157 = vst.msk [vmem:[#allocation3 + $0x7c] sm:$0xf] %vm9390_vm8, %v2092_v6  ;;  %vm9396_vm8 = vnez %v9288_v38 }
 0x236   : > { %2383 = vst.msk [vmem:[#allocation3] sm:$0xf] %vm9154_vm5, %v2287_v61  ;;  %v2307_v59 = vpop.permute.xlu2 %2306 }
 0x237   : > { %2393 = vst.msk [vmem:[#allocation3 + $0x28] sm:$0xf] %vm9154_vm5, %v2307_v59  ;;  %v2465_v59 = vsel %vm6965_vm15, %v2433_v1, 0.0  ;;  %vm9397_vm15 = vnez %v9300_v8 }
 0x238   : > { %v2497_v10 = vpack.c.bf16 %v2465_v59, %v2465_v59 }
 0x23a   : > { %2567 = vrot.lane.b32.xlu0 %v2491_v28, %s6420_s16  ;;  %2569 = vrot.lane.b32.xlu1 %v2492_v36, %s6420_s16  ;;  %v2496_v28 = vpack.c.bf16 %v2432_v54, %v2432_v54  ;;  %v2435_v36 = vld [vmem:[#allocation2 + $0xc7] sm:$0xff] }
 0x23b   : > { %v2467_v43 = vsel %vm9331_vm12, %v2435_v36, 0.0  ;;  %v2438_v36 = vld [vmem:[#allocation2 + $0xdf] sm:$0xff] }
 0x23c   : > { %v2291_v32 = vpop.permute.xlu0 %2290  ;;  %v2293_v6 = vpop.permute.xlu1 %2292  ;;  %2571 = vrot.lane.b32.xlu2 %v2493_v23, %s6420_s16 }
 0x23d   : > { %2385 = vst.msk [vmem:[#allocation3 + $0x8] sm:$0xf] %vm9154_vm5, %v2291_v32 }
 0x23e   : > { %2386 = vst.msk [vmem:[#allocation3 + $0xc] sm:$0xf] %vm9154_vm5, %v2293_v6  ;;  %v2313_v61 = vpop.permute.xlu2 %2312  ;;  %v2498_v6 = vpack.c.bf16 %v2434_v62, %v2434_v62 }
 0x23f   : > { %2396 = vst.msk [vmem:[#allocation3 + $0x34] sm:$0xf] %vm9154_vm5, %v2313_v61  ;;  %v2436_v61 = vld [vmem:[#allocation2 + $0xcf] sm:$0xff] }
 0x240   : > { %v2500_v59 = vpack.c.bf16 %v2436_v61, %v2436_v61 }
 0x242   : > { %2573 = vrot.lane.b32.xlu0 %v2494_v40, %s6420_s16  ;;  %2575 = vrot.lane.b32.xlu1 %v2495_v53, %s6420_s16  ;;  %v2437_v40 = vld [vmem:[#allocation2 + $0xd7] sm:$0xff]  ;;  %v2499_v53 = vpack.c.bf16 %v2467_v43, %v2467_v43  ;;  %v2439_v43 = vld [vmem:[#allocation2 + $0xe7] sm:$0xff] }
 0x243   : > { %v2469_v1 = vsel %vm9395_vm14, %v2437_v40, 0.0  ;;  %v2440_v40 = vld [vmem:[#allocation2 + $0xef] sm:$0xff] }
 0x244   : > { %v2297_v23 = vpop.permute.xlu0 %2296  ;;  %v2299_v32 = vpop.permute.xlu1 %2298  ;;  %2577 = vrot.lane.b32.xlu2 %v2496_v28, %s6420_s16  ;;  %v2501_v62 = vpack.c.bf16 %v2469_v1, %v2469_v1 }
 0x245   : > { %2388 = vst.msk [vmem:[#allocation3 + $0x14] sm:$0xf] %vm9154_vm5, %v2297_v23 }
 0x246   : > { %2389 = vst.msk [vmem:[#allocation3 + $0x18] sm:$0xf] %vm9154_vm5, %v2299_v32  ;;  %v2319_v54 = vpop.permute.xlu2 %2318 }
 0x247   : > { %2399 = vst.msk [vmem:[#allocation3 + $0x40] sm:$0xf] %vm9154_vm5, %v2319_v54  ;;  %v2471_v54 = vsel %vm9396_vm8, %v2439_v43, 0.0  ;;  %vm9403_vm8 = vnez %v9212_v45 }
 0x248   : > { %v2503_v1 = vpack.c.bf16 %v2471_v54, %v2471_v54 }
 0x24a   : > { %2579 = vrot.lane.b32.xlu0 %v2497_v10, %s6420_s16  ;;  %2581 = vrot.lane.b32.xlu1 %v2498_v6, %s6420_s16  ;;  %v2502_v10 = vpack.c.bf16 %v2438_v36, %v2438_v36  ;;  %v2441_v6 = vld [vmem:[#allocation2 + $0xf7] sm:$0xff] }
 0x24b   : > { %v2473_v61 = vsel %vm9397_vm15, %v2441_v6, 0.0  ;;  %v2444_v6 = vld [vmem:[#allocation2 + $0x10f] sm:$0xff]  ;;  %vm9401_vm15 = vnez %v9206_v50 }
 0x24c   : > { %v2303_v28 = vpop.permute.xlu0 %2302  ;;  %v2305_v23 = vpop.permute.xlu1 %2304  ;;  %2583 = vrot.lane.b32.xlu2 %v2499_v53, %s6420_s16 }
 0x24d   : > { %2391 = vst.msk [vmem:[#allocation3 + $0x20] sm:$0xf] %vm9154_vm5, %v2303_v28 }
 0x24e   : > { %2392 = vst.msk [vmem:[#allocation3 + $0x24] sm:$0xf] %vm9154_vm5, %v2305_v23  ;;  %v2325_v32 = vpop.permute.xlu2 %2324  ;;  %v2504_v23 = vpack.c.bf16 %v2440_v40, %v2440_v40 }
 0x24f   : > { %2402 = vst.msk [vmem:[#allocation3 + $0x4c] sm:$0xf] %vm9154_vm5, %v2325_v32  ;;  %v2475_v32 = vsel %vm9398_vm6, %v7262_v41, 0.0  ;;  %vm9399_vm6 = vnez %v9318_v3 }
 0x250   : > { %v2507_v40 = vpack.c.bf16 %v2475_v32, %v2475_v32 }
 0x252   : > { %2585 = vrot.lane.b32.xlu0 %v2500_v59, %s6420_s16  ;;  %2587 = vrot.lane.b32.xlu1 %v2501_v62, %s6420_s16  ;;  %v2505_v59 = vpack.c.bf16 %v2473_v61, %v2473_v61  ;;  %v2442_v62 = vld [vmem:[#allocation2 + $0xff] sm:$0xff]  ;;  %v2508_v61 = vpack.c.bf16 %v2444_v6, %v2444_v6 }
 0x253   : > { %v2506_v54 = vpack.c.bf16 %v2442_v62, %v2442_v62 }
 0x254   : > { %v2309_v53 = vpop.permute.xlu0 %2308  ;;  %v2311_v28 = vpop.permute.xlu1 %2310  ;;  %2589 = vrot.lane.b32.xlu2 %v2502_v10, %s6420_s16 }
 0x255   : > { %2394 = vst.msk [vmem:[#allocation3 + $0x2c] sm:$0xf] %vm9154_vm5, %v2309_v53 }
 0x256   : > { %2395 = vst.msk [vmem:[#allocation3 + $0x30] sm:$0xf] %vm9154_vm5, %v2311_v28  ;;  %v2331_v36 = vpop.permute.xlu2 %2330  ;;  %v2445_v28 = vld [vmem:[#allocation2 + $0x117] sm:$0xff] }
 0x257   : > { %2405 = vst.msk [vmem:[#allocation3 + $0x58] sm:$0xf] %vm9154_vm5, %v2331_v36  ;;  %v2477_v41 = vsel %vm9399_vm6, %v2445_v28, 0.0  ;;  %vm9155_vm6 = vcmask 224448  }
 0x258   : > { %v2509_v62 = vpack.c.bf16 %v2477_v41, %v2477_v41 }
 0x25a   : > { %2591 = vrot.lane.b32.xlu0 %v2503_v1, %s6420_s16  ;;  %2593 = vrot.lane.b32.xlu1 %v2504_v23, %s6420_s16  ;;  %v2446_v1 = vld [vmem:[#allocation2 + $0x11f] sm:$0xff] }
 0x25b   : > { %v2510_v32 = vpack.c.bf16 %v2446_v1, %v2446_v1  ;;  %v2678_v1 = vld [vmem:[#allocation2 + $0x58] sm:$0xff] }
 0x25c   : > { %v2315_v43 = vpop.permute.xlu0 %2314  ;;  %v2317_v10 = vpop.permute.xlu1 %2316  ;;  %2595 = vrot.lane.b32.xlu2 %v2505_v59, %s6420_s16  ;;  %v2672_v59 = vld [vmem:[#allocation2 + $0x28] sm:$0xff] }
 0x25d   : > { %2397 = vst.msk [vmem:[#allocation3 + $0x38] sm:$0xf] %vm9154_vm5, %v2315_v43 }
 0x25e   : > { %2398 = vst.msk [vmem:[#allocation3 + $0x3c] sm:$0xf] %vm9154_vm5, %v2317_v10  ;;  %v2337_v53 = vpop.permute.xlu2 %2336  ;;  %v2704_v10 = vpack.c.bf16 %v2672_v59, %v2672_v59  ;;  %v2681_v59 = vld [vmem:[#allocation2 + $0x70] sm:$0xff] }
 0x25f   : > { %2408 = vst.msk [vmem:[#allocation3 + $0x64] sm:$0xf] %vm9154_vm5, %v2337_v53 }
 0x262   : > { %2597 = vrot.lane.b32.xlu0 %v2506_v54, %s6420_s16  ;;  %2599 = vrot.lane.b32.xlu1 %v2507_v40, %s6420_s16  ;;  %v2675_v40 = vld [vmem:[#allocation2 + $0x40] sm:$0xff] }
 0x263   : > { %v2707_v28 = vpack.c.bf16 %v2675_v40, %v2675_v40 }
 0x264   : > { %v2321_v23 = vpop.permute.xlu0 %2320  ;;  %v2323_v36 = vpop.permute.xlu1 %2322  ;;  %2601 = vrot.lane.b32.xlu2 %v2508_v61, %s6420_s16 }
 0x265   : > { %2400 = vst.msk [vmem:[#allocation3 + $0x44] sm:$0xf] %vm9154_vm5, %v2321_v23 }
 0x266   : > { %2401 = vst.msk [vmem:[#allocation3 + $0x48] sm:$0xf] %vm9154_vm5, %v2323_v36  ;;  %v2343_v43 = vpop.permute.xlu2 %2342  ;;  %v2710_v36 = vpack.c.bf16 %v2678_v1, %v2678_v1  ;;  %v2693_v1 = vld [vmem:[#allocation2 + $0xd0] sm:$0xff] }
 0x267   : > { %2411 = vst.msk [vmem:[#allocation3 + $0x70] sm:$0xf] %vm9154_vm5, %v2343_v43  ;;  %v2684_v43 = vld [vmem:[#allocation2 + $0x88] sm:$0xff] }
 0x26a   : > { %2603 = vrot.lane.b32.xlu0 %v2509_v62, %s6420_s16  ;;  %2605 = vrot.lane.b32.xlu1 %v2510_v32, %s6420_s16  ;;  %v2713_v32 = vpack.c.bf16 %v2681_v59, %v2681_v59 }
 0x26c   : > { %v2327_v6 = vpop.permute.xlu0 %2326  ;;  %v2329_v54 = vpop.permute.xlu1 %2328  ;;  %2768 = vrot.lane.b32.xlu2 %v2704_v10, %s6421_s17 }
 0x26d   : > { %2403 = vst.msk [vmem:[#allocation3 + $0x50] sm:$0xf] %vm9154_vm5, %v2327_v6  ;;  %v2716_v6 = vpack.c.bf16 %v2684_v43, %v2684_v43 }
 0x26e   : > { %2404 = vst.msk [vmem:[#allocation3 + $0x54] sm:$0xf] %vm9154_vm5, %v2329_v54  ;;  %v2349_v53 = vpop.permute.xlu2 %2348  ;;  %v2687_v54 = vld [vmem:[#allocation2 + $0xa0] sm:$0xff] }
 0x26f   : > { %2414 = vst.msk [vmem:[#allocation3 + $0x7c] sm:$0xf] %vm9154_vm5, %v2349_v53  ;;  %v2719_v53 = vpack.c.bf16 %v2687_v54, %v2687_v54 }
 0x272   : > { %2770 = vrot.lane.b32.xlu0 %v7281_v15, %s6421_s17  ;;  %2772 = vrot.lane.b32.xlu1 %v7289_v57, %s6421_s17 }
 0x274   : > { %v2333_v61 = vpop.permute.xlu0 %2332  ;;  %v2335_v41 = vpop.permute.xlu1 %2334  ;;  %2774 = vrot.lane.b32.xlu2 %v2707_v28, %s6421_s17  ;;  %v2690_v28 = vld [vmem:[#allocation2 + $0xb8] sm:$0xff] }
 0x275   : > { %2406 = vst.msk [vmem:[#allocation3 + $0x5c] sm:$0xf] %vm9154_vm5, %v2333_v61 }
 0x276   : > { %2407 = vst.msk [vmem:[#allocation3 + $0x60] sm:$0xf] %vm9154_vm5, %v2335_v41  ;;  %v2548_v23 = vpop.permute.xlu2 %2547  ;;  %v2722_v41 = vpack.c.bf16 %v2690_v28, %v2690_v28 }
 0x277   : > { %2642 = vst.msk [vmem:[#allocation3 + $0x8] sm:$0xf] %vm9155_vm6, %v2548_v23 }
 0x27a   : > { %2776 = vrot.lane.b32.xlu0 %v7292_v16, %s6421_s17  ;;  %2778 = vrot.lane.b32.xlu1 %v7301_v31, %s6421_s17 }
 0x27c   : > { %v2339_v15 = vpop.permute.xlu0 %2338  ;;  %v2341_v57 = vpop.permute.xlu1 %2340  ;;  %2780 = vrot.lane.b32.xlu2 %v2710_v36, %s6421_s17  ;;  %v2725_v36 = vpack.c.bf16 %v2693_v1, %v2693_v1 }
 0x27d   : > { %2409 = vst.msk [vmem:[#allocation3 + $0x68] sm:$0xf] %vm9154_vm5, %v2339_v15  ;;  %v2696_v15 = vld [vmem:[#allocation2 + $0xe8] sm:$0xff] }
 0x27e   : > { %2410 = vst.msk [vmem:[#allocation3 + $0x6c] sm:$0xf] %vm9154_vm5, %v2341_v57  ;;  %v2554_v62 = vpop.permute.xlu2 %2553  ;;  %v2728_v59 = vpack.c.bf16 %v2696_v15, %v2696_v15 }
 0x27f   : > { %2645 = vst.msk [vmem:[#allocation3 + $0x14] sm:$0xf] %vm9155_vm6, %v2554_v62  ;;  %v2699_v62 = vld [vmem:[#allocation2 + $0x100] sm:$0xff] }
 0x282   : > { %2782 = vrot.lane.b32.xlu0 %v7304_v7, %s6421_s17  ;;  %2784 = vrot.lane.b32.xlu1 %v7313_v55, %s6421_s17 }
 0x284   : > { %v2345_v16 = vpop.permute.xlu0 %2344  ;;  %v2347_v31 = vpop.permute.xlu1 %2346  ;;  %2786 = vrot.lane.b32.xlu2 %v2713_v32, %s6421_s17 }
 0x285   : > { %2412 = vst.msk [vmem:[#allocation3 + $0x74] sm:$0xf] %vm9154_vm5, %v2345_v16  ;;  %v2731_v16 = vpack.c.bf16 %v2699_v62, %v2699_v62  ;;  %v9408_v62 = vld [vmem:[#allocation9_spill] sm:$0xff] }
 0x286   : > { %2413 = vst.msk [vmem:[#allocation3 + $0x78] sm:$0xf] %vm9154_vm5, %v2347_v31  ;;  %v2560_v10 = vpop.permute.xlu2 %2559  ;;  %v2702_v31 = vld [vmem:[#allocation2 + $0x118] sm:$0xff]  ;;  %vm9400_vm5 = vnez %v9202_v39 }
 0x287   : > { %2648 = vst.msk [vmem:[#allocation3 + $0x20] sm:$0xf] %vm9155_vm6, %v2560_v10  ;;  %v2734_v10 = vpack.c.bf16 %v2702_v31, %v2702_v31 }
 0x28a   : > { %2788 = vrot.lane.b32.xlu0 %v7316_v22, %s6421_s17  ;;  %2790 = vrot.lane.b32.xlu1 %v7325_v24, %s6421_s17 }
 0x28c   : > { %v2544_v7 = vpop.permute.xlu0 %2543  ;;  %v2546_v55 = vpop.permute.xlu1 %2545  ;;  %2792 = vrot.lane.b32.xlu2 %v2716_v6, %s6421_s17 }
 0x28d   : > { %2640 = vst.msk [vmem:[#allocation3] sm:$0xf] %vm9155_vm6, %v2544_v7 }
 0x28e   : > { %2641 = vst.msk [vmem:[#allocation3 + $0x4] sm:$0xf] %vm9155_vm6, %v2546_v55  ;;  %v2566_v40 = vpop.permute.xlu2 %2565 }
 0x28f   : > { %2651 = vst.msk [vmem:[#allocation3 + $0x2c] sm:$0xf] %vm9155_vm6, %v2566_v40 }
 0x292   : > { %2794 = vrot.lane.b32.xlu0 %v7328_v35, %s6421_s17  ;;  %2796 = vrot.lane.b32.xlu1 %v7337_v14, %s6421_s17 }
 0x294   : > { %v2550_v22 = vpop.permute.xlu0 %2549  ;;  %v2552_v24 = vpop.permute.xlu1 %2551  ;;  %2798 = vrot.lane.b32.xlu2 %v2719_v53, %s6421_s17 }
 0x295   : > { %2643 = vst.msk [vmem:[#allocation3 + $0xc] sm:$0xf] %vm9155_vm6, %v2550_v22 }
 0x296   : > { %2644 = vst.msk [vmem:[#allocation3 + $0x10] sm:$0xf] %vm9155_vm6, %v2552_v24  ;;  %v2572_v61 = vpop.permute.xlu2 %2571 }
 0x297   : > { %2654 = vst.msk [vmem:[#allocation3 + $0x38] sm:$0xf] %vm9155_vm6, %v2572_v61  ;;  %v2901_v61 = vld [vmem:[#allocation2 + $0x49] sm:$0xff] }
 0x29a   : > { %2800 = vrot.lane.b32.xlu0 %v7340_v26, %s6421_s17  ;;  %2802 = vrot.lane.b32.xlu1 %v7349_v25, %s6421_s17 }
 0x29c   : > { %v2556_v35 = vpop.permute.xlu0 %2555  ;;  %v2558_v14 = vpop.permute.xlu1 %2557  ;;  %2804 = vrot.lane.b32.xlu2 %v2722_v41, %s6421_s17  ;;  %v2965_v41 = vpack.c.bf16 %v2901_v61, %v2901_v61  ;;  %v9417_v61 = vld [vmem:[#allocation33_spill] sm:$0xff] }
 0x29d   : > { %2646 = vst.msk [vmem:[#allocation3 + $0x18] sm:$0xf] %vm9155_vm6, %v2556_v35 }
 0x29e   : > { %2647 = vst.msk [vmem:[#allocation3 + $0x1c] sm:$0xf] %vm9155_vm6, %v2558_v14  ;;  %v2578_v23 = vpop.permute.xlu2 %2577 }
 0x29f   : > { %2657 = vst.msk [vmem:[#allocation3 + $0x44] sm:$0xf] %vm9155_vm6, %v2578_v23  ;;  %v2904_v23 = vld [vmem:[#allocation2 + $0x61] sm:$0xff] }
 0x2a2   : > { %2806 = vrot.lane.b32.xlu0 %v7352_v13, %s6421_s17  ;;  %2808 = vrot.lane.b32.xlu1 %v7361_v17, %s6421_s17 }
 0x2a4   : > { %v2562_v26 = vpop.permute.xlu0 %2561  ;;  %v2564_v25 = vpop.permute.xlu1 %2563  ;;  %2810 = vrot.lane.b32.xlu2 %v2725_v36, %s6421_s17 }
 0x2a5   : > { %2649 = vst.msk [vmem:[#allocation3 + $0x24] sm:$0xf] %vm9155_vm6, %v2562_v26 }
 0x2a6   : > { %2650 = vst.msk [vmem:[#allocation3 + $0x28] sm:$0xf] %vm9155_vm6, %v2564_v25  ;;  %v2584_v57 = vpop.permute.xlu2 %2583 }
 0x2a7   : > { %2660 = vst.msk [vmem:[#allocation3 + $0x50] sm:$0xf] %vm9155_vm6, %v2584_v57 }
 0x2aa   : > { %2812 = vrot.lane.b32.xlu0 %v7364_v20, %s6421_s17  ;;  %2814 = vrot.lane.b32.xlu1 %v7373_v52, %s6421_s17 }
 0x2ac   : > { %v2568_v13 = vpop.permute.xlu0 %2567  ;;  %v2570_v17 = vpop.permute.xlu1 %2569  ;;  %2816 = vrot.lane.b32.xlu2 %v2728_v59, %s6421_s17 }
 0x2ad   : > { %2652 = vst.msk [vmem:[#allocation3 + $0x30] sm:$0xf] %vm9155_vm6, %v2568_v13  ;;  %v2907_v13 = vld [vmem:[#allocation2 + $0x79] sm:$0xff] }
 0x2ae   : > { %2653 = vst.msk [vmem:[#allocation3 + $0x34] sm:$0xf] %vm9155_vm6, %v2570_v17  ;;  %v2590_v32 = vpop.permute.xlu2 %2589  ;;  %v2971_v17 = vpack.c.bf16 %v2907_v13, %v2907_v13 }
 0x2af   : > { %2663 = vst.msk [vmem:[#allocation3 + $0x5c] sm:$0xf] %vm9155_vm6, %v2590_v32 }
 0x2b2   : > { %2818 = vrot.lane.b32.xlu0 %v7376_v46, %s6421_s17  ;;  %2820 = vrot.lane.b32.xlu1 %v7385_v58, %s6421_s17  ;;  %v2898_v46 = vld [vmem:[#allocation2 + $0x31] sm:$0xff]  ;;  %v2703_v58 = vld [vmem:[#allocation2 + $0x120] sm:$0xff] }
 0x2b3   : > { %v2930_v55 = vsel %vm9400_vm5, %v2898_v46, 0.0  ;;  %v2735_v54 = vpack.c.bf16 %v2703_v58, %v2703_v58  ;;  %vm9161_vm5 = vcmask 257248  }
 0x2b4   : > { %v2574_v20 = vpop.permute.xlu0 %2573  ;;  %v2576_v52 = vpop.permute.xlu1 %2575  ;;  %2822 = vrot.lane.b32.xlu2 %v2731_v16, %s6421_s17 }
 0x2b5   : > { %2655 = vst.msk [vmem:[#allocation3 + $0x3c] sm:$0xf] %vm9155_vm6, %v2574_v20 }
 0x2b6   : > { %2656 = vst.msk [vmem:[#allocation3 + $0x40] sm:$0xf] %vm9155_vm6, %v2576_v52  ;;  %v2596_v43 = vpop.permute.xlu2 %2595 }
 0x2b7   : > { %2666 = vst.msk [vmem:[#allocation3 + $0x68] sm:$0xf] %vm9155_vm6, %v2596_v43  ;;  %v2910_v43 = vld [vmem:[#allocation2 + $0x91] sm:$0xff] }
 0x2ba   : > { %2824 = vrot.lane.b32.xlu0 %v7388_v0, %s6421_s17  ;;  %2826 = vrot.lane.b32.xlu1 %v7399_v9, %s6421_s17  ;;  %v2962_v0 = vpack.c.bf16 %v2930_v55, %v2930_v55  ;;  %v2932_v9 = vsel %vm9401_vm15, %v7413_v18, 0.0  ;;  %vm9402_vm15 = vnez %v9210_v21  ;;  %v9414_v55 = vld [vmem:[#allocation13_spill] sm:$0xff] }
 0x2bb   : > { %v2964_v24 = vpack.c.bf16 %v2932_v9, %v2932_v9 }
 0x2bc   : > { %v2580_v6 = vpop.permute.xlu0 %2579  ;;  %v2582_v7 = vpop.permute.xlu1 %2581  ;;  %2828 = vrot.lane.b32.xlu2 %v2734_v10, %s6421_s17  ;;  %v9410_v10 = vld [vmem:[#allocation10_spill] sm:$0xff] }
 0x2bd   : > { %2658 = vst.msk [vmem:[#allocation3 + $0x48] sm:$0xf] %vm9155_vm6, %v2580_v6  ;;  %v9412_v6 = vld [vmem:[#allocation30_spill] sm:$0xff] }
 0x2be   : > { %2659 = vst.msk [vmem:[#allocation3 + $0x4c] sm:$0xf] %vm9155_vm6, %v2582_v7  ;;  %v2602_v40 = vpop.permute.xlu2 %2601  ;;  %v9413_v7 = vld [vmem:[#allocation31_spill] sm:$0xff] }
 0x2bf   : > { %2669 = vst.msk [vmem:[#allocation3 + $0x74] sm:$0xf] %vm9155_vm6, %v2602_v40 }
 0x2c2   : > { %2830 = vrot.lane.b32.xlu0 %v2735_v54, %s6421_s17  ;;  %3025 = vrot.lane.b32.xlu1 %v7410_v49, %s6422_s23  ;;  %v2934_v49 = vsel %vm9402_vm15, %v7420_v12, 0.0  ;;  %v9404_v12 = vld [vmem:[#allocation8_spill] sm:$0xff] }
 0x2c3   : > { %v2966_v14 = vpack.c.bf16 %v2934_v49, %v2934_v49  ;;  %vm9405_vm15 = vnez %v9404_v12 }
 0x2c4   : > { %v2586_v53 = vpop.permute.xlu0 %2585  ;;  %v2588_v22 = vpop.permute.xlu1 %2587  ;;  %3027 = vrot.lane.b32.xlu2 %v2962_v0, %s6422_s23  ;;  %v2938_v26 = vsel %vm9405_vm15, %v7443_v60, 0.0  ;;  %v9407_v60 = vld [vmem:[#allocation29_spill] sm:$0xff]  ;;  %vm9409_vm15 = vnez %v9408_v62 }
 0x2c5   : > { %2661 = vst.msk [vmem:[#allocation3 + $0x54] sm:$0xf] %vm9155_vm6, %v2586_v53  ;;  %v2970_v57 = vpack.c.bf16 %v2938_v26, %v2938_v26  ;;  %v2940_v32 = vsel %vm9409_vm15, %v9407_v60, 0.0  ;;  %vm9415_vm15 = vnez %v9414_v55  ;;  %v9420_v26 = vld [vmem:[#allocation17_spill] sm:$0xff] }
 0x2c6   : > { %2662 = vst.msk [vmem:[#allocation3 + $0x58] sm:$0xf] %vm9155_vm6, %v2588_v22  ;;  %v2769_v28 = vpop.permute.xlu2 %2768  ;;  %v2972_v52 = vpack.c.bf16 %v2940_v32, %v2940_v32  ;;  %v2944_v54 = vsel %vm9415_vm15, %v9413_v7, 0.0  ;;  %v2913_v22 = vld [vmem:[#allocation2 + $0xa9] sm:$0xff] }
 0x2c7   : > { %2865 = vst.msk [vmem:[#allocation3] sm:$0xf] %vm9161_vm5, %v2769_v28  ;;  %v2976_v9 = vpack.c.bf16 %v2944_v54, %v2944_v54  ;;  %v9416_v28 = vld [vmem:[#allocation32_spill] sm:$0xff] }
 0x2ca   : > { %3029 = vrot.lane.b32.xlu0 %v7415_v42, %s6422_s23  ;;  %3031 = vrot.lane.b32.xlu1 %v2964_v24, %s6422_s23  ;;  %v2936_v42 = vsel %vm9403_vm8, %v2904_v23, 0.0  ;;  %vm9411_vm8 = vnez %v9410_v10  ;;  %v2977_v24 = vpack.c.bf16 %v2913_v22, %v2913_v22 }
 0x2cb   : > { %v2968_v36 = vpack.c.bf16 %v2936_v42, %v2936_v42  ;;  %v2942_v46 = vsel %vm9411_vm8, %v2910_v43, 0.0  ;;  %v9425_v43 = vld [vmem:[#allocation18_spill] sm:$0xff]  ;;  %vm9429_vm8 = vnez %v9376_v19 }
 0x2cc   : > { %v2592_v18 = vpop.permute.xlu0 %2591  ;;  %v2594_v35 = vpop.permute.xlu1 %2593  ;;  %3033 = vrot.lane.b32.xlu2 %v2965_v41, %s6422_s23  ;;  %v2974_v58 = vpack.c.bf16 %v2942_v46, %v2942_v46  ;;  %v9418_v41 = vld [vmem:[#allocation15_spill] sm:$0xff] }
 0x2cd   : > { %2664 = vst.msk [vmem:[#allocation3 + $0x60] sm:$0xf] %vm9155_vm6, %v2592_v18  ;;  %v2915_v18 = vld [vmem:[#allocation2 + $0xb9] sm:$0xff] }
 0x2ce   : > { %2665 = vst.msk [vmem:[#allocation3 + $0x64] sm:$0xf] %vm9155_vm6, %v2594_v35  ;;  %v2775_v1 = vpop.permute.xlu2 %2774  ;;  %v2979_v23 = vpack.c.bf16 %v2915_v18, %v2915_v18 }
 0x2cf   : > { %2868 = vst.msk [vmem:[#allocation3 + $0xc] sm:$0xf] %vm9161_vm5, %v2775_v1 }
 0x2d2   : > { %3035 = vrot.lane.b32.xlu0 %v2966_v14, %s6422_s23  ;;  %3037 = vrot.lane.b32.xlu1 %v7440_v51, %s6422_s23  ;;  %v9406_v51 = vld [vmem:[#allocation28_spill] sm:$0xff] }
 0x2d4   : > { %v2598_v25 = vpop.permute.xlu0 %2597  ;;  %v2600_v15 = vpop.permute.xlu1 %2599  ;;  %3039 = vrot.lane.b32.xlu2 %v2968_v36, %s6422_s23  ;;  %v2918_v36 = vld [vmem:[#allocation2 + $0xd1] sm:$0xff] }
 0x2d5   : > { %2667 = vst.msk [vmem:[#allocation3 + $0x6c] sm:$0xf] %vm9155_vm6, %v2598_v25 }
 0x2d6   : > { %2668 = vst.msk [vmem:[#allocation3 + $0x70] sm:$0xf] %vm9155_vm6, %v2600_v15  ;;  %v2781_v59 = vpop.permute.xlu2 %2780 }
 0x2d7   : > { %2871 = vst.msk [vmem:[#allocation3 + $0x18] sm:$0xf] %vm9161_vm5, %v2781_v59 }
 0x2da   : > { %3041 = vrot.lane.b32.xlu0 %v9406_v51, %s6422_s23  ;;  %3043 = vrot.lane.b32.xlu1 %v2970_v57, %s6422_s23  ;;  %v9422_v51 = vld [vmem:[#allocation16_spill] sm:$0xff] }
 0x2db   : > { %vm9423_vm15 = vnez %v9422_v51 }
 0x2dc   : > { %v2604_v16 = vpop.permute.xlu0 %2603  ;;  %v2606_v20 = vpop.permute.xlu1 %2605  ;;  %3045 = vrot.lane.b32.xlu2 %v2971_v17, %s6422_s23  ;;  %v2916_v17 = vld [vmem:[#allocation2 + $0xc1] sm:$0xff] }
 0x2dd   : > { %2670 = vst.msk [vmem:[#allocation3 + $0x78] sm:$0xf] %vm9155_vm6, %v2604_v16  ;;  %v2948_v60 = vsel %vm9423_vm15, %v2916_v17, 0.0  ;;  %v9424_v16 = vld [vmem:[#allocation34_spill] sm:$0xff]  ;;  %vm9427_vm15 = vnez %v9379_v44 }
 0x2de   : > { %2671 = vst.msk [vmem:[#allocation3 + $0x7c] sm:$0xf] %vm9155_vm6, %v2606_v20  ;;  %v2787_v31 = vpop.permute.xlu2 %2786  ;;  %vm9419_vm6 = vnez %v9418_v41  ;;  %v2980_v32 = vpack.c.bf16 %v2948_v60, %v2948_v60 }
 0x2df   : > { %2874 = vst.msk [vmem:[#allocation3 + $0x24] sm:$0xf] %vm9161_vm5, %v2787_v31  ;;  %v2946_v49 = vsel %vm9419_vm6, %v9417_v61, 0.0  ;;  %vm9421_vm6 = vnez %v9420_v26 }
 0x2e0   : > { %v2978_v1 = vpack.c.bf16 %v2946_v49, %v2946_v49  ;;  %v2950_v25 = vsel %vm9421_vm6, %v2918_v36, 0.0  ;;  %vm9426_vm6 = vnez %v9425_v43 }
 0x2e1   : > { %v2982_v13 = vpack.c.bf16 %v2950_v25, %v2950_v25  ;;  %v2952_v46 = vsel %vm9426_vm6, %v7505_v34, 0.0  ;;  %vm9156_vm6 = vcmask 1043456  }
 0x2e2   : > { %3047 = vrot.lane.b32.xlu0 %v2972_v52, %s6422_s23  ;;  %3049 = vrot.lane.b32.xlu1 %v9412_v6, %s6422_s23 }
 0x2e4   : > { %v2771_v40 = vpop.permute.xlu0 %2770  ;;  %v2773_v0 = vpop.permute.xlu1 %2772  ;;  %3051 = vrot.lane.b32.xlu2 %v2974_v58, %s6422_s23  ;;  %v2984_v58 = vpack.c.bf16 %v2952_v46, %v2952_v46 }
 0x2e5   : > { %2866 = vst.msk [vmem:[#allocation3 + $0x4] sm:$0xf] %vm9161_vm5, %v2771_v40 }
 0x2e6   : > { %2867 = vst.msk [vmem:[#allocation3 + $0x8] sm:$0xf] %vm9161_vm5, %v2773_v0  ;;  %v2793_v53 = vpop.permute.xlu2 %2792 }
 0x2e7   : > { %2877 = vst.msk [vmem:[#allocation3 + $0x30] sm:$0xf] %vm9161_vm5, %v2793_v53  ;;  %v3190_v53 = vld [vmem:[%s9064_s1 + $0x10] sm:$0xf] }
 0x2ea   : > { %3053 = vrot.lane.b32.xlu0 %v9416_v28, %s6422_s23  ;;  %3055 = vrot.lane.b32.xlu1 %v2976_v9, %s6422_s23  ;;  %v2921_v9 = vld [vmem:[#allocation2 + $0xe9] sm:$0xff] }
 0x2eb   : > { %v2985_v22 = vpack.c.bf16 %v2921_v9, %v2921_v9  ;;  %v9432_v9 = vld [vmem:[#allocation24_spill] sm:$0xff] }
 0x2ec   : > { %v2777_v35 = vpop.permute.xlu0 %2776  ;;  %v2779_v14 = vpop.permute.xlu1 %2778  ;;  %3057 = vrot.lane.b32.xlu2 %v2977_v24, %s6422_s23  ;;  %v3284_v24 = vunpack.c.l.b16 %v3190_v53 }
 0x2ed   : > { %2869 = vst.msk [vmem:[#allocation3 + $0x10] sm:$0xf] %vm9161_vm5, %v2777_v35 }
 0x2ee   : > { %2870 = vst.msk [vmem:[#allocation3 + $0x14] sm:$0xf] %vm9161_vm5, %v2779_v14  ;;  %v2799_v42 = vpop.permute.xlu2 %2798  ;;  %v3287_v28 = vpack.c.b16 %v3284_v24, %v3284_v24  ;;  %v6271_v14 = vld [vmem:[%s9064_s1 + $0x8] sm:$0xff] }
 0x2ef   : > { %2880 = vst.msk [vmem:[#allocation3 + $0x3c] sm:$0xf] %vm9161_vm5, %v2799_v42  ;;  %v6270_v42 = vld [vmem:[%s9064_s1] sm:$0xff] }
 0x2f0   : > { %v3341_v61 = vsel %vm9156_vm6, %v3287_v28, 0  ;;  %vm9157_vm6 = vcmask 290048   ;;  %v3496_v28 = vld [vmem:[#allocation2 + $0x7] sm:$0xff] }
 0x2f1   : > { %3348 = vmatpush.bf16.msra.mxu0 %v3341_v61  ;;  %6291 = vmatpush.bf16.msra.mxu2 %v3341_v61 }
 0x2f2   : > { %3059 = vrot.lane.b32.xlu0 %v2978_v1, %s6422_s23  ;;  %3061 = vrot.lane.b32.xlu1 %v2979_v23, %s6422_s23  ;;  %v2919_v1 = vld [vmem:[#allocation2 + $0xd9] sm:$0xff] }
 0x2f3   : > { %v2983_v23 = vpack.c.bf16 %v2919_v1, %v2919_v1 }
 0x2f4   : > { %v2783_v15 = vpop.permute.xlu0 %2782  ;;  %v2785_v57 = vpop.permute.xlu1 %2784  ;;  %3063 = vrot.lane.b32.xlu2 %v2980_v32, %s6422_s23 }
 0x2f5   : > { %2872 = vst.msk [vmem:[#allocation3 + $0x1c] sm:$0xf] %vm9161_vm5, %v2783_v15  ;;  %3349 = vmatpush.bf16.msra.mxu0 %v6271_v14  ;;  %6292 = vmatpush.bf16.msra.mxu2 %v6271_v14 }
 0x2f6   : > { %2873 = vst.msk [vmem:[#allocation3 + $0x20] sm:$0xf] %vm9161_vm5, %v2785_v57  ;;  %v2805_v59 = vpop.permute.xlu2 %2804  ;;  %v3497_v57 = vld [vmem:[#allocation2 + $0xf] sm:$0xff] }
 0x2f7   : > { %2883 = vst.msk [vmem:[#allocation3 + $0x48] sm:$0xf] %vm9161_vm5, %v2805_v59  ;;  %v2923_v59 = vld [vmem:[#allocation2 + $0xf9] sm:$0xff] }
 0x2f8   : > { %v2987_v17 = vpack.c.bf16 %v2923_v59, %v2923_v59 }
 0x2f9   : > { %3350 = vmatpush.bf16.msra.mxu0 %v6270_v42  ;;  %6293 = vmatpush.bf16.msra.mxu2 %v6270_v42 }
 0x2fa   : > { %3065 = vrot.lane.b32.xlu0 %v9424_v16, %s6422_s23  ;;  %3067 = vrot.lane.b32.xlu1 %v2982_v13, %s6422_s23  ;;  %v2924_v13 = vld [vmem:[#allocation2 + $0x101] sm:$0xff]  ;;  %v3561_v16 = vpack.c.bf16 %v3497_v57, %v3497_v57 }
 0x2fb   : > { %v2956_v60 = vsel %vm9427_vm15, %v2924_v13, 0.0  ;;  %vm9430_vm15 = vcmask 290048   ;;  %v2925_v13 = vld [vmem:[#allocation2 + $0x109] sm:$0xff] }
 0x2fc   : > { %v2789_v20 = vpop.permute.xlu0 %2788  ;;  %v2791_v52 = vpop.permute.xlu1 %2790  ;;  %3069 = vrot.lane.b32.xlu2 %v2983_v23, %s6422_s23  ;;  %v2988_v32 = vpack.c.bf16 %v2956_v60, %v2956_v60  ;;  %vm9431_vm1 = vmmov %vm9430_vm15  ;;  %v2989_v60 = vpack.c.bf16 %v2925_v13, %v2925_v13 }
 0x2fd   : > { %2875 = vst.msk [vmem:[#allocation3 + $0x28] sm:$0xf] %vm9161_vm5, %v2789_v20 }
 0x2fe   : > { %2876 = vst.msk [vmem:[#allocation3 + $0x2c] sm:$0xf] %vm9161_vm5, %v2791_v52  ;;  %v2811_v31 = vpop.permute.xlu2 %2810 }
 0x2ff   : > { %2886 = vst.msk [vmem:[#allocation3 + $0x54] sm:$0xf] %vm9161_vm5, %v2811_v31 }
 0x302   : > { %3071 = vrot.lane.b32.xlu0 %v2984_v58, %s6422_s23  ;;  %3073 = vrot.lane.b32.xlu1 %v2985_v22, %s6422_s23  ;;  %v2922_v58 = vld [vmem:[#allocation2 + $0xf1] sm:$0xff] }
 0x304   : > { %v2795_v6 = vpop.permute.xlu0 %2794  ;;  %v2797_v7 = vpop.permute.xlu1 %2796 }
 0x305   : > { %2878 = vst.msk [vmem:[#allocation3 + $0x34] sm:$0xf] %vm9161_vm5, %v2795_v6  ;;  %v2954_v6 = vsel %vm9429_vm8, %v2922_v58, 0.0  ;;  %vm9435_vm8 = vcmask 27648  }
 0x306   : > { %2879 = vst.msk [vmem:[#allocation3 + $0x38] sm:$0xf] %vm9161_vm5, %v2797_v7  ;;  %v2817_v54 = vpop.permute.xlu2 %2816  ;;  %v2986_v7 = vpack.c.bf16 %v2954_v6, %v2954_v6 }
 0x307   : > { %2889 = vst.msk [vmem:[#allocation3 + $0x60] sm:$0xf] %vm9161_vm5, %v2817_v54 }
 0x308   : > { %3075 = vrot.lane.b32.xlu2 %v2986_v7, %s6422_s23 }
 0x30a   : > { %3077 = vrot.lane.b32.xlu0 %v2987_v17, %s6422_s23  ;;  %3079 = vrot.lane.b32.xlu1 %v2988_v32, %s6422_s23 }
 0x30c   : > { %v2801_v40 = vpop.permute.xlu0 %2800  ;;  %v2803_v0 = vpop.permute.xlu1 %2802 }
 0x30d   : > { %2881 = vst.msk [vmem:[#allocation3 + $0x40] sm:$0xf] %vm9161_vm5, %v2801_v40 }
 0x30e   : > { %2882 = vst.msk [vmem:[#allocation3 + $0x44] sm:$0xf] %vm9161_vm5, %v2803_v0  ;;  %v2823_v34 = vpop.permute.xlu2 %2822 }
 0x30f   : > { %2892 = vst.msk [vmem:[#allocation3 + $0x6c] sm:$0xf] %vm9161_vm5, %v2823_v34  ;;  %v2926_v34 = vld [vmem:[#allocation2 + $0x111] sm:$0xff] }
 0x310   : > { %v2958_v53 = vsel %vm9384_vm9, %v2926_v34, 0.0  ;;  %vm9168_vm9 = vcmask 326656   ;;  %3081 = vrot.lane.b32.xlu2 %v2989_v60, %s6422_s23 }
 0x311   : > { %v2990_v22 = vpack.c.bf16 %v2958_v53, %v2958_v53 }
 0x313   : > { %3083 = vrot.lane.b32.xlu0 %v2990_v22, %s6422_s23 }
 0x314   : > { %v2807_v49 = vpop.permute.xlu0 %2806  ;;  %v2809_v18 = vpop.permute.xlu1 %2808 }
 0x315   : > { %2884 = vst.msk [vmem:[#allocation3 + $0x4c] sm:$0xf] %vm9161_vm5, %v2807_v49 }
 0x316   : > { %2885 = vst.msk [vmem:[#allocation3 + $0x50] sm:$0xf] %vm9161_vm5, %v2809_v18  ;;  %v2829_v35 = vpop.permute.xlu2 %2828  ;;  %v3528_v18 = vsel %vm6736_vm3, %v3496_v28, 0.0  ;;  %vm9447_vm3 = vmmov %vm9431_vm1 }
 0x317   : > { %2895 = vst.msk [vmem:[#allocation3 + $0x78] sm:$0xf] %vm9161_vm5, %v2829_v35  ;;  %v3560_v35 = vpack.c.bf16 %v3528_v18, %v3528_v18 }
 0x31c   : > { %v2813_v36 = vpop.permute.xlu0 %2812  ;;  %v2815_v25 = vpop.permute.xlu1 %2814 }
 0x31d   : > { %2887 = vst.msk [vmem:[#allocation3 + $0x58] sm:$0xf] %vm9161_vm5, %v2813_v36 }
 0x31e   : > { %2888 = vst.msk [vmem:[#allocation3 + $0x5c] sm:$0xf] %vm9161_vm5, %v2815_v25  ;;  %v3028_v15 = vpop.permute.xlu2 %3027  ;;  %v2927_v25 = vld [vmem:[#allocation2 + $0x119] sm:$0xff] }
 0x31f   : > { %3123 = vst.msk [vmem:[#allocation3 + $0x4] sm:$0xf] %vm9157_vm6, %v3028_v15  ;;  %vm9428_vm6 = vcmask 27648   ;;  %v2991_v15 = vpack.c.bf16 %v2927_v25, %v2927_v25 }
 0x321   : > { %3085 = vrot.lane.b32.xlu1 %v2991_v15, %s6422_s23 }
 0x324   : > { %v2819_v20 = vpop.permute.xlu0 %2818  ;;  %v2821_v52 = vpop.permute.xlu1 %2820 }
 0x325   : > { %2890 = vst.msk [vmem:[#allocation3 + $0x64] sm:$0xf] %vm9161_vm5, %v2819_v20 }
 0x326   : > { %2891 = vst.msk [vmem:[#allocation3 + $0x68] sm:$0xf] %vm9161_vm5, %v2821_v52  ;;  %v6254_v31 = vld [vmem:[#allocation3] sm:$0xf0]  ;;  %v3034_v46 = vpop.permute.xlu2 %3033  ;;  %v2928_v52 = vld [vmem:[#allocation2 + $0x121] sm:$0xff] }
 0x327   : > { %3593 = vst.msk [vmem:[#allocation3 + $0x4] sm:$0xf] %vm9428_vm6, %v3561_v16  ;;  %vm9434_vm6 = vmmov %vm9431_vm1 }
 0x328   : > { %3126 = vst.msk [vmem:[#allocation3 + $0x10] sm:$0xf] %vm9430_vm15, %v3034_v46  ;;  %vm9433_vm15 = vmmov %vm9431_vm1  ;;  %v2960_v46 = vsel %vm9387_vm2, %v2928_v52, 0.0 }
 0x329   : > { %v2992_v58 = vpack.c.bf16 %v2960_v46, %v2960_v46  ;;  %vm9448_vm2 = vmmov %vm9431_vm1  ;;  %v3625_v46 = vld [vmem:[#allocation2 + $0x10] sm:$0xff] }
 0x32b   : > { %3087 = vrot.lane.b32.xlu2 %v2992_v58, %s6422_s23  ;;  %v3657_v58 = vpack.c.bf16 %v3625_v46, %v3625_v46 }
 0x32c   : > { %v2825_v54 = vpop.permute.xlu0 %2824  ;;  %v2827_v40 = vpop.permute.xlu1 %2826 }
 0x32d   : > { %2893 = vst.msk [vmem:[#allocation3 + $0x70] sm:$0xf] %vm9161_vm5, %v2825_v54  ;;  %3722 = vrot.lane.b32.xlu1 %v3657_v58, %s6415_s11 }
 0x32e   : > { %2894 = vst.msk [vmem:[#allocation3 + $0x74] sm:$0xf] %vm9161_vm5, %v2827_v40  ;;  %v3040_v0 = vpop.permute.xlu2 %3039 }
 0x32f   : > { %3129 = vst.msk [vmem:[#allocation3 + $0x1c] sm:$0xf] %vm9431_vm1, %v3040_v0 }
 0x334   : > { %v2831_v24 = vpop.permute.xlu0 %2830  ;;  %v3026_v61 = vpop.permute.xlu1 %3025 }
 0x335   : > { %2896 = vst.msk [vmem:[#allocation3 + $0x7c] sm:$0xf] %vm9161_vm5, %v2831_v24  ;;  %vm9436_vm5 = vmmov %vm9431_vm1 }
 0x336   : > { %3122 = vst.msk [vmem:[#allocation3] sm:$0xf] %vm9433_vm15, %v3026_v61  ;;  %v3046_v49 = vpop.permute.xlu2 %3045  ;;  %vm9437_vm15 = vmmov %vm9431_vm1 }
 0x337   : > { %3132 = vst.msk [vmem:[#allocation3 + $0x28] sm:$0xf] %vm9434_vm6, %v3046_v49  ;;  %vm9438_vm6 = vmmov %vm9431_vm1 }
 0x33c   : > { %v3030_v14 = vpop.permute.xlu0 %3029  ;;  %v3032_v1 = vpop.permute.xlu1 %3031 }
 0x33d   : > { %v6074_v23 = vld [vmem:[#allocation3] sm:$0xf]  ;;  %3124 = vst.msk [vmem:[#allocation3 + $0x8] sm:$0xf] %vm9431_vm1, %v3030_v14 }
 0x33e   : > { %3592 = vst.msk [vmem:[#allocation3] sm:$0xf] %vm9435_vm8, %v3560_v35  ;;  %v6075_v42 = vor.u32 %v6254_v31, %v6074_v23  ;;  %v3052_v36 = vpop.permute.xlu2 %3051  ;;  %vm9439_vm8 = vmmov %vm9431_vm1  ;;  %v9442_v31 = vld [vmem:[#allocation26_spill] sm:$0xff] }
 0x33f   : > { %3125 = vst.msk [vmem:[#allocation3 + $0xc] sm:$0xf] %vm9436_vm5, %v3032_v1  ;;  %vm9440_vm5 = vmmov %vm9431_vm1 }
 0x340   : > { %6144 = vmatmul.msk.bf16.vlgmr.msra.gmra.mxu0 %vm9168_vm9, %v6075_v42  ;;  %3135 = vst.msk [vmem:[#allocation3 + $0x34] sm:$0xf] %vm9437_vm15, %v3052_v36  ;;  %vm9441_vm15 = vmmov %vm9431_vm1 }
 0x344   : > { %v3036_v57 = vpop.permute.xlu0 %3035  ;;  %v3038_v59 = vpop.permute.xlu1 %3037 }
 0x345   : > { %3127 = vst.msk [vmem:[#allocation3 + $0x14] sm:$0xf] %vm9438_vm6, %v3036_v57  ;;  %vm9443_vm6 = vmmov %vm9431_vm1 }
 0x346   : > { %3128 = vst.msk [vmem:[#allocation3 + $0x18] sm:$0xf] %vm9431_vm1, %v3038_v59  ;;  %v3058_v17 = vpop.permute.xlu2 %3057  ;;  %v6255_v20 = vld [vmem:[#allocation3 + $0x8] sm:$0xff] }
 0x347   : > { %3138 = vst.msk [vmem:[#allocation3 + $0x40] sm:$0xf] %vm9439_vm8, %v3058_v17  ;;  %vm9444_vm8 = vmmov %vm9431_vm1 }
 0x34c   : > { %v3042_v32 = vpop.permute.xlu0 %3041  ;;  %v3044_v16 = vpop.permute.xlu1 %3043  ;;  %v6256_v34 = vld [vmem:[#allocation3 + $0x10] sm:$0xff] }
 0x34d   : > { %3130 = vst.msk [vmem:[#allocation3 + $0x20] sm:$0xf] %vm9440_vm5, %v3042_v32  ;;  %vm9445_vm5 = vmmov %vm9431_vm1  ;;  %v6257_v49 = vld [vmem:[#allocation3 + $0x18] sm:$0xff] }
 0x34e   : > { %3131 = vst.msk [vmem:[#allocation3 + $0x24] sm:$0xf] %vm9441_vm15, %v3044_v16  ;;  %v3064_v54 = vpop.permute.xlu2 %3063  ;;  %vm9446_vm15 = vmmov %vm9431_vm1  ;;  %v3624_v16 = vld [vmem:[#allocation2 + $0x8] sm:$0xff] }
 0x34f   : > { %3141 = vst.msk [vmem:[#allocation3 + $0x4c] sm:$0xf] %vm9444_vm8, %v3064_v54  ;;  %vm9450_vm8 = vmmov %vm9431_vm1  ;;  %v7905_v54 = vld [vmem:[%s9065_s2] ss:$0 sm:$0xff] }
 0x350   : > { %6145 = vmatmul.msk.bf16.gmra.mxu0 %vm9168_vm9, %v6255_v20  ;;  %v3656_v20 = vpack.c.bf16 %v3624_v16, %v3624_v16 }
 0x352   : > { %3720 = vrot.lane.b32.xlu0 %v3656_v20, %s6415_s11 }
 0x354   : > { %v3048_v6 = vpop.permute.xlu0 %3047  ;;  %v3050_v7 = vpop.permute.xlu1 %3049 }
 0x355   : > { %3133 = vst.msk [vmem:[#allocation3 + $0x2c] sm:$0xf] %vm9443_vm6, %v3048_v6  ;;  %vm9449_vm6 = vmmov %vm9431_vm1  ;;  %v6258_v1 = vld [vmem:[#allocation3 + $0x20] sm:$0xff] }
 0x356   : > { %3134 = vst.msk [vmem:[#allocation3 + $0x30] sm:$0xf] %vm9431_vm1, %v3050_v7  ;;  %v3070_v35 = vpop.permute.xlu2 %3069 }
 0x35c   : > { %v3054_v40 = vpop.permute.xlu0 %3053  ;;  %v3056_v0 = vpop.permute.xlu1 %3055  ;;  %v6259_v25 = vld [vmem:[#allocation3 + $0x28] sm:$0xff] }
 0x35d   : > { %3136 = vst.msk [vmem:[#allocation3 + $0x38] sm:$0xf] %vm9445_vm5, %v3054_v40  ;;  %vm9451_vm5 = vmmov %vm9431_vm1  ;;  %v6260_v13 = vld [vmem:[#allocation3 + $0x30] sm:$0xff] }
 0x35e   : > { %3137 = vst.msk [vmem:[#allocation3 + $0x3c] sm:$0xf] %vm9446_vm15, %v3056_v0  ;;  %vm9454_vm15 = vmmov %vm9431_vm1 }
 0x35f   : > { %3144 = vst.msk [vmem:[#allocation3 + $0x58] sm:$0xf] %vm9451_vm5, %v3070_v35  ;;  %vm9457_vm5 = vmmov %vm9431_vm1 }
 0x360   : > { %6146 = vmatmul.msk.bf16.gmra.mxu0 %vm9168_vm9, %v6256_v34 }
 0x362   : > { %v3076_v42 = vpop.permute.xlu2 %3075 }
 0x364   : > { %v3060_v53 = vpop.permute.xlu0 %3059  ;;  %v3062_v22 = vpop.permute.xlu1 %3061 }
 0x365   : > { %3139 = vst.msk [vmem:[#allocation3 + $0x44] sm:$0xf] %vm9447_vm3, %v3060_v53  ;;  %vm9452_vm3 = vmmov %vm9431_vm1  ;;  %v6261_v52 = vld [vmem:[#allocation3 + $0x38] sm:$0xff] }
 0x366   : > { %3140 = vst.msk [vmem:[#allocation3 + $0x48] sm:$0xf] %vm9448_vm2, %v3062_v22  ;;  %vm9453_vm2 = vmmov %vm9431_vm1 }
 0x367   : > { %3147 = vst.msk [vmem:[#allocation3 + $0x64] sm:$0xf] %vm9453_vm2, %v3076_v42  ;;  %vm9459_vm2 = vcmask 31744  }
 0x36a   : > { %v3082_v17 = vpop.permute.xlu2 %3081 }
 0x36b   : > { %3150 = vst.msk [vmem:[#allocation3 + $0x70] sm:$0xf] %vm9431_vm1, %v3082_v17 }
 0x36c   : > { %v6262_v24 = vld [vmem:[#allocation3 + $0x40] sm:$0xff]  ;;  %v3066_v28 = vpop.permute.xlu0 %3065  ;;  %v3068_v61 = vpop.permute.xlu1 %3067 }
 0x36d   : > { %3142 = vst.msk [vmem:[#allocation3 + $0x50] sm:$0xf] %vm9449_vm6, %v3066_v28  ;;  %6152 = vmatmul.msk.bf16.vlgmr.msra.gmra.mxu2 %vm9168_vm9, %v6262_v24  ;;  %v6263_v14 = vld [vmem:[#allocation3 + $0x48] sm:$0xff]  ;;  %vm9455_vm6 = vmmov %vm9431_vm1 }
 0x36e   : > { %3143 = vst.msk [vmem:[#allocation3 + $0x54] sm:$0xf] %vm9431_vm1, %v3068_v61 }
 0x370   : > { %6147 = vmatmul.msk.bf16.gmra.mxu0 %vm9168_vm9, %v6257_v49 }
 0x374   : > { %v3072_v18 = vpop.permute.xlu0 %3071  ;;  %v3074_v23 = vpop.permute.xlu1 %3073 }
 0x375   : > { %3145 = vst.msk [vmem:[#allocation3 + $0x5c] sm:$0xf] %vm9450_vm8, %v3072_v18  ;;  %v6264_v36 = vld [vmem:[#allocation3 + $0x50] sm:$0xff]  ;;  %vm9456_vm8 = vmmov %vm9431_vm1 }
 0x376   : > { %3146 = vst.msk [vmem:[#allocation3 + $0x60] sm:$0xf] %vm9452_vm3, %v3074_v23  ;;  %vm9458_vm3 = vmmov %vm9431_vm1 }
 0x377   : > { %vm9462_vm1 = vmmov %vm9459_vm2 }
 0x37c   : > { %v3078_v15 = vpop.permute.xlu0 %3077  ;;  %v3080_v57 = vpop.permute.xlu1 %3079  ;;  %v6265_v59 = vld [vmem:[#allocation3 + $0x58] sm:$0xff] }
 0x37d   : > { %6153 = vmatmul.msk.bf16.gmra.mxu2 %vm9168_vm9, %v6263_v14  ;;  %3148 = vst.msk [vmem:[#allocation3 + $0x68] sm:$0xf] %vm9454_vm15, %v3078_v15  ;;  %v6266_v32 = vld [vmem:[#allocation3 + $0x60] sm:$0xff]  ;;  %vm9460_vm15 = vmmov %vm9459_vm2 }
 0x37e   : > { %3149 = vst.msk [vmem:[#allocation3 + $0x6c] sm:$0xf] %vm9455_vm6, %v3080_v57  ;;  %vm9461_vm6 = vcmask 27648  }
 0x380   : > { %6148 = vmatmul.msk.bf16.gmra.mxu0 %vm9168_vm9, %v6258_v1 }
 0x385   : > { %v3084_v60 = vpop.permute.xlu0 %3083  ;;  %v3088_v6 = vpop.permute.xlu2 %3087  ;;  %v6267_v40 = vld [vmem:[#allocation3 + $0x68] sm:$0xff] }
 0x386   : > { %3151 = vst.msk [vmem:[#allocation3 + $0x74] sm:$0xf] %vm9456_vm8, %v3084_v60  ;;  %vm9463_vm8 = vmmov %vm9461_vm6 }
 0x387   : > { %3153 = vst.msk [vmem:[#allocation3 + $0x7c] sm:$0xf] %vm9457_vm5, %v3088_v6  ;;  %vm9464_vm5 = vmmov %vm9462_vm1 }
 0x38d   : > { %6154 = vmatmul.msk.bf16.gmra.mxu2 %vm9168_vm9, %v6264_v36  ;;  %v6268_v18 = vld [vmem:[#allocation3 + $0x70] sm:$0xff] }
 0x390   : > { %6149 = vmatmul.msk.bf16.gmra.mxu0 %vm9168_vm9, %v6259_v25 }
 0x393   : > { %v3086_v7 = vpop.permute.xlu1 %3085 }
 0x394   : > { %3152 = vst.msk [vmem:[#allocation3 + $0x78] sm:$0xf] %vm9458_vm3, %v3086_v7  ;;  %vm9465_vm3 = vmmov %vm9461_vm6 }
 0x39d   : > { %6155 = vmatmul.msk.bf16.gmra.mxu2 %vm9168_vm9, %v6265_v59 }
 0x3a0   : > { %6150 = vmatmul.msk.bf16.gmra.mxu0 %vm9168_vm9, %v6260_v13 }
 0x3ad   : > { %6156 = vmatmul.msk.bf16.gmra.mxu2 %vm9168_vm9, %v6266_v32 }
 0x3b0   : > { %6151 = vmatmul.msk.bf16.gmra.mxu0 %vm9168_vm9, %v6261_v52  ;;  %v6269_v52 = vld [vmem:[#allocation3 + $0x78] sm:$0xff] }
 0x3bd   : > { %v3352_v0 = vpop.f32.mrf.mxu0  ;;  %6157 = vmatmul.msk.bf16.gmra.mxu2 %vm9168_vm9, %v6267_v40 }
 0x3be   : > { %v3353_v34 = vadd.f32 %v7905_v54, %v3352_v0 }
 0x3c0   : > { %v3432_v53 = vmax.f32 %v3353_v34, 0.0 }
 0x3c2   : > { %3464 = vst.msk [vmem:[#allocation2 + $0x18] sm:$0xff] %vm9459_vm2, %v3432_v53  ;;  %vm9466_vm2 = vmmov %vm9462_vm1 }
 0x3c5   : > { %v3354_v22 = vpop.f32.mrf.mxu0 }
 0x3c6   : > { %v3355_v24 = vadd.f32 %v7905_v54, %v3354_v22 }
 0x3c8   : > { %v3433_v28 = vmax.f32 %v3355_v24, 0.0 }
 0x3c9   : > { %v3626_v61 = vld [vmem:[#allocation2 + $0x18] sm:$0xff] }
 0x3ca   : > { %v7911_v49 = vld [vmem:[#allocation2 + $0x17] sm:$0xff]  ;;  %3465 = vst.msk [vmem:[#allocation2 + $0x20] sm:$0xff] %vm9460_vm15, %v3433_v28  ;;  %v3658_v35 = vpack.c.bf16 %v3626_v61, %v3626_v61  ;;  %vm9467_vm15 = vmmov %vm9465_vm3 }
 0x3cb   : > { %v3530_v14 = vsel %vm6767_vm7, %v7911_v49, 0.0 }
 0x3cc   : > { %v3562_v1 = vpack.c.bf16 %v3530_v14, %v3530_v14  ;;  %3724 = vrot.lane.b32.xlu2 %v3658_v35, %s6415_s11 }
 0x3cd   : > { %v3357_v23 = vpop.f32.mrf.mxu0  ;;  %6158 = vmatmul.msk.bf16.gmra.mxu2 %vm9168_vm9, %v6268_v18 }
 0x3ce   : > { %3594 = vst.msk [vmem:[#allocation3 + $0x8] sm:$0xf] %vm9461_vm6, %v3562_v1  ;;  %v3358_v42 = vadd.f32 %v7905_v54, %v3357_v23  ;;  %vm9468_vm6 = vmmov %vm9462_vm1 }
 0x3d0   : > { %v3434_v36 = vmax.f32 %v3358_v42, 0.0 }
 0x3d1   : > { %v3627_v25 = vld [vmem:[#allocation2 + $0x20] sm:$0xff] }
 0x3d2   : > { %v3499_v15 = vld [vmem:[#allocation2 + $0x1f] sm:$0xff]  ;;  %3466 = vst.msk [vmem:[#allocation2 + $0x28] sm:$0xff] %vm9462_vm1, %v3434_v36  ;;  %v3659_v57 = vpack.c.bf16 %v3627_v25, %v3627_v25  ;;  %vm9469_vm1 = vmmov %vm9465_vm3 }
 0x3d3   : > { %v7922_v59 = vpack.c.bf16 %v3499_v15, %v3499_v15 }
 0x3d4   : > { %3726 = vrot.lane.b32.xlu0 %v3659_v57, %s6415_s11 }
 0x3d5   : > { %3595 = vst.msk [vmem:[#allocation3 + $0xc] sm:$0xf] %vm9463_vm8, %v7922_v59  ;;  %v3359_v13 = vpop.f32.mrf.mxu0  ;;  %vm9470_vm8 = vmmov %vm9466_vm2 }
 0x3d6   : > { %v3360_v17 = vadd.f32 %v7905_v54, %v3359_v13 }
 0x3d8   : > { %v3435_v60 = vmax.f32 %v3360_v17, 0.0 }
 0x3d9   : > { %v3628_v32 = vld [vmem:[#allocation2 + $0x28] sm:$0xff] }
 0x3da   : > { %v7928_v16 = vld [vmem:[#allocation2 + $0x27] sm:$0xff]  ;;  %3467 = vst.msk [vmem:[#allocation2 + $0x30] sm:$0xff] %vm9464_vm5, %v3435_v60  ;;  %v3660_v20 = vpack.c.bf16 %v3628_v32, %v3628_v32  ;;  %vm9471_vm5 = vmmov %vm9469_vm1 }
 0x3db   : > { %v3532_v46 = vsel %vm6793_vm10, %v7928_v16, 0.0 }
 0x3dc   : > { %v3564_v58 = vpack.c.bf16 %v3532_v46, %v3532_v46  ;;  %3728 = vrot.lane.b32.xlu1 %v3660_v20, %s6415_s11 }
 0x3dd   : > { %v3362_v6 = vpop.f32.mrf.mxu0  ;;  %6159 = vmatmul.msk.bf16.gmra.mxu2 %vm9168_vm9, %v6269_v52 }
 0x3de   : > { %3596 = vst.msk [vmem:[#allocation3 + $0x10] sm:$0xf] %vm9465_vm3, %v3564_v58  ;;  %v3363_v7 = vadd.f32 %v7905_v54, %v3362_v6  ;;  %vm9472_vm3 = vmmov %vm9466_vm2 }
 0x3e0   : > { %v3436_v40 = vmax.f32 %v3363_v7, 0.0 }
 0x3e1   : > { %v3629_v0 = vld [vmem:[#allocation2 + $0x30] sm:$0xff] }
 0x3e2   : > { %v3501_v34 = vld [vmem:[#allocation2 + $0x2f] sm:$0xff]  ;;  %3468 = vst.msk [vmem:[#allocation2 + $0x38] sm:$0xff] %vm9466_vm2, %v3436_v40  ;;  %v3661_v53 = vpack.c.bf16 %v3629_v0, %v3629_v0 }
 0x3e3   : > { %v7939_v22 = vpack.c.bf16 %v3501_v34, %v3501_v34 }
 0x3e4   : > { %3730 = vrot.lane.b32.xlu2 %v3661_v53, %s6415_s11 }
 0x3e5   : > { %3597 = vst.msk [vmem:[#allocation3 + $0x14] sm:$0xf] %vm9467_vm15, %v7939_v22  ;;  %v3364_v24 = vpop.f32.mrf.mxu0  ;;  %vm9473_vm15 = vmmov %vm9469_vm1 }
 0x3e6   : > { %v3365_v28 = vadd.f32 %v7905_v54, %v3364_v24 }
 0x3e8   : > { %v3437_v61 = vmax.f32 %v3365_v28, 0.0 }
 0x3e9   : > { %v3630_v18 = vld [vmem:[#allocation2 + $0x38] sm:$0xff] }
 0x3ea   : > { %v7945_v35 = vld [vmem:[#allocation2 + $0x37] sm:$0xff]  ;;  %3469 = vst.msk [vmem:[#allocation2 + $0x40] sm:$0xff] %vm9468_vm6, %v3437_v61  ;;  %v3662_v14 = vpack.c.bf16 %v3630_v18, %v3630_v18  ;;  %vm9474_vm6 = vmmov %vm9466_vm2 }
 0x3eb   : > { %v3534_v1 = vsel %vm6809_vm11, %v7945_v35, 0.0 }
 0x3ec   : > { %v3566_v23 = vpack.c.bf16 %v3534_v1, %v3534_v1  ;;  %3732 = vrot.lane.b32.xlu0 %v3662_v14, %s6415_s11 }
 0x3ed   : > { %v3367_v42 = vpop.f32.mrf.mxu0 }
 0x3ee   : > { %3598 = vst.msk [vmem:[#allocation3 + $0x18] sm:$0xf] %vm9469_vm1, %v3566_v23  ;;  %v3368_v36 = vadd.f32 %v7905_v54, %v3367_v42  ;;  %vm9475_vm1 = vmmov %vm9466_vm2 }
 0x3f0   : > { %v3438_v25 = vmax.f32 %v3368_v36, 0.0  ;;  %v3392_v15 = vpop.f32.mrf.mxu2 }
 0x3f1   : > { %v3631_v57 = vld [vmem:[#allocation2 + $0x40] sm:$0xff]  ;;  %v3393_v17 = vadd.f32 %v7905_v54, %v3392_v15 }
 0x3f2   : > { %v3503_v13 = vld [vmem:[#allocation2 + $0x3f] sm:$0xff]  ;;  %3470 = vst.msk [vmem:[#allocation2 + $0x48] sm:$0xff] %vm9470_vm8, %v3438_v25  ;;  %v3663_v60 = vpack.c.bf16 %v3631_v57, %v3631_v57  ;;  %vm9476_vm8 = vmmov %vm9471_vm5 }
 0x3f3   : > { %v7956_v32 = vpack.c.bf16 %v3503_v13, %v3503_v13  ;;  %v3448_v20 = vmax.f32 %v3393_v17, 0.0 }
 0x3f4   : > { %3734 = vrot.lane.b32.xlu1 %v3663_v60, %s6415_s11 }
 0x3f5   : > { %3599 = vst.msk [vmem:[#allocation3 + $0x1c] sm:$0xf] %vm9471_vm5, %v7956_v32  ;;  %v3369_v52 = vpop.f32.mrf.mxu0  ;;  %vm9477_vm5 = vmmov %vm9475_vm1 }
 0x3f6   : > { %3480 = vst.msk [vmem:[#allocation2 + $0x98] sm:$0xff] %vm9472_vm3, %v3448_v20  ;;  %v3370_v46 = vadd.f32 %v7905_v54, %v3369_v52  ;;  %vm9478_vm3 = vmmov %vm9476_vm8 }
 0x3f8   : > { %v3439_v58 = vmax.f32 %v3370_v46, 0.0  ;;  %v3394_v6 = vpop.f32.mrf.mxu2 }
 0x3f9   : > { %v3632_v7 = vld [vmem:[#allocation2 + $0x48] sm:$0xff]  ;;  %v3395_v0 = vadd.f32 %v7905_v54, %v3394_v6 }
 0x3fa   : > { %v7963_v40 = vld [vmem:[#allocation2 + $0x47] sm:$0xff]  ;;  %3471 = vst.msk [vmem:[#allocation2 + $0x50] sm:$0xff] %vm9466_vm2, %v3439_v58  ;;  %v3664_v34 = vpack.c.bf16 %v3632_v7, %v3632_v7  ;;  %vm9479_vm2 = vmmov %vm9475_vm1 }
 0x3fb   : > { %v3536_v53 = vsel %vm6844_vm13, %v7963_v40, 0.0  ;;  %v3449_v28 = vmax.f32 %v3395_v0, 0.0 }
 0x3fc   : > { %v3568_v24 = vpack.c.bf16 %v3536_v53, %v3536_v53  ;;  %3736 = vrot.lane.b32.xlu2 %v3664_v34, %s6415_s11 }
 0x3fd   : > { %v3372_v61 = vpop.f32.mrf.mxu0  ;;  %3481 = vst.msk [vmem:[#allocation2 + $0xa0] sm:$0xff] %vm9474_vm6, %v3449_v28  ;;  %vm9481_vm6 = vmmov %vm9475_vm1 }
 0x3fe   : > { %3600 = vst.msk [vmem:[#allocation3 + $0x20] sm:$0xf] %vm9473_vm15, %v3568_v24  ;;  %v3373_v18 = vadd.f32 %v7905_v54, %v3372_v61  ;;  %vm9480_vm15 = vmmov %vm9478_vm3 }
 0x400   : > { %v3440_v14 = vmax.f32 %v3373_v18, 0.0  ;;  %v3397_v1 = vpop.f32.mrf.mxu2 }
 0x401   : > { %v3633_v23 = vld [vmem:[#allocation2 + $0x50] sm:$0xff]  ;;  %v3398_v36 = vadd.f32 %v7905_v54, %v3397_v1 }
 0x402   : > { %v3505_v42 = vld [vmem:[#allocation2 + $0x4f] sm:$0xff]  ;;  %3472 = vst.msk [vmem:[#allocation2 + $0x58] sm:$0xff] %vm9475_vm1, %v3440_v14  ;;  %v3665_v25 = vpack.c.bf16 %v3633_v23, %v3633_v23  ;;  %vm9482_vm1 = vmmov %vm9478_vm3 }
 0x403   : > { %v7976_v15 = vpack.c.bf16 %v3505_v42, %v3505_v42  ;;  %v3450_v57 = vmax.f32 %v3398_v36, 0.0 }
 0x404   : > { %3738 = vrot.lane.b32.xlu0 %v3665_v25, %s6415_s11  ;;  %v3515_v17 = vld [vmem:[#allocation2 + $0x9f] sm:$0xff] }
 0x405   : > { %3601 = vst.msk [vmem:[#allocation3 + $0x24] sm:$0xf] %vm9476_vm8, %v7976_v15  ;;  %v3374_v13 = vpop.f32.mrf.mxu0  ;;  %v7983_v20 = vpack.c.bf16 %v3515_v17, %v3515_v17  ;;  %vm9483_vm8 = vmmov %vm9479_vm2 }
 0x406   : > { %3482 = vst.msk [vmem:[#allocation2 + $0xa8] sm:$0xff] %vm9477_vm5, %v3450_v57  ;;  %v3375_v60 = vadd.f32 %v7905_v54, %v3374_v13  ;;  %vm9484_vm5 = vmmov %vm9482_vm1 }
 0x407   : > { %3611 = vst.msk [vmem:[#allocation3 + $0x4c] sm:$0xf] %vm9478_vm3, %v7983_v20  ;;  %vm9485_vm3 = vmmov %vm9479_vm2 }
 0x408   : > { %v3441_v52 = vmax.f32 %v3375_v60, 0.0  ;;  %v3399_v46 = vpop.f32.mrf.mxu2 }
 0x409   : > { %v3634_v58 = vld [vmem:[#allocation2 + $0x58] sm:$0xff]  ;;  %v3400_v7 = vadd.f32 %v7905_v54, %v3399_v46 }
 0x40a   : > { %v7987_v6 = vld [vmem:[#allocation2 + $0x57] sm:$0xff]  ;;  %3473 = vst.msk [vmem:[#allocation2 + $0x60] sm:$0xff] %vm9479_vm2, %v3441_v52  ;;  %v3666_v0 = vpack.c.bf16 %v3634_v58, %v3634_v58  ;;  %vm9487_vm2 = vmmov %vm9482_vm1 }
 0x40b   : > { %v3538_v34 = vsel %vm6871_vm0, %v7987_v6, 0.0  ;;  %v3451_v24 = vmax.f32 %v3400_v7, 0.0 }
 0x40c   : > { %v3570_v53 = vpack.c.bf16 %v3538_v34, %v3538_v34  ;;  %3740 = vrot.lane.b32.xlu1 %v3666_v0, %s6415_s11 }
 0x40d   : > { %v3377_v28 = vpop.f32.mrf.mxu0  ;;  %v7996_v61 = vld [vmem:[#allocation2 + $0xa7] sm:$0xff]  ;;  %3483 = vst.msk [vmem:[#allocation2 + $0xb0] sm:$0xff] %vm9481_vm6, %v3451_v24  ;;  %vm9489_vm6 = vmmov %vm9482_vm1 }
 0x40e   : > { %3602 = vst.msk [vmem:[#allocation3 + $0x28] sm:$0xf] %vm9480_vm15, %v3570_v53  ;;  %v3378_v18 = vadd.f32 %v7905_v54, %v3377_v28  ;;  %v3548_v14 = vsel %vm9331_vm12, %v7996_v61, 0.0  ;;  %vm9488_vm15 = vmmov %vm9485_vm3 }
 0x40f   : > { %v3580_v1 = vpack.c.bf16 %v3548_v14, %v3548_v14 }
 0x410   : > { %v3442_v23 = vmax.f32 %v3378_v18, 0.0  ;;  %v3402_v42 = vpop.f32.mrf.mxu2 }
 0x411   : > { %v3635_v36 = vld [vmem:[#allocation2 + $0x60] sm:$0xff]  ;;  %3612 = vst.msk [vmem:[#allocation3 + $0x50] sm:$0xf] %vm9482_vm1, %v3580_v1  ;;  %v3403_v57 = vadd.f32 %v7905_v54, %v3402_v42  ;;  %vm9490_vm1 = vmmov %vm9485_vm3 }
 0x412   : > { %v3507_v25 = vld [vmem:[#allocation2 + $0x5f] sm:$0xff]  ;;  %3474 = vst.msk [vmem:[#allocation2 + $0x68] sm:$0xff] %vm9483_vm8, %v3442_v23  ;;  %v3667_v13 = vpack.c.bf16 %v3635_v36, %v3635_v36  ;;  %vm9491_vm8 = vcmask 60448  }
 0x413   : > { %v8006_v17 = vpack.c.bf16 %v3507_v25, %v3507_v25  ;;  %v3452_v60 = vmax.f32 %v3403_v57, 0.0 }
 0x414   : > { %3742 = vrot.lane.b32.xlu2 %v3667_v13, %s6415_s11  ;;  %v3517_v46 = vld [vmem:[#allocation2 + $0xaf] sm:$0xff]  ;;  %v3721_v13 = vpop.permute.xlu0 %3720 }
 0x415   : > { %3603 = vst.msk [vmem:[#allocation3 + $0x2c] sm:$0xf] %vm9484_vm5, %v8006_v17  ;;  %v3379_v52 = vpop.f32.mrf.mxu0  ;;  %v8013_v7 = vpack.c.bf16 %v3517_v46, %v3517_v46  ;;  %vm9492_vm5 = vmmov %vm9487_vm2 }
 0x416   : > { %3484 = vst.msk [vmem:[#allocation2 + $0xb8] sm:$0xff] %vm9485_vm3, %v3452_v60  ;;  %v3380_v58 = vadd.f32 %v7905_v54, %v3379_v52  ;;  %vm9493_vm3 = vmmov %vm9490_vm1 }
 0x417   : > { %9486 = vst [vmem:[#allocation20_spill] sm:$0xff] %v8013_v7 }
 0x418   : > { %v3443_v0 = vmax.f32 %v3380_v58, 0.0  ;;  %3613 = vst.msk [vmem:[#allocation3 + $0x54] sm:$0xf] %vm9487_vm2, %v8013_v7  ;;  %v3404_v34 = vpop.f32.mrf.mxu2 }
 0x419   : > { %v3636_v53 = vld [vmem:[#allocation2 + $0x68] sm:$0xff]  ;;  %v3405_v28 = vadd.f32 %v7905_v54, %v3404_v34  ;;  %3816 = vst.msk [vmem:[#allocation3] sm:$0xf] %vm9491_vm8, %v3721_v13 }
 0x41a   : > { %v8017_v24 = vld [vmem:[#allocation2 + $0x67] sm:$0xff]  ;;  %3475 = vst.msk [vmem:[#allocation2 + $0x70] sm:$0xff] %vm9488_vm15, %v3443_v0  ;;  %v3668_v18 = vpack.c.bf16 %v3636_v53, %v3636_v53  ;;  %vm9494_vm15 = vmmov %vm9490_vm1 }
 0x41b   : > { %v3540_v14 = vsel %vm6887_vm4, %v8017_v24, 0.0  ;;  %v3453_v23 = vmax.f32 %v3405_v28, 0.0 }
 0x41c   : > { %v3572_v1 = vpack.c.bf16 %v3540_v14, %v3540_v14  ;;  %3744 = vrot.lane.b32.xlu0 %v3668_v18, %s6415_s11 }
 0x41d   : > { %v3382_v42 = vpop.f32.mrf.mxu0  ;;  %v8026_v36 = vld [vmem:[#allocation2 + $0xb7] sm:$0xff]  ;;  %3485 = vst.msk [vmem:[#allocation2 + $0xc0] sm:$0xff] %vm9490_vm1, %v3453_v23 }
 0x41e   : > { %3604 = vst.msk [vmem:[#allocation3 + $0x30] sm:$0xf] %vm9489_vm6, %v3572_v1  ;;  %v3383_v25 = vadd.f32 %v7905_v54, %v3382_v42  ;;  %v3550_v57 = vsel %vm9395_vm14, %v8026_v36, 0.0  ;;  %vm9496_vm6 = vmmov %vm9491_vm8 }
 0x41f   : > { %v3582_v60 = vpack.c.bf16 %v3550_v57, %v3550_v57  ;;  %v3723_v57 = vpop.permute.xlu1 %3722  ;;  %vm9497_vm1 = vmmov %vm9496_vm6 }
 0x420   : > { %v3444_v52 = vmax.f32 %v3383_v25, 0.0  ;;  %v3407_v46 = vpop.f32.mrf.mxu2  ;;  %3817 = vst.msk [vmem:[#allocation3 + $0x4] sm:$0xf] %vm9497_vm1, %v3723_v57  ;;  %vm9498_vm8 = vmmov %vm9487_vm2 }
 0x421   : > { %v3637_v58 = vld [vmem:[#allocation2 + $0x70] sm:$0xff]  ;;  %3614 = vst.msk [vmem:[#allocation3 + $0x58] sm:$0xf] %vm9492_vm5, %v3582_v60  ;;  %v3408_v34 = vadd.f32 %v7905_v54, %v3407_v46  ;;  %vm9499_vm5 = vmmov %vm9493_vm3 }
 0x422   : > { %v3509_v0 = vld [vmem:[#allocation2 + $0x6f] sm:$0xff]  ;;  %3476 = vst.msk [vmem:[#allocation2 + $0x78] sm:$0xff] %vm9493_vm3, %v3444_v52  ;;  %v3669_v53 = vpack.c.bf16 %v3637_v58, %v3637_v58  ;;  %vm9500_vm3 = vnez %v9243_v37  ;;  %vm9504_vm1 = vmmov %vm9487_vm2 }
 0x423   : > { %v8037_v28 = vpack.c.bf16 %v3509_v0, %v3509_v0  ;;  %v3454_v18 = vmax.f32 %v3408_v34, 0.0 }
 0x424   : > { %3746 = vrot.lane.b32.xlu1 %v3669_v53, %s6415_s11  ;;  %v3519_v1 = vld [vmem:[#allocation2 + $0xbf] sm:$0xff] }
 0x425   : > { %3605 = vst.msk [vmem:[#allocation3 + $0x34] sm:$0xf] %vm9487_vm2, %v8037_v28  ;;  %v3384_v14 = vpop.f32.mrf.mxu0  ;;  %v8044_v25 = vpack.c.bf16 %v3519_v1, %v3519_v1 }
 0x426   : > { %3486 = vst.msk [vmem:[#allocation2 + $0xc8] sm:$0xff] %vm9494_vm15, %v3454_v18  ;;  %v3385_v23 = vadd.f32 %v7905_v54, %v3384_v14  ;;  %v3725_v42 = vpop.permute.xlu2 %3724  ;;  %vm9502_vm15 = vmmov %vm9499_vm5 }
 0x427   : > { %9495 = vst [vmem:[#allocation22_spill] sm:$0xff] %v8044_v25 }
 0x428   : > { %3818 = vst.msk [vmem:[#allocation3 + $0x8] sm:$0xf] %vm9496_vm6, %v3725_v42  ;;  %v3445_v13 = vmax.f32 %v3385_v23, 0.0  ;;  %v3409_v60 = vpop.f32.mrf.mxu2  ;;  %vm9503_vm6 = vnez %v9288_v38 }
 0x429   : > { %v3638_v52 = vld [vmem:[#allocation2 + $0x78] sm:$0xff]  ;;  %3615 = vst.msk [vmem:[#allocation3 + $0x5c] sm:$0xf] %vm9498_vm8, %v8044_v25  ;;  %v3410_v58 = vadd.f32 %v7905_v54, %v3409_v60  ;;  %vm9505_vm8 = vmmov %vm9499_vm5 }
 0x42a   : > { %v8048_v46 = vld [vmem:[#allocation2 + $0x77] sm:$0xff]  ;;  %3477 = vst.msk [vmem:[#allocation2 + $0x80] sm:$0xff] %vm9499_vm5, %v3445_v13  ;;  %v3670_v0 = vpack.c.bf16 %v3638_v52, %v3638_v52  ;;  %vm9506_vm5 = vmmov %vm9504_vm1 }
 0x42b   : > { %v3542_v34 = vsel %vm9500_vm3, %v8048_v46, 0.0  ;;  %v3455_v18 = vmax.f32 %v3410_v58, 0.0  ;;  %vm9516_vm9 = vmmov %vm9506_vm5 }
 0x42c   : > { %v3574_v53 = vpack.c.bf16 %v3542_v34, %v3542_v34  ;;  %3748 = vrot.lane.b32.xlu2 %v3670_v0, %s6415_s11 }
 0x42d   : > { %v3387_v14 = vpop.f32.mrf.mxu0  ;;  %v8059_v1 = vld [vmem:[#allocation2 + $0xc7] sm:$0xff]  ;;  %3487 = vst.msk [vmem:[#allocation2 + $0xd0] sm:$0xff] %vm9502_vm15, %v3455_v18  ;;  %vm9509_vm15 = vmmov %vm9504_vm1 }
 0x42e   : > { %3606 = vst.msk [vmem:[#allocation3 + $0x38] sm:$0xf] %vm9487_vm2, %v3574_v53  ;;  %v3388_v23 = vadd.f32 %v7905_v54, %v3387_v14  ;;  %v3552_v42 = vsel %vm9503_vm6, %v8059_v1, 0.0  ;;  %vm9507_vm2 = vmmov %vm9505_vm8 }
 0x42f   : > { %9501 = vst [vmem:[#allocation8_spill] sm:$0xff] %v8059_v1  ;;  %v3584_v57 = vpack.c.bf16 %v3552_v42, %v3552_v42  ;;  %vm9519_vm6 = vmmov %vm9516_vm9 }
 0x430   : > { %v3446_v13 = vmax.f32 %v3388_v23, 0.0  ;;  %v3412_v60 = vpop.f32.mrf.mxu2 }
 0x431   : > { %v3639_v52 = vld [vmem:[#allocation2 + $0x80] sm:$0xff]  ;;  %3616 = vst.msk [vmem:[#allocation3 + $0x60] sm:$0xf] %vm9504_vm1, %v3584_v57  ;;  %v3413_v0 = vadd.f32 %v7905_v54, %v3412_v60  ;;  %vm9510_vm1 = vmmov %vm9507_vm2 }
 0x432   : > { %v3511_v58 = vld [vmem:[#allocation2 + $0x7f] sm:$0xff]  ;;  %3478 = vst.msk [vmem:[#allocation2 + $0x88] sm:$0xff] %vm9505_vm8, %v3446_v13  ;;  %v3671_v34 = vpack.c.bf16 %v3639_v52, %v3639_v52  ;;  %vm9511_vm8 = vnez %v9256_v2 }
 0x433   : > { %v8069_v53 = vpack.c.bf16 %v3511_v58, %v3511_v58  ;;  %v3456_v18 = vmax.f32 %v3413_v0, 0.0  ;;  %v3642_v13 = vld [vmem:[#allocation2 + $0x98] sm:$0xff] }
 0x434   : > { %3750 = vrot.lane.b32.xlu0 %v3671_v34, %s6415_s11  ;;  %v3521_v23 = vld [vmem:[#allocation2 + $0xcf] sm:$0xff]  ;;  %v3674_v34 = vpack.c.bf16 %v3642_v13, %v3642_v13 }
 0x435   : > { %3607 = vst.msk [vmem:[#allocation3 + $0x3c] sm:$0xf] %vm9506_vm5, %v8069_v53  ;;  %v3389_v14 = vpop.f32.mrf.mxu0  ;;  %v8076_v57 = vpack.c.bf16 %v3521_v23, %v3521_v23 }
 0x436   : > { %3488 = vst.msk [vmem:[#allocation2 + $0xd8] sm:$0xff] %vm9507_vm2, %v3456_v18  ;;  %v3390_v42 = vadd.f32 %v7905_v54, %v3389_v14  ;;  %vm9513_vm2 = vmmov %vm9510_vm1 }
 0x437   : > { %9508 = vst [vmem:[#allocation28_spill] sm:$0xff] %v8076_v57 }
 0x438   : > { %v3447_v38 = vmax.f32 %v3390_v42, 0.0  ;;  %3617 = vst.msk [vmem:[#allocation3 + $0x64] sm:$0xf] %vm9509_vm15, %v8076_v57  ;;  %v3414_v60 = vpop.f32.mrf.mxu2  ;;  %vm9514_vm15 = vnez %v9300_v8 }
 0x439   : > { %v3640_v52 = vld [vmem:[#allocation2 + $0x88] sm:$0xff]  ;;  %v3415_v0 = vadd.f32 %v7905_v54, %v3414_v60  ;;  %v3645_v60 = vld [vmem:[#allocation2 + $0xb0] sm:$0xff] }
 0x43a   : > { %v8080_v58 = vld [vmem:[#allocation2 + $0x87] sm:$0xff]  ;;  %3479 = vst.msk [vmem:[#allocation2 + $0x90] sm:$0xff] %vm9510_vm1, %v3447_v38  ;;  %v3672_v25 = vpack.c.bf16 %v3640_v52, %v3640_v52  ;;  %vm9515_vm1 = vcmask 60448  }
 0x43b   : > { %v3544_v18 = vsel %vm9511_vm8, %v8080_v58, 0.0  ;;  %v3457_v23 = vmax.f32 %v3415_v0, 0.0  ;;  %v3643_v0 = vld [vmem:[#allocation2 + $0xa0] sm:$0xff] }
 0x43c   : > { %v3576_v14 = vpack.c.bf16 %v3544_v18, %v3544_v18  ;;  %3756 = vrot.lane.b32.xlu0 %v3674_v34, %s6415_s11  ;;  %3752 = vrot.lane.b32.xlu1 %v3672_v25, %s6415_s11  ;;  %v3675_v1 = vpack.c.bf16 %v3643_v0, %v3643_v0 }
 0x43d   : > { %v8090_v42 = vld [vmem:[#allocation2 + $0xd7] sm:$0xff]  ;;  %3489 = vst.msk [vmem:[#allocation2 + $0xe0] sm:$0xff] %vm9513_vm2, %v3457_v23 }
 0x43e   : > { %3608 = vst.msk [vmem:[#allocation3 + $0x40] sm:$0xf] %vm9506_vm5, %v3576_v14  ;;  %v3731_v38 = vpop.permute.xlu2 %3730  ;;  %v3554_v13 = vsel %vm9514_vm15, %v8090_v42, 0.0  ;;  %v3677_v14 = vpack.c.bf16 %v3645_v60, %v3645_v60  ;;  %vm9517_vm5 = vnez %v9260_v30  ;;  %vm9520_vm15 = vmmov %vm9519_vm6 }
 0x43f   : > { %9512 = vst [vmem:[#allocation29_spill] sm:$0xff] %v8090_v42  ;;  %v3586_v52 = vpack.c.bf16 %v3554_v13, %v3554_v13 }
 0x440   : > { %3821 = vst.msk [vmem:[#allocation3 + $0x14] sm:$0xf] %vm9515_vm1, %v3731_v38  ;;  %v3417_v18 = vpop.f32.mrf.mxu2 }
 0x441   : > { %v3641_v34 = vld [vmem:[#allocation2 + $0x90] sm:$0xff]  ;;  %3618 = vst.msk [vmem:[#allocation3 + $0x68] sm:$0xf] %vm9516_vm9, %v3586_v52  ;;  %v3418_v25 = vadd.f32 %v7905_v54, %v3417_v18  ;;  %v3648_v18 = vld [vmem:[#allocation2 + $0xc8] sm:$0xff] }
 0x442   : > { %v3673_v57 = vpack.c.bf16 %v3641_v34, %v3641_v34  ;;  %v3513_v56 = vld [vmem:[#allocation2 + $0x8f] sm:$0xff]  ;;  %v8099_v23 = vld [vmem:[#allocation2 + $0x97] sm:$0xff] }
 0x443   : > { %v8101_v7 = vpack.c.bf16 %v3513_v56, %v3513_v56  ;;  %v3546_v38 = vsel %vm9517_vm5, %v8099_v23, 0.0  ;;  %v3458_v13 = vmax.f32 %v3418_v25, 0.0  ;;  %v3644_v34 = vld [vmem:[#allocation2 + $0xa8] sm:$0xff]  ;;  %v3646_v25 = vld [vmem:[#allocation2 + $0xb8] sm:$0xff] }
 0x444   : > { %3762 = vrot.lane.b32.xlu0 %v3677_v14, %s6415_s11  ;;  %3754 = vrot.lane.b32.xlu2 %v3673_v57, %s6415_s11  ;;  %v3578_v52 = vpack.c.bf16 %v3546_v38, %v3546_v38  ;;  %v3523_v60 = vld [vmem:[#allocation2 + $0xdf] sm:$0xff]  ;;  %v3680_v14 = vpack.c.bf16 %v3648_v18, %v3648_v18  ;;  %v3676_v38 = vpack.c.bf16 %v3644_v34, %v3644_v34 }
 0x445   : > { %3758 = vrot.lane.b32.xlu1 %v3675_v1, %s6415_s11  ;;  %3609 = vst.msk [vmem:[#allocation3 + $0x44] sm:$0xf] %vm9516_vm9, %v8101_v7  ;;  %v8112_v0 = vpack.c.bf16 %v3523_v60, %v3523_v60  ;;  %v3678_v42 = vpack.c.bf16 %v3646_v25, %v3646_v25  ;;  %vm9521_vm9 = vmmov %vm9513_vm2  ;;  %v3651_v18 = vld [vmem:[#allocation2 + $0xe0] sm:$0xff] }
 0x446   : > { %3490 = vst.msk [vmem:[#allocation2 + $0xe8] sm:$0xff] %vm9513_vm2, %v3458_v13  ;;  %v3727_v56 = vpop.permute.xlu0 %3726  ;;  %v3647_v34 = vld [vmem:[#allocation2 + $0xc0] sm:$0xff]  ;;  %vm9524_vm2 = vcmask 27648  }
 0x447   : > { %9518 = vst [vmem:[#allocation30_spill] sm:$0xff] %v8112_v0 }
 0x448   : > { %3819 = vst.msk [vmem:[#allocation3 + $0xc] sm:$0xf] %vm9515_vm1, %v3727_v56  ;;  %v3419_v57 = vpop.f32.mrf.mxu2 }
 0x449   : > { %3610 = vst.msk [vmem:[#allocation3 + $0x48] sm:$0xf] %vm9519_vm6, %v3578_v52  ;;  %v3420_v1 = vadd.f32 %v7905_v54, %v3419_v57  ;;  %vm9522_vm6 = vnez %v9309_v11  ;;  %v3649_v57 = vld [vmem:[#allocation2 + $0xd0] sm:$0xff] }
 0x44a   : > { %3619 = vst.msk [vmem:[#allocation3 + $0x6c] sm:$0xf] %vm9520_vm15, %v8112_v0  ;;  %vm9523_vm15 = vmmov %vm9515_vm1  ;;  %v3681_v0 = vpack.c.bf16 %v3649_v57, %v3649_v57 }
 0x44b   : > { %v3459_v13 = vmax.f32 %v3420_v1, 0.0  ;;  %vm9525_vm1 = vmmov %vm9521_vm9 }
 0x44c   : > { %3768 = vrot.lane.b32.xlu0 %v3680_v14, %s6415_s11  ;;  %3760 = vrot.lane.b32.xlu2 %v3676_v38, %s6415_s11  ;;  %v3683_v14 = vpack.c.bf16 %v3651_v18, %v3651_v18  ;;  %v3679_v38 = vpack.c.bf16 %v3647_v34, %v3647_v34 }
 0x44d   : > { %3764 = vrot.lane.b32.xlu1 %v3678_v42, %s6415_s11  ;;  %v8122_v60 = vld [vmem:[#allocation2 + $0xe7] sm:$0xff]  ;;  %3491 = vst.msk [vmem:[#allocation2 + $0xf0] sm:$0xff] %vm9521_vm9, %v3459_v13  ;;  %vm9527_vm9 = vmmov %vm9523_vm15 }
 0x44e   : > { %v3729_v52 = vpop.permute.xlu1 %3728  ;;  %v3556_v56 = vsel %vm9522_vm6, %v8122_v60, 0.0  ;;  %vm9557_vm6 = vnez %v9442_v31  ;;  %v4594_v31 = vld [vmem:[#allocation2 + $0x69] sm:$0xff] }
 0x44f   : > { %3820 = vst.msk [vmem:[#allocation3 + $0x10] sm:$0xf] %vm9523_vm15, %v3729_v52  ;;  %v3588_v25 = vpack.c.bf16 %v3556_v56, %v3556_v56  ;;  %vm9528_vm15 = vmmov %vm9524_vm2 }
 0x450   : > { %v3422_v1 = vpop.f32.mrf.mxu2 }
 0x451   : > { %3620 = vst.msk [vmem:[#allocation3 + $0x70] sm:$0xf] %vm9524_vm2, %v3588_v25  ;;  %v3423_v42 = vadd.f32 %v7905_v54, %v3422_v1  ;;  %v3650_v25 = vld [vmem:[#allocation2 + $0xd8] sm:$0xff]  ;;  %v3652_v1 = vld [vmem:[#allocation2 + $0xe8] sm:$0xff]  ;;  %vm9530_vm2 = vmmov %vm9525_vm1 }
 0x452   : > { %v3682_v57 = vpack.c.bf16 %v3650_v25, %v3650_v25 }
 0x453   : > { %v3460_v13 = vmax.f32 %v3423_v42, 0.0  ;;  %v3684_v42 = vpack.c.bf16 %v3652_v1, %v3652_v1 }
 0x454   : > { %3774 = vrot.lane.b32.xlu0 %v3683_v14, %s6415_s11  ;;  %3766 = vrot.lane.b32.xlu2 %v3679_v38, %s6415_s11  ;;  %v3525_v52 = vld [vmem:[#allocation2 + $0xef] sm:$0xff] }
 0x455   : > { %3770 = vrot.lane.b32.xlu1 %v3681_v0, %s6415_s11  ;;  %3492 = vst.msk [vmem:[#allocation2 + $0xf8] sm:$0xff] %vm9525_vm1, %v3460_v13  ;;  %v8135_v11 = vpack.c.bf16 %v3525_v52, %v3525_v52  ;;  %vm9531_vm1 = vnez %v9318_v3  ;;  %v3653_v25 = vld [vmem:[#allocation2 + $0xf0] sm:$0xff] }
 0x456   : > { %v3737_v56 = vpop.permute.xlu2 %3736 }
 0x457   : > { %9526 = vst [vmem:[#allocation31_spill] sm:$0xff] %v8135_v11 }
 0x458   : > { %3824 = vst.msk [vmem:[#allocation3 + $0x20] sm:$0xf] %vm9527_vm9, %v3737_v56  ;;  %v3424_v18 = vpop.f32.mrf.mxu2 }
 0x459   : > { %3621 = vst.msk [vmem:[#allocation3 + $0x74] sm:$0xf] %vm9528_vm15, %v8135_v11  ;;  %v3425_v34 = vadd.f32 %v7905_v54, %v3424_v18  ;;  %v3849_v18 = vld [vmem:[#allocation2 + $0x11] sm:$0xff]  ;;  %v3848_v11 = vld [vmem:[#allocation2 + $0x9] sm:$0xff] }
 0x45b   : > { %v3461_v14 = vmax.f32 %v3425_v34, 0.0 }
 0x45c   : > { %3772 = vrot.lane.b32.xlu2 %v3682_v57, %s6415_s11  ;;  %v3654_v0 = vld [vmem:[#allocation2 + $0xf8] sm:$0xff] }
 0x45d   : > { %3776 = vrot.lane.b32.xlu1 %v3684_v42, %s6415_s11  ;;  %v8143_v38 = vld [vmem:[#allocation2 + $0xf7] sm:$0xff]  ;;  %3493 = vst.msk [vmem:[#allocation2 + $0x100] sm:$0xff] %vm9530_vm2, %v3461_v14  ;;  %v3686_v52 = vpack.c.bf16 %v3654_v0, %v3654_v0  ;;  %v3685_v42 = vpack.c.bf16 %v3653_v25, %v3653_v25  ;;  %vm9532_vm2 = vnez %v9202_v39  ;;  %v3912_v25 = vpack.c.bf16 %v3848_v11, %v3848_v11  ;;  %v3855_v11 = vld [vmem:[#allocation2 + $0x41] sm:$0xff] }
 0x45e   : > { %9529 = vst [vmem:[#allocation32_spill] sm:$0xff] %v8143_v38  ;;  %v3733_v13 = vpop.permute.xlu0 %3732  ;;  %v3558_v56 = vsel %vm9531_vm1, %v8143_v38, 0.0  ;;  %v3881_v14 = vsel %vm9532_vm2, %v3849_v18, 0.0  ;;  %vm9535_vm2 = vcmask 27648   ;;  %v3850_v18 = vld [vmem:[#allocation2 + $0x19] sm:$0xff]  ;;  %vm9539_vm1 = vnez %v9210_v21 }
 0x45f   : > { %3822 = vst.msk [vmem:[#allocation3 + $0x18] sm:$0xf] %vm9527_vm9, %v3733_v13  ;;  %v3590_v1 = vpack.c.bf16 %v3558_v56, %v3558_v56  ;;  %3780 = vrot.lane.b32.xlu0 %v3686_v52, %s6415_s11  ;;  %vm9533_vm9 = vcmask 31744   ;;  %v3913_v52 = vpack.c.bf16 %v3881_v14, %v3881_v14 }
 0x460   : > { %v3427_v34 = vpop.f32.mrf.mxu2 }
 0x461   : > { %3622 = vst.msk [vmem:[#allocation3 + $0x78] sm:$0xf] %vm9528_vm15, %v3590_v1  ;;  %v3428_v57 = vadd.f32 %v7905_v54, %v3427_v34  ;;  %vm9534_vm15 = vcmask 60448   ;;  %v3852_v1 = vld [vmem:[#allocation2 + $0x29] sm:$0xff]  ;;  %v3851_v34 = vld [vmem:[#allocation2 + $0x21] sm:$0xff] }
 0x463   : > { %v3462_v0 = vmax.f32 %v3428_v57, 0.0 }
 0x464   : > { %3778 = vrot.lane.b32.xlu2 %v3685_v42, %s6415_s11  ;;  %v3655_v3 = vld [vmem:[#allocation2 + $0x100] sm:$0xff]  ;;  %v3916_v42 = vpack.c.bf16 %v3852_v1, %v3852_v1 }
 0x465   : > { %v3527_v13 = vld [vmem:[#allocation2 + $0xff] sm:$0xff]  ;;  %3494 = vst.msk [vmem:[#allocation2 + $0x108] sm:$0xff] %vm9533_vm9, %v3462_v0  ;;  %v3687_v38 = vpack.c.bf16 %v3655_v3, %v3655_v3  ;;  %v3914_v3 = vpack.c.bf16 %v3850_v18, %v3850_v18  ;;  %vm9536_vm9 = vmmov %vm9534_vm15 }
 0x466   : > { %v3735_v56 = vpop.permute.xlu1 %3734  ;;  %v8157_v8 = vpack.c.bf16 %v3527_v13, %v3527_v13  ;;  %v3854_v18 = vld [vmem:[#allocation2 + $0x39] sm:$0xff] }
 0x467   : > { %3823 = vst.msk [vmem:[#allocation3 + $0x1c] sm:$0xf] %vm9534_vm15, %v3735_v56  ;;  %3978 = vrot.lane.b32.xlu0 %v3913_v52, %s6416_s12  ;;  %3782 = vrot.lane.b32.xlu1 %v3687_v38, %s6415_s11  ;;  %vm9537_vm15 = vnez %v9206_v50  ;;  %v3853_v38 = vld [vmem:[#allocation2 + $0x31] sm:$0xff] }
 0x468   : > { %3623 = vst.msk [vmem:[#allocation3 + $0x7c] sm:$0xf] %vm9535_vm2, %v8157_v8  ;;  %v3883_v14 = vsel %vm9537_vm15, %v3851_v34, 0.0  ;;  %vm9538_vm2 = vnez %v9212_v45  ;;  %v3885_v56 = vsel %vm9539_vm1, %v3853_v38, 0.0  ;;  %v3918_v34 = vpack.c.bf16 %v3854_v18, %v3854_v18  ;;  %vm9540_vm1 = vmmov %vm9536_vm9 }
 0x469   : > { %v3915_v0 = vpack.c.bf16 %v3883_v14, %v3883_v14  ;;  %v3887_v13 = vsel %vm9538_vm2, %v3855_v11, 0.0  ;;  %v3917_v1 = vpack.c.bf16 %v3885_v56, %v3885_v56  ;;  %vm9541_vm2 = vnez %v9404_v12  ;;  %v3859_v56 = vld [vmem:[#allocation2 + $0x61] sm:$0xff] }
 0x46a   : > { %vm9543_vm15 = vnez %v9408_v62 }
 0x46c   : > { %3976 = vrot.lane.b32.xlu2 %v3912_v25, %s6416_s12  ;;  %v3919_v25 = vpack.c.bf16 %v3887_v13, %v3887_v13  ;;  %v3861_v13 = vld [vmem:[#allocation2 + $0x71] sm:$0xff] }
 0x46e   : > { %v3743_v57 = vpop.permute.xlu2 %3742 }
 0x46f   : > { %3827 = vst.msk [vmem:[#allocation3 + $0x2c] sm:$0xf] %vm9536_vm9, %v3743_v57  ;;  %3984 = vrot.lane.b32.xlu0 %v3916_v42, %s6416_s12  ;;  %3980 = vrot.lane.b32.xlu1 %v3914_v3, %s6416_s12  ;;  %v3858_v57 = vld [vmem:[#allocation2 + $0x59] sm:$0xff]  ;;  %v3856_v42 = vld [vmem:[#allocation2 + $0x49] sm:$0xff]  ;;  %v3857_v3 = vld [vmem:[#allocation2 + $0x51] sm:$0xff] }
 0x470   : > { %v3922_v11 = vpack.c.bf16 %v3858_v57, %v3858_v57  ;;  %v3920_v38 = vpack.c.bf16 %v3856_v42, %v3856_v42  ;;  %v3860_v42 = vld [vmem:[#allocation2 + $0x69] sm:$0xff] }
 0x474   : > { %3982 = vrot.lane.b32.xlu2 %v3915_v0, %s6416_s12  ;;  %v3889_v0 = vsel %vm9541_vm2, %v3857_v3, 0.0  ;;  %v3429_v3 = vpop.f32.mrf.mxu2  ;;  %vm9546_vm2 = vnez %v9422_v51 }
 0x476   : > { %v3739_v52 = vpop.permute.xlu0 %3738 }
 0x477   : > { %3825 = vst.msk [vmem:[#allocation3 + $0x24] sm:$0xf] %vm9536_vm9, %v3739_v52  ;;  %3990 = vrot.lane.b32.xlu0 %v3919_v25, %s6416_s12  ;;  %3986 = vrot.lane.b32.xlu1 %v3917_v1, %s6416_s12  ;;  %v3921_v52 = vpack.c.bf16 %v3889_v0, %v3889_v0  ;;  %vm9542_vm9 = vnez %v9410_v10  ;;  %v3891_v1 = vsel %vm9543_vm15, %v3859_v56, 0.0  ;;  %v3862_v0 = vld [vmem:[#allocation2 + $0x79] sm:$0xff]  ;;  %v3863_v56 = vld [vmem:[#allocation2 + $0x81] sm:$0xff]  ;;  %vm9544_vm15 = vcmask 31744  }
 0x478   : > { %v3893_v25 = vsel %vm9542_vm9, %v3861_v13, 0.0  ;;  %v3923_v57 = vpack.c.bf16 %v3891_v1, %v3891_v1  ;;  %v3926_v1 = vpack.c.bf16 %v3862_v0, %v3862_v0  ;;  %vm9545_vm9 = vnez %v9414_v55  ;;  %v3866_v0 = vld [vmem:[#allocation2 + $0x99] sm:$0xff] }
 0x47c   : > { %3988 = vrot.lane.b32.xlu2 %v3918_v34, %s6416_s12  ;;  %v3925_v34 = vpack.c.bf16 %v3893_v25, %v3893_v25 }
 0x47e   : > { %v3741_v14 = vpop.permute.xlu1 %3740 }
 0x47f   : > { %3826 = vst.msk [vmem:[#allocation3 + $0x28] sm:$0xf] %vm9540_vm1, %v3741_v14  ;;  %3996 = vrot.lane.b32.xlu0 %v3922_v11, %s6416_s12  ;;  %3992 = vrot.lane.b32.xlu1 %v3920_v38, %s6416_s12  ;;  %v3430_v14 = vadd.f32 %v7905_v54, %v3429_v3  ;;  %v3924_v11 = vpack.c.bf16 %v3860_v42, %v3860_v42  ;;  %v3864_v38 = vld [vmem:[#allocation2 + $0x89] sm:$0xff]  ;;  %v3867_v54 = vld [vmem:[#allocation2 + $0xa1] sm:$0xff] }
 0x480   : > { %v3928_v25 = vpack.c.bf16 %v3864_v38, %v3864_v38  ;;  %v3899_v42 = vsel %vm9546_vm2, %v3867_v54, 0.0  ;;  %vm9549_vm2 = vnez %v9420_v26 }
 0x481   : > { %v3463_v13 = vmax.f32 %v3430_v14, 0.0 }
 0x483   : > { %3495 = vst.msk [vmem:[#allocation2 + $0x110] sm:$0xff] %vm9544_vm15, %v3463_v13  ;;  %vm9547_vm15 = vnez %v9418_v41  ;;  %v3930_v13 = vpack.c.bf16 %v3866_v0, %v3866_v0 }
 0x484   : > { %3994 = vrot.lane.b32.xlu2 %v3921_v52, %s6416_s12 }
 0x486   : > { %v3749_v18 = vpop.permute.xlu2 %3748 }
 0x487   : > { %3830 = vst.msk [vmem:[#allocation3 + $0x38] sm:$0xf] %vm9540_vm1, %v3749_v18  ;;  %4002 = vrot.lane.b32.xlu0 %v3925_v34, %s6416_s12  ;;  %3998 = vrot.lane.b32.xlu1 %v3923_v57, %s6416_s12  ;;  %v3895_v18 = vsel %vm9545_vm9, %v3863_v56, 0.0  ;;  %v3865_v34 = vld [vmem:[#allocation2 + $0x91] sm:$0xff]  ;;  %v3870_v56 = vld [vmem:[#allocation2 + $0xb9] sm:$0xff]  ;;  %vm9551_vm9 = vnez %v9425_v43 }
 0x488   : > { %v3927_v57 = vpack.c.bf16 %v3895_v18, %v3895_v18  ;;  %v3897_v3 = vsel %vm9547_vm15, %v3865_v34, 0.0  ;;  %v3934_v18 = vpack.c.bf16 %v3870_v56, %v3870_v56  ;;  %vm9548_vm15 = vmmov %vm9540_vm1 }
 0x489   : > { %v3929_v38 = vpack.c.bf16 %v3897_v3, %v3897_v3 }
 0x48c   : > { %4000 = vrot.lane.b32.xlu2 %v3924_v11, %s6416_s12  ;;  %v3931_v11 = vpack.c.bf16 %v3899_v42, %v3899_v42  ;;  %v3871_v42 = vld [vmem:[#allocation2 + $0xc1] sm:$0xff] }
 0x48e   : > { %v3745_v52 = vpop.permute.xlu0 %3744 }
 0x48f   : > { %3828 = vst.msk [vmem:[#allocation3 + $0x30] sm:$0xf] %vm9540_vm1, %v3745_v52  ;;  %4008 = vrot.lane.b32.xlu0 %v3928_v25, %s6416_s12  ;;  %4004 = vrot.lane.b32.xlu1 %v3926_v1, %s6416_s12  ;;  %v3868_v52 = vld [vmem:[#allocation2 + $0xa9] sm:$0xff]  ;;  %v3869_v25 = vld [vmem:[#allocation2 + $0xb1] sm:$0xff] }
 0x490   : > { %v3932_v54 = vpack.c.bf16 %v3868_v52, %v3868_v52  ;;  %v3901_v34 = vsel %vm9549_vm2, %v3869_v25, 0.0  ;;  %v3872_v52 = vld [vmem:[#allocation2 + $0xc9] sm:$0xff]  ;;  %vm9552_vm2 = vmmov %vm9548_vm15 }
 0x491   : > { %v3933_v3 = vpack.c.bf16 %v3901_v34, %v3901_v34  ;;  %v3936_v25 = vpack.c.bf16 %v3872_v52, %v3872_v52 }
 0x494   : > { %4006 = vrot.lane.b32.xlu2 %v3927_v57, %s6416_s12  ;;  %v3873_v57 = vld [vmem:[#allocation2 + $0xd1] sm:$0xff] }
 0x496   : > { %v3747_v14 = vpop.permute.xlu1 %3746 }
 0x497   : > { %3829 = vst.msk [vmem:[#allocation3 + $0x34] sm:$0xf] %vm9540_vm1, %v3747_v14  ;;  %4014 = vrot.lane.b32.xlu0 %v3931_v11, %s6416_s12  ;;  %4010 = vrot.lane.b32.xlu1 %v3929_v38, %s6416_s12  ;;  %vm9550_vm1 = vnez %v9376_v19  ;;  %v3903_v11 = vsel %vm9551_vm9, %v3871_v42, 0.0 }
 0x498   : > { %v3905_v14 = vsel %vm9550_vm1, %v3873_v57, 0.0  ;;  %v3935_v56 = vpack.c.bf16 %v3903_v11, %v3903_v11  ;;  %vm9553_vm1 = vmmov %vm9552_vm2 }
 0x499   : > { %vm9556_vm9 = vmmov %vm9553_vm1 }
 0x49c   : > { %4012 = vrot.lane.b32.xlu2 %v3930_v13, %s6416_s12  ;;  %v3937_v13 = vpack.c.bf16 %v3905_v14, %v3905_v14 }
 0x49e   : > { %v3755_v1 = vpop.permute.xlu2 %3754 }
 0x49f   : > { %3833 = vst.msk [vmem:[#allocation3 + $0x44] sm:$0xf] %vm9548_vm15, %v3755_v1  ;;  %4020 = vrot.lane.b32.xlu0 %v3934_v18, %s6416_s12  ;;  %4016 = vrot.lane.b32.xlu1 %v3932_v54, %s6416_s12  ;;  %v3876_v1 = vld [vmem:[#allocation2 + $0xe9] sm:$0xff]  ;;  %v3874_v18 = vld [vmem:[#allocation2 + $0xd9] sm:$0xff]  ;;  %v3875_v54 = vld [vmem:[#allocation2 + $0xe1] sm:$0xff] }
 0x4a0   : > { %v3940_v42 = vpack.c.bf16 %v3876_v1, %v3876_v1 }
 0x4a4   : > { %4018 = vrot.lane.b32.xlu2 %v3933_v3, %s6416_s12  ;;  %v3938_v3 = vpack.c.bf16 %v3874_v18, %v3874_v18 }
 0x4a6   : > { %v3751_v38 = vpop.permute.xlu0 %3750  ;;  %v3761_v0 = vpop.permute.xlu2 %3760 }
 0x4a7   : > { %3831 = vst.msk [vmem:[#allocation3 + $0x3c] sm:$0xf] %vm9548_vm15, %v3751_v38  ;;  %4026 = vrot.lane.b32.xlu0 %v3937_v13, %s6416_s12  ;;  %4022 = vrot.lane.b32.xlu1 %v3935_v56, %s6416_s12  ;;  %vm9554_vm15 = vnez %v9379_v44  ;;  %v3879_v38 = vld [vmem:[#allocation2 + $0x101] sm:$0xff] }
 0x4a8   : > { %3836 = vst.msk [vmem:[#allocation3 + $0x50] sm:$0xf] %vm9552_vm2, %v3761_v0  ;;  %v3907_v11 = vsel %vm9554_vm15, %v3875_v54, 0.0  ;;  %vm9555_vm2 = vmmov %vm9553_vm1  ;;  %v3877_v0 = vld [vmem:[#allocation2 + $0xf1] sm:$0xff]  ;;  %v3911_v56 = vsel %vm9557_vm6, %v3879_v38, 0.0  ;;  %vm9561_vm6 = vnez %v9204_v4 }
 0x4a9   : > { %v3939_v13 = vpack.c.bf16 %v3907_v11, %v3907_v11  ;;  %v3943_v18 = vpack.c.bf16 %v3911_v56, %v3911_v56  ;;  %vm9559_vm15 = vmmov %vm9555_vm2 }
 0x4ac   : > { %4024 = vrot.lane.b32.xlu2 %v3936_v25, %s6416_s12 }
 0x4ae   : > { %v3757_v34 = vpop.permute.xlu0 %3756  ;;  %v3767_v57 = vpop.permute.xlu2 %3766 }
 0x4af   : > { %3834 = vst.msk [vmem:[#allocation3 + $0x48] sm:$0xf] %vm9553_vm1, %v3757_v34  ;;  %v3753_v14 = vpop.permute.xlu1 %3752  ;;  %4032 = vrot.lane.b32.xlu0 %v3940_v42, %s6416_s12  ;;  %4028 = vrot.lane.b32.xlu1 %v3938_v3, %s6416_s12  ;;  %vm9558_vm1 = vnez %v9432_v9  ;;  %v4138_v3 = vsel %vm6767_vm7, %v7928_v16, 0.0 }
 0x4b0   : > { %3839 = vst.msk [vmem:[#allocation3 + $0x5c] sm:$0xf] %vm9555_vm2, %v3767_v57  ;;  %v3909_v52 = vsel %vm9558_vm1, %v3877_v0, 0.0  ;;  %v3878_v57 = vld [vmem:[#allocation2 + $0xf9] sm:$0xff]  ;;  %v4170_v0 = vpack.c.bf16 %v4138_v3, %v4138_v3  ;;  %vm9564_vm1 = vmmov %vm9555_vm2 }
 0x4b1   : > { %3832 = vst.msk [vmem:[#allocation3 + $0x40] sm:$0xf] %vm9556_vm9, %v3753_v14  ;;  %v3941_v54 = vpack.c.bf16 %v3909_v52, %v3909_v52  ;;  %vm9560_vm9 = vmmov %vm9555_vm2  ;;  %v3942_v42 = vpack.c.bf16 %v3878_v57, %v3878_v57  ;;  %v4136_v14 = vsel %vm9561_vm6, %v7911_v49, 0.0 }
 0x4b4   : > { %4030 = vrot.lane.b32.xlu2 %v3939_v13, %s6416_s12  ;;  %v4168_v13 = vpack.c.bf16 %v4136_v14, %v4136_v14  ;;  %v4148_v14 = vsel %vm6887_vm4, %v8048_v46, 0.0 }
 0x4b6   : > { %v3763_v25 = vpop.permute.xlu0 %3762  ;;  %v3773_v1 = vpop.permute.xlu2 %3772 }
 0x4b7   : > { %3837 = vst.msk [vmem:[#allocation3 + $0x54] sm:$0xf] %vm9555_vm2, %v3763_v25  ;;  %v3759_v34 = vpop.permute.xlu1 %3758  ;;  %4038 = vrot.lane.b32.xlu0 %v3943_v18, %s6416_s12  ;;  %4034 = vrot.lane.b32.xlu1 %v3941_v54, %s6416_s12  ;;  %v4140_v25 = vsel %vm6793_vm10, %v7945_v35, 0.0  ;;  %v4142_v18 = vsel %vm6809_vm11, %v7963_v40, 0.0  ;;  %vm9650_vm11 = vnez %v9420_v26 }
 0x4b8   : > { %3842 = vst.msk [vmem:[#allocation3 + $0x68] sm:$0xf] %vm9559_vm15, %v3773_v1  ;;  %vm9562_vm15 = vmmov %vm9555_vm2  ;;  %v4144_v1 = vsel %vm6844_vm13, %v7987_v6, 0.0  ;;  %v4146_v6 = vsel %vm6871_vm0, %v8017_v24, 0.0  ;;  %vm9631_vm13 = vcmask 158848  }
 0x4b9   : > { %3835 = vst.msk [vmem:[#allocation3 + $0x4c] sm:$0xf] %vm9560_vm9, %v3759_v34  ;;  %vm9563_vm9 = vmmov %vm9555_vm2  ;;  %v4176_v54 = vpack.c.bf16 %v4144_v1, %v4144_v1  ;;  %v4174_v34 = vpack.c.bf16 %v4142_v18, %v4142_v18  ;;  %v9582_v18 = vld [vmem:[#allocation28_spill] sm:$0xff] }
 0x4bc   : > { %4036 = vrot.lane.b32.xlu2 %v3942_v42, %s6416_s12  ;;  %v4178_v42 = vpack.c.bf16 %v4146_v6, %v4146_v6  ;;  %v9586_v6 = vld [vmem:[#allocation29_spill] sm:$0xff] }
 0x4be   : > { %v3769_v11 = vpop.permute.xlu0 %3768  ;;  %v3779_v38 = vpop.permute.xlu2 %3778 }
 0x4bf   : > { %3840 = vst.msk [vmem:[#allocation3 + $0x60] sm:$0xf] %vm9562_vm15, %v3769_v11  ;;  %v3765_v56 = vpop.permute.xlu1 %3764  ;;  %4236 = vrot.lane.b32.xlu0 %v4170_v0, %s6417_s13  ;;  %4232 = vrot.lane.b32.xlu1 %v4168_v13, %s6417_s13  ;;  %vm9565_vm15 = vcmask 93248  }
 0x4c0   : > { %3845 = vst.msk [vmem:[#allocation3 + $0x74] sm:$0xf] %vm9555_vm2, %v3779_v38  ;;  %vm9566_vm2 = vmmov %vm9564_vm1 }
 0x4c1   : > { %3838 = vst.msk [vmem:[#allocation3 + $0x58] sm:$0xf] %vm9563_vm9, %v3765_v56  ;;  %vm9568_vm9 = vmmov %vm9566_vm2 }
 0x4c4   : > { %4234 = vrot.lane.b32.xlu2 %v7922_v59, %s6417_s13  ;;  %v4172_v59 = vpack.c.bf16 %v4140_v25, %v4140_v25  ;;  %v9580_v25 = vld [vmem:[#allocation8_spill] sm:$0xff] }
 0x4c5   : > { %v4158_v1 = vsel %vm9395_vm14, %v9580_v25, 0.0 }
 0x4c6   : > { %v3775_v49 = vpop.permute.xlu0 %3774  ;;  %v3977_v16 = vpop.permute.xlu2 %3976 }
 0x4c7   : > { %3843 = vst.msk [vmem:[#allocation3 + $0x6c] sm:$0xf] %vm9564_vm1, %v3775_v49  ;;  %v3771_v52 = vpop.permute.xlu1 %3770  ;;  %4242 = vrot.lane.b32.xlu0 %v7956_v32, %s6417_s13  ;;  %4238 = vrot.lane.b32.xlu1 %v7939_v22, %s6417_s13  ;;  %vm9567_vm1 = vmmov %vm9565_vm15  ;;  %v4154_v49 = vsel %vm9517_vm5, %v7996_v61, 0.0 }
 0x4c8   : > { %4072 = vst.msk [vmem:[#allocation3] sm:$0xf] %vm9565_vm15, %v3977_v16  ;;  %vm9569_vm15 = vmmov %vm9566_vm2 }
 0x4c9   : > { %3841 = vst.msk [vmem:[#allocation3 + $0x64] sm:$0xf] %vm9566_vm2, %v3771_v52  ;;  %vm9570_vm2 = vmmov %vm9567_vm1 }
 0x4ca   : > { %vm9592_vm4 = vmmov %vm9567_vm1 }
 0x4cc   : > { %4240 = vrot.lane.b32.xlu2 %v4172_v59, %s6417_s13 }
 0x4ce   : > { %v3983_v35 = vpop.permute.xlu2 %3982 }
 0x4cf   : > { %4075 = vst.msk [vmem:[#allocation3 + $0xc] sm:$0xf] %vm9567_vm1, %v3983_v35  ;;  %v3777_v32 = vpop.permute.xlu1 %3776  ;;  %4248 = vrot.lane.b32.xlu0 %v4176_v54, %s6417_s13  ;;  %4244 = vrot.lane.b32.xlu1 %v4174_v34, %s6417_s13  ;;  %v9583_v35 = vld [vmem:[#allocation22_spill] sm:$0xff]  ;;  %v4190_v34 = vpack.c.bf16 %v4158_v1, %v4158_v1  ;;  %v4363_v1 = vld [vmem:[#allocation2 + $0x30] sm:$0xff] }
 0x4d0   : > { %3844 = vst.msk [vmem:[#allocation3 + $0x70] sm:$0xf] %vm9568_vm9, %v3777_v32 }
 0x4d1   : > { %v3781_v22 = vpop.permute.xlu0 %3780 }
 0x4d2   : > { %3846 = vst.msk [vmem:[#allocation3 + $0x78] sm:$0xf] %vm9569_vm15, %v3781_v22  ;;  %vm9571_vm15 = vmmov %vm9567_vm1  ;;  %v9584_v22 = vld [vmem:[#allocation23_spill] sm:$0xff] }
 0x4d4   : > { %4246 = vrot.lane.b32.xlu2 %v7976_v15, %s6417_s13  ;;  %v4150_v15 = vsel %vm9500_vm3, %v8080_v58, 0.0  ;;  %v4152_v58 = vsel %vm9511_vm8, %v8099_v23, 0.0  ;;  %vm9590_vm3 = vmmov %vm9567_vm1 }
 0x4d5   : > { %v4184_v13 = vpack.c.bf16 %v4152_v58, %v4152_v58  ;;  %v9597_v58 = vld [vmem:[#allocation31_spill] sm:$0xff] }
 0x4d6   : > { %v3989_v40 = vpop.permute.xlu2 %3988 }
 0x4d7   : > { %4078 = vst.msk [vmem:[#allocation3 + $0x18] sm:$0xf] %vm9570_vm2, %v3989_v40  ;;  %4254 = vrot.lane.b32.xlu0 %v8037_v28, %s6417_s13  ;;  %4250 = vrot.lane.b32.xlu1 %v8006_v17, %s6417_s13  ;;  %v4182_v28 = vpack.c.bf16 %v4150_v15, %v4150_v15  ;;  %v4180_v17 = vpack.c.bf16 %v4148_v14, %v4148_v14  ;;  %vm9572_vm2 = vmmov %vm9567_vm1 }
 0x4d9   : > { %v3979_v57 = vpop.permute.xlu0 %3978  ;;  %v3783_v3 = vpop.permute.xlu1 %3782 }
 0x4da   : > { %4073 = vst.msk [vmem:[#allocation3 + $0x4] sm:$0xf] %vm9567_vm1, %v3979_v57  ;;  %v9587_v57 = vld [vmem:[#allocation21_spill] sm:$0xff] }
 0x4db   : > { %3847 = vst.msk [vmem:[#allocation3 + $0x7c] sm:$0xf] %vm9568_vm9, %v3783_v3  ;;  %vm9573_vm9 = vmmov %vm9567_vm1 }
 0x4dc   : > { %4252 = vrot.lane.b32.xlu2 %v4178_v42, %s6417_s13 }
 0x4de   : > { %v3995_v24 = vpop.permute.xlu2 %3994 }
 0x4df   : > { %4081 = vst.msk [vmem:[#allocation3 + $0x24] sm:$0xf] %vm9571_vm15, %v3995_v24  ;;  %4260 = vrot.lane.b32.xlu0 %v4182_v28, %s6417_s13  ;;  %4256 = vrot.lane.b32.xlu1 %v4180_v17, %s6417_s13  ;;  %vm9574_vm15 = vmmov %vm9567_vm1 }
 0x4e1   : > { %v3985_v11 = vpop.permute.xlu0 %3984  ;;  %v3981_v38 = vpop.permute.xlu1 %3980 }
 0x4e2   : > { %4076 = vst.msk [vmem:[#allocation3 + $0x10] sm:$0xf] %vm9572_vm2, %v3985_v11  ;;  %vm9575_vm2 = vmmov %vm9567_vm1  ;;  %v9594_v11 = vld [vmem:[#allocation32_spill] sm:$0xff] }
 0x4e3   : > { %4074 = vst.msk [vmem:[#allocation3 + $0x8] sm:$0xf] %vm9567_vm1, %v3981_v38  ;;  %v9595_v38 = vld [vmem:[#allocation25_spill] sm:$0xff] }
 0x4e4   : > { %4258 = vrot.lane.b32.xlu2 %v8069_v53, %s6417_s13  ;;  %v4156_v53 = vsel %vm9331_vm12, %v8026_v36, 0.0  ;;  %v9577_v36 = vld [vmem:[#allocation20_spill] sm:$0xff]  ;;  %vm9596_vm0 = vnez %v9595_v38 }
 0x4e5   : > { %v4188_v23 = vpack.c.bf16 %v4156_v53, %v4156_v53 }
 0x4e6   : > { %v4001_v46 = vpop.permute.xlu2 %4000 }
 0x4e7   : > { %4084 = vst.msk [vmem:[#allocation3 + $0x30] sm:$0xf] %vm9573_vm9, %v4001_v46  ;;  %4266 = vrot.lane.b32.xlu0 %v7983_v20, %s6417_s13  ;;  %4262 = vrot.lane.b32.xlu1 %v8101_v7, %s6417_s13  ;;  %v4186_v7 = vpack.c.bf16 %v4154_v49, %v4154_v49  ;;  %vm9576_vm9 = vmmov %vm9567_vm1  ;;  %v4164_v46 = vsel %vm9596_vm0, %v9594_v11, 0.0  ;;  %v4360_v49 = vld [vmem:[#allocation2 + $0x18] sm:$0xff]  ;;  %vm9626_vm0 = vnez %v9206_v50  ;;  %v4844_v50 = vld [vmem:[#allocation2 + $0x47] sm:$0xff] }
 0x4e9   : > { %v3991_v0 = vpop.permute.xlu0 %3990  ;;  %v3987_v56 = vpop.permute.xlu1 %3986 }
 0x4ea   : > { %4079 = vst.msk [vmem:[#allocation3 + $0x1c] sm:$0xf] %vm9574_vm15, %v3991_v0  ;;  %vm9578_vm15 = vmmov %vm9567_vm1  ;;  %v4134_v0 = vld [vmem:[#allocation2 + $0x107] sm:$0xff] }
 0x4eb   : > { %4077 = vst.msk [vmem:[#allocation3 + $0x14] sm:$0xf] %vm9575_vm2, %v3987_v56  ;;  %vm9579_vm2 = vmmov %vm9567_vm1  ;;  %v4196_v56 = vpack.c.bf16 %v4164_v46, %v4164_v46 }
 0x4ec   : > { %4264 = vrot.lane.b32.xlu2 %v4184_v13, %s6417_s13 }
 0x4ee   : > { %v4007_v20 = vpop.permute.xlu2 %4006 }
 0x4ef   : > { %4087 = vst.msk [vmem:[#allocation3 + $0x3c] sm:$0xf] %vm9567_vm1, %v4007_v20  ;;  %4272 = vrot.lane.b32.xlu0 %v4188_v23, %s6417_s13  ;;  %4268 = vrot.lane.b32.xlu1 %v4186_v7, %s6417_s13  ;;  %v9599_v20 = vld [vmem:[#allocation27_spill] sm:$0xff] }
 0x4f1   : > { %v3997_v16 = vpop.permute.xlu0 %3996  ;;  %v3993_v52 = vpop.permute.xlu1 %3992 }
 0x4f2   : > { %4082 = vst.msk [vmem:[#allocation3 + $0x28] sm:$0xf] %vm9576_vm9, %v3997_v16  ;;  %vm9585_vm9 = vnez %v9584_v22  ;;  %v4392_v16 = vpack.c.bf16 %v4360_v49, %v4360_v49  ;;  %v4368_v49 = vld [vmem:[#allocation2 + $0x58] sm:$0xff] }
 0x4f3   : > { %4080 = vst.msk [vmem:[#allocation3 + $0x20] sm:$0xf] %vm9578_vm15, %v3993_v52  ;;  %v4162_v40 = vsel %vm9585_vm9, %v8122_v60, 0.0  ;;  %vm9588_vm15 = vnez %v9587_v57  ;;  %v9591_v60 = vld [vmem:[#allocation30_spill] sm:$0xff]  ;;  %v4135_v52 = vld [vmem:[#allocation2 + $0x10f] sm:$0xff] }
 0x4f4   : > { %4270 = vrot.lane.b32.xlu2 %v9577_v36, %s6417_s13  ;;  %v4160_v42 = vsel %vm9588_vm15, %v9586_v6, 0.0  ;;  %v4194_v15 = vpack.c.bf16 %v4162_v40, %v4162_v40  ;;  %vm9633_vm15 = vnez %v9404_v12 }
 0x4f5   : > { %v4192_v14 = vpack.c.bf16 %v4160_v42, %v4160_v42 }
 0x4f6   : > { %v4013_v61 = vpop.permute.xlu2 %4012 }
 0x4f7   : > { %4090 = vst.msk [vmem:[#allocation3 + $0x48] sm:$0xf] %vm9579_vm2, %v4013_v61  ;;  %4278 = vrot.lane.b32.xlu0 %v9582_v18, %s6417_s13  ;;  %4274 = vrot.lane.b32.xlu1 %v9583_v35, %s6417_s13  ;;  %vm9589_vm2 = vmmov %vm9567_vm1  ;;  %v4199_v61 = vpack.c.bf16 %v4135_v52, %v4135_v52  ;;  %v4361_v18 = vld [vmem:[#allocation2 + $0x20] sm:$0xff]  ;;  %v4370_v52 = vld [vmem:[#allocation2 + $0x68] sm:$0xff] }
 0x4f9   : > { %v4003_v54 = vpop.permute.xlu0 %4002  ;;  %v3999_v32 = vpop.permute.xlu1 %3998 }
 0x4fa   : > { %4085 = vst.msk [vmem:[#allocation3 + $0x34] sm:$0xf] %vm9567_vm1, %v4003_v54  ;;  %v8370_v54 = vpack.c.bf16 %v4363_v1, %v4363_v1  ;;  %v4371_v1 = vld [vmem:[#allocation2 + $0x70] sm:$0xff] }
 0x4fb   : > { %4083 = vst.msk [vmem:[#allocation3 + $0x2c] sm:$0xf] %vm9589_vm2, %v3999_v32  ;;  %vm9593_vm2 = vmmov %vm9567_vm1  ;;  %v4362_v32 = vld [vmem:[#allocation2 + $0x28] sm:$0xff] }
 0x4fc   : > { %4276 = vrot.lane.b32.xlu2 %v4190_v34, %s6417_s13  ;;  %v4393_v34 = vpack.c.bf16 %v4361_v18, %v4361_v18  ;;  %v8376_v6 = vpack.c.bf16 %v4362_v32, %v4362_v32  ;;  %v4375_v32 = vld [vmem:[#allocation2 + $0x90] sm:$0xff] }
 0x4fe   : > { %v4019_v3 = vpop.permute.xlu2 %4018 }
 0x4ff   : > { %4093 = vst.msk [vmem:[#allocation3 + $0x54] sm:$0xf] %vm9590_vm3, %v4019_v3  ;;  %4284 = vrot.lane.b32.xlu0 %v4194_v15, %s6417_s13  ;;  %4280 = vrot.lane.b32.xlu1 %v4192_v14, %s6417_s13  ;;  %vm9598_vm3 = vmmov %vm9567_vm1  ;;  %v4366_v3 = vld [vmem:[#allocation2 + $0x48] sm:$0xff]  ;;  %v4364_v15 = vld [vmem:[#allocation2 + $0x38] sm:$0xff] }
 0x501   : > { %v4009_v24 = vpop.permute.xlu0 %4008  ;;  %v4005_v28 = vpop.permute.xlu1 %4004 }
 0x502   : > { %4088 = vst.msk [vmem:[#allocation3 + $0x40] sm:$0xf] %vm9567_vm1, %v4009_v24  ;;  %v8382_v24 = vpack.c.bf16 %v4366_v3, %v4366_v3  ;;  %v4407_v3 = vpack.c.bf16 %v4375_v32, %v4375_v32 }
 0x503   : > { %4086 = vst.msk [vmem:[#allocation3 + $0x38] sm:$0xf] %vm9592_vm4, %v4005_v28  ;;  %vm9600_vm4 = vnez %v9599_v20  ;;  %v8384_v28 = vpack.c.bf16 %v4364_v15, %v4364_v15 }
 0x504   : > { %4282 = vrot.lane.b32.xlu2 %v9591_v60, %s6417_s13  ;;  %v4166_v23 = vsel %vm9600_vm4, %v4134_v0, 0.0  ;;  %v4365_v60 = vld [vmem:[#allocation2 + $0x40] sm:$0xff]  ;;  %v4367_v0 = vld [vmem:[#allocation2 + $0x50] sm:$0xff]  ;;  %vm9622_vm4 = vnez %v9202_v39 }
 0x505   : > { %v8391_v11 = vpack.c.bf16 %v4365_v60, %v4365_v60  ;;  %v4842_v39 = vld [vmem:[#allocation2 + $0x37] sm:$0xff] }
 0x506   : > { %v4025_v17 = vpop.permute.xlu2 %4024 }
 0x507   : > { %4096 = vst.msk [vmem:[#allocation3 + $0x60] sm:$0xf] %vm9593_vm2, %v4025_v17  ;;  %4290 = vrot.lane.b32.xlu0 %v8157_v8, %s6417_s13  ;;  %4286 = vrot.lane.b32.xlu1 %v9597_v58, %s6417_s13  ;;  %v4198_v8 = vpack.c.bf16 %v4166_v23, %v4166_v23  ;;  %vm9601_vm2 = vmmov %vm9567_vm1  ;;  %v4369_v58 = vld [vmem:[#allocation2 + $0x60] sm:$0xff] }
 0x509   : > { %v4015_v13 = vpop.permute.xlu0 %4014  ;;  %v4011_v53 = vpop.permute.xlu1 %4010 }
 0x50a   : > { %4091 = vst.msk [vmem:[#allocation3 + $0x4c] sm:$0xf] %vm9598_vm3, %v4015_v13  ;;  %vm9602_vm3 = vmmov %vm9567_vm1 }
 0x50b   : > { %4089 = vst.msk [vmem:[#allocation3 + $0x44] sm:$0xf] %vm9567_vm1, %v4011_v53  ;;  %v8399_v53 = vpack.c.bf16 %v4367_v0, %v4367_v0  ;;  %v4376_v0 = vld [vmem:[#allocation2 + $0x98] sm:$0xff] }
 0x50c   : > { %4288 = vrot.lane.b32.xlu2 %v4196_v56, %s6417_s13  ;;  %v8397_v56 = vpack.c.bf16 %v4369_v58, %v4369_v58  ;;  %v4378_v58 = vld [vmem:[#allocation2 + $0xa8] sm:$0xff] }
 0x50e   : > { %v4031_v7 = vpop.permute.xlu2 %4030 }
 0x50f   : > { %4099 = vst.msk [vmem:[#allocation3 + $0x6c] sm:$0xf] %vm9601_vm2, %v4031_v7  ;;  %4456 = vrot.lane.b32.xlu0 %v4392_v16, %s6418_s14  ;;  %4292 = vrot.lane.b32.xlu1 %v4198_v8, %s6417_s13  ;;  %vm9603_vm2 = vmmov %vm9567_vm1  ;;  %v8406_v7 = vpack.c.bf16 %v4368_v49, %v4368_v49  ;;  %v4372_v8 = vld [vmem:[#allocation2 + $0x78] sm:$0xff]  ;;  %v8424_v49 = vpack.c.bf16 %v4378_v58, %v4378_v58 }
 0x511   : > { %v4021_v36 = vpop.permute.xlu0 %4020  ;;  %v4017_v25 = vpop.permute.xlu1 %4016 }
 0x512   : > { %4094 = vst.msk [vmem:[#allocation3 + $0x58] sm:$0xf] %vm9602_vm3, %v4021_v36  ;;  %vm9604_vm3 = vmmov %vm9567_vm1 }
 0x513   : > { %4092 = vst.msk [vmem:[#allocation3 + $0x50] sm:$0xf] %vm9567_vm1, %v4017_v25  ;;  %v4402_v25 = vpack.c.bf16 %v4370_v52, %v4370_v52 }
 0x514   : > { %4294 = vrot.lane.b32.xlu2 %v4199_v61, %s6417_s13  ;;  %v4404_v61 = vpack.c.bf16 %v4372_v8, %v4372_v8  ;;  %s6002_s13 = sshll.u32 %s5999_s10, 4  ;;  %s6003_s13 = int_to_ptr.hbm [resolvable:$true] %s6002_s13 }
 0x516   : > { %v4037_v35 = vpop.permute.xlu2 %4036 }
 0x517   : > { %4102 = vst.msk [vmem:[#allocation3 + $0x78] sm:$0xf] %vm9603_vm2, %v4037_v35  ;;  %4462 = vrot.lane.b32.xlu0 %v8370_v54, %s6418_s14  ;;  %4458 = vrot.lane.b32.xlu1 %v4393_v34, %s6418_s14  ;;  %vm9605_vm2 = vcmask 126048   ;;  %v4403_v35 = vpack.c.bf16 %v4371_v1, %v4371_v1 }
 0x519   : > { %v4027_v40 = vpop.permute.xlu0 %4026  ;;  %v4023_v42 = vpop.permute.xlu1 %4022 }
 0x51a   : > { %4097 = vst.msk [vmem:[#allocation3 + $0x64] sm:$0xf] %vm9604_vm3, %v4027_v40  ;;  %vm9606_vm3 = vmmov %vm9567_vm1  ;;  %v4373_v40 = vld [vmem:[#allocation2 + $0x80] sm:$0xff] }
 0x51b   : > { %4095 = vst.msk [vmem:[#allocation3 + $0x5c] sm:$0xf] %vm9567_vm1, %v4023_v42  ;;  %v4405_v15 = vpack.c.bf16 %v4373_v40, %v4373_v40 }
 0x51c   : > { %4460 = vrot.lane.b32.xlu2 %v8376_v6, %s6418_s14 }
 0x51e   : > { %v4235_v14 = vpop.permute.xlu2 %4234 }
 0x51f   : > { %4329 = vst.msk [vmem:[#allocation3 + $0x4] sm:$0xf] %vm9605_vm2, %v4235_v14  ;;  %4468 = vrot.lane.b32.xlu0 %v8382_v24, %s6418_s14  ;;  %4464 = vrot.lane.b32.xlu1 %v8384_v28, %s6418_s14  ;;  %v4374_v14 = vld [vmem:[#allocation2 + $0x88] sm:$0xff] }
 0x521   : > { %v4033_v17 = vpop.permute.xlu0 %4032  ;;  %v4029_v46 = vpop.permute.xlu1 %4028 }
 0x522   : > { %4100 = vst.msk [vmem:[#allocation3 + $0x70] sm:$0xf] %vm9606_vm3, %v4033_v17  ;;  %vm9607_vm3 = vmmov %vm9567_vm1  ;;  %v4406_v17 = vpack.c.bf16 %v4374_v14, %v4374_v14 }
 0x523   : > { %4098 = vst.msk [vmem:[#allocation3 + $0x68] sm:$0xf] %vm9567_vm1, %v4029_v46 }
 0x524   : > { %4466 = vrot.lane.b32.xlu2 %v8391_v11, %s6418_s14 }
 0x526   : > { %v4241_v13 = vpop.permute.xlu2 %4240 }
 0x527   : > { %4332 = vst.msk [vmem:[#allocation3 + $0x10] sm:$0xf] %vm9605_vm2, %v4241_v13  ;;  %4474 = vrot.lane.b32.xlu0 %v8397_v56, %s6418_s14  ;;  %4470 = vrot.lane.b32.xlu1 %v8399_v53, %s6418_s14 }
 0x529   : > { %v4039_v23 = vpop.permute.xlu0 %4038  ;;  %v4035_v16 = vpop.permute.xlu1 %4034 }
 0x52a   : > { %4103 = vst.msk [vmem:[#allocation3 + $0x7c] sm:$0xf] %vm9607_vm3, %v4039_v23  ;;  %vm9608_vm3 = vmmov %vm9605_vm2  ;;  %v4408_v23 = vpack.c.bf16 %v4376_v0, %v4376_v0 }
 0x52b   : > { %4101 = vst.msk [vmem:[#allocation3 + $0x74] sm:$0xf] %vm9567_vm1, %v4035_v16  ;;  %vm9609_vm1 = vmmov %vm9605_vm2  ;;  %v4377_v16 = vld [vmem:[#allocation2 + $0xa0] sm:$0xff] }
 0x52c   : > { %4472 = vrot.lane.b32.xlu2 %v8406_v7, %s6418_s14  ;;  %v4409_v52 = vpack.c.bf16 %v4377_v16, %v4377_v16  ;;  %v4385_v16 = vld [vmem:[#allocation2 + $0xe0] sm:$0xff] }
 0x52e   : > { %v4247_v36 = vpop.permute.xlu2 %4246 }
 0x52f   : > { %4335 = vst.msk [vmem:[#allocation3 + $0x1c] sm:$0xf] %vm9605_vm2, %v4247_v36  ;;  %4480 = vrot.lane.b32.xlu0 %v4404_v61, %s6418_s14  ;;  %4476 = vrot.lane.b32.xlu1 %v4402_v25, %s6418_s14  ;;  %vm9610_vm2 = vmmov %vm9609_vm1  ;;  %v4381_v61 = vld [vmem:[#allocation2 + $0xc0] sm:$0xff]  ;;  %v4379_v25 = vld [vmem:[#allocation2 + $0xb0] sm:$0xff] }
 0x531   : > { %v4237_v18 = vpop.permute.xlu0 %4236  ;;  %v4233_v34 = vpop.permute.xlu1 %4232 }
 0x532   : > { %4330 = vst.msk [vmem:[#allocation3 + $0x8] sm:$0xf] %vm9608_vm3, %v4237_v18  ;;  %vm9611_vm3 = vmmov %vm9609_vm1  ;;  %v8433_v18 = vpack.c.bf16 %v4381_v61, %v4381_v61  ;;  %v4386_v61 = vld [vmem:[#allocation2 + $0xe8] sm:$0xff] }
 0x533   : > { %4328 = vst.msk [vmem:[#allocation3] sm:$0xf] %vm9609_vm1, %v4233_v34  ;;  %v4380_v34 = vld [vmem:[#allocation2 + $0xb8] sm:$0xff] }
 0x534   : > { %4478 = vrot.lane.b32.xlu2 %v4403_v35, %s6418_s14  ;;  %v8435_v35 = vpack.c.bf16 %v4379_v25, %v4379_v25  ;;  %v8442_v40 = vpack.c.bf16 %v4380_v34, %v4380_v34 }
 0x536   : > { %v4253_v42 = vpop.permute.xlu2 %4252 }
 0x537   : > { %4338 = vst.msk [vmem:[#allocation3 + $0x28] sm:$0xf] %vm9610_vm2, %v4253_v42  ;;  %4486 = vrot.lane.b32.xlu0 %v4407_v3, %s6418_s14  ;;  %4482 = vrot.lane.b32.xlu1 %v4405_v15, %s6418_s14  ;;  %vm9612_vm2 = vmmov %vm9609_vm1  ;;  %v4384_v3 = vld [vmem:[#allocation2 + $0xd8] sm:$0xff]  ;;  %v4382_v15 = vld [vmem:[#allocation2 + $0xc8] sm:$0xff] }
 0x539   : > { %v4243_v60 = vpop.permute.xlu0 %4242  ;;  %v4239_v46 = vpop.permute.xlu1 %4238 }
 0x53a   : > { %4333 = vst.msk [vmem:[#allocation3 + $0x14] sm:$0xf] %vm9611_vm3, %v4243_v60  ;;  %vm9613_vm3 = vmmov %vm9609_vm1  ;;  %v8448_v60 = vpack.c.bf16 %v4384_v3, %v4384_v3 }
 0x53b   : > { %4331 = vst.msk [vmem:[#allocation3 + $0xc] sm:$0xf] %vm9609_vm1, %v4239_v46  ;;  %v4383_v46 = vld [vmem:[#allocation2 + $0xd0] sm:$0xff] }
 0x53c   : > { %4484 = vrot.lane.b32.xlu2 %v4406_v17, %s6418_s14  ;;  %v8450_v17 = vpack.c.bf16 %v4382_v15, %v4382_v15  ;;  %v8457_v0 = vpack.c.bf16 %v4383_v46, %v4383_v46  ;;  %v4389_v46 = vld [vmem:[#allocation2 + $0x100] sm:$0xff] }
 0x53e   : > { %v4259_v13 = vpop.permute.xlu2 %4258 }
 0x53f   : > { %4341 = vst.msk [vmem:[#allocation3 + $0x34] sm:$0xf] %vm9612_vm2, %v4259_v13  ;;  %4492 = vrot.lane.b32.xlu0 %v8424_v49, %s6418_s14  ;;  %4488 = vrot.lane.b32.xlu1 %v4408_v23, %s6418_s14  ;;  %vm9614_vm2 = vmmov %vm9609_vm1  ;;  %v4387_v23 = vld [vmem:[#allocation2 + $0xf0] sm:$0xff] }
 0x541   : > { %v4249_v8 = vpop.permute.xlu0 %4248  ;;  %v4245_v36 = vpop.permute.xlu1 %4244 }
 0x542   : > { %4336 = vst.msk [vmem:[#allocation3 + $0x20] sm:$0xf] %vm9613_vm3, %v4249_v8  ;;  %vm9615_vm3 = vmmov %vm9609_vm1 }
 0x543   : > { %4334 = vst.msk [vmem:[#allocation3 + $0x18] sm:$0xf] %vm9609_vm1, %v4245_v36  ;;  %v8465_v36 = vpack.c.bf16 %v4385_v16, %v4385_v16 }
 0x544   : > { %4490 = vrot.lane.b32.xlu2 %v4409_v52, %s6418_s14  ;;  %v8463_v52 = vpack.c.bf16 %v4387_v23, %v4387_v23  ;;  %v4421_v23 = vpack.c.bf16 %v4389_v46, %v4389_v46  ;;  %v4588_v46 = vld [vmem:[#allocation2 + $0x39] sm:$0xff] }
 0x546   : > { %v4265_v1 = vpop.permute.xlu2 %4264 }
 0x547   : > { %4344 = vst.msk [vmem:[#allocation3 + $0x40] sm:$0xf] %vm9614_vm2, %v4265_v1  ;;  %4498 = vrot.lane.b32.xlu0 %v8433_v18, %s6418_s14  ;;  %4494 = vrot.lane.b32.xlu1 %v8435_v35, %s6418_s14  ;;  %vm9616_vm2 = vmmov %vm9609_vm1  ;;  %v8472_v1 = vpack.c.bf16 %v4386_v61, %v4386_v61  ;;  %v4391_v61 = vld [vmem:[#allocation2 + $0x110] sm:$0xff] }
 0x549   : > { %v4255_v32 = vpop.permute.xlu0 %4254  ;;  %v4251_v42 = vpop.permute.xlu1 %4250 }
 0x54a   : > { %4339 = vst.msk [vmem:[#allocation3 + $0x2c] sm:$0xf] %vm9615_vm3, %v4255_v32  ;;  %vm9617_vm3 = vmmov %vm9609_vm1  ;;  %v4390_v32 = vld [vmem:[#allocation2 + $0x108] sm:$0xff] }
 0x54b   : > { %4337 = vst.msk [vmem:[#allocation3 + $0x24] sm:$0xf] %vm9609_vm1, %v4251_v42  ;;  %v4388_v42 = vld [vmem:[#allocation2 + $0xf8] sm:$0xff]  ;;  %v4422_v15 = vpack.c.bf16 %v4390_v32, %v4390_v32  ;;  %v4423_v32 = vpack.c.bf16 %v4391_v61, %v4391_v61 }
 0x54c   : > { %4496 = vrot.lane.b32.xlu2 %v8442_v40, %s6418_s14 }
 0x54e   : > { %v4271_v14 = vpop.permute.xlu2 %4270 }
 0x54f   : > { %4347 = vst.msk [vmem:[#allocation3 + $0x4c] sm:$0xf] %vm9616_vm2, %v4271_v14  ;;  %4504 = vrot.lane.b32.xlu0 %v8448_v60, %s6418_s14  ;;  %4500 = vrot.lane.b32.xlu1 %v8450_v17, %s6418_s14  ;;  %vm9618_vm2 = vmmov %vm9609_vm1  ;;  %v4420_v14 = vpack.c.bf16 %v4388_v42, %v4388_v42  ;;  %v4584_v42 = vld [vmem:[#allocation2 + $0x19] sm:$0xff] }
 0x551   : > { %v4261_v58 = vpop.permute.xlu0 %4260  ;;  %v4257_v13 = vpop.permute.xlu1 %4256 }
 0x552   : > { %4342 = vst.msk [vmem:[#allocation3 + $0x38] sm:$0xf] %vm9617_vm3, %v4261_v58  ;;  %vm9619_vm3 = vmmov %vm9609_vm1  ;;  %v4585_v58 = vld [vmem:[#allocation2 + $0x21] sm:$0xff] }
 0x553   : > { %4340 = vst.msk [vmem:[#allocation3 + $0x30] sm:$0xf] %vm9609_vm1, %v4257_v13 }
 0x554   : > { %4502 = vrot.lane.b32.xlu2 %v8457_v0, %s6418_s14 }
 0x556   : > { %v4277_v8 = vpop.permute.xlu2 %4276 }
 0x557   : > { %4350 = vst.msk [vmem:[#allocation3 + $0x58] sm:$0xf] %vm9618_vm2, %v4277_v8  ;;  %4510 = vrot.lane.b32.xlu0 %v8463_v52, %s6418_s14  ;;  %4506 = vrot.lane.b32.xlu1 %v8465_v36, %s6418_s14  ;;  %vm9620_vm2 = vmmov %vm9609_vm1  ;;  %v4617_v8 = vsel %vm9622_vm4, %v4585_v58, 0.0  ;;  %v4586_v58 = vld [vmem:[#allocation2 + $0x29] sm:$0xff] }
 0x559   : > { %v4267_v25 = vpop.permute.xlu0 %4266  ;;  %v4263_v34 = vpop.permute.xlu1 %4262 }
 0x55a   : > { %4345 = vst.msk [vmem:[#allocation3 + $0x44] sm:$0xf] %vm9619_vm3, %v4267_v25  ;;  %vm9621_vm3 = vmmov %vm9609_vm1 }
 0x55b   : > { %4343 = vst.msk [vmem:[#allocation3 + $0x3c] sm:$0xf] %vm9609_vm1, %v4263_v34  ;;  %v4649_v34 = vpack.c.bf16 %v4617_v8, %v4617_v8  ;;  %v8496_v8 = vpack.c.bf16 %v4586_v58, %v4586_v58 }
 0x55c   : > { %4508 = vrot.lane.b32.xlu2 %v8472_v1, %s6418_s14 }
 0x55e   : > { %v4283_v3 = vpop.permute.xlu2 %4282 }
 0x55f   : > { %4353 = vst.msk [vmem:[#allocation3 + $0x64] sm:$0xf] %vm9620_vm2, %v4283_v3  ;;  %4516 = vrot.lane.b32.xlu0 %v4422_v15, %s6418_s14  ;;  %4512 = vrot.lane.b32.xlu1 %v4420_v14, %s6418_s14  ;;  %vm9623_vm2 = vmmov %vm9609_vm1  ;;  %v4648_v15 = vpack.c.bf16 %v4584_v42, %v4584_v42 }
 0x561   : > { %v4273_v13 = vpop.permute.xlu0 %4272  ;;  %v4269_v16 = vpop.permute.xlu1 %4268 }
 0x562   : > { %4348 = vst.msk [vmem:[#allocation3 + $0x50] sm:$0xf] %vm9621_vm3, %v4273_v13  ;;  %vm9624_vm3 = vmmov %vm9609_vm1  ;;  %v8492_v13 = vld [vmem:[#allocation2 + $0x31] sm:$0xff] }
 0x563   : > { %4346 = vst.msk [vmem:[#allocation3 + $0x48] sm:$0xf] %vm9609_vm1, %v4269_v16  ;;  %v8494_v16 = vpack.c.bf16 %v4588_v46, %v4588_v46  ;;  %v4619_v61 = vsel %vm9626_vm0, %v8492_v13, 0.0 }
 0x564   : > { %4514 = vrot.lane.b32.xlu2 %v4421_v23, %s6418_s14  ;;  %v4651_v42 = vpack.c.bf16 %v4619_v61, %v4619_v61  ;;  %v4590_v61 = vld [vmem:[#allocation2 + $0x49] sm:$0xff] }
 0x565   : > { %v8522_v37 = vpack.c.bf16 %v4590_v61, %v4590_v61 }
 0x566   : > { %v4289_v25 = vpop.permute.xlu2 %4288 }
 0x567   : > { %4356 = vst.msk [vmem:[#allocation3 + $0x70] sm:$0xf] %vm9623_vm2, %v4289_v25  ;;  %4714 = vrot.lane.b32.xlu0 %v4649_v34, %s6419_s15  ;;  %4518 = vrot.lane.b32.xlu1 %v4423_v32, %s6418_s14  ;;  %vm9625_vm2 = vmmov %vm9609_vm1  ;;  %v8506_v25 = vld [vmem:[#allocation2 + $0x51] sm:$0xff]  ;;  %v8508_v34 = vld [vmem:[#allocation2 + $0x41] sm:$0xff]  ;;  %s6363_s14 = sshra.s32 %s6003_s13, 4  ;;  %s6364_s14 = int_to_ptr.hbm [resolvable:$true] %s6363_s14 }
 0x568   : > { %s6365_s25 = scalar_lea.hbm %s6364_s14, 64  ;;  %p6370_p0 = scmp.lt.s32.totalorder %s6364_s14, %s9068_s5 }
 0x569   : > { %v4279_v3 = vpop.permute.xlu0 %4278  ;;  %v4275_v14 = vpop.permute.xlu1 %4274  ;;  %p6366_p11 = scmp.ne.s32.totalorder %s6364_s14, %s6365_s25 }
 0x56a   : > { %4351 = vst.msk [vmem:[#allocation3 + $0x5c] sm:$0xf] %vm9624_vm3, %v4279_v3  ;;  %vm9627_vm3 = vmmov %vm9609_vm1 }
 0x56b   : > { %4349 = vst.msk [vmem:[#allocation3 + $0x54] sm:$0xf] %vm9609_vm1, %v4275_v14  ;;  %vm9628_vm1 = vnez %v9212_v45  ;;  %vm9630_vm9 = vmmov %vm9627_vm3  ;;  %p6367_p12 = pnand %p6366_p11, %p6492_p5 }
 0x56c   : > { %4712 = vrot.lane.b32.xlu2 %v4648_v15, %s6419_s15  ;;  %v4623_v15 = vsel %vm9628_vm1, %v8506_v25, 0.0 }
 0x56d   : > { %v4655_v58 = vpack.c.bf16 %v4623_v15, %v4623_v15  ;;  %p6368_p13 = pneg %p6367_p12 }
 0x56e   : > { %v4295_v23 = vpop.permute.xlu2 %4294 }
 0x56f   : > { %4359 = vst.msk [vmem:[#allocation3 + $0x7c] sm:$0xf] %vm9625_vm2, %v4295_v23  ;;  %4720 = vrot.lane.b32.xlu0 %v8494_v16, %s6419_s15  ;;  %4716 = vrot.lane.b32.xlu1 %v8496_v8, %s6419_s15  ;;  %vm9629_vm2 = vnez %v9210_v21 }
 0x570   : > { %v4621_v14 = vsel %vm9629_vm2, %v8508_v34, 0.0 }
 0x571   : > { %v4285_v32 = vpop.permute.xlu0 %4284  ;;  %v4281_v3 = vpop.permute.xlu1 %4280  ;;  %v4653_v23 = vpack.c.bf16 %v4621_v14, %v4621_v14  ;;  %v8530_v14 = vpack.c.bf16 %v4594_v31, %v4594_v31 }
 0x572   : > { %4354 = vst.msk [vmem:[#allocation3 + $0x68] sm:$0xf] %vm9627_vm3, %v4285_v32 }
 0x573   : > { %4352 = vst.msk [vmem:[#allocation3 + $0x60] sm:$0xf] %vm9630_vm9, %v4281_v3  ;;  %vm9632_vm9 = vmmov %vm9627_vm3  ;;  %v8528_v3 = vld [vmem:[#allocation2 + $0x61] sm:$0xff] }
 0x574   : > { %4718 = vrot.lane.b32.xlu2 %v4651_v42, %s6419_s15  ;;  %v4592_v42 = vld [vmem:[#allocation2 + $0x59] sm:$0xff] }
 0x576   : > { %v4461_v46 = vpop.permute.xlu2 %4460 }
 0x577   : > { %4554 = vst.msk [vmem:[#allocation3 + $0x8] sm:$0xf] %vm9631_vm13, %v4461_v46  ;;  %4726 = vrot.lane.b32.xlu0 %v4655_v58, %s6419_s15  ;;  %4722 = vrot.lane.b32.xlu1 %v4653_v23, %s6419_s15  ;;  %v8532_v46 = vpack.c.bf16 %v4592_v42, %v4592_v42  ;;  %v4625_v58 = vsel %vm9633_vm15, %v8528_v3, 0.0  ;;  %v8544_v23 = vld [vmem:[#allocation2 + $0x71] sm:$0xff]  ;;  %vm9638_vm15 = vcmask 126048  }
 0x578   : > { %v4657_v61 = vpack.c.bf16 %v4625_v58, %v4625_v58  ;;  %v4596_v58 = vld [vmem:[#allocation2 + $0x79] sm:$0xff] }
 0x579   : > { %v4291_v32 = vpop.permute.xlu0 %4290  ;;  %v4287_v20 = vpop.permute.xlu1 %4286 }
 0x57a   : > { %4357 = vst.msk [vmem:[#allocation3 + $0x74] sm:$0xf] %vm9627_vm3, %v4291_v32  ;;  %vm9635_vm3 = vmmov %vm9631_vm13 }
 0x57b   : > { %4355 = vst.msk [vmem:[#allocation3 + $0x6c] sm:$0xf] %vm9632_vm9, %v4287_v20  ;;  %v8542_v20 = vld [vmem:[#allocation2 + $0x81] sm:$0xff]  ;;  %vm9636_vm9 = vnez %v9410_v10  ;;  %vm9639_vm1 = vmmov %vm9635_vm3  ;;  %v8558_v10 = vpack.c.bf16 %v4596_v58, %v4596_v58 }
 0x57c   : > { %4724 = vrot.lane.b32.xlu2 %v8522_v37, %s6419_s15  ;;  %9634 = vst [vmem:[#allocation33_spill] sm:$0xff] %v8542_v20  ;;  %v4629_v42 = vsel %vm9636_vm9, %v8542_v20, 0.0  ;;  %vm9643_vm9 = vnez %v9414_v55  ;;  %v4601_v58 = vld [vmem:[#allocation2 + $0xa1] sm:$0xff] }
 0x57d   : > { %v4661_v38 = vpack.c.bf16 %v4629_v42, %v4629_v42  ;;  %9640 = vst [vmem:[#allocation15_spill] sm:$0xff] %v8558_v10 }
 0x57e   : > { %v4467_v15 = vpop.permute.xlu2 %4466 }
 0x57f   : > { %4557 = vst.msk [vmem:[#allocation3 + $0x14] sm:$0xf] %vm9631_vm13, %v4467_v15  ;;  %4732 = vrot.lane.b32.xlu0 %v8530_v14, %s6419_s15  ;;  %4728 = vrot.lane.b32.xlu1 %v8532_v46, %s6419_s15  ;;  %vm9637_vm13 = vnez %v9408_v62  ;;  %v4600_v62 = vld [vmem:[#allocation2 + $0x99] sm:$0xff] }
 0x580   : > { %v4627_v15 = vsel %vm9637_vm13, %v8544_v23, 0.0  ;;  %v4664_v42 = vpack.c.bf16 %v4600_v62, %v4600_v62  ;;  %vm9646_vm13 = vnez %v9418_v41  ;;  %v4858_v41 = vld [vmem:[#allocation2 + $0xb7] sm:$0xff] }
 0x581   : > { %v4457_v31 = vpop.permute.xlu0 %4456  ;;  %v4293_v32 = vpop.permute.xlu1 %4292  ;;  %v4659_v9 = vpack.c.bf16 %v4627_v15, %v4627_v15 }
 0x582   : > { %4552 = vst.msk [vmem:[#allocation3] sm:$0xf] %vm9635_vm3, %v4457_v31  ;;  %vm9641_vm3 = vmmov %vm9639_vm1 }
 0x583   : > { %4358 = vst.msk [vmem:[#allocation3 + $0x78] sm:$0xf] %vm9638_vm15, %v4293_v32  ;;  %vm9642_vm15 = vmmov %vm9639_vm1  ;;  %v4599_v32 = vld [vmem:[#allocation2 + $0x91] sm:$0xff] }
 0x584   : > { %4730 = vrot.lane.b32.xlu2 %v4657_v61, %s6419_s15  ;;  %v4598_v61 = vld [vmem:[#allocation2 + $0x89] sm:$0xff] }
 0x585   : > { %v4662_v15 = vpack.c.bf16 %v4598_v61, %v4598_v61 }
 0x586   : > { %v4473_v5 = vpop.permute.xlu2 %4472 }
 0x587   : > { %4560 = vst.msk [vmem:[#allocation3 + $0x20] sm:$0xf] %vm9639_vm1, %v4473_v5  ;;  %4738 = vrot.lane.b32.xlu0 %v4661_v38, %s6419_s15  ;;  %4734 = vrot.lane.b32.xlu1 %v4659_v9, %s6419_s15  ;;  %v4631_v9 = vsel %vm9643_vm9, %v4599_v32, 0.0  ;;  %v4603_v38 = vld [vmem:[#allocation2 + $0xb1] sm:$0xff]  ;;  %vm9647_vm9 = vmmov %vm9639_vm1 }
 0x588   : > { %v4663_v48 = vpack.c.bf16 %v4631_v9, %v4631_v9 }
 0x589   : > { %v4463_v31 = vpop.permute.xlu0 %4462  ;;  %v4459_v20 = vpop.permute.xlu1 %4458 }
 0x58a   : > { %4555 = vst.msk [vmem:[#allocation3 + $0xc] sm:$0xf] %vm9641_vm3, %v4463_v31  ;;  %vm9644_vm3 = vmmov %vm9639_vm1 }
 0x58b   : > { %4553 = vst.msk [vmem:[#allocation3 + $0x4] sm:$0xf] %vm9642_vm15, %v4459_v20  ;;  %vm9645_vm15 = vnez %v9422_v51  ;;  %v4633_v20 = vsel %vm9646_vm13, %v4601_v58, 0.0  ;;  %v8584_v58 = vld [vmem:[#allocation2 + $0xc1] sm:$0xff] }
 0x58c   : > { %4736 = vrot.lane.b32.xlu2 %v8558_v10, %s6419_s15  ;;  %v4635_v62 = vsel %vm9645_vm15, %v4603_v38, 0.0  ;;  %v4860_v51 = vld [vmem:[#allocation2 + $0xc7] sm:$0xff] }
 0x58d   : > { %v4667_v32 = vpack.c.bf16 %v4635_v62, %v4635_v62 }
 0x58e   : > { %v4479_v5 = vpop.permute.xlu2 %4478 }
 0x58f   : > { %4563 = vst.msk [vmem:[#allocation3 + $0x2c] sm:$0xf] %vm9639_vm1, %v4479_v5  ;;  %4744 = vrot.lane.b32.xlu0 %v4664_v42, %s6419_s15  ;;  %4740 = vrot.lane.b32.xlu1 %v4662_v15, %s6419_s15  ;;  %v4665_v5 = vpack.c.bf16 %v4633_v20, %v4633_v20  ;;  %v4602_v42 = vld [vmem:[#allocation2 + $0xa9] sm:$0xff] }
 0x590   : > { %v4856_v15 = vld [vmem:[#allocation2 + $0xa7] sm:$0xff] }
 0x591   : > { %v4469_v31 = vpop.permute.xlu0 %4468  ;;  %v4465_v10 = vpop.permute.xlu1 %4464 }
 0x592   : > { %4558 = vst.msk [vmem:[#allocation3 + $0x18] sm:$0xf] %vm9644_vm3, %v4469_v31  ;;  %v4666_v31 = vpack.c.bf16 %v4602_v42, %v4602_v42  ;;  %vm9648_vm3 = vmmov %vm9639_vm1  ;;  %v4857_v42 = vld [vmem:[#allocation2 + $0xaf] sm:$0xff] }
 0x593   : > { %4556 = vst.msk [vmem:[#allocation3 + $0x10] sm:$0xf] %vm9639_vm1, %v4465_v10  ;;  %v4604_v10 = vld [vmem:[#allocation2 + $0xb9] sm:$0xff] }
 0x594   : > { %4742 = vrot.lane.b32.xlu2 %v4663_v48, %s6419_s15  ;;  %v4888_v48 = vsel %vm9511_vm8, %v4856_v15, 0.0  ;;  %vm9651_vm8 = vmmov %vm9639_vm1 }
 0x595   : > { %v4920_v20 = vpack.c.bf16 %v4888_v48, %v4888_v48  ;;  %v4840_v48 = vld [vmem:[#allocation2 + $0x27] sm:$0xff] }
 0x596   : > { %v4485_v61 = vpop.permute.xlu2 %4484 }
 0x597   : > { %4566 = vst.msk [vmem:[#allocation3 + $0x38] sm:$0xf] %vm9647_vm9, %v4485_v61  ;;  %4750 = vrot.lane.b32.xlu0 %v4667_v32, %s6419_s15  ;;  %4746 = vrot.lane.b32.xlu1 %v4665_v5, %s6419_s15  ;;  %v8586_v61 = vpack.c.bf16 %v4604_v10, %v4604_v10  ;;  %vm9649_vm9 = vmmov %vm9639_vm1  ;;  %v4637_v32 = vsel %vm9650_vm11, %v8584_v58, 0.0 }
 0x598   : > { %v4669_v5 = vpack.c.bf16 %v4637_v32, %v4637_v32 }
 0x599   : > { %v4475_v9 = vpop.permute.xlu0 %4474  ;;  %v4471_v55 = vpop.permute.xlu1 %4470 }
 0x59a   : > { %4561 = vst.msk [vmem:[#allocation3 + $0x24] sm:$0xf] %vm9648_vm3, %v4475_v9  ;;  %vm9652_vm3 = vmmov %vm9639_vm1  ;;  %v4921_v9 = vpack.c.bf16 %v4857_v42, %v4857_v42  ;;  %v4841_v42 = vld [vmem:[#allocation2 + $0x2f] sm:$0xff] }
 0x59b   : > { %4559 = vst.msk [vmem:[#allocation3 + $0x1c] sm:$0xf] %vm9639_vm1, %v4471_v55 }
 0x59c   : > { %4748 = vrot.lane.b32.xlu2 %v4666_v31, %s6419_s15 }
 0x59e   : > { %v4491_v62 = vpop.permute.xlu2 %4490 }
 0x59f   : > { %4569 = vst.msk [vmem:[#allocation3 + $0x44] sm:$0xf] %vm9649_vm9, %v4491_v62  ;;  %5000 = vrot.lane.b32.xlu0 %v4920_v20, %s6420_s16  ;;  %4752 = vrot.lane.b32.xlu1 %v8586_v61, %s6419_s15  ;;  %vm9653_vm9 = vmmov %vm9639_vm1  ;;  %v4872_v20 = vsel %vm9561_vm6, %v4840_v48, 0.0 }
 0x5a0   : > { %vm9656_vm6 = vmmov %vm9639_vm1 }
 0x5a1   : > { %v4481_v2 = vpop.permute.xlu0 %4480  ;;  %v4477_v55 = vpop.permute.xlu1 %4476 }
 0x5a2   : > { %4564 = vst.msk [vmem:[#allocation3 + $0x30] sm:$0xf] %vm9651_vm8, %v4481_v2  ;;  %vm9654_vm8 = vmmov %vm9639_vm1  ;;  %v4904_v2 = vpack.c.bf16 %v4872_v20, %v4872_v20 }
 0x5a3   : > { %4562 = vst.msk [vmem:[#allocation3 + $0x28] sm:$0xf] %vm9652_vm3, %v4477_v55  ;;  %vm9655_vm3 = vmmov %vm9639_vm1 }
 0x5a4   : > { %4754 = vrot.lane.b32.xlu2 %v4669_v5, %s6419_s15 }
 0x5a6   : > { %v4497_v15 = vpop.permute.xlu2 %4496 }
 0x5a7   : > { %4572 = vst.msk [vmem:[#allocation3 + $0x50] sm:$0xf] %vm9639_vm1, %v4497_v15  ;;  %5226 = vrot.lane.b32.xlu0 %v8435_v35, %s6421_s17  ;;  %5002 = vrot.lane.b32.xlu1 %v4921_v9, %s6420_s16  ;;  %v5369_v35 = vsel %vm9646_vm13, %v4603_v38, 0.0  ;;  %v4905_v15 = vpack.c.bf16 %v4841_v42, %v4841_v42  ;;  %vm9658_vm13 = vmmov %vm9639_vm1  ;;  %v4890_v9 = vsel %vm9517_vm5, %v4858_v41, 0.0  ;;  %v4892_v41 = vsel %vm9331_vm12, %v4860_v51, 0.0 }
 0x5a8   : > { %v5401_v55 = vpack.c.bf16 %v5369_v35, %v5369_v35  ;;  %vm9661_vm5 = vmmov %vm9639_vm1  ;;  %v4874_v35 = vsel %vm6767_vm7, %v4842_v39, 0.0 }
 0x5a9   : > { %v4487_v10 = vpop.permute.xlu0 %4486  ;;  %v4483_v62 = vpop.permute.xlu1 %4482 }
 0x5aa   : > { %4567 = vst.msk [vmem:[#allocation3 + $0x3c] sm:$0xf] %vm9653_vm9, %v4487_v10  ;;  %vm9657_vm9 = vmmov %vm9639_vm1  ;;  %v4922_v10 = vpack.c.bf16 %v4890_v9, %v4890_v9 }
 0x5ab   : > { %4565 = vst.msk [vmem:[#allocation3 + $0x34] sm:$0xf] %vm9654_vm8, %v4483_v62  ;;  %vm9659_vm8 = vmmov %vm9639_vm1 }
 0x5ac   : > { %5224 = vrot.lane.b32.xlu2 %v8424_v49, %s6421_s17 }
 0x5ae   : > { %v4503_v32 = vpop.permute.xlu2 %4502 }
 0x5af   : > { %4575 = vst.msk [vmem:[#allocation3 + $0x5c] sm:$0xf] %vm9655_vm3, %v4503_v32  ;;  %4968 = vrot.lane.b32.xlu0 %v4904_v2, %s6420_s16  ;;  %5480 = vrot.lane.b32.xlu1 %v4666_v31, %s6422_s23  ;;  %vm9660_vm3 = vmmov %vm9639_vm1 }
 0x5b0   : > { %vm9667_vm7 = vmmov %vm9660_vm3 }
 0x5b1   : > { %v4493_v5 = vpop.permute.xlu0 %4492  ;;  %v4489_v4 = vpop.permute.xlu1 %4488 }
 0x5b2   : > { %4570 = vst.msk [vmem:[#allocation3 + $0x48] sm:$0xf] %vm9656_vm6, %v4493_v5  ;;  %vm9662_vm6 = vmmov %vm9639_vm1 }
 0x5b3   : > { %4568 = vst.msk [vmem:[#allocation3 + $0x40] sm:$0xf] %vm9639_vm1, %v4489_v4  ;;  %vm9663_vm1 = vcmask 191648  }
 0x5b4   : > { %5482 = vrot.lane.b32.xlu2 %v5401_v55, %s6422_s23  ;;  %v4906_v55 = vpack.c.bf16 %v4874_v35, %v4874_v35  ;;  %vm9673_vm12 = vmmov %vm9663_vm1 }
 0x5b6   : > { %v4509_v49 = vpop.permute.xlu2 %4508 }
 0x5b7   : > { %4578 = vst.msk [vmem:[#allocation3 + $0x68] sm:$0xf] %vm9657_vm9, %v4509_v49  ;;  %5194 = vrot.lane.b32.xlu0 %v8370_v54, %s6421_s17  ;;  %4970 = vrot.lane.b32.xlu1 %v4905_v15, %s6420_s16  ;;  %v5353_v54 = vsel %vm9622_vm4, %v8492_v13, 0.0  ;;  %vm9664_vm4 = vmmov %vm9660_vm3 }
 0x5b8   : > { %v5385_v62 = vpack.c.bf16 %v5353_v54, %v5353_v54  ;;  %vm9665_vm9 = vmmov %vm9660_vm3 }
 0x5b9   : > { %v4499_v38 = vpop.permute.xlu0 %4498  ;;  %v4495_v31 = vpop.permute.xlu1 %4494 }
 0x5ba   : > { %4573 = vst.msk [vmem:[#allocation3 + $0x54] sm:$0xf] %vm9658_vm13, %v4499_v38  ;;  %vm9666_vm13 = vmmov %vm9663_vm1 }
 0x5bb   : > { %4571 = vst.msk [vmem:[#allocation3 + $0x4c] sm:$0xf] %vm9659_vm8, %v4495_v31  ;;  %vm9668_vm8 = vmmov %vm9660_vm3  ;;  %v4924_v31 = vpack.c.bf16 %v4892_v41, %v4892_v41 }
 0x5bc   : > { %5192 = vrot.lane.b32.xlu2 %v8376_v6, %s6421_s17  ;;  %v4859_v6 = vld [vmem:[#allocation2 + $0xbf] sm:$0xff] }
 0x5bd   : > { %v4923_v2 = vpack.c.bf16 %v4859_v6, %v4859_v6 }
 0x5be   : > { %v4515_v48 = vpop.permute.xlu2 %4514 }
 0x5bf   : > { %4581 = vst.msk [vmem:[#allocation3 + $0x74] sm:$0xf] %vm9660_vm3, %v4515_v48  ;;  %5004 = vrot.lane.b32.xlu0 %v4922_v10, %s6420_s16  ;;  %5448 = vrot.lane.b32.xlu1 %v8496_v8, %s6422_s23  ;;  %vm9669_vm3 = vmmov %vm9663_vm1 }
 0x5c1   : > { %v4505_v30 = vpop.permute.xlu0 %4504  ;;  %v4501_v20 = vpop.permute.xlu1 %4500 }
 0x5c2   : > { %4576 = vst.msk [vmem:[#allocation3 + $0x60] sm:$0xf] %vm9661_vm5, %v4505_v30  ;;  %vm9671_vm5 = vmmov %vm9664_vm4  ;;  %v4876_v30 = vsel %vm6793_vm10, %v4844_v50, 0.0  ;;  %v4847_v50 = vld [vmem:[#allocation2 + $0x5f] sm:$0xff] }
 0x5c3   : > { %4574 = vst.msk [vmem:[#allocation3 + $0x58] sm:$0xf] %vm9662_vm6, %v4501_v20  ;;  %vm9672_vm6 = vmmov %vm9663_vm1  ;;  %v5341_v20 = vld [vmem:[#allocation2 + $0xd1] sm:$0xff] }
 0x5c4   : > { %5450 = vrot.lane.b32.xlu2 %v5385_v62, %s6422_s23  ;;  %v5340_v62 = vld [vmem:[#allocation2 + $0xc9] sm:$0xff] }
 0x5c6   : > { %v4713_v32 = vpop.permute.xlu2 %4712 }
 0x5c7   : > { %4808 = vst.msk [vmem:[#allocation3] sm:$0xf] %vm9663_vm1, %v4713_v32  ;;  %5230 = vrot.lane.b32.xlu0 %v8433_v18, %s6421_s17  ;;  %5006 = vrot.lane.b32.xlu1 %v4923_v2, %s6420_s16  ;;  %v5371_v18 = vsel %vm9645_vm15, %v8584_v58, 0.0  ;;  %vm9670_vm15 = vmmov %vm9663_vm1  ;;  %v4908_v32 = vpack.c.bf16 %v4876_v30, %v4876_v30  ;;  %v5373_v2 = vsel %vm9650_vm11, %v5341_v20, 0.0 }
 0x5c8   : > { %v5403_v4 = vpack.c.bf16 %v5371_v18, %v5371_v18  ;;  %v5405_v39 = vpack.c.bf16 %v5373_v2, %v5373_v2  ;;  %v5357_v18 = vsel %vm9629_vm2, %v8506_v25, 0.0 }
 0x5c9   : > { %v4511_v13 = vpop.permute.xlu0 %4510  ;;  %v4507_v8 = vpop.permute.xlu1 %4506 }
 0x5ca   : > { %4579 = vst.msk [vmem:[#allocation3 + $0x6c] sm:$0xf] %vm9664_vm4, %v4511_v13  ;;  %vm9674_vm4 = vmmov %vm9663_vm1 }
 0x5cb   : > { %4577 = vst.msk [vmem:[#allocation3 + $0x64] sm:$0xf] %vm9665_vm9, %v4507_v8 }
 0x5cc   : > { %5228 = vrot.lane.b32.xlu2 %v8442_v40, %s6421_s17  ;;  %v4843_v40 = vld [vmem:[#allocation2 + $0x3f] sm:$0xff] }
 0x5cd   : > { %v4907_v15 = vpack.c.bf16 %v4843_v40, %v4843_v40  ;;  %v4863_v40 = vld [vmem:[#allocation2 + $0xdf] sm:$0xff] }
 0x5ce   : > { %v4719_v5 = vpop.permute.xlu2 %4718  ;;  %v4927_v51 = vpack.c.bf16 %v4863_v40, %v4863_v40 }
 0x5cf   : > { %4811 = vst.msk [vmem:[#allocation3 + $0xc] sm:$0xf] %vm9666_vm13, %v4719_v5  ;;  %4972 = vrot.lane.b32.xlu0 %v4906_v55, %s6420_s16  ;;  %5484 = vrot.lane.b32.xlu1 %v8586_v61, %s6422_s23 }
 0x5d1   : > { %v4517_v33 = vpop.permute.xlu0 %4516  ;;  %v4513_v42 = vpop.permute.xlu1 %4512 }
 0x5d2   : > { %4582 = vst.msk [vmem:[#allocation3 + $0x78] sm:$0xf] %vm9667_vm7, %v4517_v33 }
 0x5d3   : > { %4580 = vst.msk [vmem:[#allocation3 + $0x70] sm:$0xf] %vm9668_vm8, %v4513_v42 }
 0x5d4   : > { %5486 = vrot.lane.b32.xlu2 %v5403_v4, %s6422_s23  ;;  %v5389_v4 = vpack.c.bf16 %v5357_v18, %v5357_v18 }
 0x5d6   : > { %v4725_v49 = vpop.permute.xlu2 %4724 }
 0x5d7   : > { %4814 = vst.msk [vmem:[#allocation3 + $0x18] sm:$0xf] %vm9669_vm3, %v4725_v49  ;;  %5198 = vrot.lane.b32.xlu0 %v8391_v11, %s6421_s17  ;;  %4974 = vrot.lane.b32.xlu1 %v4907_v15, %s6420_s16  ;;  %v5355_v11 = vsel %vm9626_vm0, %v8508_v34, 0.0  ;;  %vm9675_vm0 = vmmov %vm9663_vm1 }
 0x5d8   : > { %v5387_v9 = vpack.c.bf16 %v5355_v11, %v5355_v11  ;;  %vm9676_vm9 = vmmov %vm9675_vm0 }
 0x5d9   : > { %v4715_v58 = vpop.permute.xlu0 %4714  ;;  %v4519_v61 = vpop.permute.xlu1 %4518  ;;  %vm9677_vm13 = vmmov %vm9675_vm0 }
 0x5da   : > { %4809 = vst.msk [vmem:[#allocation3 + $0x4] sm:$0xf] %vm9670_vm15, %v4715_v58  ;;  %vm9678_vm10 = vmmov %vm9675_vm0 }
 0x5db   : > { %4583 = vst.msk [vmem:[#allocation3 + $0x7c] sm:$0xf] %vm9671_vm5, %v4519_v61  ;;  %vm9679_vm7 = vmmov %vm9675_vm0  ;;  %v6289_v61 = vld [vmem:[%s9066_s3 + $0x8] sm:$0xff] }
 0x5dc   : > { %5196 = vrot.lane.b32.xlu2 %v8384_v28, %s6421_s17  ;;  %v4861_v28 = vld [vmem:[#allocation2 + $0xcf] sm:$0xff]  ;;  %vm9680_vm8 = vmmov %vm9675_vm0 }
 0x5dd   : > { %v4925_v54 = vpack.c.bf16 %v4861_v28, %v4861_v28  ;;  %vm9681_vm11 = vmmov %vm9675_vm0  ;;  %v5343_v28 = vld [vmem:[#allocation2 + $0xe1] sm:$0xff] }
 0x5de   : > { %v4731_v38 = vpop.permute.xlu2 %4730  ;;  %vm9682_vm3 = vmmov %vm9675_vm0 }
 0x5df   : > { %4817 = vst.msk [vmem:[#allocation3 + $0x24] sm:$0xf] %vm9672_vm6, %v4731_v38  ;;  %5008 = vrot.lane.b32.xlu0 %v4924_v31, %s6420_s16  ;;  %5452 = vrot.lane.b32.xlu1 %v8494_v16, %s6422_s23  ;;  %vm9683_vm15 = vmmov %vm9675_vm0  ;;  %vm9685_vm6 = vnez %v9425_v43 }
 0x5e0   : > { %vm9684_vm5 = vmmov %vm9675_vm0  ;;  %v4639_v21 = vsel %vm9685_vm6, %v5341_v20, 0.0 }
 0x5e1   : > { %v4721_v27 = vpop.permute.xlu0 %4720  ;;  %v4717_v48 = vpop.permute.xlu1 %4716  ;;  %vm9686_vm2 = vmmov %vm9675_vm0  ;;  %v4671_v58 = vpack.c.bf16 %v4639_v21, %v4639_v21 }
 0x5e2   : > { %4812 = vst.msk [vmem:[#allocation3 + $0x10] sm:$0xf] %vm9673_vm12, %v4721_v27  ;;  %vm9687_vm12 = vcmask 1043456   ;;  %v6288_v27 = vld [vmem:[%s9066_s3] sm:$0xff] }
 0x5e3   : > { %4810 = vst.msk [vmem:[#allocation3 + $0x8] sm:$0xf] %vm9663_vm1, %v4717_v48  ;;  %vm9688_vm1 = vmmov %vm9675_vm0 }
 0x5e4   : > { %5454 = vrot.lane.b32.xlu2 %v5387_v9, %s6422_s23  ;;  %v5342_v9 = vld [vmem:[#allocation2 + $0xd9] sm:$0xff] }
 0x5e5   : > { %v5406_v48 = vpack.c.bf16 %v5342_v9, %v5342_v9  ;;  %v4866_v9 = vld [vmem:[#allocation2 + $0xf7] sm:$0xff] }
 0x5e6   : > { %v4737_v10 = vpop.permute.xlu2 %4736 }
 0x5e7   : > { %4820 = vst.msk [vmem:[#allocation3 + $0x30] sm:$0xf] %vm9674_vm4, %v4737_v10  ;;  %5234 = vrot.lane.b32.xlu0 %v8457_v0, %s6421_s17  ;;  %5010 = vrot.lane.b32.xlu1 %v4925_v54, %s6420_s16  ;;  %v5404_v0 = vpack.c.bf16 %v5340_v62, %v5340_v62  ;;  %vm9689_vm4 = vmmov %vm9675_vm0  ;;  %v4911_v62 = vpack.c.bf16 %v4847_v50, %v4847_v50 }
 0x5e9   : > { %v4727_v16 = vpop.permute.xlu0 %4726  ;;  %v4723_v34 = vpop.permute.xlu1 %4722 }
 0x5ea   : > { %4815 = vst.msk [vmem:[#allocation3 + $0x1c] sm:$0xf] %vm9675_vm0, %v4727_v16  ;;  %v5375_v16 = vsel %vm9685_vm6, %v5343_v28, 0.0  ;;  %vm9691_vm0 = vcmask 257248  }
 0x5eb   : > { %4813 = vst.msk [vmem:[#allocation3 + $0x14] sm:$0xf] %vm9676_vm9, %v4723_v34  ;;  %v4846_v34 = vld [vmem:[#allocation2 + $0x57] sm:$0xff]  ;;  %vm9692_vm9 = vmmov %vm9688_vm1 }
 0x5ec   : > { %5232 = vrot.lane.b32.xlu2 %v8450_v17, %s6421_s17  ;;  %v4845_v17 = vld [vmem:[#allocation2 + $0x4f] sm:$0xff] }
 0x5ed   : > { %v4909_v35 = vpack.c.bf16 %v4845_v17, %v4845_v17 }
 0x5ee   : > { %v4743_v6 = vpop.permute.xlu2 %4742 }
 0x5ef   : > { %4823 = vst.msk [vmem:[#allocation3 + $0x3c] sm:$0xf] %vm9677_vm13, %v4743_v6  ;;  %4976 = vrot.lane.b32.xlu0 %v4908_v32, %s6420_s16  ;;  %5488 = vrot.lane.b32.xlu1 %v5404_v0, %s6422_s23  ;;  %vm9693_vm13 = vnez %v9216_v63 }
 0x5f0   : > { %v4878_v20 = vsel %vm9693_vm13, %v4846_v34, 0.0  ;;  %v4867_v34 = vld [vmem:[#allocation2 + $0xff] sm:$0xff] }
 0x5f1   : > { %v4733_v47 = vpop.permute.xlu0 %4732  ;;  %v4729_v13 = vpop.permute.xlu1 %4728  ;;  %v4910_v6 = vpack.c.bf16 %v4878_v20, %v4878_v20  ;;  %v5122_v20 = vld [vmem:[#allocation2 + $0xf8] sm:$0xff] }
 0x5f2   : > { %4818 = vst.msk [vmem:[#allocation3 + $0x28] sm:$0xf] %vm9678_vm10, %v4733_v47 }
 0x5f3   : > { %4816 = vst.msk [vmem:[#allocation3 + $0x20] sm:$0xf] %vm9679_vm7, %v4729_v13  ;;  %vm9695_vm7 = vmmov %vm9691_vm0  ;;  %v4864_v13 = vld [vmem:[#allocation2 + $0xe7] sm:$0xff] }
 0x5f4   : > { %5490 = vrot.lane.b32.xlu2 %v5405_v39, %s6422_s23 }
 0x5f6   : > { %v4749_v8 = vpop.permute.xlu2 %4748 }
 0x5f7   : > { %4826 = vst.msk [vmem:[#allocation3 + $0x48] sm:$0xf] %vm9680_vm8, %v4749_v8  ;;  %5202 = vrot.lane.b32.xlu0 %v8399_v53, %s6421_s17  ;;  %4978 = vrot.lane.b32.xlu1 %v4909_v35, %s6420_s16  ;;  %v5612_v53 = vld [vmem:[%s9066_s3 + $0x10] sm:$0xf]  ;;  %vm9696_vm8 = vcmask 290048  }
 0x5f8   : > { %v5706_v33 = vunpack.c.l.b16 %v5612_v53  ;;  %vm9701_vm6 = vmmov %vm9696_vm8 }
 0x5f9   : > { %v4739_v26 = vpop.permute.xlu0 %4738  ;;  %v4735_v5 = vpop.permute.xlu1 %4734 }
 0x5fa   : > { %4821 = vst.msk [vmem:[#allocation3 + $0x34] sm:$0xf] %vm9681_vm11, %v4739_v26  ;;  %v5709_v25 = vpack.c.b16 %v5706_v33, %v5706_v33  ;;  %v4865_v26 = vld [vmem:[#allocation2 + $0xef] sm:$0xff] }
 0x5fb   : > { %4819 = vst.msk [vmem:[#allocation3 + $0x2c] sm:$0xf] %vm9682_vm3, %v4735_v5  ;;  %vm9698_vm3 = vnez %v9376_v19  ;;  %v5345_v5 = vld [vmem:[#allocation2 + $0xf1] sm:$0xff]  ;;  %v5104_v19 = vld [vmem:[#allocation2 + $0x68] sm:$0xff] }
 0x5fc   : > { %5200 = vrot.lane.b32.xlu2 %v8382_v24, %s6421_s17  ;;  %v5761_v49 = vsel %vm9687_vm12, %v5709_v25, 0  ;;  %v4641_v2 = vsel %vm9698_vm3, %v5343_v28, 0.0  ;;  %vm9703_vm12 = vnez %v9587_v57  ;;  %v5377_v53 = vsel %vm9698_vm3, %v5345_v5, 0.0 }
 0x5fd   : > { %6294 = vmatpush.bf16.msra.mxu3 %v5761_v49  ;;  %5768 = vmatpush.bf16.msra.mxu1 %v5761_v49 }
 0x5fe   : > { %v4755_v55 = vpop.permute.xlu2 %4754 }
 0x5ff   : > { %4829 = vst.msk [vmem:[#allocation3 + $0x54] sm:$0xf] %vm9683_vm15, %v4755_v55  ;;  %4756 = vrot.lane.b32.xlu0 %v5404_v0, %s6419_s15  ;;  %5456 = vrot.lane.b32.xlu1 %v8522_v37, %s6422_s23  ;;  %v4862_v37 = vld [vmem:[#allocation2 + $0xd7] sm:$0xff]  ;;  %vm9699_vm15 = vnez %v9212_v45  ;;  %v4896_v45 = vsel %vm9703_vm12, %v4864_v13, 0.0  ;;  %v4929_v55 = vpack.c.bf16 %v4865_v26, %v4865_v26 }
 0x600   : > { %v4894_v41 = vsel %vm9395_vm14, %v4862_v37, 0.0  ;;  %vm9690_vm14 = vcmask 224448   ;;  %v5359_v47 = vsel %vm9699_vm15, %v8528_v3, 0.0  ;;  %v4928_v35 = vpack.c.bf16 %v4896_v45, %v4896_v45 }
 0x601   : > { %v4745_v24 = vpop.permute.xlu0 %4744  ;;  %v4741_v42 = vpop.permute.xlu1 %4740  ;;  %v4926_v31 = vpack.c.bf16 %v4894_v41, %v4894_v41  ;;  %6295 = vmatpush.bf16.msra.mxu3 %v6289_v61  ;;  %5769 = vmatpush.bf16.msra.mxu1 %v6289_v61  ;;  %vm9694_vm10 = vmmov %vm9690_vm14  ;;  %v5391_v39 = vpack.c.bf16 %v5359_v47, %v5359_v47 }
 0x602   : > { %4824 = vst.msk [vmem:[#allocation3 + $0x40] sm:$0xf] %vm9684_vm5, %v4745_v24  ;;  %vm9697_vm11 = vmmov %vm9694_vm10  ;;  %v5409_v24 = vpack.c.bf16 %v5377_v53, %v5377_v53 }
 0x603   : > { %4822 = vst.msk [vmem:[#allocation3 + $0x38] sm:$0xf] %vm9686_vm2, %v4741_v42  ;;  %vm9700_vm5 = vmmov %vm9691_vm0 }
 0x604   : > { %5458 = vrot.lane.b32.xlu2 %v5389_v4, %s6422_s23  ;;  %vm9702_vm2 = vmmov %vm9694_vm10  ;;  %v4848_v4 = vld [vmem:[#allocation2 + $0x67] sm:$0xff] }
 0x605   : > { %6296 = vmatpush.bf16.msra.mxu3 %v6288_v27  ;;  %5770 = vmatpush.bf16.msra.mxu1 %v6288_v27 }
 0x606   : > { %v5225_v15 = vpop.permute.xlu2 %5224 }
 0x607   : > { %5014 = vrot.lane.b32.xlu0 %v4927_v51, %s6420_s16  ;;  %4758 = vrot.lane.b32.xlu1 %v4671_v58, %s6419_s15  ;;  %v4849_v51 = vld [vmem:[#allocation2 + $0x6f] sm:$0xff] }
 0x609   : > { %v4751_v38 = vpop.permute.xlu0 %4750  ;;  %v4747_v11 = vpop.permute.xlu1 %4746 }
 0x60a   : > { %4827 = vst.msk [vmem:[#allocation3 + $0x4c] sm:$0xf] %vm9688_vm1, %v4751_v38  ;;  %vm9704_vm1 = vmmov %vm9691_vm0  ;;  %v5105_v38 = vld [vmem:[#allocation2 + $0x70] sm:$0xff] }
 0x60b   : > { %4825 = vst.msk [vmem:[#allocation3 + $0x44] sm:$0xf] %vm9689_vm4, %v4747_v11  ;;  %vm9705_vm4 = vmmov %vm9701_vm6  ;;  %v5137_v27 = vpack.c.bf16 %v5105_v38, %v5105_v38 }
 0x60c   : > { %5012 = vrot.lane.b32.xlu2 %v4926_v31, %s6420_s16  ;;  %vm9709_vm13 = vmmov %vm9705_vm4 }
 0x60e   : > { %v5483_v59 = vpop.permute.xlu2 %5482 }
 0x60f   : > { %5492 = vrot.lane.b32.xlu0 %v5406_v48, %s6422_s23  ;;  %5236 = vrot.lane.b32.xlu1 %v8448_v60, %s6421_s17  ;;  %v5407_v60 = vpack.c.bf16 %v5375_v16, %v5375_v16 }
 0x611   : > { %v5001_v10 = vpop.permute.xlu0 %5000  ;;  %v4753_v54 = vpop.permute.xlu1 %4752 }
 0x612   : > { %5080 = vst.msk [vmem:[#allocation3 + $0x40] sm:$0xf] %vm9690_vm14, %v5001_v10  ;;  %vm9706_vm14 = vcmask 326656  }
 0x613   : > { %5304 = vst.msk [vmem:[#allocation3 + $0x40] sm:$0xf] %vm9691_vm0, %v5225_v15  ;;  %vm9707_vm0 = vmmov %vm9702_vm2 }
 0x614   : > { %5238 = vrot.lane.b32.xlu2 %v8465_v36, %s6421_s17  ;;  %4828 = vst.msk [vmem:[#allocation3 + $0x50] sm:$0xf] %vm9692_vm9, %v4753_v54  ;;  %vm9708_vm9 = vmmov %vm9704_vm1 }
 0x615   : > { %vm9714_vm3 = vmmov %vm9706_vm14 }
 0x616   : > { %v5193_v30 = vpop.permute.xlu2 %5192  ;;  %vm9715_vm15 = vmmov %vm9707_vm0 }
 0x617   : > { %4982 = vrot.lane.b32.xlu0 %v4911_v62, %s6420_s16  ;;  %5494 = vrot.lane.b32.xlu1 %v5407_v60, %s6422_s23  ;;  %vm9719_vm12 = vmmov %vm9707_vm0  ;;  %v4931_v60 = vpack.c.bf16 %v4867_v34, %v4867_v34  ;;  %v4852_v34 = vld [vmem:[#allocation2 + $0x87] sm:$0xff] }
 0x619   : > { %v5227_v43 = vpop.permute.xlu0 %5226  ;;  %v5003_v32 = vpop.permute.xlu1 %5002 }
 0x61a   : > { %5081 = vst.msk [vmem:[#allocation3 + $0x44] sm:$0xf] %vm9694_vm10, %v5003_v32  ;;  %vm9710_vm10 = vmmov %vm9707_vm0  ;;  %v5154_v32 = vpack.c.bf16 %v5122_v20, %v5122_v20  ;;  %v9759_v20 = vld [vmem:[#allocation12_spill] sm:$0xff] }
 0x61b   : > { %5305 = vst.msk [vmem:[#allocation3 + $0x44] sm:$0xf] %vm9695_vm7, %v5227_v43  ;;  %vm9711_vm7 = vnez %v9221_v29  ;;  %v4913_v29 = vpack.c.bf16 %v4849_v51, %v4849_v51  ;;  %v4850_v43 = vld [vmem:[#allocation2 + $0x77] sm:$0xff] }
 0x61c   : > { %4980 = vrot.lane.b32.xlu2 %v4910_v6, %s6420_s16  ;;  %5561 = vst.msk [vmem:[#allocation3 + $0x44] sm:$0xf] %vm9696_vm8, %v5483_v59  ;;  %v4880_v25 = vsel %vm9711_vm7, %v4848_v4, 0.0  ;;  %vm9712_vm8 = vmmov %vm9704_vm1  ;;  %v9741_v4 = vld [vmem:[#allocation9_spill] sm:$0xff] }
 0x61d   : > { %v4912_v15 = vpack.c.bf16 %v4880_v25, %v4880_v25 }
 0x61e   : > { %v5451_v36 = vpop.permute.xlu2 %5450 }
 0x61f   : > { %5460 = vrot.lane.b32.xlu0 %v8532_v46, %s6422_s23  ;;  %5204 = vrot.lane.b32.xlu1 %v8406_v7, %s6421_s17  ;;  %v4673_v7 = vpack.c.bf16 %v4641_v2, %v4641_v2  ;;  %v5346_v2 = vld [vmem:[#allocation2 + $0xf9] sm:$0xff] }
 0x620   : > { %v5410_v13 = vpack.c.bf16 %v5346_v2, %v5346_v2 }
 0x621   : > { %v4969_v63 = vpop.permute.xlu0 %4968  ;;  %v5481_v0 = vpop.permute.xlu1 %5480 }
 0x622   : > { %5064 = vst.msk [vmem:[#allocation3] sm:$0xf] %vm9697_vm11, %v4969_v63  ;;  %vm9713_vm11 = vmmov %vm9705_vm4  ;;  %v9729_v63 = vld [vmem:[#allocation11_spill] sm:$0xff] }
 0x623   : > { %5288 = vst.msk [vmem:[#allocation3] sm:$0xf] %vm9700_vm5, %v5193_v30  ;;  %vm9716_vm5 = vnez %v9404_v12 }
 0x624   : > { %5206 = vrot.lane.b32.xlu2 %v8397_v56, %s6421_s17  ;;  %5560 = vst.msk [vmem:[#allocation3 + $0x40] sm:$0xf] %vm9701_vm6, %v5481_v0  ;;  %v5361_v41 = vsel %vm9716_vm5, %v8544_v23, 0.0  ;;  %vm9717_vm6 = vmmov %vm9704_vm1 }
 0x625   : > { %v5393_v11 = vpack.c.bf16 %v5361_v41, %v5361_v41 }
 0x626   : > { %v5229_v46 = vpop.permute.xlu2 %5228 }
 0x627   : > { %4762 = vrot.lane.b32.xlu0 %v4673_v7, %s6419_s15  ;;  %5462 = vrot.lane.b32.xlu1 %v5391_v39, %s6422_s23 }
 0x629   : > { %v5195_v17 = vpop.permute.xlu0 %5194  ;;  %v4971_v8 = vpop.permute.xlu1 %4970 }
 0x62a   : > { %5065 = vst.msk [vmem:[#allocation3 + $0x4] sm:$0xf] %vm9702_vm2, %v4971_v8  ;;  %vm9718_vm2 = vmmov %vm9705_vm4 }
 0x62b   : > { %5289 = vst.msk [vmem:[#allocation3 + $0x4] sm:$0xf] %vm9704_vm1, %v5195_v17  ;;  %v6280_v56 = vld [vmem:[#allocation3 + $0x40] sm:$0xff]  ;;  %vm9720_vm1 = vnez %v9584_v22  ;;  %vm9727_vm7 = vmmov %vm9718_vm2 }
 0x62c   : > { %4760 = vrot.lane.b32.xlu2 %v5406_v48, %s6419_s15  ;;  %5545 = vst.msk [vmem:[#allocation3 + $0x4] sm:$0xf] %vm9705_vm4, %v5451_v36  ;;  %6240 = vmatmul.msk.bf16.vlgmr.msra.gmra.mxu3 %vm9706_vm14, %v6280_v56  ;;  %v4898_v12 = vsel %vm9720_vm1, %v4866_v9, 0.0  ;;  %vm9721_vm4 = vmmov %vm9717_vm6  ;;  %v5124_v9 = vld [vmem:[#allocation2 + $0x108] sm:$0xff] }
 0x62d   : > { %vm9722_vm14 = vmmov %vm9718_vm2  ;;  %v4930_v10 = vpack.c.bf16 %v4898_v12, %v4898_v12 }
 0x62e   : > { %v5487_v3 = vpop.permute.xlu2 %5486 }
 0x62f   : > { %5240 = vrot.lane.b32.xlu0 %v8472_v1, %s6421_s17  ;;  %5016 = vrot.lane.b32.xlu1 %v4928_v35, %s6420_s16  ;;  %v5344_v1 = vld [vmem:[#allocation2 + $0xe9] sm:$0xff]  ;;  %v4851_v35 = vld [vmem:[#allocation2 + $0x7f] sm:$0xff] }
 0x630   : > { %v5408_v40 = vpack.c.bf16 %v5344_v1, %v5344_v1  ;;  %v9740_v1 = vld [vmem:[#allocation33_spill] sm:$0xff] }
 0x631   : > { %v5005_v57 = vpop.permute.xlu0 %5004  ;;  %v5449_v18 = vpop.permute.xlu1 %5448 }
 0x632   : > { %5082 = vst.msk [vmem:[#allocation3 + $0x48] sm:$0xf] %vm9707_vm0, %v5005_v57  ;;  %vm9723_vm0 = vmmov %vm9714_vm3  ;;  %v5106_v57 = vld [vmem:[#allocation2 + $0x78] sm:$0xff] }
 0x633   : > { %5306 = vst.msk [vmem:[#allocation3 + $0x48] sm:$0xf] %vm9708_vm9, %v5229_v46  ;;  %vm9724_vm9 = vnez %v9379_v44  ;;  %v5347_v46 = vld [vmem:[#allocation2 + $0x101] sm:$0xff]  ;;  %vm9733_vm5 = vmmov %vm9723_vm0 }
 0x634   : > { %5018 = vrot.lane.b32.xlu2 %v4929_v55, %s6420_s16  ;;  %5544 = vst.msk [vmem:[#allocation3] sm:$0xf] %vm9709_vm13, %v5449_v18  ;;  %v4643_v54 = vsel %vm9724_vm9, %v5345_v5, 0.0  ;;  %vm9725_vm13 = vmmov %vm9710_vm10  ;;  %v5379_v17 = vsel %vm9724_vm9, %v5347_v46, 0.0  ;;  %v4915_v5 = vpack.c.bf16 %v4851_v35, %v4851_v35  ;;  %v5138_v18 = vpack.c.bf16 %v5106_v57, %v5106_v57 }
 0x635   : > { %v4675_v50 = vpack.c.bf16 %v4643_v54, %v4643_v54  ;;  %v5411_v45 = vpack.c.bf16 %v5379_v17, %v5379_v17  ;;  %vm9742_vm9 = vnez %v9741_v4 }
 0x636   : > { %v5197_v33 = vpop.permute.xlu2 %5196 }
 0x637   : > { %5498 = vrot.lane.b32.xlu0 %v5409_v24, %s6422_s23  ;;  %5242 = vrot.lane.b32.xlu1 %v8463_v52, %s6421_s17  ;;  %v5136_v52 = vpack.c.bf16 %v5104_v19, %v5104_v19 }
 0x639   : > { %v5231_v42 = vpop.permute.xlu0 %5230  ;;  %v5007_v21 = vpop.permute.xlu1 %5006 }
 0x63a   : > { %5083 = vst.msk [vmem:[#allocation3 + $0x4c] sm:$0xf] %vm9710_vm10, %v5007_v21  ;;  %vm9726_vm10 = vmmov %vm9721_vm4 }
 0x63b   : > { %5307 = vst.msk [vmem:[#allocation3 + $0x4c] sm:$0xf] %vm9712_vm8, %v5231_v42  ;;  %v6272_v37 = vld [vmem:[#allocation3] sm:$0xff]  ;;  %vm9728_vm8 = vmmov %vm9719_vm12  ;;  %v5363_v42 = vsel %vm9742_vm9, %v9740_v1, 0.0 }
 0x63c   : > { %5496 = vrot.lane.b32.xlu2 %v5408_v40, %s6422_s23  ;;  %5563 = vst.msk [vmem:[#allocation3 + $0x4c] sm:$0xf] %vm9713_vm11, %v5487_v3  ;;  %6232 = vmatmul.msk.bf16.vlgmr.msra.gmra.mxu1 %vm9714_vm3, %v6272_v37  ;;  %vm9730_vm11 = vnez %v9729_v63  ;;  %vm9731_vm3 = vmmov %vm9721_vm4  ;;  %v5107_v3 = vld [vmem:[#allocation2 + $0x80] sm:$0xff]  ;;  %v5395_v19 = vpack.c.bf16 %v5363_v42, %v5363_v42  ;;  %v4869_v37 = vld [vmem:[#allocation2 + $0x10f] sm:$0xff] }
 0x63d   : > { %v4882_v0 = vsel %vm9730_vm11, %v4850_v43, 0.0  ;;  %v5139_v44 = vpack.c.bf16 %v5107_v3, %v5107_v3  ;;  %v5332_v63 = vld [vmem:[#allocation2 + $0x89] sm:$0xff]  ;;  %v9767_v3 = vld [vmem:[#allocation10_spill] sm:$0xff] }
 0x63e   : > { %v5455_v49 = vpop.permute.xlu2 %5454  ;;  %v4914_v39 = vpack.c.bf16 %v4882_v0, %v4882_v0  ;;  %v5108_v0 = vld [vmem:[#allocation2 + $0x88] sm:$0xff]  ;;  %v4871_v42 = vld [vmem:[#allocation2 + $0x11f] sm:$0xff] }
 0x63f   : > { %5208 = vrot.lane.b32.xlu0 %v5136_v52, %s6421_s17  ;;  %4984 = vrot.lane.b32.xlu1 %v4912_v15, %s6420_s16  ;;  %v4868_v15 = vld [vmem:[#allocation2 + $0x107] sm:$0xff] }
 0x641   : > { %v4973_v58 = vpop.permute.xlu0 %4972  ;;  %v5485_v61 = vpop.permute.xlu1 %5484 }
 0x642   : > { %5066 = vst.msk [vmem:[#allocation3 + $0x8] sm:$0xf] %vm9715_vm15, %v4973_v58  ;;  %vm9732_vm15 = vmmov %vm9718_vm2  ;;  %v4933_v58 = vpack.c.bf16 %v4869_v37, %v4869_v37 }
 0x643   : > { %5290 = vst.msk [vmem:[#allocation3 + $0x8] sm:$0xf] %vm9717_vm6, %v5197_v33  ;;  %vm9734_vm6 = vmmov %vm9728_vm8 }
 0x644   : > { %4986 = vrot.lane.b32.xlu2 %v4913_v29, %s6420_s16  ;;  %5562 = vst.msk [vmem:[#allocation3 + $0x48] sm:$0xf] %vm9718_vm2, %v5485_v61  ;;  %vm9735_vm2 = vmmov %vm9731_vm3  ;;  %v9750_v61 = vld [vmem:[#allocation25_spill] sm:$0xff] }
 0x645   : > { %vm9737_vm1 = vmmov %vm9734_vm6 }
 0x646   : > { %v5233_v31 = vpop.permute.xlu2 %5232  ;;  %vm9749_vm11 = vmmov %vm9737_vm1 }
 0x647   : > { %5466 = vrot.lane.b32.xlu0 %v5393_v11, %s6422_s23  ;;  %5210 = vrot.lane.b32.xlu1 %v5137_v27, %s6421_s17  ;;  %v5348_v27 = vld [vmem:[#allocation2 + $0x109] sm:$0xff] }
 0x648   : > { %v5412_v12 = vpack.c.bf16 %v5348_v27, %v5348_v27 }
 0x649   : > { %v5199_v59 = vpop.permute.xlu0 %5198  ;;  %v4975_v48 = vpop.permute.xlu1 %4974 }
 0x64a   : > { %5067 = vst.msk [vmem:[#allocation3 + $0xc] sm:$0xf] %vm9719_vm12, %v4975_v48  ;;  %vm9736_vm12 = vmmov %vm9727_vm7 }
 0x64b   : > { %5291 = vst.msk [vmem:[#allocation3 + $0xc] sm:$0xf] %vm9721_vm4, %v5199_v59  ;;  %v6281_v23 = vld [vmem:[#allocation3 + $0x48] sm:$0xff]  ;;  %vm9738_vm4 = vmmov %vm9735_vm2 }
 0x64c   : > { %5464 = vrot.lane.b32.xlu2 %v8530_v14, %s6422_s23  ;;  %5547 = vst.msk [vmem:[#allocation3 + $0xc] sm:$0xf] %vm9722_vm14, %v5455_v49  ;;  %6241 = vmatmul.msk.bf16.gmra.mxu3 %vm9723_vm0, %v6281_v23  ;;  %v5123_v14 = vld [vmem:[#allocation2 + $0x100] sm:$0xff]  ;;  %vm9739_vm14 = vmmov %vm9727_vm7  ;;  %v9745_v49 = vld [vmem:[#allocation24_spill] sm:$0xff]  ;;  %v5156_v23 = vpack.c.bf16 %v5124_v9, %v5124_v9 }
 0x64d   : > { %v5155_v62 = vpack.c.bf16 %v5123_v14, %v5123_v14  ;;  %v5110_v9 = vld [vmem:[#allocation2 + $0x98] sm:$0xff] }
 0x64e   : > { %v5491_v28 = vpop.permute.xlu2 %5490 }
 0x64f   : > { %5020 = vrot.lane.b32.xlu0 %v4930_v10, %s6420_s16  ;;  %4764 = vrot.lane.b32.xlu1 %v5408_v40, %s6419_s15  ;;  %v9743_v40 = vld [vmem:[#allocation15_spill] sm:$0xff]  ;;  %v5349_v10 = vld [vmem:[#allocation2 + $0x111] sm:$0xff] }
 0x651   : > { %v5009_v22 = vpop.permute.xlu0 %5008  ;;  %v5453_v16 = vpop.permute.xlu1 %5452 }
 0x652   : > { %5084 = vst.msk [vmem:[#allocation3 + $0x50] sm:$0xf] %vm9725_vm13, %v5009_v22  ;;  %vm9744_vm13 = vcmask 191648  }
 0x653   : > { %5308 = vst.msk [vmem:[#allocation3 + $0x50] sm:$0xf] %vm9726_vm10, %v5233_v31  ;;  %vm9746_vm10 = vnez %v9745_v49  ;;  %v5127_v49 = vld [vmem:[#allocation2 + $0x120] sm:$0xff] }
 0x654   : > { %4766 = vrot.lane.b32.xlu2 %v4675_v50, %s6419_s15  ;;  %5546 = vst.msk [vmem:[#allocation3 + $0x8] sm:$0xf] %vm9727_vm7, %v5453_v16  ;;  %v4645_v52 = vsel %vm9746_vm10, %v5347_v46, 0.0  ;;  %vm9747_vm7 = vmmov %vm9737_vm1  ;;  %v4853_v16 = vld [vmem:[#allocation2 + $0x8f] sm:$0xff]  ;;  %v5381_v14 = vsel %vm9746_vm10, %v5349_v10, 0.0  ;;  %v5140_v46 = vpack.c.bf16 %v5108_v0, %v5108_v0 }
 0x655   : > { %v4677_v29 = vpack.c.bf16 %v4645_v52, %v4645_v52 }
 0x656   : > { %v5201_v30 = vpop.permute.xlu2 %5200 }
 0x657   : > { %5246 = vrot.lane.b32.xlu0 %v5155_v62, %s6421_s17  ;;  %5022 = vrot.lane.b32.xlu1 %v4931_v60, %s6420_s16  ;;  %v4917_v62 = vpack.c.bf16 %v4853_v16, %v4853_v16  ;;  %v5413_v60 = vpack.c.bf16 %v5381_v14, %v5381_v14 }
 0x659   : > { %v5235_v6 = vpop.permute.xlu0 %5234  ;;  %v5011_v36 = vpop.permute.xlu1 %5010 }
 0x65a   : > { %5085 = vst.msk [vmem:[#allocation3 + $0x54] sm:$0xf] %vm9728_vm8, %v5011_v36  ;;  %vm9748_vm8 = vmmov %vm9736_vm12 }
 0x65b   : > { %5309 = vst.msk [vmem:[#allocation3 + $0x54] sm:$0xf] %vm9731_vm3, %v5235_v6  ;;  %v6273_v47 = vld [vmem:[#allocation3 + $0x8] sm:$0xff]  ;;  %vm9751_vm3 = vnez %v9750_v61 }
 0x65c   : > { %5244 = vrot.lane.b32.xlu2 %v5154_v32, %s6421_s17  ;;  %5565 = vst.msk [vmem:[#allocation3 + $0x54] sm:$0xf] %vm9732_vm15, %v5491_v28  ;;  %6233 = vmatmul.msk.bf16.gmra.mxu1 %vm9733_vm5, %v6273_v47  ;;  %v4900_v41 = vsel %vm9751_vm3, %v4868_v15, 0.0  ;;  %vm9752_vm15 = vmmov %vm9744_vm13  ;;  %v5125_v28 = vld [vmem:[#allocation2 + $0x110] sm:$0xff]  ;;  %v5396_v47 = vpack.c.bf16 %v5332_v63, %v5332_v63  ;;  %v5350_v61 = vld [vmem:[#allocation2 + $0x119] sm:$0xff] }
 0x65d   : > { %v4932_v31 = vpack.c.bf16 %v4900_v41, %v4900_v41  ;;  %vm9753_vm5 = vmmov %vm9737_vm1  ;;  %v5157_v22 = vpack.c.bf16 %v5125_v28, %v5125_v28  ;;  %v5334_v63 = vld [vmem:[#allocation2 + $0x99] sm:$0xff] }
 0x65e   : > { %v5459_v7 = vpop.permute.xlu2 %5458 }
 0x65f   : > { %4988 = vrot.lane.b32.xlu0 %v4914_v39, %s6420_s16  ;;  %5500 = vrot.lane.b32.xlu1 %v5410_v13, %s6422_s23  ;;  %v5333_v39 = vld [vmem:[#allocation2 + $0x91] sm:$0xff] }
 0x661   : > { %v4977_v8 = vpop.permute.xlu0 %4976  ;;  %v5489_v56 = vpop.permute.xlu1 %5488 }
 0x662   : > { %5068 = vst.msk [vmem:[#allocation3 + $0x10] sm:$0xf] %vm9734_vm6, %v4977_v8  ;;  %vm9754_vm6 = vmmov %vm9735_vm2 }
 0x663   : > { %5292 = vst.msk [vmem:[#allocation3 + $0x10] sm:$0xf] %vm9735_vm2, %v5201_v30  ;;  %vm9755_vm2 = vmmov %vm9723_vm0 }
 0x664   : > { %5502 = vrot.lane.b32.xlu2 %v5411_v45, %s6422_s23  ;;  %5564 = vst.msk [vmem:[#allocation3 + $0x50] sm:$0xf] %vm9736_vm12, %v5489_v56  ;;  %vm9756_vm12 = vmmov %vm9738_vm4  ;;  %v9765_v45 = vld [vmem:[#allocation26_spill] sm:$0xff] }
 0x665   : > { %vm9762_vm9 = vmmov %vm9754_vm6 }
 0x666   : > { %v5013_v26 = vpop.permute.xlu2 %5012  ;;  %vm9764_vm10 = vmmov %vm9754_vm6 }
 0x667   : > { %5214 = vrot.lane.b32.xlu0 %v5139_v44, %s6421_s17  ;;  %4990 = vrot.lane.b32.xlu1 %v4915_v5, %s6420_s16  ;;  %vm9770_vm3 = vmmov %vm9755_vm2 }
 0x669   : > { %v5203_v55 = vpop.permute.xlu0 %5202  ;;  %v4979_v53 = vpop.permute.xlu1 %4978 }
 0x66a   : > { %5069 = vst.msk [vmem:[#allocation3 + $0x14] sm:$0xf] %vm9737_vm1, %v4979_v53  ;;  %vm9757_vm1 = vmmov %vm9748_vm8 }
 0x66b   : > { %5293 = vst.msk [vmem:[#allocation3 + $0x14] sm:$0xf] %vm9738_vm4, %v5203_v55  ;;  %v6282_v33 = vld [vmem:[#allocation3 + $0x50] sm:$0xff]  ;;  %vm9758_vm4 = vmmov %vm9744_vm13  ;;  %v4870_v55 = vld [vmem:[#allocation2 + $0x117] sm:$0xff] }
 0x66c   : > { %5212 = vrot.lane.b32.xlu2 %v5138_v18, %s6421_s17  ;;  %5549 = vst.msk [vmem:[#allocation3 + $0x14] sm:$0xf] %vm9739_vm14, %v5459_v7  ;;  %6242 = vmatmul.msk.bf16.gmra.mxu3 %vm9723_vm0, %v6282_v33  ;;  %vm9760_vm14 = vnez %v9759_v20  ;;  %vm9761_vm0 = vmmov %vm9753_vm5  ;;  %v5109_v7 = vld [vmem:[#allocation2 + $0x90] sm:$0xff]  ;;  %v5126_v18 = vld [vmem:[#allocation2 + $0x118] sm:$0xff] }
 0x66d   : > { %v4884_v43 = vsel %vm9760_vm14, %v4852_v34, 0.0  ;;  %v5141_v17 = vpack.c.bf16 %v5109_v7, %v5109_v7  ;;  %v5158_v4 = vpack.c.bf16 %v5126_v18, %v5126_v18 }
 0x66e   : > { %v5239_v24 = vpop.permute.xlu2 %5238  ;;  %v4916_v32 = vpack.c.bf16 %v4884_v43, %v4884_v43  ;;  %v5111_v43 = vld [vmem:[#allocation2 + $0xa0] sm:$0xff] }
 0x66f   : > { %4768 = vrot.lane.b32.xlu0 %v5410_v13, %s6419_s15  ;;  %5468 = vrot.lane.b32.xlu1 %v9743_v40, %s6422_s23 }
 0x671   : > { %v4757_v21 = vpop.permute.xlu0 %4756  ;;  %v5457_v25 = vpop.permute.xlu1 %5456 }
 0x672   : > { %4830 = vst.msk [vmem:[#allocation3 + $0x58] sm:$0xf] %vm9744_vm13, %v4757_v21  ;;  %vm9763_vm13 = vmmov %vm9757_vm1 }
 0x673   : > { %5086 = vst.msk [vmem:[#allocation3 + $0x58] sm:$0xf] %vm9747_vm7, %v5013_v26  ;;  %vm9766_vm7 = vnez %v9765_v45 }
 0x674   : > { %5470 = vrot.lane.b32.xlu2 %v5395_v19, %s6422_s23  ;;  %5548 = vst.msk [vmem:[#allocation3 + $0x10] sm:$0xf] %vm9748_vm8, %v5457_v25  ;;  %v4647_v56 = vsel %vm9766_vm7, %v5349_v10, 0.0  ;;  %vm9768_vm8 = vnez %v9767_v3  ;;  %v5351_v19 = vld [vmem:[#allocation2 + $0x121] sm:$0xff]  ;;  %v4935_v25 = vpack.c.bf16 %v4871_v42, %v4871_v42  ;;  %v8918_v10 = vld [vmem:[%s9067_s4] ss:$0 sm:$0xff] }
 0x675   : > { %v5365_v35 = vsel %vm9768_vm8, %v5333_v39, 0.0  ;;  %v4679_v5 = vpack.c.bf16 %v4647_v56, %v4647_v56  ;;  %v5383_v37 = vsel %vm9766_vm7, %v5351_v19, 0.0 }
 0x676   : > { %v4981_v51 = vpop.permute.xlu2 %4980  ;;  %v5397_v57 = vpack.c.bf16 %v5365_v35, %v5365_v35 }
 0x677   : > { %5070 = vst.msk [vmem:[#allocation3 + $0x18] sm:$0xf] %vm9749_vm11, %v4981_v51  ;;  %5026 = vrot.lane.b32.xlu0 %v4933_v58, %s6420_s16  ;;  %4770 = vrot.lane.b32.xlu1 %v4677_v29, %s6419_s15  ;;  %vm9769_vm11 = vmmov %vm9757_vm1  ;;  %v5415_v58 = vpack.c.bf16 %v5383_v37, %v5383_v37  ;;  %v5159_v29 = vpack.c.bf16 %v5127_v49, %v5127_v49 }
 0x679   : > { %v5015_v38 = vpop.permute.xlu0 %5014  ;;  %v4759_v11 = vpop.permute.xlu1 %4758 }
 0x67a   : > { %4831 = vst.msk [vmem:[#allocation3 + $0x5c] sm:$0xf] %vm9752_vm15, %v4759_v11  ;;  %vm9771_vm15 = vmmov %vm9758_vm4 }
 0x67b   : > { %5087 = vst.msk [vmem:[#allocation3 + $0x5c] sm:$0xf] %vm9753_vm5, %v5015_v38  ;;  %v6274_v59 = vld [vmem:[#allocation3 + $0x10] sm:$0xff]  ;;  %v5414_v38 = vpack.c.bf16 %v5350_v61, %v5350_v61  ;;  %vm9785_vm7 = vmmov %vm9771_vm15 }
 0x67c   : > { %5024 = vrot.lane.b32.xlu2 %v4932_v31, %s6420_s16  ;;  %5311 = vst.msk [vmem:[#allocation3 + $0x5c] sm:$0xf] %vm9754_vm6, %v5239_v24  ;;  %6234 = vmatmul.msk.bf16.gmra.mxu1 %vm9755_vm2, %v6274_v59  ;;  %v9772_v24 = vld [vmem:[#allocation27_spill] sm:$0xff]  ;;  %vm9774_vm6 = vmmov %vm9761_vm0  ;;  %v4854_v31 = vld [vmem:[#allocation2 + $0x97] sm:$0xff] }
 0x67d   : > { %vm9773_vm5 = vnez %v9772_v24  ;;  %vm9775_vm2 = vmmov %vm9757_vm1  ;;  %v9782_v59 = vld [vmem:[#allocation14_spill] sm:$0xff] }
 0x67e   : > { %v5207_v48 = vpop.permute.xlu2 %5206  ;;  %v4902_v1 = vsel %vm9773_vm5, %v4870_v55, 0.0  ;;  %vm9779_vm14 = vmmov %vm9775_vm2 }
 0x67f   : > { %5504 = vrot.lane.b32.xlu0 %v5412_v12, %s6422_s23  ;;  %5248 = vrot.lane.b32.xlu1 %v5156_v23, %s6421_s17  ;;  %v4934_v21 = vpack.c.bf16 %v4902_v1, %v4902_v1  ;;  %v5142_v23 = vpack.c.bf16 %v5110_v9, %v5110_v9  ;;  %vm9791_vm5 = vmmov %vm9775_vm2 }
 0x681   : > { %v5493_v54 = vpop.permute.xlu0 %5492  ;;  %v5237_v50 = vpop.permute.xlu1 %5236 }
 0x682   : > { %5310 = vst.msk [vmem:[#allocation3 + $0x58] sm:$0xf] %vm9756_vm12, %v5237_v50  ;;  %vm9776_vm12 = vmmov %vm9761_vm0 }
 0x683   : > { %5566 = vst.msk [vmem:[#allocation3 + $0x58] sm:$0xf] %vm9757_vm1, %v5493_v54  ;;  %vm9777_vm1 = vmmov %vm9761_vm0  ;;  %v4855_v54 = vld [vmem:[#allocation2 + $0x9f] sm:$0xff] }
 0x684   : > { %5250 = vrot.lane.b32.xlu2 %v5157_v22, %s6421_s17  ;;  %v5335_v22 = vld [vmem:[#allocation2 + $0xa1] sm:$0xff]  ;;  %v4919_v34 = vpack.c.bf16 %v4855_v54, %v4855_v54  ;;  %vm9786_vm8 = vmmov %vm9777_vm1 }
 0x686   : > { %v4761_v30 = vpop.permute.xlu2 %4760 }
 0x687   : > { %4832 = vst.msk [vmem:[#allocation3 + $0x60] sm:$0xf] %vm9758_vm4, %v4761_v30  ;;  %4994 = vrot.lane.b32.xlu0 %v4917_v62, %s6420_s16  ;;  %5506 = vrot.lane.b32.xlu1 %v5413_v60, %s6422_s23  ;;  %vm9778_vm4 = vmmov %vm9762_vm9  ;;  %v9787_v60 = vld [vmem:[#allocation13_spill] sm:$0xff] }
 0x689   : > { %v4983_v6 = vpop.permute.xlu0 %4982  ;;  %v5495_v36 = vpop.permute.xlu1 %5494 }
 0x68a   : > { %5071 = vst.msk [vmem:[#allocation3 + $0x1c] sm:$0xf] %vm9761_vm0, %v4983_v6  ;;  %vm9780_vm0 = vmmov %vm9770_vm3 }
 0x68b   : > { %5295 = vst.msk [vmem:[#allocation3 + $0x1c] sm:$0xf] %vm9762_vm9, %v5207_v48  ;;  %vm9781_vm9 = vmmov %vm9778_vm4 }
 0x68c   : > { %4992 = vrot.lane.b32.xlu2 %v4916_v32, %s6420_s16  ;;  %5567 = vst.msk [vmem:[#allocation3 + $0x5c] sm:$0xf] %vm9763_vm13, %v5495_v36  ;;  %vm9783_vm13 = vnez %v9782_v59  ;;  %v5143_v36 = vpack.c.bf16 %v5111_v43, %v5111_v43 }
 0x68d   : > { %v4886_v48 = vsel %vm9783_vm13, %v4854_v31, 0.0  ;;  %vm9798_vm13 = vmmov %vm9775_vm2 }
 0x68e   : > { %v5019_v2 = vpop.permute.xlu2 %5018  ;;  %v4918_v28 = vpack.c.bf16 %v4886_v48, %v4886_v48 }
 0x68f   : > { %5472 = vrot.lane.b32.xlu0 %v5396_v47, %s6422_s23  ;;  %5216 = vrot.lane.b32.xlu1 %v5140_v46, %s6421_s17  ;;  %v5398_v46 = vpack.c.bf16 %v5334_v63, %v5334_v63 }
 0x691   : > { %v5461_v13 = vpop.permute.xlu0 %5460  ;;  %v5205_v8 = vpop.permute.xlu1 %5204 }
 0x692   : > { %5294 = vst.msk [vmem:[#allocation3 + $0x18] sm:$0xf] %vm9764_vm10, %v5205_v8  ;;  %vm9784_vm10 = vmmov %vm9775_vm2 }
 0x693   : > { %5550 = vst.msk [vmem:[#allocation3 + $0x18] sm:$0xf] %vm9769_vm11, %v5461_v13  ;;  %v6283_v26 = vld [vmem:[#allocation3 + $0x58] sm:$0xff]  ;;  %vm9788_vm11 = vnez %v9787_v60 }
 0x694   : > { %5218 = vrot.lane.b32.xlu2 %v5141_v17, %s6421_s17  ;;  %6243 = vmatmul.msk.bf16.gmra.mxu3 %vm9770_vm3, %v6283_v26  ;;  %v5367_v20 = vsel %vm9788_vm11, %v5335_v22, 0.0  ;;  %vm9789_vm3 = vmmov %vm9778_vm4 }
 0x695   : > { %v5399_v32 = vpack.c.bf16 %v5367_v20, %v5367_v20 }
 0x696   : > { %v5497_v44 = vpop.permute.xlu2 %5496 }
 0x697   : > { %4774 = vrot.lane.b32.xlu0 %v4679_v5, %s6419_s15  ;;  %5474 = vrot.lane.b32.xlu1 %v5397_v57, %s6422_s23 }
 0x699   : > { %v4763_v53 = vpop.permute.xlu0 %4762  ;;  %v5463_v33 = vpop.permute.xlu1 %5462 }
 0x69a   : > { %4833 = vst.msk [vmem:[#allocation3 + $0x64] sm:$0xf] %vm9771_vm15, %v4763_v53  ;;  %vm9790_vm15 = vmmov %vm9780_vm0 }
 0x69b   : > { %5089 = vst.msk [vmem:[#allocation3 + $0x64] sm:$0xf] %vm9774_vm6, %v5019_v2  ;;  %vm9792_vm6 = vmmov %vm9789_vm3 }
 0x69c   : > { %4772 = vrot.lane.b32.xlu2 %v5412_v12, %s6419_s15  ;;  %5551 = vst.msk [vmem:[#allocation3 + $0x1c] sm:$0xf] %vm9775_vm2, %v5463_v33  ;;  %s6369_s15 = scalar_lea.hbm %s9068_s5, 128 }
 0x69d   : > { %p6371_p1 = scmp.lt.s32.totalorder %s6369_s15, %s6365_s25 }
 0x69e   : > { %v4987_v40 = vpop.permute.xlu2 %4986 }
 0x69f   : > { %5073 = vst.msk [vmem:[#allocation3 + $0x24] sm:$0xf] %vm9776_vm12, %v4987_v40  ;;  %5252 = vrot.lane.b32.xlu0 %v5158_v4, %s6421_s17  ;;  %5028 = vrot.lane.b32.xlu1 %v4934_v21, %s6420_s16  ;;  %vm9793_vm12 = vmmov %vm9785_vm7  ;;  %p6372_p2 = por %p6371_p1, %p6370_p0 }
 0x6a1   : > { %v5241_v52 = vpop.permute.xlu0 %5240  ;;  %v5017_v15 = vpop.permute.xlu1 %5016  ;;  %p6373_p3 = pnand %p6372_p2, %p6368_p13 }
 0x6a2   : > { %5088 = vst.msk [vmem:[#allocation3 + $0x60] sm:$0xf] %vm9777_vm1, %v5017_v15 }
 0x6a3   : > { %5312 = vst.msk [vmem:[#allocation3 + $0x60] sm:$0xf] %vm9778_vm4, %v5241_v52  ;;  %v6275_v51 = vld [vmem:[#allocation3 + $0x18] sm:$0xff]  ;;  %vm9794_vm4 = vmmov %vm9789_vm3 }
 0x6a4   : > { %5030 = vrot.lane.b32.xlu2 %v4935_v25, %s6420_s16  ;;  %5568 = vst.msk [vmem:[#allocation3 + $0x60] sm:$0xf] %vm9779_vm14, %v5497_v44  ;;  %6235 = vmatmul.msk.bf16.gmra.mxu1 %vm9780_vm0, %v6275_v51  ;;  %vm9795_vm14 = vmmov %vm9780_vm0 }
 0x6a5   : > { %vm9796_vm0 = vmmov %vm9777_vm1 }
 0x6a6   : > { %v5465_v41 = vpop.permute.xlu2 %5464  ;;  %vm9802_vm11 = vmmov %vm9796_vm0 }
 0x6a7   : > { %5510 = vrot.lane.b32.xlu0 %v5415_v58, %s6422_s23  ;;  %5254 = vrot.lane.b32.xlu1 %v5159_v29, %s6421_s17 }
 0x6a9   : > { %v5499_v11 = vpop.permute.xlu0 %5498  ;;  %v5243_v27 = vpop.permute.xlu1 %5242 }
 0x6aa   : > { %5313 = vst.msk [vmem:[#allocation3 + $0x64] sm:$0xf] %vm9781_vm9, %v5243_v27  ;;  %vm9797_vm9 = vmmov %vm9789_vm3 }
 0x6ab   : > { %5569 = vst.msk [vmem:[#allocation3 + $0x64] sm:$0xf] %vm9784_vm10, %v5499_v11  ;;  %vm9799_vm10 = vmmov %vm9796_vm0 }
 0x6ac   : > { %5508 = vrot.lane.b32.xlu2 %v5414_v38, %s6422_s23 }
 0x6ae   : > { %v4767_v12 = vpop.permute.xlu2 %4766 }
 0x6af   : > { %4835 = vst.msk [vmem:[#allocation3 + $0x6c] sm:$0xf] %vm9785_vm7, %v4767_v12  ;;  %5220 = vrot.lane.b32.xlu0 %v5142_v23, %s6421_s17  ;;  %4996 = vrot.lane.b32.xlu1 %v4918_v28, %s6420_s16  ;;  %v5812_v50 = vpop.f32.mrf.mxu3  ;;  %vm9800_vm7 = vmmov %vm9789_vm3 }
 0x6b0   : > { %v5813_v16 = vadd.f32 %v8918_v10, %v5812_v50 }
 0x6b1   : > { %v5209_v14 = vpop.permute.xlu0 %5208  ;;  %v4985_v30 = vpop.permute.xlu1 %4984 }
 0x6b2   : > { %5072 = vst.msk [vmem:[#allocation3 + $0x20] sm:$0xf] %vm9786_vm8, %v4985_v30  ;;  %v6284_v62 = vld [vmem:[#allocation3 + $0x60] sm:$0xff]  ;;  %vm9801_vm8 = vmmov %vm9775_vm2 }
 0x6b3   : > { %5868 = vst [vmem:[#allocation4 + $0x80] sm:$0xff] %v5813_v16  ;;  %6244 = vmatmul.msk.bf16.gmra.mxu3 %vm9790_vm15, %v6284_v62  ;;  %vm9803_vm15 = vmmov %vm9775_vm2 }
 0x6b4   : > { %4998 = vrot.lane.b32.xlu2 %v4919_v34, %s6420_s16  ;;  %5296 = vst.msk [vmem:[#allocation3 + $0x20] sm:$0xf] %vm9789_vm3, %v5209_v14  ;;  %s215_s16 = sand.u32 1, %s6403_s19  }
 0x6b5   : > { %5552 = vst.msk [vmem:[#allocation3 + $0x20] sm:$0xf] %vm9791_vm5, %v5465_v41  ;;  %vm9804_vm5 = vmmov %vm9795_vm14  ;;  %s5988_s22 = scalar_lea.sflag [#allocation6], %s215_s16 }
 0x6b6   : > { %v5245_v6 = vpop.permute.xlu2 %5244 }
 0x6b7   : > { %5478 = vrot.lane.b32.xlu0 %v5399_v32, %s6422_s23  ;;  %5222 = vrot.lane.b32.xlu1 %v5143_v36, %s6421_s17  ;;  %v5814_v0 = vpop.f32.mrf.mxu3  ;;  %s6069_s17 = sshll.u32 %s215_s16, 6 }
 0x6b8   : > { %v5815_v2 = vadd.f32 %v8918_v10, %v5814_v0 }
 0x6b9   : > { %v5467_v47 = vpop.permute.xlu0 %5466  ;;  %v5211_v7 = vpop.permute.xlu1 %5210 }
 0x6ba   : > { %v5772_v39 = vpop.f32.mrf.mxu1  ;;  %5297 = vst.msk [vmem:[#allocation3 + $0x24] sm:$0xf] %vm9792_vm6, %v5211_v7  ;;  %vm9805_vm6 = vmmov %vm9793_vm12 }
 0x6bb   : > { %5869 = vst [vmem:[#allocation4 + $0x88] sm:$0xff] %v5815_v2  ;;  %v5773_v13 = vadd.f32 %v8918_v10, %v5772_v39 }
 0x6bc   : > { %5476 = vrot.lane.b32.xlu2 %v5398_v46, %s6422_s23  ;;  %5553 = vst.msk [vmem:[#allocation3 + $0x24] sm:$0xf] %vm9775_vm2, %v5467_v47  ;;  %vm9806_vm2 = vmmov %vm9796_vm0  ;;  %s8964_s23 = scalar_lea.vmem [#allocation5], %s6069_s17 }
 0x6bd   : > { %5852 = vst [vmem:[#allocation4] sm:$0xff] %v5773_v13  ;;  %s6000_s11 = sshll.u32 %s8964_s23, 4  ;;  %s6001_s11 = int_to_ptr.vmem [resolvable:$true] %s6000_s11 }
 0x6be   : > { %v5503_v17 = vpop.permute.xlu2 %5502 }
 0x6c1   : > { %v5021_v8 = vpop.permute.xlu0 %5020  ;;  %v4765_v45 = vpop.permute.xlu1 %4764 }
 0x6c2   : > { %v5774_v56 = vpop.f32.mrf.mxu1  ;;  %4834 = vst.msk [vmem:[#allocation3 + $0x68] sm:$0xf] %vm9793_vm12, %v4765_v45  ;;  %v5900_v49 = vld [vmem:[#allocation4 + $0x80] ss:$2 sm:$0xff]  ;;  %v5932_v52 = vld [vmem:[#allocation4 + $0x81] ss:$2 sm:$0xff]  ;;  %vm9807_vm12 = vmmov %vm9801_vm8 }
 0x6c3   : > { %v5775_v3 = vadd.f32 %v8918_v10, %v5774_v56  ;;  %5090 = vst.msk [vmem:[#allocation3 + $0x68] sm:$0xf] %vm9777_vm1, %v5021_v8  ;;  %v6276_v35 = vld [vmem:[#allocation3 + $0x20] sm:$0xff]  ;;  %v5955_v41 = vadd.f32 %v5932_v52, %v5900_v49  ;;  %vm9808_vm1 = vmmov %vm9796_vm0 }
 0x6c4   : > { %5314 = vst.msk [vmem:[#allocation3 + $0x68] sm:$0xf] %vm9794_vm4, %v5245_v6  ;;  %6236 = vmatmul.msk.bf16.gmra.mxu1 %vm9795_vm14, %v6276_v35  ;;  %vm9809_vm4 = vmmov %vm9805_vm6 }
 0x6c5   : > { %5853 = vst [vmem:[#allocation4 + $0x8] sm:$0xff] %v5775_v3  ;;  %vm9810_vm14 = vmmov %vm9796_vm0 }
 0x6c6   : > { %v5213_v26 = vpop.permute.xlu2 %5212 }
 0x6c9   : > { %v5247_v44 = vpop.permute.xlu0 %5246  ;;  %v5023_v5 = vpop.permute.xlu1 %5022 }
 0x6ca   : > { %5091 = vst.msk [vmem:[#allocation3 + $0x6c] sm:$0xf] %vm9796_vm0, %v5023_v5  ;;  %vm9811_vm0 = vmmov %vm9789_vm3 }
 0x6cb   : > { %5315 = vst.msk [vmem:[#allocation3 + $0x6c] sm:$0xf] %vm9797_vm9, %v5247_v44  ;;  %vm9812_vm9 = vmmov %vm9804_vm5 }
 0x6cc   : > { %5571 = vst.msk [vmem:[#allocation3 + $0x6c] sm:$0xf] %vm9798_vm13, %v5503_v17  ;;  %v5884_v12 = vld [vmem:[#allocation4] ss:$2 sm:$0xff]  ;;  %v5916_v23 = vld [vmem:[#allocation4 + $0x1] ss:$2 sm:$0xff]  ;;  %vm9813_vm13 = vmmov %vm9811_vm0 }
 0x6cd   : > { %v5947_v50 = vadd.f32 %v5916_v23, %v5884_v12 }
 0x6ce   : > { %v5471_v57 = vpop.permute.xlu2 %5470 }
 0x6cf   : > { %v5817_v55 = vpop.f32.mrf.mxu3 }
 0x6d0   : > { %v5818_v18 = vadd.f32 %v8918_v10, %v5817_v55 }
 0x6d1   : > { %v4989_v53 = vpop.permute.xlu0 %4988  ;;  %v5501_v33 = vpop.permute.xlu1 %5500 }
 0x6d2   : > { %5074 = vst.msk [vmem:[#allocation3 + $0x28] sm:$0xf] %vm9799_vm10, %v4989_v53  ;;  %vm9814_vm10 = vmmov %vm9801_vm8 }
 0x6d3   : > { %5870 = vst [vmem:[#allocation4 + $0x90] sm:$0xff] %v5818_v18 }
 0x6d4   : > { %5298 = vst.msk [vmem:[#allocation3 + $0x28] sm:$0xf] %vm9800_vm7, %v5213_v26  ;;  %vm9815_vm7 = vmmov %vm9809_vm4 }
 0x6d5   : > { %5570 = vst.msk [vmem:[#allocation3 + $0x68] sm:$0xf] %vm9801_vm8, %v5501_v33  ;;  %vm9816_vm8 = vmmov %vm9808_vm1 }
 0x6d6   : > { %v5025_v24 = vpop.permute.xlu2 %5024 }
 0x6d7   : > { %v5819_v1 = vpop.f32.mrf.mxu3 }
 0x6d8   : > { %v5820_v4 = vadd.f32 %v8918_v10, %v5819_v1 }
 0x6d9   : > { %v5215_v42 = vpop.permute.xlu0 %5214  ;;  %v4991_v40 = vpop.permute.xlu1 %4990 }
 0x6da   : > { %v5777_v21 = vpop.f32.mrf.mxu1  ;;  %5075 = vst.msk [vmem:[#allocation3 + $0x2c] sm:$0xf] %vm9802_vm11, %v4991_v40  ;;  %vm9817_vm11 = vmmov %vm9811_vm0 }
 0x6db   : > { %5871 = vst [vmem:[#allocation4 + $0x98] sm:$0xff] %v5820_v4  ;;  %v5778_v19 = vadd.f32 %v8918_v10, %v5777_v21 }
 0x6dc   : > { %5299 = vst.msk [vmem:[#allocation3 + $0x2c] sm:$0xf] %vm9789_vm3, %v5215_v42  ;;  %v6285_v25 = vld [vmem:[#allocation3 + $0x68] sm:$0xff]  ;;  %vm9818_vm3 = vmmov %vm9814_vm10 }
 0x6dd   : > { %5854 = vst [vmem:[#allocation4 + $0x10] sm:$0xff] %v5778_v19  ;;  %6245 = vmatmul.msk.bf16.gmra.mxu3 %vm9804_vm5, %v6285_v25  ;;  %vm9820_vm5 = vmmov %vm9818_vm3 }
 0x6de   : > { %v5251_v37 = vpop.permute.xlu2 %5250  ;;  %5555 = vst.msk [vmem:[#allocation3 + $0x2c] sm:$0xf] %vm9803_vm15, %v5471_v57  ;;  %vm9819_vm15 = vmmov %vm9811_vm0 }
 0x6e1   : > { %v4769_v15 = vpop.permute.xlu0 %4768  ;;  %v5469_v51 = vpop.permute.xlu1 %5468 }
 0x6e2   : > { %v5902_v58 = vld [vmem:[#allocation4 + $0x90] ss:$2 sm:$0xff]  ;;  %v5934_v29 = vld [vmem:[#allocation4 + $0x91] ss:$2 sm:$0xff]  ;;  %4836 = vst.msk [vmem:[#allocation3 + $0x70] sm:$0xf] %vm9805_vm6, %v4769_v15  ;;  %v5779_v61 = vpop.f32.mrf.mxu1  ;;  %vm9821_vm6 = vmmov %vm9812_vm9 }
 0x6e3   : > { %v5956_v38 = vadd.f32 %v5934_v29, %v5902_v58  ;;  %5092 = vst.msk [vmem:[#allocation3 + $0x70] sm:$0xf] %vm9806_vm2, %v5025_v24  ;;  %v5780_v31 = vadd.f32 %v8918_v10, %v5779_v61  ;;  %vm9822_vm2 = vmmov %vm9809_vm4 }
 0x6e4   : > { %5554 = vst.msk [vmem:[#allocation3 + $0x28] sm:$0xf] %vm9807_vm12, %v5469_v51  ;;  %vm9823_vm12 = vmmov %vm9808_vm1 }
 0x6e5   : > { %v5967_v11 = vadd.f32 %v5956_v38, %v5955_v41  ;;  %5855 = vst [vmem:[#allocation4 + $0x18] sm:$0xff] %v5780_v31 }
 0x6e6   : > { %v4993_v27 = vpop.permute.xlu2 %4992 }
 0x6e7   : > { %5076 = vst.msk [vmem:[#allocation3 + $0x30] sm:$0xf] %vm9808_vm1, %v4993_v27  ;;  %v5975_v9 = vmul.f32 0.25, %v5967_v11  ;;  %vm9824_vm1 = vmmov %vm9818_vm3 }
 0x6e9   : > { %5983 = vst [vmem:[%s8964_s23 + $0x20] sm:$0xff] %v5975_v9  ;;  %v5027_v59 = vpop.permute.xlu0 %5026  ;;  %v4771_v48 = vpop.permute.xlu1 %4770 }
 0x6ea   : > { %4837 = vst.msk [vmem:[#allocation3 + $0x74] sm:$0xf] %vm9809_vm4, %v4771_v48  ;;  %vm9825_vm4 = vmmov %vm9816_vm8 }
 0x6eb   : > { %5093 = vst.msk [vmem:[#allocation3 + $0x74] sm:$0xf] %vm9810_vm14, %v5027_v59  ;;  %v6277_v28 = vld [vmem:[#allocation3 + $0x28] sm:$0xff]  ;;  %vm9826_vm14 = vmmov %vm9825_vm4 }
 0x6ec   : > { %v5886_v54 = vld [vmem:[#allocation4 + $0x10] ss:$2 sm:$0xff]  ;;  %v5918_v22 = vld [vmem:[#allocation4 + $0x11] ss:$2 sm:$0xff]  ;;  %5317 = vst.msk [vmem:[#allocation3 + $0x74] sm:$0xf] %vm9811_vm0, %v5251_v37  ;;  %6237 = vmatmul.msk.bf16.gmra.mxu1 %vm9812_vm9, %v6277_v28  ;;  %vm9827_vm9 = vmmov %vm9824_vm1 }
 0x6ed   : > { %v5948_v16 = vadd.f32 %v5918_v22, %v5886_v54 }
 0x6ee   : > { %v5219_v14 = vpop.permute.xlu2 %5218 }
 0x6ef   : > { %v5963_v34 = vadd.f32 %v5948_v16, %v5947_v50  ;;  %v5822_v30 = vpop.f32.mrf.mxu3 }
 0x6f0   : > { %v5823_v60 = vadd.f32 %v8918_v10, %v5822_v30 }
 0x6f1   : > { %v5971_v62 = vmul.f32 0.25, %v5963_v34  ;;  %v5505_v20 = vpop.permute.xlu0 %5504  ;;  %v5249_v43 = vpop.permute.xlu1 %5248 }
 0x6f2   : > { %5316 = vst.msk [vmem:[#allocation3 + $0x70] sm:$0xf] %vm9813_vm13, %v5249_v43  ;;  %vm9828_vm13 = vmmov %vm9821_vm6 }
 0x6f3   : > { %5979 = vst [vmem:[%s8964_s23] sm:$0xff] %v5971_v62 }
 0x6f4   : > { %5872 = vst [vmem:[#allocation4 + $0xa0] sm:$0xff] %v5823_v60 }
 0x6f5   : > { %5572 = vst.msk [vmem:[#allocation3 + $0x70] sm:$0xf] %vm9814_vm10, %v5505_v20  ;;  %vm9829_vm10 = vmmov %vm9811_vm0 }
 0x6f6   : > { %v4773_v6 = vpop.permute.xlu2 %4772 }
 0x6f7   : > { %4838 = vst.msk [vmem:[#allocation3 + $0x78] sm:$0xf] %vm9815_vm7, %v4773_v6  ;;  %v5824_v32 = vpop.f32.mrf.mxu3  ;;  %vm9830_vm7 = vmmov %vm9824_vm1 }
 0x6f8   : > { %v5825_v36 = vadd.f32 %v8918_v10, %v5824_v32 }
 0x6f9   : > { %v4995_v63 = vpop.permute.xlu0 %4994  ;;  %v5507_v0 = vpop.permute.xlu1 %5506 }
 0x6fa   : > { %5077 = vst.msk [vmem:[#allocation3 + $0x34] sm:$0xf] %vm9816_vm8, %v4995_v63  ;;  %v5782_v2 = vpop.f32.mrf.mxu1  ;;  %vm9831_vm8 = vmmov %vm9825_vm4 }
 0x6fb   : > { %5873 = vst [vmem:[#allocation4 + $0xa8] sm:$0xff] %v5825_v36  ;;  %v5783_v47 = vadd.f32 %v8918_v10, %v5782_v2 }
 0x6fc   : > { %5301 = vst.msk [vmem:[#allocation3 + $0x34] sm:$0xf] %vm9817_vm11, %v5219_v14  ;;  %vm9832_vm11 = vmmov %vm9811_vm0 }
 0x6fd   : > { %5573 = vst.msk [vmem:[#allocation3 + $0x74] sm:$0xf] %vm9818_vm3, %v5507_v0  ;;  %vm9833_vm3 = vmmov %vm9824_vm1 }
 0x6fe   : > { %v5031_v46 = vpop.permute.xlu2 %5030  ;;  %5856 = vst [vmem:[#allocation4 + $0x20] sm:$0xff] %v5783_v47 }
 0x701   : > { %v5473_v7 = vpop.permute.xlu0 %5472  ;;  %v5217_v39 = vpop.permute.xlu1 %5216 }
 0x702   : > { %5300 = vst.msk [vmem:[#allocation3 + $0x30] sm:$0xf] %vm9819_vm15, %v5217_v39  ;;  %v5784_v13 = vpop.f32.mrf.mxu1  ;;  %vm9834_vm15 = vmmov %vm9821_vm6  ;;  %v5904_v25 = vld [vmem:[#allocation4 + $0xa0] ss:$2 sm:$0xff]  ;;  %v5936_v37 = vld [vmem:[#allocation4 + $0xa1] ss:$2 sm:$0xff] }
 0x703   : > { %5556 = vst.msk [vmem:[#allocation3 + $0x30] sm:$0xf] %vm9820_vm5, %v5473_v7  ;;  %v5785_v17 = vadd.f32 %v8918_v10, %v5784_v13  ;;  %vm9835_vm5 = vmmov %vm9811_vm0  ;;  %v5957_v29 = vadd.f32 %v5936_v37, %v5904_v25 }
 0x704   : > { %v6286_v8 = vld [vmem:[#allocation3 + $0x70] sm:$0xff] }
 0x705   : > { %5857 = vst [vmem:[#allocation4 + $0x28] sm:$0xff] %v5785_v17  ;;  %6246 = vmatmul.msk.bf16.gmra.mxu3 %vm9821_vm6, %v6286_v8  ;;  %vm9836_vm6 = vmmov %vm9824_vm1 }
 0x706   : > { %v5509_v45 = vpop.permute.xlu2 %5508 }
 0x709   : > { %v4775_v56 = vpop.permute.xlu0 %4774  ;;  %v5475_v3 = vpop.permute.xlu1 %5474 }
 0x70a   : > { %4839 = vst.msk [vmem:[#allocation3 + $0x7c] sm:$0xf] %vm9822_vm2, %v4775_v56  ;;  %vm9837_vm2 = vmmov %vm9828_vm13 }
 0x70b   : > { %5095 = vst.msk [vmem:[#allocation3 + $0x7c] sm:$0xf] %vm9823_vm12, %v5031_v46 }
 0x70c   : > { %5557 = vst.msk [vmem:[#allocation3 + $0x34] sm:$0xf] %vm9824_vm1, %v5475_v3  ;;  %v5888_v11 = vld [vmem:[#allocation4 + $0x20] ss:$2 sm:$0xff]  ;;  %v5920_v27 = vld [vmem:[#allocation4 + $0x21] ss:$2 sm:$0xff] }
 0x70d   : > { %v5949_v12 = vadd.f32 %v5920_v27, %v5888_v11 }
 0x70e   : > { %v4999_v35 = vpop.permute.xlu2 %4998 }
 0x70f   : > { %5079 = vst.msk [vmem:[#allocation3 + $0x3c] sm:$0xf] %vm9825_vm4, %v4999_v35 }
 0x711   : > { %v5253_v26 = vpop.permute.xlu0 %5252  ;;  %v5029_v44 = vpop.permute.xlu1 %5028 }
 0x712   : > { %5094 = vst.msk [vmem:[#allocation3 + $0x78] sm:$0xf] %vm9826_vm14, %v5029_v44 }
 0x713   : > { %5318 = vst.msk [vmem:[#allocation3 + $0x78] sm:$0xf] %vm9811_vm0, %v5253_v26  ;;  %v6278_v5 = vld [vmem:[#allocation3 + $0x30] sm:$0xff] }
 0x714   : > { %5574 = vst.msk [vmem:[#allocation3 + $0x78] sm:$0xf] %vm9827_vm9, %v5509_v45  ;;  %6238 = vmatmul.msk.bf16.gmra.mxu1 %vm9828_vm13, %v6278_v5 }
 0x716   : > { %v5477_v19 = vpop.permute.xlu2 %5476 }
 0x717   : > { %v5827_v57 = vpop.f32.mrf.mxu3 }
 0x718   : > { %v5828_v55 = vadd.f32 %v8918_v10, %v5827_v57 }
 0x719   : > { %v5511_v18 = vpop.permute.xlu0 %5510  ;;  %v5255_v53 = vpop.permute.xlu1 %5254 }
 0x71a   : > { %5319 = vst.msk [vmem:[#allocation3 + $0x7c] sm:$0xf] %vm9829_vm10, %v5255_v53 }
 0x71b   : > { %5874 = vst [vmem:[#allocation4 + $0xb0] sm:$0xff] %v5828_v55 }
 0x71c   : > { %5575 = vst.msk [vmem:[#allocation3 + $0x7c] sm:$0xf] %vm9830_vm7, %v5511_v18 }
 0x71f   : > { %v5829_v33 = vpop.f32.mrf.mxu3 }
 0x720   : > { %v5830_v24 = vadd.f32 %v8918_v10, %v5829_v33 }
 0x721   : > { %v5221_v1 = vpop.permute.xlu0 %5220  ;;  %v4997_v4 = vpop.permute.xlu1 %4996 }
 0x722   : > { %5078 = vst.msk [vmem:[#allocation3 + $0x38] sm:$0xf] %vm9831_vm8, %v4997_v4  ;;  %v5787_v42 = vpop.f32.mrf.mxu1 }
 0x723   : > { %5875 = vst [vmem:[#allocation4 + $0xb8] sm:$0xff] %v5830_v24  ;;  %v5788_v40 = vadd.f32 %v8918_v10, %v5787_v42  ;;  %v6287_v21 = vld [vmem:[#allocation3 + $0x78] sm:$0xff] }
 0x724   : > { %5302 = vst.msk [vmem:[#allocation3 + $0x38] sm:$0xf] %vm9832_vm11, %v5221_v1  ;;  %6247 = vmatmul.msk.bf16.gmra.mxu3 %vm9834_vm15, %v6287_v21 }
 0x725   : > { %5558 = vst.msk [vmem:[#allocation3 + $0x38] sm:$0xf] %vm9833_vm3, %v5477_v19 }
 0x726   : > { %5858 = vst [vmem:[#allocation4 + $0x30] sm:$0xff] %v5788_v40 }
 0x729   : > { %v5479_v49 = vpop.permute.xlu0 %5478  ;;  %v5223_v52 = vpop.permute.xlu1 %5222 }
 0x72a   : > { %v5906_v15 = vld [vmem:[#allocation4 + $0xb0] ss:$2 sm:$0xff]  ;;  %v5938_v51 = vld [vmem:[#allocation4 + $0xb1] ss:$2 sm:$0xff]  ;;  %5303 = vst.msk [vmem:[#allocation3 + $0x3c] sm:$0xf] %vm9835_vm5, %v5223_v52  ;;  %v5789_v58 = vpop.f32.mrf.mxu1 }
 0x72b   : > { %v5958_v61 = vadd.f32 %v5938_v51, %v5906_v15  ;;  %5559 = vst.msk [vmem:[#allocation3 + $0x3c] sm:$0xf] %vm9836_vm6, %v5479_v49  ;;  %v5790_v41 = vadd.f32 %v8918_v10, %v5789_v58 }
 0x72d   : > { %v5968_v38 = vadd.f32 %v5958_v61, %v5957_v29  ;;  %5859 = vst [vmem:[#allocation4 + $0x38] sm:$0xff] %v5790_v41 }
 0x72f   : > { %v5976_v31 = vmul.f32 0.25, %v5968_v38 }
 0x731   : > { %5984 = vst [vmem:[%s8964_s23 + $0x28] sm:$0xff] %v5976_v31 }
 0x732   : > { %v6279_v9 = vld [vmem:[#allocation3 + $0x38] sm:$0xff] }
 0x733   : > { %6239 = vmatmul.msk.bf16.gmra.mxu1 %vm9837_vm2, %v6279_v9 }
 0x734   : > { %v5890_v59 = vld [vmem:[#allocation4 + $0x30] ss:$2 sm:$0xff]  ;;  %v5922_v48 = vld [vmem:[#allocation4 + $0x31] ss:$2 sm:$0xff] }
 0x735   : > { %v5950_v23 = vadd.f32 %v5922_v48, %v5890_v59 }
 0x736   : > { %v5832_v54 = vpop.f32.mrf.mxu3 }
 0x737   : > { %v5964_v28 = vadd.f32 %v5950_v23, %v5949_v12  ;;  %v5833_v22 = vadd.f32 %v8918_v10, %v5832_v54 }
 0x739   : > { %v5972_v50 = vmul.f32 0.25, %v5964_v28  ;;  %5876 = vst [vmem:[#allocation4 + $0xc0] sm:$0xff] %v5833_v22 }
 0x73b   : > { %5980 = vst [vmem:[%s8964_s23 + $0x8] sm:$0xff] %v5972_v50 }
 0x73e   : > { %v5834_v16 = vpop.f32.mrf.mxu3 }
 0x73f   : > { %v5835_v14 = vadd.f32 %v8918_v10, %v5834_v16 }
 0x741   : > { %5877 = vst [vmem:[#allocation4 + $0xc8] sm:$0xff] %v5835_v14  ;;  %v5792_v34 = vpop.f32.mrf.mxu1 }
 0x742   : > { %v5793_v30 = vadd.f32 %v8918_v10, %v5792_v34 }
 0x744   : > { %5860 = vst [vmem:[#allocation4 + $0x40] sm:$0xff] %v5793_v30 }
 0x748   : > { %v5908_v0 = vld [vmem:[#allocation4 + $0xc0] ss:$2 sm:$0xff]  ;;  %v5940_v2 = vld [vmem:[#allocation4 + $0xc1] ss:$2 sm:$0xff] }
 0x749   : > { %v5794_v62 = vpop.f32.mrf.mxu1  ;;  %v5959_v13 = vadd.f32 %v5940_v2, %v5908_v0 }
 0x74a   : > { %v5795_v60 = vadd.f32 %v8918_v10, %v5794_v62 }
 0x74c   : > { %5861 = vst [vmem:[#allocation4 + $0x48] sm:$0xff] %v5795_v60 }
 0x753   : > { %v5892_v56 = vld [vmem:[#allocation4 + $0x40] ss:$2 sm:$0xff]  ;;  %v5924_v3 = vld [vmem:[#allocation4 + $0x41] ss:$2 sm:$0xff] }
 0x754   : > { %v5951_v44 = vadd.f32 %v5924_v3, %v5892_v56 }
 0x760   : > { %v5837_v20 = vpop.f32.mrf.mxu3 }
 0x761   : > { %v5838_v43 = vadd.f32 %v8918_v10, %v5837_v20 }
 0x763   : > { %5878 = vst [vmem:[#allocation4 + $0xd0] sm:$0xff] %v5838_v43 }
 0x768   : > { %v5839_v6 = vpop.f32.mrf.mxu3 }
 0x769   : > { %v5840_v32 = vadd.f32 %v8918_v10, %v5839_v6  ;;  %v5797_v36 = vpop.f32.mrf.mxu1 }
 0x76a   : > { %v5798_v63 = vadd.f32 %v8918_v10, %v5797_v36 }
 0x76b   : > { %5879 = vst [vmem:[#allocation4 + $0xd8] sm:$0xff] %v5840_v32 }
 0x76c   : > { %5862 = vst [vmem:[#allocation4 + $0x50] sm:$0xff] %v5798_v63 }
 0x771   : > { %v5799_v47 = vpop.f32.mrf.mxu1 }
 0x772   : > { %v5910_v46 = vld [vmem:[#allocation4 + $0xd0] ss:$2 sm:$0xff]  ;;  %v5942_v7 = vld [vmem:[#allocation4 + $0xd1] ss:$2 sm:$0xff]  ;;  %v5800_v39 = vadd.f32 %v8918_v10, %v5799_v47 }
 0x773   : > { %v5960_v17 = vadd.f32 %v5942_v7, %v5910_v46 }
 0x774   : > { %5863 = vst [vmem:[#allocation4 + $0x58] sm:$0xff] %v5800_v39 }
 0x775   : > { %v5969_v8 = vadd.f32 %v5960_v17, %v5959_v13 }
 0x777   : > { %v5977_v45 = vmul.f32 0.25, %v5969_v8 }
 0x779   : > { %5985 = vst [vmem:[%s8964_s23 + $0x30] sm:$0xff] %v5977_v45 }
 0x77b   : > { %v5894_v35 = vld [vmem:[#allocation4 + $0x50] ss:$2 sm:$0xff]  ;;  %v5926_v26 = vld [vmem:[#allocation4 + $0x51] ss:$2 sm:$0xff] }
 0x77c   : > { %v5952_v5 = vadd.f32 %v5926_v26, %v5894_v35 }
 0x77e   : > { %v5965_v57 = vadd.f32 %v5952_v5, %v5951_v44 }
 0x780   : > { %v5973_v55 = vmul.f32 0.25, %v5965_v57 }
 0x782   : > { %5981 = vst [vmem:[%s8964_s23 + $0x10] sm:$0xff] %v5973_v55 }
 0x788   : > { %v5842_v18 = vpop.f32.mrf.mxu3 }
 0x789   : > { %v5843_v53 = vadd.f32 %v8918_v10, %v5842_v18 }
 0x78b   : > { %5880 = vst [vmem:[#allocation4 + $0xe0] sm:$0xff] %v5843_v53 }
 0x790   : > { %v5844_v33 = vpop.f32.mrf.mxu3 }
 0x791   : > { %v5845_v24 = vadd.f32 %v8918_v10, %v5844_v33  ;;  %v5802_v1 = vpop.f32.mrf.mxu1 }
 0x792   : > { %v5803_v4 = vadd.f32 %v8918_v10, %v5802_v1 }
 0x793   : > { %5881 = vst [vmem:[#allocation4 + $0xe8] sm:$0xff] %v5845_v24 }
 0x794   : > { %5864 = vst [vmem:[#allocation4 + $0x60] sm:$0xff] %v5803_v4 }
 0x799   : > { %v5804_v42 = vpop.f32.mrf.mxu1 }
 0x79a   : > { %v5805_v40 = vadd.f32 %v8918_v10, %v5804_v42  ;;  %v5912_v15 = vld [vmem:[#allocation4 + $0xe0] ss:$2 sm:$0xff]  ;;  %v5944_v51 = vld [vmem:[#allocation4 + $0xe1] ss:$2 sm:$0xff] }
 0x79b   : > { %v5961_v38 = vadd.f32 %v5944_v51, %v5912_v15 }
 0x79c   : > { %5865 = vst [vmem:[#allocation4 + $0x68] sm:$0xff] %v5805_v40 }
 0x7a3   : > { %v5896_v9 = vld [vmem:[#allocation4 + $0x60] ss:$2 sm:$0xff]  ;;  %v5928_v59 = vld [vmem:[#allocation4 + $0x61] ss:$2 sm:$0xff] }
 0x7a4   : > { %v5953_v23 = vadd.f32 %v5928_v59, %v5896_v9 }
 0x7a7   : > { %v5847_v21 = vpop.f32.mrf.mxu3 }
 0x7a8   : > { %v5848_v19 = vadd.f32 %v8918_v10, %v5847_v21 }
 0x7aa   : > { %5882 = vst [vmem:[#allocation4 + $0xf0] sm:$0xff] %v5848_v19 }
 0x7af   : > { %v5849_v25 = vpop.f32.mrf.mxu3 }
 0x7b0   : > { %v5850_v37 = vadd.f32 %v8918_v10, %v5849_v25  ;;  %v5807_v49 = vpop.f32.mrf.mxu1 }
 0x7b1   : > { %v5808_v52 = vadd.f32 %v8918_v10, %v5807_v49 }
 0x7b2   : > { %5883 = vst [vmem:[#allocation4 + $0xf8] sm:$0xff] %v5850_v37 }
 0x7b3   : > { %5866 = vst [vmem:[#allocation4 + $0x70] sm:$0xff] %v5808_v52 }
 0x7b8   : > { %v5809_v58 = vpop.f32.mrf.mxu1 }
 0x7b9   : > { %v5914_v29 = vld [vmem:[#allocation4 + $0xf0] ss:$2 sm:$0xff]  ;;  %v5946_v61 = vld [vmem:[#allocation4 + $0xf1] ss:$2 sm:$0xff]  ;;  %v5810_v41 = vadd.f32 %v8918_v10, %v5809_v58 }
 0x7ba   : > { %v5962_v31 = vadd.f32 %v5946_v61, %v5914_v29 }
 0x7bb   : > { %5867 = vst [vmem:[#allocation4 + $0x78] sm:$0xff] %v5810_v41 }
 0x7bc   : > { %v5970_v11 = vadd.f32 %v5962_v31, %v5961_v38 }
 0x7be   : > { %v5978_v27 = vmul.f32 0.25, %v5970_v11 }
 0x7c0   : > { %5986 = vst [vmem:[%s8964_s23 + $0x38] sm:$0xff] %v5978_v27 }
 0x7c2   : > { %v5898_v48 = vld [vmem:[#allocation4 + $0x70] ss:$2 sm:$0xff]  ;;  %v5930_v12 = vld [vmem:[#allocation4 + $0x71] ss:$2 sm:$0xff] }
 0x7c3   : > { %v5954_v10 = vadd.f32 %v5930_v12, %v5898_v48 }
 0x7c5   : > { %v5966_v28 = vadd.f32 %v5954_v10, %v5953_v23 }
 0x7c7   : > { %v5974_v54 = vmul.f32 0.25, %v5966_v28 }
 0x7c9   : > { %5982 = vst [vmem:[%s8964_s23 + $0x18] sm:$0xff] %v5974_v54 }
 0x7ca   : > { %6376 = shalt.err (!%p6373_p3)
}
 0x7cb   : > { %s6423_s16 = smov 128  }
 0x7cc   : > { %6297 = dma.vmem_to_hbm [thread:$0]  (%p6492_p5), %s6001_s11, 1024, %s6003_s13, %s5988_s22, %s6423_s16, %s6423_s16, %s6416_s12  }
 0x7cd PF: > { %p6303_p4 = scmp.ge.s32.totalorder %s6411_s21, 2  ;;  %s6017_s23 = sand.u32 1, %s6399_s18  }
 0x7ce   : > { %s6018_s7 = scalar_lea.sflag [#allocation6], %s6017_s23 }
 0x7cf   : > { %p6300_p7 = pnand %p6303_p4, %p6496_p6 }
 0x7d1   : > { %p6301_p8 = pneg %p6300_p7 }
 0x7d3   : > { %6394 = dma.done.wait (%p6301_p8), %s6018_s7, 1024  }
 0x7d4   : > { %6396 = vsyncadd (%p6301_p8), %s6018_s7, 4294966272  ;;  %p15_p9 = scmp.ge.s32.totalorder %s6479_s24, 4   ;;  %s9838_s18 = smov %s6403_s19 }
 0x7d5   : > { %s9839_s19 = smov %s6407_s20  ;;  %s9840_s20 = smov %s6490_s27 }
 0x7d6   : > { %s9841_s21 = smov %s6479_s24  ;;  %17 = sbr.rel (!%p15_p9) target bundleno = 3 (0x3), region = 106 }
 0x7db   :  { %6024 = vsyncpa [#allocation6], 1 }
 0x7dc   :  { %6026 = vsyncpa [#allocation6 + $0x1], 1 }

</bundles_post_ra>
